<compile_context>
chip_gen: v7x
topology: tpu7x:2x2x1
jax: 0.10.0
libtpu: 0.0.40
codegen_flags: <defaults>
</compile_context>

<pallas_src>
import functools

import jax
import jax.numpy as jnp
from jax import lax
from jax.experimental import pallas as pl
from jax.experimental.pallas import tpu as pltpu


def _round_up(x, m):
    return (x + m - 1) // m * m


def _largest_divisor_leq(n, cap):
    cap = max(1, min(n, cap))
    for d in range(cap, 0, -1):
        if n % d == 0:
            return d
    return 1


def _tpu_config():
    """Generation-aware scoped-VMEM limit + preferred Cout tile width."""
    try:
        vmem_cap = int(pltpu.get_tpu_info().vmem_capacity_bytes)
    except Exception:
        vmem_cap = 64 * 1024 * 1024            # conservative fallback
    if vmem_cap <= 64 * 1024 * 1024:           # v7x: 64 MiB per TensorCore
        vmem_limit = 40 * 1024 * 1024
    else:                                      # v5e/v6e: 128 MiB
        vmem_limit = 96 * 1024 * 1024
    mxu_n = 256                                # v6e/v7x: 256-wide MXU
    try:
        kind = jax.devices()[0].device_kind.lower()
        if any(t in kind for t in ("v2", "v3", "v4", "v5")):
            mxu_n = 128                        # 128-wide MXU -> prefer TN=128
    except Exception:
        pass
    return vmem_limit, mxu_n


def _pick_tn(cout, mxu_n):
    if cout % 256 == 0 and mxu_n >= 256:
        return 256
    if cout % 128 == 0:
        return 128
    return cout                                # full-dim block (masked store)


# ---------------------------------------------------------------------------
# (a) Space-to-depth "plane" kernel: Conv2d(5x5,s2,p2) + leaky_relu
# ---------------------------------------------------------------------------
def _conv5x5_s2_lrelu_kernel(x_ref, w_ref, b_ref, o_ref, *, tho, wo, slope):
    # x_ref : (1, 4, Hh, Wh, Cin) bf16  space-to-depth planes (resident/batch)
    # w_ref : (25, Cin, TN)       bf16  per-tap weights (resident/Cout tile)
    # b_ref : (1, TN)             f32
    # o_ref : (1, tho, wo, TN)    bf16  streamed output tile
    row0 = pl.program_id(2) * tho
    acc = None                                      # traced f32 accumulator
    for ph in range(2):                             # output-row phase (kh % 2)
        for dh in range(3 - ph):                    # kh = 2*dh + ph
            kh = 2 * dh + ph
            for pw in range(2):                     # output-col phase (kw % 2)
                plane = ph * 2 + pw
                # One aligned, full-width slab load per (plane, dh); the dw
                # shifts below are sliced from this value, not re-loaded.
                slab = x_ref[0, plane, pl.ds(row0 + dh, tho), :, :]  # (tho,Wh,C)
                for dw in range(3 - pw):            # kw = 2*dw + pw
                    kw = 2 * dw + pw
                    lhs = slab[:, dw:dw + wo, :].reshape(tho * wo, -1)
                    part = jnp.dot(lhs, w_ref[kh * 5 + kw],
                                   preferred_element_type=jnp.float32)
                    acc = part if acc is None else acc + part
    res = acc + b_ref[...]                          # (tho*wo, TN) + (1, TN)
    res = jnp.where(res >= 0, res, slope * res)     # leaky_relu in f32
    o_ref[0] = res.reshape(tho, wo, -1).astype(o_ref.dtype)


def _plane_conv5x5_s2_lrelu(x_nhwc, w_hwio, bias, *, slope, vmem_limit, mxu_n):
    B, H, W, C = x_nhwc.shape
    _, _, cin_w, cout = w_hwio.shape
    assert cin_w == C, (cin_w, C)
    Ho = (H - 1) // 2 + 1
    Wo = (W - 1) // 2 + 1

    # Spatial zero-pad (2 each side), rounded to even extents, then split into
    # 4 stride-2 phase planes.  Activations stay bf16 end to end.
    Hp, Wp = _round_up(H + 4, 2), _round_up(W + 4, 2)
    xp = jnp.pad(x_nhwc, ((0, 0), (2, Hp - H - 2), (2, Wp - W - 2), (0, 0)))
    Hh, Wh = Hp // 2, Wp // 2
    planes = xp.reshape(B, Hh, 2, Wh, 2, C).transpose(0, 2, 4, 1, 3, 5)
    planes = planes.reshape(B, 4, Hh, Wh, C)

    w_taps = w_hwio.reshape(25, C, cout).astype(jnp.bfloat16)   # (kh,kw) major
    b_row = bias.reshape(1, cout).astype(jnp.float32)

    TN = _pick_tn(cout, mxu_n)
    # Batch enough output rows per dot to fill the MXU M dimension while
    # keeping the live f32 accumulator (tho*Wo*TN*4 B) modest.
    acc_budget = 2 * 1024 * 1024
    tho_cap = min((2 * mxu_n + Wo - 1) // Wo,
                  max(1, acc_budget // max(1, Wo * TN * 4)))
    tho = _largest_divisor_leq(Ho, max(1, tho_cap))

    kernel = functools.partial(_conv5x5_s2_lrelu_kernel,
                               tho=tho, wo=Wo, slope=slope)
    # TODO(synk): at very large resolutions the resident planes block should be
    # single-buffered (pipeline_mode=pl.Buffered(1)) or Hh-tiled with a 2-row
    # halo, and the output could be stored directly in next-layer plane layout.
    return pl.pallas_call(
        kernel,
        out_shape=jax.ShapeDtypeStruct((B, Ho, Wo, cout), jnp.bfloat16),
        grid=(B, cout // TN, Ho // tho),
        in_specs=[
            # planes: resident per batch (block index ignores j, m)
            pl.BlockSpec((1, 4, Hh, Wh, C), lambda bb, j, m: (bb, 0, 0, 0, 0)),
            # weights: resident per Cout tile
            pl.BlockSpec((25, C, TN), lambda bb, j, m: (0, 0, j)),
            pl.BlockSpec((1, TN), lambda bb, j, m: (0, j)),
        ],
        out_specs=pl.BlockSpec((1, tho, Wo, TN), lambda bb, j, m: (bb, m, 0, j)),
        compiler_params=pltpu.CompilerParams(
            dimension_semantics=("parallel", "parallel", "parallel"),
            vmem_limit_bytes=vmem_limit,
        ),
    )(planes, w_taps, b_row)


# ---------------------------------------------------------------------------
# (b) Dense (im2col) kernel: matmul + bias + leaky_relu
# ---------------------------------------------------------------------------
def _matmul_bias_lrelu_kernel(a_ref, w_ref, b_ref, o_ref, *, slope):
    # a:(tm, K) bf16, w:(K, tn) bf16, b:(1, tn) f32 -> o:(tm, tn) bf16
    acc = jnp.dot(a_ref[...], w_ref[...], preferred_element_type=jnp.float32)
    res = acc + b_ref[...]
    o_ref[...] = jnp.where(res >= 0, res, slope * res).astype(o_ref.dtype)


def _im2col_s2_5x5(x_nhwc, Ho, Wo):
    """(B,H,W,C) -> (B,Ho,Wo,25*C) patches of the pad=2/stride=2 5x5 conv in
    (kh,kw,c) order (matches w_hwio.reshape(25*C, Cout))."""
    B, H, W, C = x_nhwc.shape
    xp = jnp.pad(x_nhwc, ((0, 0), (2, 2), (2, 2), (0, 0)))
    taps = []
    for kh in range(5):
        for kw in range(5):
            taps.append(lax.slice(
                xp, (0, kh, kw, 0),
                (B, kh + 2 * (Ho - 1) + 1, kw + 2 * (Wo - 1) + 1, C),
                (1, 2, 2, 1)))
    return jnp.concatenate(taps, axis=-1)


def _dense_conv5x5_s2_lrelu(x_nhwc, w_hwio, bias, *, slope, vmem_limit, mxu_n):
    B, H, W, C = x_nhwc.shape
    _, _, cin_w, cout = w_hwio.shape
    assert cin_w == C, (cin_w, C)
    Ho = (H - 1) // 2 + 1
    Wo = (W - 1) // 2 + 1
    K = 25 * C
    M = B * Ho * Wo

    a = _im2col_s2_5x5(x_nhwc, Ho, Wo).reshape(M, K)
    w = w_hwio.reshape(K, cout).astype(jnp.bfloat16)
    b = bias.reshape(1, cout).astype(jnp.float32)

    tn = _pick_tn(cout, mxu_n)
    tm = 512 if M >= 512 else _round_up(M, 8)
    Mp = _round_up(M, tm)
    if Mp != M:
        a = jnp.pad(a, ((0, Mp - M), (0, 0)))

    out = pl.pallas_call(
        functools.partial(_matmul_bias_lrelu_kernel, slope=slope),
        out_shape=jax.ShapeDtypeStruct((Mp, cout), jnp.bfloat16),
        grid=(cout // tn, Mp // tm),          # weights resident, patches stream
        in_specs=[
            pl.BlockSpec((tm, K), lambda j, i: (i, 0)),
            pl.BlockSpec((K, tn), lambda j, i: (0, j)),
            pl.BlockSpec((1, tn), lambda j, i: (0, j)),
        ],
        out_specs=pl.BlockSpec((tm, tn), lambda j, i: (i, j)),
        compiler_params=pltpu.CompilerParams(
            dimension_semantics=("parallel", "parallel"),
            vmem_limit_bytes=vmem_limit,
        ),
    )(a, w, b)
    return out[:M].reshape(B, Ho, Wo, cout)


# ---------------------------------------------------------------------------
# One dis_conv layer (router)
# ---------------------------------------------------------------------------
def conv5x5_s2_lrelu(x_nhwc, w_hwio, bias, *, slope, vmem_limit, mxu_n):
    B, H, W, C = x_nhwc.shape
    Ho = (H - 1) // 2 + 1
    Wo = (W - 1) // 2 + 1
    # Layer 1 (tiny Cin) and the <=4x4-spatial tail layers: fold the 25 taps
    # into the contraction dim and run one dense matmul kernel over all
    # batch*output pixels.  Everything else: space-to-depth plane kernel.
    if 25 * C <= 160 or Ho * Wo <= 16:
        return _dense_conv5x5_s2_lrelu(x_nhwc, w_hwio, bias, slope=slope,
                                       vmem_limit=vmem_limit, mxu_n=mxu_n)
    return _plane_conv5x5_s2_lrelu(x_nhwc, w_hwio, bias, slope=slope,
                                   vmem_limit=vmem_limit, mxu_n=mxu_n)


# ---------------------------------------------------------------------------
# Parameter construction (deterministic, synthetic) + spectral normalization
# ---------------------------------------------------------------------------
def _spectral_normalize(w_hwio, key, n_iter=5, eps=1e-12):
    """Divide weight by its largest singular value (PyTorch spectral_norm
    reshapes to (Cout, -1); singular values are flatten-order invariant)."""
    kh, kw, cin, cout = w_hwio.shape
    w_mat = w_hwio.reshape(kh * kw * cin, cout).T             # (Cout, K)
    u = jax.random.normal(key, (cout,), dtype=jnp.float32)
    u = u / (jnp.linalg.norm(u) + eps)
    v = None
    for _ in range(n_iter):
        v = w_mat.T @ u
        v = v / (jnp.linalg.norm(v) + eps)
        u = w_mat @ v
        u = u / (jnp.linalg.norm(u) + eps)
    sigma = u @ (w_mat @ v)
    return w_hwio / sigma


def make_params(key, cnum=64):
    chans = [(4, cnum), (cnum, 2 * cnum), (2 * cnum, 4 * cnum),
             (4 * cnum, 4 * cnum), (4 * cnum, 4 * cnum), (4 * cnum, 4 * cnum)]
    params = []
    for i, (cin, cout) in enumerate(chans):
        kw_key, _, u_key = jax.random.split(jax.random.fold_in(key, i), 3)
        w = 0.02 * jax.random.normal(kw_key, (5, 5, cin, cout), dtype=jnp.float32)
        b = jnp.zeros((cout,), dtype=jnp.float32)
        w = _spectral_normalize(w, u_key)
        params.append((w, b))
    return params


# ---------------------------------------------------------------------------
# Full forward
# ---------------------------------------------------------------------------
def inpaint_discriminator_forward(x_nchw, mask, params):
    """x:(B,3,H,W) NCHW; mask is accepted but unused (matches PyTorch forward)."""
    del mask
    B, C, H, W = x_nchw.shape
    vmem_limit, mxu_n = _tpu_config()
    # NCHW -> NHWC, append ones channel, cast to bf16 once (bf16 end to end:
    # each activation makes a single HBM round trip between layers).
    x = jnp.transpose(x_nchw, (0, 2, 3, 1)).astype(jnp.bfloat16)
    x = jnp.concatenate([x, jnp.ones((B, H, W, 1), jnp.bfloat16)], axis=-1)
    for (w, b) in params:
        x = conv5x5_s2_lrelu(x, w, b, slope=0.2,
                             vmem_limit=vmem_limit, mxu_n=mxu_n)
    return jnp.transpose(x.astype(jnp.float32), (0, 3, 1, 2))   # NHWC -> NCHW


if __name__ == "__main__":
    key = jax.random.PRNGKey(0)
    k_x, k_m, k_p = jax.random.split(key, 3)

    # 32x32 exercises both kernel paths: layer 1 + tail layers use the dense
    # (im2col) kernel, layer 2 uses the space-to-depth plane kernel.
    B, H, W = 2, 32, 32
    x = jax.random.normal(k_x, (B, 3, H, W), dtype=jnp.float32)
    mask = (jax.random.uniform(k_m, (B, 1, H, W)) > 0.5).astype(jnp.float32)

    params = make_params(k_p, cnum=64)

    fwd = jax.jit(lambda xx, mm: inpaint_discriminator_forward(xx, mm, params))
    out = fwd(x, mask)
    jax.block_until_ready(out)

    assert out.shape == (B, 256, 1, 1), out.shape
    assert bool(jnp.all(jnp.isfinite(out)))
    print("KERNEL_OK")
</pallas_src>

<mosaic_0001>
module attributes {stable_mosaic.version = 11 : i64} {
  func.func @_matmul_bias_lrelu_kernel(%arg0: i32, %arg1: i32, %arg2: memref<512x100xbf16, #tpu.memory_space<vmem>>, %arg3: memref<100x64xbf16, #tpu.memory_space<vmem>>, %arg4: memref<1x64xf32, #tpu.memory_space<vmem>>, %arg5: memref<512x64xbf16, #tpu.memory_space<vmem>>) attributes {dimension_semantics = [#tpu.dimension_semantics<parallel>, #tpu.dimension_semantics<parallel>], iteration_bounds = array<i64: 1, 1>, scalar_prefetch = 0 : i64, scratch_operands = 0 : i64, tpu.core_type = #tpu.core_type<tc>, window_params = [{transform_indices = @transform_0, window_bounds = array<i64: 512, 100>}, {transform_indices = @transform_1, window_bounds = array<i64: 100, 64>}, {transform_indices = @transform_2, window_bounds = array<i64: 1, 64>}, {transform_indices = @transform_3, window_bounds = array<i64: 512, 64>}]} {
    %c0 = arith.constant 0 : index
    %c0_0 = arith.constant 0 : index
    %0 = vector.load %arg2[%c0, %c0_0] : memref<512x100xbf16, #tpu.memory_space<vmem>>, vector<512x100xbf16>
    %c0_1 = arith.constant 0 : index
    %c0_2 = arith.constant 0 : index
    %1 = vector.load %arg3[%c0_1, %c0_2] : memref<100x64xbf16, #tpu.memory_space<vmem>>, vector<100x64xbf16>
    %cst = arith.constant dense<0.000000e+00> : vector<512x64xf32>
    %2 = tpu.matmul %0, %1, %cst {dimension_numbers = #tpu.dot_dimension_numbers<[1], [0], [0], [1], [0, 0, 1, 1], [], []>} : vector<512x100xbf16>, vector<100x64xbf16>, vector<512x64xf32> -> vector<512x64xf32>
    %c0_3 = arith.constant 0 : index
    %c0_4 = arith.constant 0 : index
    %3 = vector.load %arg4[%c0_3, %c0_4] : memref<1x64xf32, #tpu.memory_space<vmem>>, vector<1x64xf32>
    %4 = vector.broadcast %3 : vector<1x64xf32> to vector<512x64xf32>
    %5 = arith.addf %2, %4 : vector<512x64xf32>
    %cst_5 = arith.constant 0.000000e+00 : f32
    %6 = vector.broadcast %cst_5 : f32 to vector<512x64xf32>
    %7 = arith.cmpf oge, %5, %6 : vector<512x64xf32>
    %cst_6 = arith.constant 2.000000e-01 : f32
    %8 = vector.broadcast %cst_6 : f32 to vector<512x64xf32>
    %9 = arith.mulf %8, %5 : vector<512x64xf32>
    %10 = arith.select %7, %5, %9 : vector<512x64xi1>, vector<512x64xf32>
    %11 = arith.truncf %10 : vector<512x64xf32> to vector<512x64xbf16>
    %c0_7 = arith.constant 0 : index
    %c0_8 = arith.constant 0 : index
    %12 = vector.load %arg5[%c0_7, %c0_8] : memref<512x64xbf16, #tpu.memory_space<vmem>>, vector<512x64xbf16>
    tpu.vector_store %arg5[%c0_7, %c0_8], %11 {strides = array<i32>} : memref<512x64xbf16, #tpu.memory_space<vmem>>, vector<512x64xbf16>,
    return
  }
  func.func @transform_0(%arg0: i32, %arg1: i32) -> (i32, i32) {
    %c0_i32 = arith.constant 0 : i32
    %c0_i32_0 = arith.constant 0 : i32
    return %arg1, %c0_i32 : i32, i32
  }
  func.func @transform_1(%arg0: i32, %arg1: i32) -> (i32, i32) {
    %c0_i32 = arith.constant 0 : i32
    %c0_i32_0 = arith.constant 0 : i32
    return %c0_i32, %arg0 : i32, i32
  }
  func.func @transform_2(%arg0: i32, %arg1: i32) -> (i32, i32) {
    %c0_i32 = arith.constant 0 : i32
    %c0_i32_0 = arith.constant 0 : i32
    return %c0_i32, %arg0 : i32, i32
  }
  func.func @transform_3(%arg0: i32, %arg1: i32) -> (i32, i32) {
    %c0_i32 = arith.constant 0 : i32
    return %arg1, %arg0 : i32, i32
  }
}

module attributes {stable_mosaic.version = 11 : i64} {
  func.func @_conv5x5_s2_lrelu_kernel(%arg0: i32, %arg1: i32, %arg2: i32, %arg3: memref<1x4x10x10x64xbf16, #tpu.memory_space<vmem>>, %arg4: memref<25x64x128xbf16, #tpu.memory_space<vmem>>, %arg5: memref<1x128xf32, #tpu.memory_space<vmem>>, %arg6: memref<1x8x8x128xbf16, #tpu.memory_space<vmem>>) attributes {dimension_semantics = [#tpu.dimension_semantics<parallel>, #tpu.dimension_semantics<parallel>, #tpu.dimension_semantics<parallel>], iteration_bounds = array<i64: 2, 1, 1>, scalar_prefetch = 0 : i64, scratch_operands = 0 : i64, tpu.core_type = #tpu.core_type<tc>, window_params = [{transform_indices = @transform_0, window_bounds = array<i64: 1, 4, 10, 10, 64>}, {transform_indices = @transform_1, window_bounds = array<i64: 25, 64, 128>}, {transform_indices = @transform_2, window_bounds = array<i64: 1, 128>}, {transform_indices = @transform_3, window_bounds = array<i64: 1, 8, 8, 128>}]} {
    %c8_i32 = arith.constant 8 : i32
    %0 = arith.muli %arg2, %c8_i32 : i32
    %c0_i32 = arith.constant 0 : i32
    %1 = arith.addi %0, %c0_i32 : i32
    %c0 = arith.constant 0 : index
    %c0_0 = arith.constant 0 : index
    %2 = arith.index_cast %1 : i32 to index
    %c0_1 = arith.constant 0 : index
    %c0_2 = arith.constant 0 : index
    %3 = vector.load %arg3[%c0, %c0_0, %2, %c0_1, %c0_2] : memref<1x4x10x10x64xbf16, #tpu.memory_space<vmem>>, vector<1x1x8x10x64xbf16>
    %4 = vector.shape_cast %3 : vector<1x1x8x10x64xbf16> to vector<8x10x64xbf16>
    %5 = vector.extract_strided_slice %4 {offsets = [0, 0, 0], sizes = [8, 8, 64], strides = [1, 1, 1]} : vector<8x10x64xbf16> to vector<8x8x64xbf16>
    %6 = vector.shape_cast %5 : vector<8x8x64xbf16> to vector<64x64xbf16>
    %c0_3 = arith.constant 0 : index
    %c0_4 = arith.constant 0 : index
    %c0_5 = arith.constant 0 : index
    %7 = vector.load %arg4[%c0_3, %c0_4, %c0_5] : memref<25x64x128xbf16, #tpu.memory_space<vmem>>, vector<1x64x128xbf16>
    %8 = vector.shape_cast %7 : vector<1x64x128xbf16> to vector<64x128xbf16>
    %cst = arith.constant dense<0.000000e+00> : vector<64x128xf32>
    %9 = tpu.matmul %6, %8, %cst {dimension_numbers = #tpu.dot_dimension_numbers<[1], [0], [0], [1], [0, 0, 1, 1], [], []>} : vector<64x64xbf16>, vector<64x128xbf16>, vector<64x128xf32> -> vector<64x128xf32>
    %10 = vector.extract_strided_slice %4 {offsets = [0, 1, 0], sizes = [8, 8, 64], strides = [1, 1, 1]} : vector<8x10x64xbf16> to vector<8x8x64xbf16>
    %11 = vector.shape_cast %10 : vector<8x8x64xbf16> to vector<64x64xbf16>
    %c2 = arith.constant 2 : index
    %c0_6 = arith.constant 0 : index
    %c0_7 = arith.constant 0 : index
    %12 = vector.load %arg4[%c2, %c0_6, %c0_7] : memref<25x64x128xbf16, #tpu.memory_space<vmem>>, vector<1x64x128xbf16>
    %13 = vector.shape_cast %12 : vector<1x64x128xbf16> to vector<64x128xbf16>
    %cst_8 = arith.constant dense<0.000000e+00> : vector<64x128xf32>
    %14 = tpu.matmul %11, %13, %cst_8 {dimension_numbers = #tpu.dot_dimension_numbers<[1], [0], [0], [1], [0, 0, 1, 1], [], []>} : vector<64x64xbf16>, vector<64x128xbf16>, vector<64x128xf32> -> vector<64x128xf32>
    %15 = arith.addf %9, %14 : vector<64x128xf32>
    %16 = vector.extract_strided_slice %4 {offsets = [0, 2, 0], sizes = [8, 8, 64], strides = [1, 1, 1]} : vector<8x10x64xbf16> to vector<8x8x64xbf16>
    %17 = vector.shape_cast %16 : vector<8x8x64xbf16> to vector<64x64xbf16>
    %c4 = arith.constant 4 : index
    %c0_9 = arith.constant 0 : index
    %c0_10 = arith.constant 0 : index
    %18 = vector.load %arg4[%c4, %c0_9, %c0_10] : memref<25x64x128xbf16, #tpu.memory_space<vmem>>, vector<1x64x128xbf16>
    %19 = vector.shape_cast %18 : vector<1x64x128xbf16> to vector<64x128xbf16>
    %cst_11 = arith.constant dense<0.000000e+00> : vector<64x128xf32>
    %20 = tpu.matmul %17, %19, %cst_11 {dimension_numbers = #tpu.dot_dimension_numbers<[1], [0], [0], [1], [0, 0, 1, 1], [], []>} : vector<64x64xbf16>, vector<64x128xbf16>, vector<64x128xf32> -> vector<64x128xf32>
    %21 = arith.addf %15, %20 : vector<64x128xf32>
    %c0_i32_12 = arith.constant 0 : i32
    %22 = arith.addi %0, %c0_i32_12 : i32
    %c0_13 = arith.constant 0 : index
    %c1 = arith.constant 1 : index
    %23 = arith.index_cast %22 : i32 to index
    %c0_14 = arith.constant 0 : index
    %c0_15 = arith.constant 0 : index
    %24 = vector.load %arg3[%c0_13, %c1, %23, %c0_14, %c0_15] : memref<1x4x10x10x64xbf16, #tpu.memory_space<vmem>>, vector<1x1x8x10x64xbf16>
    %25 = vector.shape_cast %24 : vector<1x1x8x10x64xbf16> to vector<8x10x64xbf16>
    %26 = vector.extract_strided_slice %25 {offsets = [0, 0, 0], sizes = [8, 8, 64], strides = [1, 1, 1]} : vector<8x10x64xbf16> to vector<8x8x64xbf16>
    %27 = vector.shape_cast %26 : vector<8x8x64xbf16> to vector<64x64xbf16>
    %c1_16 = arith.constant 1 : index
    %c0_17 = arith.constant 0 : index
    %c0_18 = arith.constant 0 : index
    %28 = vector.load %arg4[%c1_16, %c0_17, %c0_18] : memref<25x64x128xbf16, #tpu.memory_space<vmem>>, vector<1x64x128xbf16>
    %29 = vector.shape_cast %28 : vector<1x64x128xbf16> to vector<64x128xbf16>
    %cst_19 = arith.constant dense<0.000000e+00> : vector<64x128xf32>
    %30 = tpu.matmul %27, %29, %cst_19 {dimension_numbers = #tpu.dot_dimension_numbers<[1], [0], [0], [1], [0, 0, 1, 1], [], []>} : vector<64x64xbf16>, vector<64x128xbf16>, vector<64x128xf32> -> vector<64x128xf32>
    %31 = arith.addf %21, %30 : vector<64x128xf32>
    %32 = vector.extract_strided_slice %25 {offsets = [0, 1, 0], sizes = [8, 8, 64], strides = [1, 1, 1]} : vector<8x10x64xbf16> to vector<8x8x64xbf16>
    %33 = vector.shape_cast %32 : vector<8x8x64xbf16> to vector<64x64xbf16>
    %c3 = arith.constant 3 : index
    %c0_20 = arith.constant 0 : index
    %c0_21 = arith.constant 0 : index
    %34 = vector.load %arg4[%c3, %c0_20, %c0_21] : memref<25x64x128xbf16, #tpu.memory_space<vmem>>, vector<1x64x128xbf16>
    %35 = vector.shape_cast %34 : vector<1x64x128xbf16> to vector<64x128xbf16>
    %cst_22 = arith.constant dense<0.000000e+00> : vector<64x128xf32>
    %36 = tpu.matmul %33, %35, %cst_22 {dimension_numbers = #tpu.dot_dimension_numbers<[1], [0], [0], [1], [0, 0, 1, 1], [], []>} : vector<64x64xbf16>, vector<64x128xbf16>, vector<64x128xf32> -> vector<64x128xf32>
    %37 = arith.addf %31, %36 : vector<64x128xf32>
    %c1_i32 = arith.constant 1 : i32
    %38 = arith.addi %0, %c1_i32 : i32
    %c0_23 = arith.constant 0 : index
    %c0_24 = arith.constant 0 : index
    %39 = arith.index_cast %38 : i32 to index
    %c0_25 = arith.constant 0 : index
    %c0_26 = arith.constant 0 : index
    %40 = vector.load %arg3[%c0_23, %c0_24, %39, %c0_25, %c0_26] : memref<1x4x10x10x64xbf16, #tpu.memory_space<vmem>>, vector<1x1x8x10x64xbf16>
    %41 = vector.shape_cast %40 : vector<1x1x8x10x64xbf16> to vector<8x10x64xbf16>
    %42 = vector.extract_strided_slice %41 {offsets = [0, 0, 0], sizes = [8, 8, 64], strides = [1, 1, 1]} : vector<8x10x64xbf16> to vector<8x8x64xbf16>
    %43 = vector.shape_cast %42 : vector<8x8x64xbf16> to vector<64x64xbf16>
    %c10 = arith.constant 10 : index
    %c0_27 = arith.constant 0 : index
    %c0_28 = arith.constant 0 : index
    %44 = vector.load %arg4[%c10, %c0_27, %c0_28] : memref<25x64x128xbf16, #tpu.memory_space<vmem>>, vector<1x64x128xbf16>
    %45 = vector.shape_cast %44 : vector<1x64x128xbf16> to vector<64x128xbf16>
    %cst_29 = arith.constant dense<0.000000e+00> : vector<64x128xf32>
    %46 = tpu.matmul %43, %45, %cst_29 {dimension_numbers = #tpu.dot_dimension_numbers<[1], [0], [0], [1], [0, 0, 1, 1], [], []>} : vector<64x64xbf16>, vector<64x128xbf16>, vector<64x128xf32> -> vector<64x128xf32>
    %47 = arith.addf %37, %46 : vector<64x128xf32>
    %48 = vector.extract_strided_slice %41 {offsets = [0, 1, 0], sizes = [8, 8, 64], strides = [1, 1, 1]} : vector<8x10x64xbf16> to vector<8x8x64xbf16>
    %49 = vector.shape_cast %48 : vector<8x8x64xbf16> to vector<64x64xbf16>
    %c12 = arith.constant 12 : index
    %c0_30 = arith.constant 0 : index
    %c0_31 = arith.constant 0 : index
    %50 = vector.load %arg4[%c12, %c0_30, %c0_31] : memref<25x64x128xbf16, #tpu.memory_space<vmem>>, vector<1x64x128xbf16>
    %51 = vector.shape_cast %50 : vector<1x64x128xbf16> to vector<64x128xbf16>
    %cst_32 = arith.constant dense<0.000000e+00> : vector<64x128xf32>
    %52 = tpu.matmul %49, %51, %cst_32 {dimension_numbers = #tpu.dot_dimension_numbers<[1], [0], [0], [1], [0, 0, 1, 1], [], []>} : vector<64x64xbf16>, vector<64x128xbf16>, vector<64x128xf32> -> vector<64x128xf32>
    %53 = arith.addf %47, %52 : vector<64x128xf32>
    %54 = vector.extract_strided_slice %41 {offsets = [0, 2, 0], sizes = [8, 8, 64], strides = [1, 1, 1]} : vector<8x10x64xbf16> to vector<8x8x64xbf16>
    %55 = vector.shape_cast %54 : vector<8x8x64xbf16> to vector<64x64xbf16>
    %c14 = arith.constant 14 : index
    %c0_33 = arith.constant 0 : index
    %c0_34 = arith.constant 0 : index
    %56 = vector.load %arg4[%c14, %c0_33, %c0_34] : memref<25x64x128xbf16, #tpu.memory_space<vmem>>, vector<1x64x128xbf16>
    %57 = vector.shape_cast %56 : vector<1x64x128xbf16> to vector<64x128xbf16>
    %cst_35 = arith.constant dense<0.000000e+00> : vector<64x128xf32>
    %58 = tpu.matmul %55, %57, %cst_35 {dimension_numbers = #tpu.dot_dimension_numbers<[1], [0], [0], [1], [0, 0, 1, 1], [], []>} : vector<64x64xbf16>, vector<64x128xbf16>, vector<64x128xf32> -> vector<64x128xf32>
    %59 = arith.addf %53, %58 : vector<64x128xf32>
    %c1_i32_36 = arith.constant 1 : i32
    %60 = arith.addi %0, %c1_i32_36 : i32
    %c0_37 = arith.constant 0 : index
    %c1_38 = arith.constant 1 : index
    %61 = arith.index_cast %60 : i32 to index
    %c0_39 = arith.constant 0 : index
    %c0_40 = arith.constant 0 : index
    %62 = vector.load %arg3[%c0_37, %c1_38, %61, %c0_39, %c0_40] : memref<1x4x10x10x64xbf16, #tpu.memory_space<vmem>>, vector<1x1x8x10x64xbf16>
    %63 = vector.shape_cast %62 : vector<1x1x8x10x64xbf16> to vector<8x10x64xbf16>
    %64 = vector.extract_strided_slice %63 {offsets = [0, 0, 0], sizes = [8, 8, 64], strides = [1, 1, 1]} : vector<8x10x64xbf16> to vector<8x8x64xbf16>
    %65 = vector.shape_cast %64 : vector<8x8x64xbf16> to vector<64x64xbf16>
    %c11 = arith.constant 11 : index
    %c0_41 = arith.constant 0 : index
    %c0_42 = arith.constant 0 : index
    %66 = vector.load %arg4[%c11, %c0_41, %c0_42] : memref<25x64x128xbf16, #tpu.memory_space<vmem>>, vector<1x64x128xbf16>
    %67 = vector.shape_cast %66 : vector<1x64x128xbf16> to vector<64x128xbf16>
    %cst_43 = arith.constant dense<0.000000e+00> : vector<64x128xf32>
    %68 = tpu.matmul %65, %67, %cst_43 {dimension_numbers = #tpu.dot_dimension_numbers<[1], [0], [0], [1], [0, 0, 1, 1], [], []>} : vector<64x64xbf16>, vector<64x128xbf16>, vector<64x128xf32> -> vector<64x128xf32>
    %69 = arith.addf %59, %68 : vector<64x128xf32>
    %70 = vector.extract_strided_slice %63 {offsets = [0, 1, 0], sizes = [8, 8, 64], strides = [1, 1, 1]} : vector<8x10x64xbf16> to vector<8x8x64xbf16>
    %71 = vector.shape_cast %70 : vector<8x8x64xbf16> to vector<64x64xbf16>
    %c13 = arith.constant 13 : index
    %c0_44 = arith.constant 0 : index
    %c0_45 = arith.constant 0 : index
    %72 = vector.load %arg4[%c13, %c0_44, %c0_45] : memref<25x64x128xbf16, #tpu.memory_space<vmem>>, vector<1x64x128xbf16>
    %73 = vector.shape_cast %72 : vector<1x64x128xbf16> to vector<64x128xbf16>
    %cst_46 = arith.constant dense<0.000000e+00> : vector<64x128xf32>
    %74 = tpu.matmul %71, %73, %cst_46 {dimension_numbers = #tpu.dot_dimension_numbers<[1], [0], [0], [1], [0, 0, 1, 1], [], []>} : vector<64x64xbf16>, vector<64x128xbf16>, vector<64x128xf32> -> vector<64x128xf32>
    %75 = arith.addf %69, %74 : vector<64x128xf32>
    %c2_i32 = arith.constant 2 : i32
    %76 = arith.addi %0, %c2_i32 : i32
    %c0_47 = arith.constant 0 : index
    %c0_48 = arith.constant 0 : index
    %77 = arith.index_cast %76 : i32 to index
    %c0_49 = arith.constant 0 : index
    %c0_50 = arith.constant 0 : index
    %78 = vector.load %arg3[%c0_47, %c0_48, %77, %c0_49, %c0_50] : memref<1x4x10x10x64xbf16, #tpu.memory_space<vmem>>, vector<1x1x8x10x64xbf16>
    %79 = vector.shape_cast %78 : vector<1x1x8x10x64xbf16> to vector<8x10x64xbf16>
    %80 = vector.extract_strided_slice %79 {offsets = [0, 0, 0], sizes = [8, 8, 64], strides = [1, 1, 1]} : vector<8x10x64xbf16> to vector<8x8x64xbf16>
    %81 = vector.shape_cast %80 : vector<8x8x64xbf16> to vector<64x64xbf16>
    %c20 = arith.constant 20 : index
    %c0_51 = arith.constant 0 : index
    %c0_52 = arith.constant 0 : index
    %82 = vector.load %arg4[%c20, %c0_51, %c0_52] : memref<25x64x128xbf16, #tpu.memory_space<vmem>>, vector<1x64x128xbf16>
    %83 = vector.shape_cast %82 : vector<1x64x128xbf16> to vector<64x128xbf16>
    %cst_53 = arith.constant dense<0.000000e+00> : vector<64x128xf32>
    %84 = tpu.matmul %81, %83, %cst_53 {dimension_numbers = #tpu.dot_dimension_numbers<[1], [0], [0], [1], [0, 0, 1, 1], [], []>} : vector<64x64xbf16>, vector<64x128xbf16>, vector<64x128xf32> -> vector<64x128xf32>
    %85 = arith.addf %75, %84 : vector<64x128xf32>
    %86 = vector.extract_strided_slice %79 {offsets = [0, 1, 0], sizes = [8, 8, 64], strides = [1, 1, 1]} : vector<8x10x64xbf16> to vector<8x8x64xbf16>
    %87 = vector.shape_cast %86 : vector<8x8x64xbf16> to vector<64x64xbf16>
    %c22 = arith.constant 22 : index
    %c0_54 = arith.constant 0 : index
    %c0_55 = arith.constant 0 : index
    %88 = vector.load %arg4[%c22, %c0_54, %c0_55] : memref<25x64x128xbf16, #tpu.memory_space<vmem>>, vector<1x64x128xbf16>
    %89 = vector.shape_cast %88 : vector<1x64x128xbf16> to vector<64x128xbf16>
    %cst_56 = arith.constant dense<0.000000e+00> : vector<64x128xf32>
    %90 = tpu.matmul %87, %89, %cst_56 {dimension_numbers = #tpu.dot_dimension_numbers<[1], [0], [0], [1], [0, 0, 1, 1], [], []>} : vector<64x64xbf16>, vector<64x128xbf16>, vector<64x128xf32> -> vector<64x128xf32>
    %91 = arith.addf %85, %90 : vector<64x128xf32>
    %92 = vector.extract_strided_slice %79 {offsets = [0, 2, 0], sizes = [8, 8, 64], strides = [1, 1, 1]} : vector<8x10x64xbf16> to vector<8x8x64xbf16>
    %93 = vector.shape_cast %92 : vector<8x8x64xbf16> to vector<64x64xbf16>
    %c24 = arith.constant 24 : index
    %c0_57 = arith.constant 0 : index
    %c0_58 = arith.constant 0 : index
    %94 = vector.load %arg4[%c24, %c0_57, %c0_58] : memref<25x64x128xbf16, #tpu.memory_space<vmem>>, vector<1x64x128xbf16>
    %95 = vector.shape_cast %94 : vector<1x64x128xbf16> to vector<64x128xbf16>
    %cst_59 = arith.constant dense<0.000000e+00> : vector<64x128xf32>
    %96 = tpu.matmul %93, %95, %cst_59 {dimension_numbers = #tpu.dot_dimension_numbers<[1], [0], [0], [1], [0, 0, 1, 1], [], []>} : vector<64x64xbf16>, vector<64x128xbf16>, vector<64x128xf32> -> vector<64x128xf32>
    %97 = arith.addf %91, %96 : vector<64x128xf32>
    %c2_i32_60 = arith.constant 2 : i32
    %98 = arith.addi %0, %c2_i32_60 : i32
    %c0_61 = arith.constant 0 : index
    %c1_62 = arith.constant 1 : index
    %99 = arith.index_cast %98 : i32 to index
    %c0_63 = arith.constant 0 : index
    %c0_64 = arith.constant 0 : index
    %100 = vector.load %arg3[%c0_61, %c1_62, %99, %c0_63, %c0_64] : memref<1x4x10x10x64xbf16, #tpu.memory_space<vmem>>, vector<1x1x8x10x64xbf16>
    %101 = vector.shape_cast %100 : vector<1x1x8x10x64xbf16> to vector<8x10x64xbf16>
    %102 = vector.extract_strided_slice %101 {offsets = [0, 0, 0], sizes = [8, 8, 64], strides = [1, 1, 1]} : vector<8x10x64xbf16> to vector<8x8x64xbf16>
    %103 = vector.shape_cast %102 : vector<8x8x64xbf16> to vector<64x64xbf16>
    %c21 = arith.constant 21 : index
    %c0_65 = arith.constant 0 : index
    %c0_66 = arith.constant 0 : index
    %104 = vector.load %arg4[%c21, %c0_65, %c0_66] : memref<25x64x128xbf16, #tpu.memory_space<vmem>>, vector<1x64x128xbf16>
    %105 = vector.shape_cast %104 : vector<1x64x128xbf16> to vector<64x128xbf16>
    %cst_67 = arith.constant dense<0.000000e+00> : vector<64x128xf32>
    %106 = tpu.matmul %103, %105, %cst_67 {dimension_numbers = #tpu.dot_dimension_numbers<[1], [0], [0], [1], [0, 0, 1, 1], [], []>} : vector<64x64xbf16>, vector<64x128xbf16>, vector<64x128xf32> -> vector<64x128xf32>
    %107 = arith.addf %97, %106 : vector<64x128xf32>
    %108 = vector.extract_strided_slice %101 {offsets = [0, 1, 0], sizes = [8, 8, 64], strides = [1, 1, 1]} : vector<8x10x64xbf16> to vector<8x8x64xbf16>
    %109 = vector.shape_cast %108 : vector<8x8x64xbf16> to vector<64x64xbf16>
    %c23 = arith.constant 23 : index
    %c0_68 = arith.constant 0 : index
    %c0_69 = arith.constant 0 : index
    %110 = vector.load %arg4[%c23, %c0_68, %c0_69] : memref<25x64x128xbf16, #tpu.memory_space<vmem>>, vector<1x64x128xbf16>
    %111 = vector.shape_cast %110 : vector<1x64x128xbf16> to vector<64x128xbf16>
    %cst_70 = arith.constant dense<0.000000e+00> : vector<64x128xf32>
    %112 = tpu.matmul %109, %111, %cst_70 {dimension_numbers = #tpu.dot_dimension_numbers<[1], [0], [0], [1], [0, 0, 1, 1], [], []>} : vector<64x64xbf16>, vector<64x128xbf16>, vector<64x128xf32> -> vector<64x128xf32>
    %113 = arith.addf %107, %112 : vector<64x128xf32>
    %c0_i32_71 = arith.constant 0 : i32
    %114 = arith.addi %0, %c0_i32_71 : i32
    %c0_72 = arith.constant 0 : index
    %c2_73 = arith.constant 2 : index
    %115 = arith.index_cast %114 : i32 to index
    %c0_74 = arith.constant 0 : index
    %c0_75 = arith.constant 0 : index
    %116 = vector.load %arg3[%c0_72, %c2_73, %115, %c0_74, %c0_75] : memref<1x4x10x10x64xbf16, #tpu.memory_space<vmem>>, vector<1x1x8x10x64xbf16>
    %117 = vector.shape_cast %116 : vector<1x1x8x10x64xbf16> to vector<8x10x64xbf16>
    %118 = vector.extract_strided_slice %117 {offsets = [0, 0, 0], sizes = [8, 8, 64], strides = [1, 1, 1]} : vector<8x10x64xbf16> to vector<8x8x64xbf16>
    %119 = vector.shape_cast %118 : vector<8x8x64xbf16> to vector<64x64xbf16>
    %c5 = arith.constant 5 : index
    %c0_76 = arith.constant 0 : index
    %c0_77 = arith.constant 0 : index
    %120 = vector.load %arg4[%c5, %c0_76, %c0_77] : memref<25x64x128xbf16, #tpu.memory_space<vmem>>, vector<1x64x128xbf16>
    %121 = vector.shape_cast %120 : vector<1x64x128xbf16> to vector<64x128xbf16>
    %cst_78 = arith.constant dense<0.000000e+00> : vector<64x128xf32>
    %122 = tpu.matmul %119, %121, %cst_78 {dimension_numbers = #tpu.dot_dimension_numbers<[1], [0], [0], [1], [0, 0, 1, 1], [], []>} : vector<64x64xbf16>, vector<64x128xbf16>, vector<64x128xf32> -> vector<64x128xf32>
    %123 = arith.addf %113, %122 : vector<64x128xf32>
    %124 = vector.extract_strided_slice %117 {offsets = [0, 1, 0], sizes = [8, 8, 64], strides = [1, 1, 1]} : vector<8x10x64xbf16> to vector<8x8x64xbf16>
    %125 = vector.shape_cast %124 : vector<8x8x64xbf16> to vector<64x64xbf16>
    %c7 = arith.constant 7 : index
    %c0_79 = arith.constant 0 : index
    %c0_80 = arith.constant 0 : index
    %126 = vector.load %arg4[%c7, %c0_79, %c0_80] : memref<25x64x128xbf16, #tpu.memory_space<vmem>>, vector<1x64x128xbf16>
    %127 = vector.shape_cast %126 : vector<1x64x128xbf16> to vector<64x128xbf16>
    %cst_81 = arith.constant dense<0.000000e+00> : vector<64x128xf32>
    %128 = tpu.matmul %125, %127, %cst_81 {dimension_numbers = #tpu.dot_dimension_numbers<[1], [0], [0], [1], [0, 0, 1, 1], [], []>} : vector<64x64xbf16>, vector<64x128xbf16>, vector<64x128xf32> -> vector<64x128xf32>
    %129 = arith.addf %123, %128 : vector<64x128xf32>
    %130 = vector.extract_strided_slice %117 {offsets = [0, 2, 0], sizes = [8, 8, 64], strides = [1, 1, 1]} : vector<8x10x64xbf16> to vector<8x8x64xbf16>
    %131 = vector.shape_cast %130 : vector<8x8x64xbf16> to vector<64x64xbf16>
    %c9 = arith.constant 9 : index
    %c0_82 = arith.constant 0 : index
    %c0_83 = arith.constant 0 : index
    %132 = vector.load %arg4[%c9, %c0_82, %c0_83] : memref<25x64x128xbf16, #tpu.memory_space<vmem>>, vector<1x64x128xbf16>
    %133 = vector.shape_cast %132 : vector<1x64x128xbf16> to vector<64x128xbf16>
    %cst_84 = arith.constant dense<0.000000e+00> : vector<64x128xf32>
    %134 = tpu.matmul %131, %133, %cst_84 {dimension_numbers = #tpu.dot_dimension_numbers<[1], [0], [0], [1], [0, 0, 1, 1], [], []>} : vector<64x64xbf16>, vector<64x128xbf16>, vector<64x128xf32> -> vector<64x128xf32>
    %135 = arith.addf %129, %134 : vector<64x128xf32>
    %c0_i32_85 = arith.constant 0 : i32
    %136 = arith.addi %0, %c0_i32_85 : i32
    %c0_86 = arith.constant 0 : index
    %c3_87 = arith.constant 3 : index
    %137 = arith.index_cast %136 : i32 to index
    %c0_88 = arith.constant 0 : index
    %c0_89 = arith.constant 0 : index
    %138 = vector.load %arg3[%c0_86, %c3_87, %137, %c0_88, %c0_89] : memref<1x4x10x10x64xbf16, #tpu.memory_space<vmem>>, vector<1x1x8x10x64xbf16>
    %139 = vector.shape_cast %138 : vector<1x1x8x10x64xbf16> to vector<8x10x64xbf16>
    %140 = vector.extract_strided_slice %139 {offsets = [0, 0, 0], sizes = [8, 8, 64], strides = [1, 1, 1]} : vector<8x10x64xbf16> to vector<8x8x64xbf16>
    %141 = vector.shape_cast %140 : vector<8x8x64xbf16> to vector<64x64xbf16>
    %c6 = arith.constant 6 : index
    %c0_90 = arith.constant 0 : index
    %c0_91 = arith.constant 0 : index
    %142 = vector.load %arg4[%c6, %c0_90, %c0_91] : memref<25x64x128xbf16, #tpu.memory_space<vmem>>, vector<1x64x128xbf16>
    %143 = vector.shape_cast %142 : vector<1x64x128xbf16> to vector<64x128xbf16>
    %cst_92 = arith.constant dense<0.000000e+00> : vector<64x128xf32>
    %144 = tpu.matmul %141, %143, %cst_92 {dimension_numbers = #tpu.dot_dimension_numbers<[1], [0], [0], [1], [0, 0, 1, 1], [], []>} : vector<64x64xbf16>, vector<64x128xbf16>, vector<64x128xf32> -> vector<64x128xf32>
    %145 = arith.addf %135, %144 : vector<64x128xf32>
    %146 = vector.extract_strided_slice %139 {offsets = [0, 1, 0], sizes = [8, 8, 64], strides = [1, 1, 1]} : vector<8x10x64xbf16> to vector<8x8x64xbf16>
    %147 = vector.shape_cast %146 : vector<8x8x64xbf16> to vector<64x64xbf16>
    %c8 = arith.constant 8 : index
    %c0_93 = arith.constant 0 : index
    %c0_94 = arith.constant 0 : index
    %148 = vector.load %arg4[%c8, %c0_93, %c0_94] : memref<25x64x128xbf16, #tpu.memory_space<vmem>>, vector<1x64x128xbf16>
    %149 = vector.shape_cast %148 : vector<1x64x128xbf16> to vector<64x128xbf16>
    %cst_95 = arith.constant dense<0.000000e+00> : vector<64x128xf32>
    %150 = tpu.matmul %147, %149, %cst_95 {dimension_numbers = #tpu.dot_dimension_numbers<[1], [0], [0], [1], [0, 0, 1, 1], [], []>} : vector<64x64xbf16>, vector<64x128xbf16>, vector<64x128xf32> -> vector<64x128xf32>
    %151 = arith.addf %145, %150 : vector<64x128xf32>
    %c1_i32_96 = arith.constant 1 : i32
    %152 = arith.addi %0, %c1_i32_96 : i32
    %c0_97 = arith.constant 0 : index
    %c2_98 = arith.constant 2 : index
    %153 = arith.index_cast %152 : i32 to index
    %c0_99 = arith.constant 0 : index
    %c0_100 = arith.constant 0 : index
    %154 = vector.load %arg3[%c0_97, %c2_98, %153, %c0_99, %c0_100] : memref<1x4x10x10x64xbf16, #tpu.memory_space<vmem>>, vector<1x1x8x10x64xbf16>
    %155 = vector.shape_cast %154 : vector<1x1x8x10x64xbf16> to vector<8x10x64xbf16>
    %156 = vector.extract_strided_slice %155 {offsets = [0, 0, 0], sizes = [8, 8, 64], strides = [1, 1, 1]} : vector<8x10x64xbf16> to vector<8x8x64xbf16>
    %157 = vector.shape_cast %156 : vector<8x8x64xbf16> to vector<64x64xbf16>
    %c15 = arith.constant 15 : index
    %c0_101 = arith.constant 0 : index
    %c0_102 = arith.constant 0 : index
    %158 = vector.load %arg4[%c15, %c0_101, %c0_102] : memref<25x64x128xbf16, #tpu.memory_space<vmem>>, vector<1x64x128xbf16>
    %159 = vector.shape_cast %158 : vector<1x64x128xbf16> to vector<64x128xbf16>
    %cst_103 = arith.constant dense<0.000000e+00> : vector<64x128xf32>
    %160 = tpu.matmul %157, %159, %cst_103 {dimension_numbers = #tpu.dot_dimension_numbers<[1], [0], [0], [1], [0, 0, 1, 1], [], []>} : vector<64x64xbf16>, vector<64x128xbf16>, vector<64x128xf32> -> vector<64x128xf32>
    %161 = arith.addf %151, %160 : vector<64x128xf32>
    %162 = vector.extract_strided_slice %155 {offsets = [0, 1, 0], sizes = [8, 8, 64], strides = [1, 1, 1]} : vector<8x10x64xbf16> to vector<8x8x64xbf16>
    %163 = vector.shape_cast %162 : vector<8x8x64xbf16> to vector<64x64xbf16>
    %c17 = arith.constant 17 : index
    %c0_104 = arith.constant 0 : index
    %c0_105 = arith.constant 0 : index
    %164 = vector.load %arg4[%c17, %c0_104, %c0_105] : memref<25x64x128xbf16, #tpu.memory_space<vmem>>, vector<1x64x128xbf16>
    %165 = vector.shape_cast %164 : vector<1x64x128xbf16> to vector<64x128xbf16>
    %cst_106 = arith.constant dense<0.000000e+00> : vector<64x128xf32>
    %166 = tpu.matmul %163, %165, %cst_106 {dimension_numbers = #tpu.dot_dimension_numbers<[1], [0], [0], [1], [0, 0, 1, 1], [], []>} : vector<64x64xbf16>, vector<64x128xbf16>, vector<64x128xf32> -> vector<64x128xf32>
    %167 = arith.addf %161, %166 : vector<64x128xf32>
    %168 = vector.extract_strided_slice %155 {offsets = [0, 2, 0], sizes = [8, 8, 64], strides = [1, 1, 1]} : vector<8x10x64xbf16> to vector<8x8x64xbf16>
    %169 = vector.shape_cast %168 : vector<8x8x64xbf16> to vector<64x64xbf16>
    %c19 = arith.constant 19 : index
    %c0_107 = arith.constant 0 : index
    %c0_108 = arith.constant 0 : index
    %170 = vector.load %arg4[%c19, %c0_107, %c0_108] : memref<25x64x128xbf16, #tpu.memory_space<vmem>>, vector<1x64x128xbf16>
    %171 = vector.shape_cast %170 : vector<1x64x128xbf16> to vector<64x128xbf16>
    %cst_109 = arith.constant dense<0.000000e+00> : vector<64x128xf32>
    %172 = tpu.matmul %169, %171, %cst_109 {dimension_numbers = #tpu.dot_dimension_numbers<[1], [0], [0], [1], [0, 0, 1, 1], [], []>} : vector<64x64xbf16>, vector<64x128xbf16>, vector<64x128xf32> -> vector<64x128xf32>
    %173 = arith.addf %167, %172 : vector<64x128xf32>
    %c1_i32_110 = arith.constant 1 : i32
    %174 = arith.addi %0, %c1_i32_110 : i32
    %c0_111 = arith.constant 0 : index
    %c3_112 = arith.constant 3 : index
    %175 = arith.index_cast %174 : i32 to index
    %c0_113 = arith.constant 0 : index
    %c0_114 = arith.constant 0 : index
    %176 = vector.load %arg3[%c0_111, %c3_112, %175, %c0_113, %c0_114] : memref<1x4x10x10x64xbf16, #tpu.memory_space<vmem>>, vector<1x1x8x10x64xbf16>
    %177 = vector.shape_cast %176 : vector<1x1x8x10x64xbf16> to vector<8x10x64xbf16>
    %178 = vector.extract_strided_slice %177 {offsets = [0, 0, 0], sizes = [8, 8, 64], strides = [1, 1, 1]} : vector<8x10x64xbf16> to vector<8x8x64xbf16>
    %179 = vector.shape_cast %178 : vector<8x8x64xbf16> to vector<64x64xbf16>
    %c16 = arith.constant 16 : index
    %c0_115 = arith.constant 0 : index
    %c0_116 = arith.constant 0 : index
    %180 = vector.load %arg4[%c16, %c0_115, %c0_116] : memref<25x64x128xbf16, #tpu.memory_space<vmem>>, vector<1x64x128xbf16>
    %181 = vector.shape_cast %180 : vector<1x64x128xbf16> to vector<64x128xbf16>
    %cst_117 = arith.constant dense<0.000000e+00> : vector<64x128xf32>
    %182 = tpu.matmul %179, %181, %cst_117 {dimension_numbers = #tpu.dot_dimension_numbers<[1], [0], [0], [1], [0, 0, 1, 1], [], []>} : vector<64x64xbf16>, vector<64x128xbf16>, vector<64x128xf32> -> vector<64x128xf32>
    %183 = arith.addf %173, %182 : vector<64x128xf32>
    %184 = vector.extract_strided_slice %177 {offsets = [0, 1, 0], sizes = [8, 8, 64], strides = [1, 1, 1]} : vector<8x10x64xbf16> to vector<8x8x64xbf16>
    %185 = vector.shape_cast %184 : vector<8x8x64xbf16> to vector<64x64xbf16>
    %c18 = arith.constant 18 : index
    %c0_118 = arith.constant 0 : index
    %c0_119 = arith.constant 0 : index
    %186 = vector.load %arg4[%c18, %c0_118, %c0_119] : memref<25x64x128xbf16, #tpu.memory_space<vmem>>, vector<1x64x128xbf16>
    %187 = vector.shape_cast %186 : vector<1x64x128xbf16> to vector<64x128xbf16>
    %cst_120 = arith.constant dense<0.000000e+00> : vector<64x128xf32>
    %188 = tpu.matmul %185, %187, %cst_120 {dimension_numbers = #tpu.dot_dimension_numbers<[1], [0], [0], [1], [0, 0, 1, 1], [], []>} : vector<64x64xbf16>, vector<64x128xbf16>, vector<64x128xf32> -> vector<64x128xf32>
    %189 = arith.addf %183, %188 : vector<64x128xf32>
    %c0_121 = arith.constant 0 : index
    %c0_122 = arith.constant 0 : index
    %190 = vector.load %arg5[%c0_121, %c0_122] : memref<1x128xf32, #tpu.memory_space<vmem>>, vector<1x128xf32>
    %191 = vector.broadcast %190 : vector<1x128xf32> to vector<64x128xf32>
    %192 = arith.addf %189, %191 : vector<64x128xf32>
    %cst_123 = arith.constant 0.000000e+00 : f32
    %193 = vector.broadcast %cst_123 : f32 to vector<64x128xf32>
    %194 = arith.cmpf oge, %192, %193 : vector<64x128xf32>
    %cst_124 = arith.constant 2.000000e-01 : f32
    %195 = vector.broadcast %cst_124 : f32 to vector<64x128xf32>
    %196 = arith.mulf %195, %192 : vector<64x128xf32>
    %197 = arith.select %194, %192, %196 : vector<64x128xi1>, vector<64x128xf32>
    %198 = vector.shape_cast %197 : vector<64x128xf32> to vector<8x8x128xf32>
    %199 = arith.truncf %198 : vector<8x8x128xf32> to vector<8x8x128xbf16>
    %c0_125 = arith.constant 0 : index
    %c0_126 = arith.constant 0 : index
    %c0_127 = arith.constant 0 : index
    %c0_128 = arith.constant 0 : index
    %200 = vector.load %arg6[%c0_125, %c0_126, %c0_127, %c0_128] : memref<1x8x8x128xbf16, #tpu.memory_space<vmem>>, vector<1x8x8x128xbf16>
    %201 = vector.shape_cast %200 : vector<1x8x8x128xbf16> to vector<8x8x128xbf16>
    %202 = vector.shape_cast %199 : vector<8x8x128xbf16> to vector<1x8x8x128xbf16>
    tpu.vector_store %arg6[%c0_125, %c0_126, %c0_127, %c0_128], %202 {strides = array<i32>} : memref<1x8x8x128xbf16, #tpu.memory_space<vmem>>, vector<1x8x8x128xbf16>,
    return
  }
  func.func @transform_0(%arg0: i32, %arg1: i32, %arg2: i32) -> (i32, i32, i32, i32, i32) {
    %c0_i32 = arith.constant 0 : i32
    %c0_i32_0 = arith.constant 0 : i32
    %c0_i32_1 = arith.constant 0 : i32
    %c0_i32_2 = arith.constant 0 : i32
    %c0_i32_3 = arith.constant 0 : i32
    return %arg0, %c0_i32, %c0_i32_0, %c0_i32_1, %c0_i32_2 : i32, i32, i32, i32, i32
  }
  func.func @transform_1(%arg0: i32, %arg1: i32, %arg2: i32) -> (i32, i32, i32) {
    %c0_i32 = arith.constant 0 : i32
    %c0_i32_0 = arith.constant 0 : i32
    %c0_i32_1 = arith.constant 0 : i32
    return %c0_i32, %c0_i32_0, %arg1 : i32, i32, i32
  }
  func.func @transform_2(%arg0: i32, %arg1: i32, %arg2: i32) -> (i32, i32) {
    %c0_i32 = arith.constant 0 : i32
    %c0_i32_0 = arith.constant 0 : i32
    return %c0_i32, %arg1 : i32, i32
  }
  func.func @transform_3(%arg0: i32, %arg1: i32, %arg2: i32) -> (i32, i32, i32, i32) {
    %c0_i32 = arith.constant 0 : i32
    %c0_i32_0 = arith.constant 0 : i32
    return %arg0, %arg2, %c0_i32, %arg1 : i32, i32, i32, i32
  }
}

module attributes {stable_mosaic.version = 11 : i64} {
  func.func @_matmul_bias_lrelu_kernel(%arg0: i32, %arg1: i32, %arg2: memref<32x3200xbf16, #tpu.memory_space<vmem>>, %arg3: memref<3200x256xbf16, #tpu.memory_space<vmem>>, %arg4: memref<1x256xf32, #tpu.memory_space<vmem>>, %arg5: memref<32x256xbf16, #tpu.memory_space<vmem>>) attributes {dimension_semantics = [#tpu.dimension_semantics<parallel>, #tpu.dimension_semantics<parallel>], iteration_bounds = array<i64: 1, 1>, scalar_prefetch = 0 : i64, scratch_operands = 0 : i64, tpu.core_type = #tpu.core_type<tc>, window_params = [{transform_indices = @transform_0, window_bounds = array<i64: 32, 3200>}, {transform_indices = @transform_1, window_bounds = array<i64: 3200, 256>}, {transform_indices = @transform_2, window_bounds = array<i64: 1, 256>}, {transform_indices = @transform_3, window_bounds = array<i64: 32, 256>}]} {
    %c0 = arith.constant 0 : index
    %c0_0 = arith.constant 0 : index
    %0 = vector.load %arg2[%c0, %c0_0] : memref<32x3200xbf16, #tpu.memory_space<vmem>>, vector<32x3200xbf16>
    %c0_1 = arith.constant 0 : index
    %c0_2 = arith.constant 0 : index
    %1 = vector.load %arg3[%c0_1, %c0_2] : memref<3200x256xbf16, #tpu.memory_space<vmem>>, vector<3200x256xbf16>
    %cst = arith.constant dense<0.000000e+00> : vector<32x256xf32>
    %2 = tpu.matmul %0, %1, %cst {dimension_numbers = #tpu.dot_dimension_numbers<[1], [0], [0], [1], [0, 0, 1, 1], [], []>} : vector<32x3200xbf16>, vector<3200x256xbf16>, vector<32x256xf32> -> vector<32x256xf32>
    %c0_3 = arith.constant 0 : index
    %c0_4 = arith.constant 0 : index
    %3 = vector.load %arg4[%c0_3, %c0_4] : memref<1x256xf32, #tpu.memory_space<vmem>>, vector<1x256xf32>
    %4 = vector.broadcast %3 : vector<1x256xf32> to vector<32x256xf32>
    %5 = arith.addf %2, %4 : vector<32x256xf32>
    %cst_5 = arith.constant 0.000000e+00 : f32
    %6 = vector.broadcast %cst_5 : f32 to vector<32x256xf32>
    %7 = arith.cmpf oge, %5, %6 : vector<32x256xf32>
    %cst_6 = arith.constant 2.000000e-01 : f32
    %8 = vector.broadcast %cst_6 : f32 to vector<32x256xf32>
    %9 = arith.mulf %8, %5 : vector<32x256xf32>
    %10 = arith.select %7, %5, %9 : vector<32x256xi1>, vector<32x256xf32>
    %11 = arith.truncf %10 : vector<32x256xf32> to vector<32x256xbf16>
    %c0_7 = arith.constant 0 : index
    %c0_8 = arith.constant 0 : index
    %12 = vector.load %arg5[%c0_7, %c0_8] : memref<32x256xbf16, #tpu.memory_space<vmem>>, vector<32x256xbf16>
    tpu.vector_store %arg5[%c0_7, %c0_8], %11 {strides = array<i32>} : memref<32x256xbf16, #tpu.memory_space<vmem>>, vector<32x256xbf16>,
    return
  }
  func.func @transform_0(%arg0: i32, %arg1: i32) -> (i32, i32) {
    %c0_i32 = arith.constant 0 : i32
    %c0_i32_0 = arith.constant 0 : i32
    return %arg1, %c0_i32 : i32, i32
  }
  func.func @transform_1(%arg0: i32, %arg1: i32) -> (i32, i32) {
    %c0_i32 = arith.constant 0 : i32
    %c0_i32_0 = arith.constant 0 : i32
    return %c0_i32, %arg0 : i32, i32
  }
  func.func @transform_2(%arg0: i32, %arg1: i32) -> (i32, i32) {
    %c0_i32 = arith.constant 0 : i32
    %c0_i32_0 = arith.constant 0 : i32
    return %c0_i32, %arg0 : i32, i32
  }
  func.func @transform_3(%arg0: i32, %arg1: i32) -> (i32, i32) {
    %c0_i32 = arith.constant 0 : i32
    return %arg1, %arg0 : i32, i32
  }
}

module attributes {stable_mosaic.version = 11 : i64} {
  func.func @_matmul_bias_lrelu_kernel(%arg0: i32, %arg1: i32, %arg2: memref<8x6400xbf16, #tpu.memory_space<vmem>>, %arg3: memref<6400x256xbf16, #tpu.memory_space<vmem>>, %arg4: memref<1x256xf32, #tpu.memory_space<vmem>>, %arg5: memref<8x256xbf16, #tpu.memory_space<vmem>>) attributes {dimension_semantics = [#tpu.dimension_semantics<parallel>, #tpu.dimension_semantics<parallel>], iteration_bounds = array<i64: 1, 1>, scalar_prefetch = 0 : i64, scratch_operands = 0 : i64, tpu.core_type = #tpu.core_type<tc>, window_params = [{transform_indices = @transform_0, window_bounds = array<i64: 8, 6400>}, {transform_indices = @transform_1, window_bounds = array<i64: 6400, 256>}, {transform_indices = @transform_2, window_bounds = array<i64: 1, 256>}, {transform_indices = @transform_3, window_bounds = array<i64: 8, 256>}]} {
    %c0 = arith.constant 0 : index
    %c0_0 = arith.constant 0 : index
    %0 = vector.load %arg2[%c0, %c0_0] : memref<8x6400xbf16, #tpu.memory_space<vmem>>, vector<8x6400xbf16>
    %c0_1 = arith.constant 0 : index
    %c0_2 = arith.constant 0 : index
    %1 = vector.load %arg3[%c0_1, %c0_2] : memref<6400x256xbf16, #tpu.memory_space<vmem>>, vector<6400x256xbf16>
    %cst = arith.constant dense<0.000000e+00> : vector<8x256xf32>
    %2 = tpu.matmul %0, %1, %cst {dimension_numbers = #tpu.dot_dimension_numbers<[1], [0], [0], [1], [0, 0, 1, 1], [], []>} : vector<8x6400xbf16>, vector<6400x256xbf16>, vector<8x256xf32> -> vector<8x256xf32>
    %c0_3 = arith.constant 0 : index
    %c0_4 = arith.constant 0 : index
    %3 = vector.load %arg4[%c0_3, %c0_4] : memref<1x256xf32, #tpu.memory_space<vmem>>, vector<1x256xf32>
    %4 = vector.broadcast %3 : vector<1x256xf32> to vector<8x256xf32>
    %5 = arith.addf %2, %4 : vector<8x256xf32>
    %cst_5 = arith.constant 0.000000e+00 : f32
    %6 = vector.broadcast %cst_5 : f32 to vector<8x256xf32>
    %7 = arith.cmpf oge, %5, %6 : vector<8x256xf32>
    %cst_6 = arith.constant 2.000000e-01 : f32
    %8 = vector.broadcast %cst_6 : f32 to vector<8x256xf32>
    %9 = arith.mulf %8, %5 : vector<8x256xf32>
    %10 = arith.select %7, %5, %9 : vector<8x256xi1>, vector<8x256xf32>
    %11 = arith.truncf %10 : vector<8x256xf32> to vector<8x256xbf16>
    %c0_7 = arith.constant 0 : index
    %c0_8 = arith.constant 0 : index
    %12 = vector.load %arg5[%c0_7, %c0_8] : memref<8x256xbf16, #tpu.memory_space<vmem>>, vector<8x256xbf16>
    tpu.vector_store %arg5[%c0_7, %c0_8], %11 {strides = array<i32>} : memref<8x256xbf16, #tpu.memory_space<vmem>>, vector<8x256xbf16>,
    return
  }
  func.func @transform_0(%arg0: i32, %arg1: i32) -> (i32, i32) {
    %c0_i32 = arith.constant 0 : i32
    %c0_i32_0 = arith.constant 0 : i32
    return %arg1, %c0_i32 : i32, i32
  }
  func.func @transform_1(%arg0: i32, %arg1: i32) -> (i32, i32) {
    %c0_i32 = arith.constant 0 : i32
    %c0_i32_0 = arith.constant 0 : i32
    return %c0_i32, %arg0 : i32, i32
  }
  func.func @transform_2(%arg0: i32, %arg1: i32) -> (i32, i32) {
    %c0_i32 = arith.constant 0 : i32
    %c0_i32_0 = arith.constant 0 : i32
    return %c0_i32, %arg0 : i32, i32
  }
  func.func @transform_3(%arg0: i32, %arg1: i32) -> (i32, i32) {
    %c0_i32 = arith.constant 0 : i32
    return %arg1, %arg0 : i32, i32
  }
}

</mosaic_0001>

<bundles_post_ra>
// kernel: _lambda_.6
= control target key start
LH: loop header
LB: loop body
LE: loop exit
PB: predicated region body
PF: predicated region fallthrough
CT: control target
= control target key end

     0   :  { %vm298_vm0 = vcmask 818176   ;;  %vm395_vm1 = vcmask 1041408   ;;  %vm1136_vm2 = vcmask 519168   ;;  %s2150_s1 = inlined_call_operand.vmem [shape: bf16[100,64], index: 1, kind: input, shape index: {}]   ;;  %s2151_s0 = inlined_call_operand.vmem [shape: bf16[512,100], index: 0, kind: input, shape index: {}]   ;;  %s2152_s2 = inlined_call_operand.vmem [shape: f32[1,64], index: 2, kind: input, shape index: {}]   ;;  %s2153_s3 = inlined_call_operand.vmem [shape: bf16[512,64], index: 3, kind: output, shape index: {}]  }
   0x1   :  { %v1538_v0 = vld [vmem:[%s2150_s1] sm:$0xff]   ;;  %v1539_v1 = vld [vmem:[%s2150_s1 + $0x8] sm:$0xff]   ;;  %v1540_v2 = vld [vmem:[%s2150_s1 + $0x10] sm:$0xff]  }
   0x2   :  { %1444 = vmatprep.subr.bf16.mxu0 %v1538_v0  ;;  %1522 = vmatprep.subr.bf16.mxu1 %v1538_v0  ;;  %v1541_v3 = vld [vmem:[%s2150_s1 + $0x18] sm:$0xff]   ;;  %v1545_v4 = vld [vmem:[%s2151_s0] sm:$0xff]   ;;  %v1543_v7 = vld [vmem:[%s2150_s1 + $0x28] sm:$0xff]  }
   0x3   :  { %1445 = vmatpush3.bf16.msra.mxu0 %v1538_v0  ;;  %1529 = vmatpush3.bf16.msra.mxu1 %v1538_v0  ;;  %v1546_v5 = vld [vmem:[%s2151_s0 + $0x80] sm:$0xff]   ;;  %v1544_v8 = vld [vmem:[%s2150_s1 + $0x30] ss:$0 sps:$4 sm:$0x33]   ;;  %v1547_v10 = vld [vmem:[%s2151_s0 + $0x8] sm:$0xff]  }
   0x4   :  { %1446 = vmatprep.subr.bf16.mxu0 %v1539_v1  ;;  %1523 = vmatprep.subr.bf16.mxu1 %v1539_v1  ;;  %v1542_v6 = vld [vmem:[%s2150_s1 + $0x20] sm:$0xff]   ;;  %v397_v9 = vsel %vm395_vm1, %v1544_v8, 0  ;;  %v1548_v11 = vld [vmem:[%s2151_s0 + $0x88] sm:$0xff]   ;;  %v1549_v12 = vld [vmem:[%s2151_s0 + $0x10] sm:$0xff]  }
   0x5   :  { %1458 = vmatprep.mubr.msk.bf16.mxu0 %vm298_vm0, %v1545_v4  ;;  %1490 = vmatprep.mubr.msk.bf16.mxu1 %vm298_vm0, %v1546_v5  ;;  %v1550_v13 = vld [vmem:[%s2151_s0 + $0x90] sm:$0xff]   ;;  %v1551_v14 = vld [vmem:[%s2151_s0 + $0x18] sm:$0xff]   ;;  %v1553_v16 = vld [vmem:[%s2151_s0 + $0x20] sm:$0xff]  }
   0x6   :  { %v1552_v15 = vld [vmem:[%s2151_s0 + $0x98] sm:$0xff]   ;;  %v1554_v17 = vld [vmem:[%s2151_s0 + $0xa0] sm:$0xff]   ;;  %v1555_v18 = vld [vmem:[%s2151_s0 + $0x28] sm:$0xff]  }
   0x7   :  { %1447 = vmatpush3.bf16.msra.mxu0 %v1539_v1  ;;  %1530 = vmatpush3.bf16.msra.mxu1 %v1539_v1  ;;  %v1556_v19 = vld [vmem:[%s2151_s0 + $0xa8] sm:$0xff]   ;;  %v1557_v20 = vld [vmem:[%s2151_s0 + $0x30] sm:$0xff]   ;;  %v1559_v22 = vld [vmem:[%s2151_s0 + $0x38] sm:$0xff]  }
   0x8   :  { %1448 = vmatprep.subr.bf16.mxu0 %v1540_v2  ;;  %1524 = vmatprep.subr.bf16.mxu1 %v1540_v2  ;;  %v1558_v21 = vld [vmem:[%s2151_s0 + $0xb0] sm:$0xff]   ;;  %v1560_v23 = vld [vmem:[%s2151_s0 + $0xb8] sm:$0xff]   ;;  %v1561_v24 = vld [vmem:[%s2151_s0 + $0x40] sm:$0xff]  }
   0x9   :  { %v1562_v25 = vld [vmem:[%s2151_s0 + $0xc0] sm:$0xff]   ;;  %v1563_v26 = vld [vmem:[%s2151_s0 + $0x48] sm:$0xff]   ;;  %v1565_v28 = vld [vmem:[%s2151_s0 + $0x50] sm:$0xff]  }
   0xa   :  { %v1564_v27 = vld [vmem:[%s2151_s0 + $0xc8] sm:$0xff]   ;;  %v1566_v29 = vld [vmem:[%s2151_s0 + $0xd0] sm:$0xff]   ;;  %v1567_v30 = vld [vmem:[%s2151_s0 + $0x58] sm:$0xff]  }
   0xb   :  { %1449 = vmatpush3.bf16.msra.mxu0 %v1540_v2  ;;  %1531 = vmatpush3.bf16.msra.mxu1 %v1540_v2  ;;  %v1568_v31 = vld [vmem:[%s2151_s0 + $0xd8] sm:$0xff]   ;;  %v1569_v32 = vld [vmem:[%s2151_s0 + $0x60] sm:$0xff]   ;;  %v1571_v34 = vld [vmem:[%s2151_s0 + $0x68] sm:$0xff]  }
   0xc   :  { %1450 = vmatprep.subr.bf16.mxu0 %v1541_v3  ;;  %1525 = vmatprep.subr.bf16.mxu1 %v1541_v3  ;;  %v1570_v33 = vld [vmem:[%s2151_s0 + $0xe0] sm:$0xff]   ;;  %v1572_v35 = vld [vmem:[%s2151_s0 + $0xe8] sm:$0xff]   ;;  %v1573_v36 = vld [vmem:[%s2151_s0 + $0x70] sm:$0xff]  }
   0xd   :  { %v1574_v37 = vld [vmem:[%s2151_s0 + $0xf0] sm:$0xff]   ;;  %v1575_v38 = vld [vmem:[%s2151_s0 + $0x78] sm:$0xff]   ;;  %v1749_v40 = vld [vmem:[%s2152_s2] ss:$0 sm:$0xff] }
   0xe   :  { %v1576_v39 = vld [vmem:[%s2151_s0 + $0xf8] sm:$0xff]  }
   0xf   :  { %1451 = vmatpush3.bf16.msra.mxu0 %v1541_v3  ;;  %1532 = vmatpush3.bf16.msra.mxu1 %v1541_v3 }
  0x10   :  { %1452 = vmatprep.subr.bf16.mxu0 %v1542_v6  ;;  %1526 = vmatprep.subr.bf16.mxu1 %v1542_v6 }
  0x13   :  { %1453 = vmatpush3.bf16.msra.mxu0 %v1542_v6  ;;  %1533 = vmatpush3.bf16.msra.mxu1 %v1542_v6 }
  0x14   :  { %1454 = vmatprep.subr.bf16.mxu0 %v1543_v7  ;;  %1527 = vmatprep.subr.bf16.mxu1 %v1543_v7 }
  0x17   :  { %1455 = vmatpush3.bf16.msra.mxu0 %v1543_v7  ;;  %1534 = vmatpush3.bf16.msra.mxu1 %v1543_v7 }
  0x18   :  { %1536 = vmatprep.subr.msk.bf16.mxu0 %vm395_vm1, %v1544_v8  ;;  %1537 = vmatprep.subr.msk.bf16.mxu1 %vm395_vm1, %v1544_v8 }
  0x1b   :  { %1457 = vmatpush3.bf16.msra.mxu0 %v397_v9  ;;  %1535 = vmatpush3.bf16.msra.mxu1 %v397_v9 }
  0x1e   :  { %1459 = vmatmul.mubr.msk.bf16.vlgmr.msra.gmra.mrb[0].mxu0 %vm298_vm0, %v1547_v10  ;;  %1491 = vmatmul.mubr.msk.bf16.vlgmr.msra.gmra.mrb[0].mxu1 %vm298_vm0, %v1548_v11 }
  0x1f   :  { %1462 = vmatprep.mubr.msk.bf16.mxu0 %vm298_vm0, %v1549_v12  ;;  %1494 = vmatprep.mubr.msk.bf16.mxu1 %vm298_vm0, %v1550_v13 }
  0x26   :  { %1463 = vmatmul.mubr.msk.bf16.gmra.mrb[4].mxu0 %vm298_vm0, %v1551_v14  ;;  %1495 = vmatmul.mubr.msk.bf16.gmra.mrb[4].mxu1 %vm298_vm0, %v1552_v15 }
  0x27   :  { %1466 = vmatprep.mubr.msk.bf16.mxu0 %vm298_vm0, %v1553_v16  ;;  %1498 = vmatprep.mubr.msk.bf16.mxu1 %vm298_vm0, %v1554_v17 }
  0x2e   :  { %1467 = vmatmul.mubr.msk.bf16.gmra.mrb[8].mxu0 %vm298_vm0, %v1555_v18  ;;  %1499 = vmatmul.mubr.msk.bf16.gmra.mrb[8].mxu1 %vm298_vm0, %v1556_v19 }
  0x2f   :  { %1470 = vmatprep.mubr.msk.bf16.mxu0 %vm298_vm0, %v1557_v20  ;;  %1502 = vmatprep.mubr.msk.bf16.mxu1 %vm298_vm0, %v1558_v21 }
  0x36   :  { %1471 = vmatmul.mubr.msk.bf16.gmra.mrb[12].mxu0 %vm298_vm0, %v1559_v22  ;;  %1503 = vmatmul.mubr.msk.bf16.gmra.mrb[12].mxu1 %vm298_vm0, %v1560_v23 }
  0x37   :  { %1474 = vmatprep.mubr.msk.bf16.mxu0 %vm298_vm0, %v1561_v24  ;;  %1506 = vmatprep.mubr.msk.bf16.mxu1 %vm298_vm0, %v1562_v25 }
  0x3e   :  { %1475 = vmatmul.mubr.msk.bf16.gmra.mrb[16].mxu0 %vm298_vm0, %v1563_v26  ;;  %1507 = vmatmul.mubr.msk.bf16.gmra.mrb[16].mxu1 %vm298_vm0, %v1564_v27 }
  0x3f   :  { %1478 = vmatprep.mubr.msk.bf16.mxu0 %vm298_vm0, %v1565_v28  ;;  %1510 = vmatprep.mubr.msk.bf16.mxu1 %vm298_vm0, %v1566_v29 }
  0x46   :  { %1479 = vmatmul.mubr.msk.bf16.gmra.mrb[20].mxu0 %vm298_vm0, %v1567_v30  ;;  %1511 = vmatmul.mubr.msk.bf16.gmra.mrb[20].mxu1 %vm298_vm0, %v1568_v31 }
  0x47   :  { %1482 = vmatprep.mubr.msk.bf16.mxu0 %vm298_vm0, %v1569_v32  ;;  %1514 = vmatprep.mubr.msk.bf16.mxu1 %vm298_vm0, %v1570_v33 }
  0x4e   :  { %1483 = vmatmul.mubr.msk.bf16.gmra.mrb[24].mxu0 %vm298_vm0, %v1571_v34  ;;  %1515 = vmatmul.mubr.msk.bf16.gmra.mrb[24].mxu1 %vm298_vm0, %v1572_v35 }
  0x4f   :  { %1486 = vmatprep.mubr.msk.bf16.mxu0 %vm298_vm0, %v1573_v36  ;;  %1518 = vmatprep.mubr.msk.bf16.mxu1 %vm298_vm0, %v1574_v37 }
  0x56   :  { %1487 = vmatmul.mubr.msk.bf16.gmra.mrb[28].mxu0 %vm298_vm0, %v1575_v38  ;;  %1519 = vmatmul.mubr.msk.bf16.gmra.mrb[28].mxu1 %vm298_vm0, %v1576_v39 }
  0xf1   :  { %v1460_v41 = vpop.f32.mrb[0].mxu0  ;;  %v1492_v42 = vpop.f32.mrb[0].mxu1 }
  0xf2   :  { %v442_v43 = vadd.f32 %v1460_v41, %v1749_v40  ;;  %v570_v44 = vadd.f32 %v1492_v42, %v1749_v40  ;;  %v433_v45 = vpop.f32.mrb[1].mxu0  ;;  %v561_v46 = vpop.f32.mrb[1].mxu1 }
  0xf3   :  { %v434_v47 = vadd.f32 %v1749_v40, %v433_v45  ;;  %v562_v48 = vadd.f32 %v1749_v40, %v561_v46  ;;  %v1461_v49 = vpop.f32.mrb[2].mxu0  ;;  %v1493_v50 = vpop.f32.mrb[2].mxu1 }
  0xf4   :  { %vm690_vm3 = vcmp.ge.f32.partialorder %v442_v43, 0.0  ;;  %v754_v51 = vmul.f32 0.2, %v442_v43  ;;  %vm722_vm4 = vcmp.ge.f32.partialorder %v570_v44, 0.0  ;;  %v786_v52 = vmul.f32 0.2, %v570_v44 }
  0xf5   :  { %vm688_vm5 = vcmp.ge.f32.partialorder %v434_v47, 0.0  ;;  %v752_v53 = vmul.f32 0.2, %v434_v47  ;;  %vm720_vm6 = vcmp.ge.f32.partialorder %v562_v48, 0.0  ;;  %v784_v54 = vmul.f32 0.2, %v562_v48 }
  0xf6   :  { %v818_v55 = vsel %vm690_vm3, %v442_v43, %v754_v51  ;;  %v850_v56 = vsel %vm722_vm4, %v570_v44, %v786_v52  ;;  %v445_v57 = vadd.f32 %v1461_v49, %v1749_v40  ;;  %v573_v58 = vadd.f32 %v1493_v50, %v1749_v40  ;;  %v436_v59 = vpop.f32.mrb[3].mxu0  ;;  %v564_v60 = vpop.f32.mrb[3].mxu1 }
  0xf7   :  { %v1343_v61 = vpack.c.bf16 %v818_v55, %v818_v55  ;;  %v1375_v62 = vpack.c.bf16 %v850_v56, %v850_v56  ;;  %v816_v63 = vsel %vm688_vm5, %v434_v47, %v752_v53  ;;  %v848_v0 = vsel %vm720_vm6, %v562_v48, %v784_v54 }
  0xf8   :  { %v1341_v1 = vpack.c.bf16 %v816_v63, %v816_v63  ;;  %v1373_v2 = vpack.c.bf16 %v848_v0, %v848_v0  ;;  %vm691_vm7 = vcmp.ge.f32.partialorder %v445_v57, 0.0  ;;  %v755_v3 = vmul.f32 0.2, %v445_v57 }
  0xf9   :  { %1139 = vst.msk [vmem:[%s2153_s3 + $0x8] sm:$0xf] %vm1136_vm2, %v1343_v61  ;;  %1171 = vst.msk [vmem:[%s2153_s3 + $0x88] sm:$0xf] %vm1136_vm2, %v1375_v62  ;;  %vm723_vm8 = vcmp.ge.f32.partialorder %v573_v58, 0.0  ;;  %v437_v5 = vadd.f32 %v1749_v40, %v436_v59  ;;  %v565_v6 = vadd.f32 %v1749_v40, %v564_v60  ;;  %v1464_v7 = vpop.f32.mrb[4].mxu0 }
  0xfa   :  { %v787_v4 = vmul.f32 0.2, %v573_v58  ;;  %v1496_v8 = vpop.f32.mrb[4].mxu1  ;;  %1137 = vst.msk [vmem:[%s2153_s3] sm:$0xf] %vm1136_vm2, %v1341_v1  ;;  %v819_v9 = vsel %vm691_vm7, %v445_v57, %v755_v3  ;;  %v458_v10 = vadd.f32 %v1464_v7, %v1749_v40  ;;  %v449_v12 = vpop.f32.mrb[5].mxu0 }
  0xfb   :  { %1169 = vst.msk [vmem:[%s2153_s3 + $0x80] sm:$0xf] %vm1136_vm2, %v1373_v2  ;;  %v586_v11 = vadd.f32 %v1496_v8, %v1749_v40  ;;  %v577_v13 = vpop.f32.mrb[5].mxu1  ;;  %v1344_v14 = vpack.c.bf16 %v819_v9, %v819_v9  ;;  %vm689_vm9 = vcmp.ge.f32.partialorder %v437_v5, 0.0  ;;  %v753_v16 = vmul.f32 0.2, %v437_v5 }
  0xfc   :  { %v851_v15 = vsel %vm723_vm8, %v573_v58, %v787_v4  ;;  %v1465_v17 = vpop.f32.mrb[6].mxu0  ;;  %v1497_v18 = vpop.f32.mrb[6].mxu1  ;;  %vm721_vm10 = vcmp.ge.f32.partialorder %v565_v6, 0.0  ;;  %v785_v20 = vmul.f32 0.2, %v565_v6  ;;  %vm694_vm11 = vcmp.ge.f32.partialorder %v458_v10, 0.0 }
  0xfd   :  { %v1376_v19 = vpack.c.bf16 %v851_v15, %v851_v15  ;;  %v452_v21 = vpop.f32.mrb[7].mxu0  ;;  %v580_v22 = vpop.f32.mrb[7].mxu1  ;;  %1140 = vst.msk [vmem:[%s2153_s3 + $0xc] sm:$0xf] %vm1136_vm2, %v1344_v14  ;;  %v817_v23 = vsel %vm689_vm9, %v437_v5, %v753_v16  ;;  %v758_v24 = vmul.f32 0.2, %v458_v10  ;;  %v450_v28 = vadd.f32 %v1749_v40, %v449_v12 }
  0xfe   :  { %vm726_vm12 = vcmp.ge.f32.partialorder %v586_v11, 0.0  ;;  %v790_v25 = vmul.f32 0.2, %v586_v11  ;;  %v1342_v26 = vpack.c.bf16 %v817_v23, %v817_v23  ;;  %v849_v27 = vsel %vm721_vm10, %v565_v6, %v785_v20 }
  0xff   :  { %1172 = vst.msk [vmem:[%s2153_s3 + $0x8c] sm:$0xf] %vm1136_vm2, %v1376_v19  ;;  %v578_v29 = vadd.f32 %v1749_v40, %v577_v13  ;;  %v1374_v30 = vpack.c.bf16 %v849_v27, %v849_v27  ;;  %v822_v31 = vsel %vm694_vm11, %v458_v10, %v758_v24  ;;  %v461_v33 = vadd.f32 %v1465_v17, %v1749_v40 }
 0x100   :  { %v854_v32 = vsel %vm726_vm12, %v586_v11, %v790_v25  ;;  %1138 = vst.msk [vmem:[%s2153_s3 + $0x4] sm:$0xf] %vm1136_vm2, %v1342_v26  ;;  %v1347_v34 = vpack.c.bf16 %v822_v31, %v822_v31  ;;  %vm692_vm13 = vcmp.ge.f32.partialorder %v450_v28, 0.0  ;;  %v756_v36 = vmul.f32 0.2, %v450_v28 }
 0x101   :  { %v1379_v35 = vpack.c.bf16 %v854_v32, %v854_v32  ;;  %1170 = vst.msk [vmem:[%s2153_s3 + $0x84] sm:$0xf] %vm1136_vm2, %v1374_v30  ;;  %vm724_vm14 = vcmp.ge.f32.partialorder %v578_v29, 0.0  ;;  %v788_v37 = vmul.f32 0.2, %v578_v29  ;;  %vm695_vm15 = vcmp.ge.f32.partialorder %v461_v33, 0.0 }
 0x102   :  { %v759_v38 = vmul.f32 0.2, %v461_v33  ;;  %1143 = vst.msk [vmem:[%s2153_s3 + $0x18] sm:$0xf] %vm1136_vm2, %v1347_v34  ;;  %v820_v39 = vsel %vm692_vm13, %v450_v28, %v756_v36  ;;  %v589_v41 = vadd.f32 %v1497_v18, %v1749_v40  ;;  %v453_v42 = vadd.f32 %v1749_v40, %v452_v21  ;;  %v1468_v44 = vpop.f32.mrb[8].mxu0  ;;  %v1500_v45 = vpop.f32.mrb[8].mxu1 }
 0x103   :  { %1175 = vst.msk [vmem:[%s2153_s3 + $0x98] sm:$0xf] %vm1136_vm2, %v1379_v35  ;;  %v581_v43 = vadd.f32 %v1749_v40, %v580_v22  ;;  %v1345_v46 = vpack.c.bf16 %v820_v39, %v820_v39  ;;  %v852_v47 = vsel %vm724_vm14, %v578_v29, %v788_v37  ;;  %v474_v49 = vadd.f32 %v1468_v44, %v1749_v40  ;;  %v465_v50 = vpop.f32.mrb[9].mxu0  ;;  %v593_v51 = vpop.f32.mrb[9].mxu1 }
 0x104   :  { %v823_v48 = vsel %vm695_vm15, %v461_v33, %v759_v38  ;;  %v1377_v52 = vpack.c.bf16 %v852_v47, %v852_v47  ;;  %vm727_vm0 = vcmp.ge.f32.partialorder %v589_v41, 0.0  ;;  %v791_v54 = vmul.f32 0.2, %v589_v41  ;;  %v1469_v55 = vpop.f32.mrb[10].mxu0  ;;  %v1501_v56 = vpop.f32.mrb[10].mxu1 }
 0x105   :  { %v1348_v53 = vpack.c.bf16 %v823_v48, %v823_v48  ;;  %1141 = vst.msk [vmem:[%s2153_s3 + $0x10] sm:$0xf] %vm1136_vm2, %v1345_v46  ;;  %vm693_vm1 = vcmp.ge.f32.partialorder %v453_v42, 0.0  ;;  %v757_v57 = vmul.f32 0.2, %v453_v42  ;;  %vm725_vm3 = vcmp.ge.f32.partialorder %v581_v43, 0.0 }
 0x106   :  { %v789_v58 = vmul.f32 0.2, %v581_v43  ;;  %1173 = vst.msk [vmem:[%s2153_s3 + $0x90] sm:$0xf] %vm1136_vm2, %v1377_v52  ;;  %v855_v59 = vsel %vm727_vm0, %v589_v41, %v791_v54  ;;  %vm698_vm4 = vcmp.ge.f32.partialorder %v474_v49, 0.0  ;;  %v602_v61 = vadd.f32 %v1500_v45, %v1749_v40  ;;  %v468_v62 = vpop.f32.mrb[11].mxu0 }
 0x107   :  { %1144 = vst.msk [vmem:[%s2153_s3 + $0x1c] sm:$0xf] %vm1136_vm2, %v1348_v53  ;;  %v762_v60 = vmul.f32 0.2, %v474_v49  ;;  %v596_v63 = vpop.f32.mrb[11].mxu1  ;;  %v1380_v0 = vpack.c.bf16 %v855_v59, %v855_v59  ;;  %v821_v1 = vsel %vm693_vm1, %v453_v42, %v757_v57  ;;  %v466_v3 = vadd.f32 %v1749_v40, %v465_v50 }
 0x108   :  { %v853_v2 = vsel %vm725_vm3, %v581_v43, %v789_v58  ;;  %v1346_v4 = vpack.c.bf16 %v821_v1, %v821_v1  ;;  %vm730_vm5 = vcmp.ge.f32.partialorder %v602_v61, 0.0  ;;  %v794_v8 = vmul.f32 0.2, %v602_v61 }
 0x109   :  { %v1378_v5 = vpack.c.bf16 %v853_v2, %v853_v2  ;;  %v826_v6 = vsel %vm698_vm4, %v474_v49, %v762_v60  ;;  %1176 = vst.msk [vmem:[%s2153_s3 + $0x9c] sm:$0xf] %vm1136_vm2, %v1380_v0  ;;  %vm696_vm6 = vcmp.ge.f32.partialorder %v466_v3, 0.0  ;;  %v760_v9 = vmul.f32 0.2, %v466_v3  ;;  %v1472_v10 = vpop.f32.mrb[12].mxu0 }
 0x10a   :  { %v1351_v7 = vpack.c.bf16 %v826_v6, %v826_v6  ;;  %1142 = vst.msk [vmem:[%s2153_s3 + $0x14] sm:$0xf] %vm1136_vm2, %v1346_v4  ;;  %v594_v11 = vadd.f32 %v1749_v40, %v593_v51  ;;  %v477_v12 = vadd.f32 %v1469_v55, %v1749_v40  ;;  %v605_v13 = vadd.f32 %v1501_v56, %v1749_v40  ;;  %v1504_v15 = vpop.f32.mrb[12].mxu1  ;;  %v481_v16 = vpop.f32.mrb[13].mxu0 }
 0x10b   :  { %1174 = vst.msk [vmem:[%s2153_s3 + $0x94] sm:$0xf] %vm1136_vm2, %v1378_v5  ;;  %v469_v14 = vadd.f32 %v1749_v40, %v468_v62  ;;  %v858_v17 = vsel %vm730_vm5, %v602_v61, %v794_v8  ;;  %v824_v18 = vsel %vm696_vm6, %v466_v3, %v760_v9  ;;  %v597_v19 = vadd.f32 %v1749_v40, %v596_v63  ;;  %v609_v21 = vpop.f32.mrb[13].mxu1  ;;  %v1473_v22 = vpop.f32.mrb[14].mxu0 }
 0x10c   :  { %1147 = vst.msk [vmem:[%s2153_s3 + $0x28] sm:$0xf] %vm1136_vm2, %v1351_v7  ;;  %v490_v20 = vadd.f32 %v1472_v10, %v1749_v40  ;;  %v1383_v23 = vpack.c.bf16 %v858_v17, %v858_v17  ;;  %v1349_v24 = vpack.c.bf16 %v824_v18, %v824_v18  ;;  %vm728_vm7 = vcmp.ge.f32.partialorder %v594_v11, 0.0  ;;  %v1505_v26 = vpop.f32.mrb[14].mxu1  ;;  %v484_v27 = vpop.f32.mrb[15].mxu0 }
 0x10d   :  { %v792_v25 = vmul.f32 0.2, %v594_v11  ;;  %vm699_vm8 = vcmp.ge.f32.partialorder %v477_v12, 0.0  ;;  %v763_v28 = vmul.f32 0.2, %v477_v12  ;;  %vm731_vm9 = vcmp.ge.f32.partialorder %v605_v13, 0.0 }
 0x10e   :  { %v795_v29 = vmul.f32 0.2, %v605_v13  ;;  %1179 = vst.msk [vmem:[%s2153_s3 + $0xa8] sm:$0xf] %vm1136_vm2, %v1383_v23  ;;  %1145 = vst.msk [vmem:[%s2153_s3 + $0x20] sm:$0xf] %vm1136_vm2, %v1349_v24  ;;  %v618_v44 = vadd.f32 %v1504_v15, %v1749_v40  ;;  %v482_v48 = vadd.f32 %v1749_v40, %v481_v16  ;;  %v610_v49 = vadd.f32 %v1749_v40, %v609_v21 }
 0x10f   :  { %v856_v30 = vsel %vm728_vm7, %v594_v11, %v792_v25  ;;  %vm697_vm10 = vcmp.ge.f32.partialorder %v469_v14, 0.0  ;;  %v761_v31 = vmul.f32 0.2, %v469_v14  ;;  %vm729_vm11 = vcmp.ge.f32.partialorder %v597_v19, 0.0  ;;  %v612_v32 = vpop.f32.mrb[15].mxu1 }
 0x110   :  { %v1381_v33 = vpack.c.bf16 %v856_v30, %v856_v30  ;;  %v827_v34 = vsel %vm699_vm8, %v477_v12, %v763_v28  ;;  %v859_v35 = vsel %vm731_vm9, %v605_v13, %v795_v29  ;;  %v793_v36 = vmul.f32 0.2, %v597_v19 }
 0x111   :  { %v1352_v37 = vpack.c.bf16 %v827_v34, %v827_v34  ;;  %v1384_v38 = vpack.c.bf16 %v859_v35, %v859_v35  ;;  %v825_v39 = vsel %vm697_vm10, %v469_v14, %v761_v31  ;;  %vm702_vm12 = vcmp.ge.f32.partialorder %v490_v20, 0.0  ;;  %v1476_v45 = vpop.f32.mrb[16].mxu0  ;;  %v1508_v46 = vpop.f32.mrb[16].mxu1 }
 0x112   :  { %1177 = vst.msk [vmem:[%s2153_s3 + $0xa0] sm:$0xf] %vm1136_vm2, %v1381_v33  ;;  %v1350_v41 = vpack.c.bf16 %v825_v39, %v825_v39  ;;  %v857_v42 = vsel %vm729_vm11, %v597_v19, %v793_v36  ;;  %v766_v43 = vmul.f32 0.2, %v490_v20  ;;  %v493_v50 = vadd.f32 %v1473_v22, %v1749_v40  ;;  %v497_v51 = vpop.f32.mrb[17].mxu0  ;;  %v625_v52 = vpop.f32.mrb[17].mxu1 }
 0x113   :  { %1148 = vst.msk [vmem:[%s2153_s3 + $0x2c] sm:$0xf] %vm1136_vm2, %v1352_v37  ;;  %1180 = vst.msk [vmem:[%s2153_s3 + $0xac] sm:$0xf] %vm1136_vm2, %v1384_v38  ;;  %v1382_v47 = vpack.c.bf16 %v857_v42, %v857_v42  ;;  %vm734_vm13 = vcmp.ge.f32.partialorder %v618_v44, 0.0  ;;  %v621_v55 = vadd.f32 %v1505_v26, %v1749_v40  ;;  %v1875_v56 = vpop.f32.mrb[18].mxu0  ;;  %v485_v7 = vadd.f32 %v1749_v40, %v484_v27 }
 0x114   :  { %1146 = vst.msk [vmem:[%s2153_s3 + $0x24] sm:$0xf] %vm1136_vm2, %v1350_v41  ;;  %v830_v53 = vsel %vm702_vm12, %v490_v20, %v766_v43  ;;  %v798_v54 = vmul.f32 0.2, %v618_v44  ;;  %v1877_v57 = vpop.f32.mrb[18].mxu1  ;;  %vm700_vm14 = vcmp.ge.f32.partialorder %v482_v48, 0.0  ;;  %v613_v11 = vadd.f32 %v1749_v40, %v612_v32 }
 0x115   :  { %1178 = vst.msk [vmem:[%s2153_s3 + $0xa4] sm:$0xf] %vm1136_vm2, %v1382_v47  ;;  %v1355_v58 = vpack.c.bf16 %v830_v53, %v830_v53  ;;  %v764_v59 = vmul.f32 0.2, %v482_v48  ;;  %vm732_vm15 = vcmp.ge.f32.partialorder %v610_v49, 0.0  ;;  %v1883_v60 = vpop.f32.mrb[19].mxu0  ;;  %v506_v14 = vadd.f32 %v1476_v45, %v1749_v40 }
 0x116   :  { %v1885_v61 = vpop.f32.mrb[19].mxu1  ;;  %v862_v62 = vsel %vm734_vm13, %v618_v44, %v798_v54  ;;  %v796_v63 = vmul.f32 0.2, %v610_v49  ;;  %vm703_vm0 = vcmp.ge.f32.partialorder %v493_v50, 0.0  ;;  %v767_v0 = vmul.f32 0.2, %v493_v50 }
 0x117   :  { %1151 = vst.msk [vmem:[%s2153_s3 + $0x38] sm:$0xf] %vm1136_vm2, %v1355_v58  ;;  %v1387_v1 = vpack.c.bf16 %v862_v62, %v862_v62  ;;  %v828_v2 = vsel %vm700_vm14, %v482_v48, %v764_v59  ;;  %vm735_vm1 = vcmp.ge.f32.partialorder %v621_v55, 0.0  ;;  %v799_v3 = vmul.f32 0.2, %v621_v55 }
 0x118   :  { %v1353_v4 = vpack.c.bf16 %v828_v2, %v828_v2  ;;  %v860_v5 = vsel %vm732_vm15, %v610_v49, %v796_v63  ;;  %v831_v6 = vsel %vm703_vm0, %v493_v50, %v767_v0  ;;  %vm701_vm3 = vcmp.ge.f32.partialorder %v485_v7, 0.0 }
 0x119   :  { %1183 = vst.msk [vmem:[%s2153_s3 + $0xb8] sm:$0xf] %vm1136_vm2, %v1387_v1  ;;  %v1385_v8 = vpack.c.bf16 %v860_v5, %v860_v5  ;;  %v1356_v9 = vpack.c.bf16 %v831_v6, %v831_v6  ;;  %v863_v10 = vsel %vm735_vm1, %v621_v55, %v799_v3  ;;  %v765_v13 = vmul.f32 0.2, %v485_v7  ;;  %v1480_v15 = vpop.f32.mrb[20].mxu0  ;;  %v1512_v16 = vpop.f32.mrb[20].mxu1 }
 0x11a   :  { %1149 = vst.msk [vmem:[%s2153_s3 + $0x30] sm:$0xf] %vm1136_vm2, %v1353_v4  ;;  %v1388_v12 = vpack.c.bf16 %v863_v10, %v863_v10  ;;  %vm733_vm4 = vcmp.ge.f32.partialorder %v613_v11, 0.0  ;;  %v797_v17 = vmul.f32 0.2, %v613_v11  ;;  %v634_v18 = vadd.f32 %v1508_v46, %v1749_v40  ;;  %v513_v20 = vpop.f32.mrb[21].mxu0 }
 0x11b   :  { %1181 = vst.msk [vmem:[%s2153_s3 + $0xb0] sm:$0xf] %vm1136_vm2, %v1385_v8  ;;  %1152 = vst.msk [vmem:[%s2153_s3 + $0x3c] sm:$0xf] %vm1136_vm2, %v1356_v9  ;;  %v498_v19 = vadd.f32 %v1749_v40, %v497_v51  ;;  %v1912_v21 = vpop.f32.mrb[21].mxu1  ;;  %v829_v22 = vsel %vm701_vm3, %v485_v7, %v765_v13  ;;  %vm706_vm5 = vcmp.ge.f32.partialorder %v506_v14, 0.0  ;;  %v626_v24 = vadd.f32 %v1749_v40, %v625_v52 }
 0x11c   :  { %1184 = vst.msk [vmem:[%s2153_s3 + $0xbc] sm:$0xf] %vm1136_vm2, %v1388_v12  ;;  %v770_v23 = vmul.f32 0.2, %v506_v14  ;;  %v1919_v25 = vpop.f32.mrb[22].mxu0  ;;  %v1921_v26 = vpop.f32.mrb[22].mxu1  ;;  %v1354_v27 = vpack.c.bf16 %v829_v22, %v829_v22  ;;  %v861_v28 = vsel %vm733_vm4, %v613_v11, %v797_v17  ;;  %v509_v41 = vadd.f32 %v1875_v56, %v1749_v40 }
 0x11d   :  { %vm738_vm6 = vcmp.ge.f32.partialorder %v634_v18, 0.0  ;;  %v802_v29 = vmul.f32 0.2, %v634_v18  ;;  %v1923_v30 = vpop.f32.mrb[23].mxu0  ;;  %v1925_v31 = vpop.f32.mrb[23].mxu1  ;;  %v1386_v32 = vpack.c.bf16 %v861_v28, %v861_v28  ;;  %vm704_vm7 = vcmp.ge.f32.partialorder %v498_v19, 0.0 }
 0x11e   :  { %v834_v33 = vsel %vm706_vm5, %v506_v14, %v770_v23  ;;  %v768_v34 = vmul.f32 0.2, %v498_v19  ;;  %1150 = vst.msk [vmem:[%s2153_s3 + $0x34] sm:$0xf] %vm1136_vm2, %v1354_v27  ;;  %vm736_vm8 = vcmp.ge.f32.partialorder %v626_v24, 0.0  ;;  %v637_v42 = vadd.f32 %v1877_v57, %v1749_v40 }
 0x11f   :  { %v1359_v35 = vpack.c.bf16 %v834_v33, %v834_v33  ;;  %v866_v36 = vsel %vm738_vm6, %v634_v18, %v802_v29  ;;  %v800_v37 = vmul.f32 0.2, %v626_v24  ;;  %1182 = vst.msk [vmem:[%s2153_s3 + $0xb4] sm:$0xf] %vm1136_vm2, %v1386_v32  ;;  %v501_v45 = vadd.f32 %v1749_v40, %v1883_v60 }
 0x120   :  { %v1391_v38 = vpack.c.bf16 %v866_v36, %v866_v36  ;;  %v832_v39 = vsel %vm704_vm7, %v498_v19, %v768_v34  ;;  %v629_v46 = vadd.f32 %v1749_v40, %v1885_v61  ;;  %vm707_vm9 = vcmp.ge.f32.partialorder %v509_v41, 0.0 }
 0x121   :  { %1155 = vst.msk [vmem:[%s2153_s3 + $0x48] sm:$0xf] %vm1136_vm2, %v1359_v35  ;;  %v1357_v43 = vpack.c.bf16 %v832_v39, %v832_v39  ;;  %v864_v44 = vsel %vm736_vm8, %v626_v24, %v800_v37  ;;  %v771_v48 = vmul.f32 0.2, %v509_v41  ;;  %vm739_vm10 = vcmp.ge.f32.partialorder %v637_v42, 0.0  ;;  %v1951_v49 = vpop.f32.mrb[24].mxu0 }
 0x122   :  { %1187 = vst.msk [vmem:[%s2153_s3 + $0xc8] sm:$0xf] %vm1136_vm2, %v1391_v38  ;;  %v1389_v47 = vpack.c.bf16 %v864_v44, %v864_v44  ;;  %v1953_v50 = vpop.f32.mrb[24].mxu1  ;;  %v803_v51 = vmul.f32 0.2, %v637_v42  ;;  %vm705_vm11 = vcmp.ge.f32.partialorder %v501_v45, 0.0  ;;  %v522_v55 = vadd.f32 %v1480_v15, %v1749_v40 }
 0x123   :  { %1153 = vst.msk [vmem:[%s2153_s3 + $0x40] sm:$0xf] %vm1136_vm2, %v1357_v43  ;;  %v769_v52 = vmul.f32 0.2, %v501_v45  ;;  %vm737_vm12 = vcmp.ge.f32.partialorder %v629_v46, 0.0  ;;  %v835_v53 = vsel %vm707_vm9, %v509_v41, %v771_v48  ;;  %v650_v56 = vadd.f32 %v1512_v16, %v1749_v40  ;;  %v1965_v57 = vpop.f32.mrb[25].mxu0 }
 0x124   :  { %1185 = vst.msk [vmem:[%s2153_s3 + $0xc0] sm:$0xf] %vm1136_vm2, %v1389_v47  ;;  %v801_v54 = vmul.f32 0.2, %v629_v46  ;;  %v1967_v58 = vpop.f32.mrb[25].mxu1  ;;  %v1360_v59 = vpack.c.bf16 %v835_v53, %v835_v53  ;;  %v867_v60 = vsel %vm739_vm10, %v637_v42, %v803_v51  ;;  %v514_v62 = vadd.f32 %v1749_v40, %v513_v20  ;;  %v1971_v63 = vpop.f32.mrb[26].mxu0 }
 0x125   :  { %v833_v61 = vsel %vm705_vm11, %v501_v45, %v769_v52  ;;  %v1973_v0 = vpop.f32.mrb[26].mxu1  ;;  %v1392_v1 = vpack.c.bf16 %v867_v60, %v867_v60  ;;  %vm710_vm13 = vcmp.ge.f32.partialorder %v522_v55, 0.0  ;;  %v1976_v4 = vpop.f32.mrb[27].mxu0  ;;  %v774_v7 = vmul.f32 0.2, %v522_v55 }
 0x126   :  { %v1358_v2 = vpack.c.bf16 %v833_v61, %v833_v61  ;;  %v865_v3 = vsel %vm737_vm12, %v629_v46, %v801_v54  ;;  %v1978_v5 = vpop.f32.mrb[27].mxu1  ;;  %1156 = vst.msk [vmem:[%s2153_s3 + $0x4c] sm:$0xf] %vm1136_vm2, %v1360_v59  ;;  %vm742_vm14 = vcmp.ge.f32.partialorder %v650_v56, 0.0  ;;  %v806_v8 = vmul.f32 0.2, %v650_v56 }
 0x127   :  { %v1390_v6 = vpack.c.bf16 %v865_v3, %v865_v3  ;;  %1188 = vst.msk [vmem:[%s2153_s3 + $0xcc] sm:$0xf] %vm1136_vm2, %v1392_v1  ;;  %vm708_vm15 = vcmp.ge.f32.partialorder %v514_v62, 0.0  ;;  %v772_v9 = vmul.f32 0.2, %v514_v62  ;;  %v642_v10 = vadd.f32 %v1749_v40, %v1912_v21 }
 0x128   :  { %1154 = vst.msk [vmem:[%s2153_s3 + $0x44] sm:$0xf] %vm1136_vm2, %v1358_v2  ;;  %v525_v11 = vadd.f32 %v1919_v25, %v1749_v40  ;;  %v838_v12 = vsel %vm710_vm13, %v522_v55, %v774_v7  ;;  %v870_v13 = vsel %vm742_vm14, %v650_v56, %v806_v8  ;;  %v653_v14 = vadd.f32 %v1921_v26, %v1749_v40 }
 0x129   :  { %1186 = vst.msk [vmem:[%s2153_s3 + $0xc4] sm:$0xf] %vm1136_vm2, %v1390_v6  ;;  %v517_v15 = vadd.f32 %v1749_v40, %v1923_v30  ;;  %v1363_v16 = vpack.c.bf16 %v838_v12, %v838_v12  ;;  %v1395_v17 = vpack.c.bf16 %v870_v13, %v870_v13  ;;  %v836_v18 = vsel %vm708_vm15, %v514_v62, %v772_v9  ;;  %v2004_v19 = vpop.f32.mrb[28].mxu0  ;;  %v2006_v20 = vpop.f32.mrb[28].mxu1 }
 0x12a   :  { %vm740_vm0 = vcmp.ge.f32.partialorder %v642_v10, 0.0  ;;  %v1361_v21 = vpack.c.bf16 %v836_v18, %v836_v18  ;;  %v804_v22 = vmul.f32 0.2, %v642_v10  ;;  %vm711_vm1 = vcmp.ge.f32.partialorder %v525_v11, 0.0  ;;  %v2008_v24 = vpop.f32.mrb[29].mxu0  ;;  %v2026_v32 = vpop.f32.mrb[29].mxu1 }
 0x12b   :  { %v775_v23 = vmul.f32 0.2, %v525_v11  ;;  %1159 = vst.msk [vmem:[%s2153_s3 + $0x58] sm:$0xf] %vm1136_vm2, %v1363_v16  ;;  %1191 = vst.msk [vmem:[%s2153_s3 + $0xd8] sm:$0xf] %vm1136_vm2, %v1395_v17  ;;  %v645_v29 = vadd.f32 %v1749_v40, %v1925_v31  ;;  %v538_v30 = vadd.f32 %v1951_v49, %v1749_v40  ;;  %v666_v45 = vadd.f32 %v1953_v50, %v1749_v40 }
 0x12c   :  { %vm743_vm3 = vcmp.ge.f32.partialorder %v653_v14, 0.0  ;;  %v807_v25 = vmul.f32 0.2, %v653_v14  ;;  %vm709_vm4 = vcmp.ge.f32.partialorder %v517_v15, 0.0  ;;  %v773_v26 = vmul.f32 0.2, %v517_v15 }
 0x12d   :  { %1157 = vst.msk [vmem:[%s2153_s3 + $0x50] sm:$0xf] %vm1136_vm2, %v1361_v21  ;;  %v868_v27 = vsel %vm740_vm0, %v642_v10, %v804_v22  ;;  %v839_v28 = vsel %vm711_vm1, %v525_v11, %v775_v23  ;;  %v2028_v33 = vpop.f32.mrb[30].mxu0  ;;  %v2030_v38 = vpop.f32.mrb[30].mxu1  ;;  %vm741_vm5 = vcmp.ge.f32.partialorder %v645_v29, 0.0  ;;  %vm714_vm6 = vcmp.ge.f32.partialorder %v538_v30, 0.0 }
 0x12e   :  { %v1393_v34 = vpack.c.bf16 %v868_v27, %v868_v27  ;;  %v1364_v35 = vpack.c.bf16 %v839_v28, %v839_v28  ;;  %v871_v36 = vsel %vm743_vm3, %v653_v14, %v807_v25  ;;  %v837_v37 = vsel %vm709_vm4, %v517_v15, %v773_v26  ;;  %v2032_v39 = vpop.f32.mrb[31].mxu0  ;;  %v2034_v31 = vpop.f32.mrb[31].mxu1 }
 0x12f   :  { %v1396_v41 = vpack.c.bf16 %v871_v36, %v871_v36  ;;  %v1362_v42 = vpack.c.bf16 %v837_v37, %v837_v37  ;;  %v805_v43 = vmul.f32 0.2, %v645_v29  ;;  %v778_v44 = vmul.f32 0.2, %v538_v30 }
 0x130   :  { %1189 = vst.msk [vmem:[%s2153_s3 + $0xd0] sm:$0xf] %vm1136_vm2, %v1393_v34  ;;  %1160 = vst.msk [vmem:[%s2153_s3 + $0x5c] sm:$0xf] %vm1136_vm2, %v1364_v35  ;;  %v530_v46 = vadd.f32 %v1749_v40, %v1965_v57  ;;  %v658_v48 = vadd.f32 %v1749_v40, %v1967_v58  ;;  %v541_v49 = vadd.f32 %v1971_v63, %v1749_v40  ;;  %vm746_vm7 = vcmp.ge.f32.partialorder %v666_v45, 0.0 }
 0x131   :  { %1192 = vst.msk [vmem:[%s2153_s3 + $0xdc] sm:$0xf] %vm1136_vm2, %v1396_v41  ;;  %1158 = vst.msk [vmem:[%s2153_s3 + $0x54] sm:$0xf] %vm1136_vm2, %v1362_v42  ;;  %v869_v47 = vsel %vm741_vm5, %v645_v29, %v805_v43  ;;  %v669_v50 = vadd.f32 %v1973_v0, %v1749_v40  ;;  %v842_v52 = vsel %vm714_vm6, %v538_v30, %v778_v44  ;;  %v810_v53 = vmul.f32 0.2, %v666_v45 }
 0x132   :  { %v1394_v51 = vpack.c.bf16 %v869_v47, %v869_v47  ;;  %v1367_v54 = vpack.c.bf16 %v842_v52, %v842_v52  ;;  %vm712_vm8 = vcmp.ge.f32.partialorder %v530_v46, 0.0  ;;  %v776_v55 = vmul.f32 0.2, %v530_v46 }
 0x133   :  { %vm744_vm9 = vcmp.ge.f32.partialorder %v658_v48, 0.0  ;;  %v874_v56 = vsel %vm746_vm7, %v666_v45, %v810_v53  ;;  %v808_v57 = vmul.f32 0.2, %v658_v48  ;;  %vm715_vm10 = vcmp.ge.f32.partialorder %v541_v49, 0.0 }
 0x134   :  { %1190 = vst.msk [vmem:[%s2153_s3 + $0xd4] sm:$0xf] %vm1136_vm2, %v1394_v51  ;;  %v779_v58 = vmul.f32 0.2, %v541_v49  ;;  %1163 = vst.msk [vmem:[%s2153_s3 + $0x68] sm:$0xf] %vm1136_vm2, %v1367_v54  ;;  %v1399_v59 = vpack.c.bf16 %v874_v56, %v874_v56  ;;  %v840_v60 = vsel %vm712_vm8, %v530_v46, %v776_v55  ;;  %v533_v1 = vadd.f32 %v1749_v40, %v1976_v4 }
 0x135   :  { %vm747_vm11 = vcmp.ge.f32.partialorder %v669_v50, 0.0  ;;  %v811_v61 = vmul.f32 0.2, %v669_v50  ;;  %v1365_v62 = vpack.c.bf16 %v840_v60, %v840_v60  ;;  %v872_v63 = vsel %vm744_vm9, %v658_v48, %v808_v57 }
 0x136   :  { %v843_v0 = vsel %vm715_vm10, %v541_v49, %v779_v58  ;;  %1195 = vst.msk [vmem:[%s2153_s3 + $0xe8] sm:$0xf] %vm1136_vm2, %v1399_v59  ;;  %v1397_v2 = vpack.c.bf16 %v872_v63, %v872_v63  ;;  %v661_v7 = vadd.f32 %v1749_v40, %v1978_v5  ;;  %vm713_vm12 = vcmp.ge.f32.partialorder %v533_v1, 0.0 }
 0x137   :  { %v1368_v3 = vpack.c.bf16 %v843_v0, %v843_v0  ;;  %v875_v6 = vsel %vm747_vm11, %v669_v50, %v811_v61  ;;  %1161 = vst.msk [vmem:[%s2153_s3 + $0x60] sm:$0xf] %vm1136_vm2, %v1365_v62  ;;  %v777_v9 = vmul.f32 0.2, %v533_v1  ;;  %v554_v4 = vadd.f32 %v2004_v19, %v1749_v40 }
 0x138   :  { %v1400_v8 = vpack.c.bf16 %v875_v6, %v875_v6  ;;  %1193 = vst.msk [vmem:[%s2153_s3 + $0xe0] sm:$0xf] %vm1136_vm2, %v1397_v2  ;;  %vm745_vm13 = vcmp.ge.f32.partialorder %v661_v7, 0.0  ;;  %v809_v5 = vmul.f32 0.2, %v661_v7  ;;  %v682_v10 = vadd.f32 %v2006_v20, %v1749_v40 }
 0x139   :  { %1164 = vst.msk [vmem:[%s2153_s3 + $0x6c] sm:$0xf] %vm1136_vm2, %v1368_v3  ;;  %v546_v11 = vadd.f32 %v1749_v40, %v2008_v24  ;;  %v841_v12 = vsel %vm713_vm12, %v533_v1, %v777_v9  ;;  %vm718_vm14 = vcmp.ge.f32.partialorder %v554_v4, 0.0  ;;  %v782_v13 = vmul.f32 0.2, %v554_v4 }
 0x13a   :  { %1196 = vst.msk [vmem:[%s2153_s3 + $0xec] sm:$0xf] %vm1136_vm2, %v1400_v8  ;;  %v674_v14 = vadd.f32 %v1749_v40, %v2026_v32  ;;  %v1366_v15 = vpack.c.bf16 %v841_v12, %v841_v12  ;;  %v873_v16 = vsel %vm745_vm13, %v661_v7, %v809_v5  ;;  %vm750_vm15 = vcmp.ge.f32.partialorder %v682_v10, 0.0 }
 0x13b   :  { %v814_v17 = vmul.f32 0.2, %v682_v10  ;;  %v1398_v18 = vpack.c.bf16 %v873_v16, %v873_v16  ;;  %v846_v19 = vsel %vm718_vm14, %v554_v4, %v782_v13  ;;  %vm716_vm0 = vcmp.ge.f32.partialorder %v546_v11, 0.0 }
 0x13c   :  { %v780_v20 = vmul.f32 0.2, %v546_v11  ;;  %1162 = vst.msk [vmem:[%s2153_s3 + $0x64] sm:$0xf] %vm1136_vm2, %v1366_v15  ;;  %v1371_v21 = vpack.c.bf16 %v846_v19, %v846_v19  ;;  %vm748_vm1 = vcmp.ge.f32.partialorder %v674_v14, 0.0  ;;  %v557_v26 = vadd.f32 %v2028_v33, %v1749_v40 }
 0x13d   :  { %v878_v22 = vsel %vm750_vm15, %v682_v10, %v814_v17  ;;  %v812_v23 = vmul.f32 0.2, %v674_v14  ;;  %1194 = vst.msk [vmem:[%s2153_s3 + $0xe4] sm:$0xf] %vm1136_vm2, %v1398_v18  ;;  %v685_v27 = vadd.f32 %v2030_v38, %v1749_v40  ;;  %v549_v30 = vadd.f32 %v1749_v40, %v2032_v39 }
 0x13e   :  { %v1403_v24 = vpack.c.bf16 %v878_v22, %v878_v22  ;;  %v844_v25 = vsel %vm716_vm0, %v546_v11, %v780_v20  ;;  %1167 = vst.msk [vmem:[%s2153_s3 + $0x78] sm:$0xf] %vm1136_vm2, %v1371_v21  ;;  %v677_v32 = vadd.f32 %v1749_v40, %v2034_v31  ;;  %vm719_vm3 = vcmp.ge.f32.partialorder %v557_v26, 0.0 }
 0x13f   :  { %v1369_v28 = vpack.c.bf16 %v844_v25, %v844_v25  ;;  %v876_v29 = vsel %vm748_vm1, %v674_v14, %v812_v23  ;;  %v783_v34 = vmul.f32 0.2, %v557_v26  ;;  %vm751_vm4 = vcmp.ge.f32.partialorder %v685_v27, 0.0 }
 0x140   :  { %1199 = vst.msk [vmem:[%s2153_s3 + $0xf8] sm:$0xf] %vm1136_vm2, %v1403_v24  ;;  %v1401_v33 = vpack.c.bf16 %v876_v29, %v876_v29  ;;  %v815_v35 = vmul.f32 0.2, %v685_v27  ;;  %vm717_vm5 = vcmp.ge.f32.partialorder %v549_v30, 0.0  ;;  %vm749_vm6 = vcmp.ge.f32.partialorder %v677_v32, 0.0 }
 0x141   :  { %1165 = vst.msk [vmem:[%s2153_s3 + $0x70] sm:$0xf] %vm1136_vm2, %v1369_v28  ;;  %v781_v36 = vmul.f32 0.2, %v549_v30  ;;  %v847_v40 = vsel %vm719_vm3, %v557_v26, %v783_v34  ;;  %v813_v37 = vmul.f32 0.2, %v677_v32 }
 0x142   :  { %1197 = vst.msk [vmem:[%s2153_s3 + $0xf0] sm:$0xf] %vm1136_vm2, %v1401_v33  ;;  %v1372_v38 = vpack.c.bf16 %v847_v40, %v847_v40  ;;  %v879_v39 = vsel %vm751_vm4, %v685_v27, %v815_v35 }
 0x143   :  { %v845_v41 = vsel %vm717_vm5, %v549_v30, %v781_v36  ;;  %v1404_v42 = vpack.c.bf16 %v879_v39, %v879_v39  ;;  %v877_v31 = vsel %vm749_vm6, %v677_v32, %v813_v37 }
 0x144   :  { %v1370_v43 = vpack.c.bf16 %v845_v41, %v845_v41  ;;  %1168 = vst.msk [vmem:[%s2153_s3 + $0x7c] sm:$0xf] %vm1136_vm2, %v1372_v38  ;;  %v1402_v44 = vpack.c.bf16 %v877_v31, %v877_v31 }
 0x145   :  { %1200 = vst.msk [vmem:[%s2153_s3 + $0xfc] sm:$0xf] %vm1136_vm2, %v1404_v42 }
 0x146   :  { %1166 = vst.msk [vmem:[%s2153_s3 + $0x74] sm:$0xf] %vm1136_vm2, %v1370_v43  ;;  %1198 = vst.msk [vmem:[%s2153_s3 + $0xf4] sm:$0xf] %vm1136_vm2, %v1402_v44 }

// kernel: _lambda_.7
= control target key start
LH: loop header
LB: loop body
LE: loop exit
PB: predicated region body
PF: predicated region fallthrough
CT: control target
= control target key end

     0   :  { %s7026_s12 = smov 0   ;;  %s7028_s13 = smov 0   ;;  %s8785_s0 = inlined_call_operand.vmem [shape: bf16[2,4,10,10,64], index: 0, kind: input, shape index: {}]   ;;  %s8786_s1 = inlined_call_operand.vmem [shape: bf16[25,64,128], index: 1, kind: input, shape index: {}]   ;;  %s8787_s2 = inlined_call_operand.vmem [shape: f32[1,128], index: 2, kind: input, shape index: {}]   ;;  %s8788_s3 = inlined_call_operand.vmem [shape: bf16[2,8,8,128], index: 3, kind: output, shape index: {}]  }
   0x1   :  { %s7030_s14 = smov 0  }
   0x2 LB: > { %s32_s15 = sadd.s32 1, %s7000_s13  ;;  %p5298_p0 = scmp.ge.s32.totalorder %s7004_s14, 1  ;;  %s7004_s14 = sphi %s7030_s14, %s13_s14   ;;  %s7000_s13 = sphi %s7028_s13, %s8836_s13   ;;  %s6996_s12 = sphi %s7026_s12, %s8835_s12  }
   0x3   : > { %p34_p1 = scmp.ge.s32.totalorder %s32_s15, 2  ;;  %p177_p2 = scmp.lt.s32.totalorder %s7004_s14, 3 }
   0x5   : > { %s8838_s15 = smov (%p34_p1, %s32_s15), 0  ;;  %p178_p3 = pnand %p5298_p0, %p177_p2 }
   0x7   : > { %181 = sbr.rel (%p178_p3) target bundleno = 496 (0x1f0), region = 32 }
   0xe   : > { %v6830_v0 = vld [vmem:[%s8786_s1 + $0x40] sm:$0xff]   ;;  %p215_p4 = scmp.lt.s32.totalorder %s6996_s12, 1  ;;  %v6832_v2 = vld [vmem:[%s8786_s1 + $0x48] sm:$0xff]   ;;  %v6834_v4 = vld [vmem:[%s8786_s1 + $0x50] sm:$0xff]   ;;  %vm636_vm0 = vcmask 1042432   ;;  %vm637_vm1 = vcmask 1046532  }
   0xf   : > { %v6831_v1 = vld [vmem:[%s8786_s1 + $0x300] sm:$0xff]   ;;  %6205 = vmatprep.subr.bf16.mxu1 %v6830_v0  ;;  %v6833_v3 = vld [vmem:[%s8786_s1 + $0x308] sm:$0xff]   ;;  %v6835_v5 = vld [vmem:[%s8786_s1 + $0x310] sm:$0xff]   ;;  %vm269_vm2 = vsmask.f32 3328  ;;  %vm429_vm3 = vcmask 523264  }
  0x10   : > { %s8840_s12 = smov (!%p215_p4, %s6996_s12), 1  ;;  %6397 = vmatprep.subr.bf16.mxu0 %v6831_v1  ;;  %6206 = vmatpush3.bf16.msra.mxu1 %v6830_v0  ;;  %v6836_v6 = vld [vmem:[%s8786_s1 + $0x58] sm:$0xff]   ;;  %vm7085_vm4 = vmor %vm636_vm0, %vm637_vm1  ;;  %v7115_v30 = vld [vmem:[%s8786_s1] sm:$0xff]   ;;  %vm270_vm5 = vsmask.f32 7440 }
  0x11   : > { %6398 = vmatpush3.bf16.msra.mxu0 %v6831_v1  ;;  %6207 = vmatprep.subr.bf16.mxu1 %v6832_v2  ;;  %s6805_s26 = smul.u32 320, %s8840_s12  ;;  %v6837_v7 = vld [vmem:[%s8786_s1 + $0x318] sm:$0xff]   ;;  %v7123_v35 = vld [vmem:[%s8786_s1 + $0x2a0] sm:$0xff]   ;;  %vm7140_vm6 = vmor %vm269_vm2, %vm270_vm5  ;;  %s5981_s22 = sshll.u32 %s8840_s12, 5 }
  0x12   : > { %6399 = vmatprep.subr.bf16.mxu0 %v6833_v3  ;;  %v7621_v13 = vld [vmem:[%s8786_s1 + $0x120] sm:$0xff]   ;;  %s238_s25 = scalar_lea.vmem %s8788_s3, %s5981_s22 }
  0x13   : > { %s7071_s6 = scalar_lea.vmem %s8785_s0, %s6805_s26 }
  0x14   : > { %6208 = vmatpush3.bf16.msra.mxu1 %v6832_v2  ;;  %v7077_v8 = vld [vmem:[%s7071_s6 + $0x10] sm:$0xf]  ;;  %v5559_v9 = vld [vmem:[%s7071_s6 + $0x14] sm:$0x1]  ;;  %v7081_v10 = vld [vmem:[%s7071_s6 + $0x18] sm:$0xf] }
  0x15   : > { %6400 = vmatpush3.bf16.msra.mxu0 %v6833_v3  ;;  %6209 = vmatprep.subr.bf16.mxu1 %v6834_v4  ;;  %v5561_v11 = vld [vmem:[%s7071_s6 + $0x1c] sm:$0x1]  ;;  %v2337_v15 = vshll.u32 %v5559_v9, 16  ;;  %v7092_v16 = vld [vmem:[%s7071_s6] sm:$0xf]  ;;  %v5614_v17 = vrot.slane %v7077_v8, 9 }
  0x16   : > { %6401 = vmatprep.subr.bf16.mxu0 %v6835_v5  ;;  %v2579_v18 = vrot.slane %v5559_v9, 5  ;;  %v5615_v19 = vrot.slane %v7081_v10, 9  ;;  %v2583_v20 = vrot.slane %v5561_v11, 5  ;;  %v7097_v21 = vld [vmem:[%s7071_s6 + $0x4] sm:$0x1]  ;;  %v2351_v23 = vshll.u32 %v5561_v11, 16 }
  0x17   : > { %v7101_v24 = vld [vmem:[%s7071_s6 + $0x8] sm:$0xf]  ;;  %v7104_v25 = vld [vmem:[%s7071_s6 + $0xc] sm:$0x1]  ;;  %v273_v29 = vshrl.u32 %v7092_v16, 16  ;;  %v276_v32 = vshll.u32 %v7092_v16, 16 }
  0x18   : > { %6210 = vmatpush3.bf16.msra.mxu1 %v6834_v4  ;;  %v2580_v27 = vsel %vm7085_vm4, %v5614_v17, %v2579_v18  ;;  %v2584_v28 = vsel %vm7085_vm4, %v5615_v19, %v2583_v20  ;;  %v282_v33 = vshll.u32 %v7097_v21, 16  ;;  %v287_v34 = vshrl.u32 %v7101_v24, 16  ;;  %v5562_v43 = vld [vmem:[%s7071_s6 + $0x20] sm:$0xf]  ;;  %v5563_v48 = vld [vmem:[%s7071_s6 + $0x24] sm:$0x1] }
  0x19   : > { %6402 = vmatpush3.bf16.msra.mxu0 %v6835_v5  ;;  %6211 = vmatprep.subr.bf16.mxu1 %v6836_v6  ;;  %v5630_v31 = vcombine.low %v2580_v27, %v2584_v28  ;;  %v275_v36 = vrot.slane %v273_v29, 4  ;;  %v290_v37 = vshll.u32 %v7101_v24, 16  ;;  %v296_v38 = vshll.u32 %v7104_v25, 16  ;;  %v7145_v55 = vld [vmem:[%s7071_s6 + $0x28] sm:$0xf] }
  0x1a   : > { %6403 = vmatprep.subr.bf16.mxu0 %v6837_v7  ;;  %v7127_v39 = vrot.slane %v2337_v15, 5  ;;  %v7129_v40 = vrot.slane %v2351_v23, 5  ;;  %v278_v41 = vrot.slane %v276_v32, 5  ;;  %v289_v42 = vrot.slane %v287_v34, 4  ;;  %v7148_v56 = vld [vmem:[%s7071_s6 + $0x2c] sm:$0x1] }
  0x1b   : > { %6405 = vmatprep.mubr.msk.bf16.mxu0 %vm429_vm3, %v5630_v31  ;;  %v284_v44 = vrot.slane %v282_v33, 5  ;;  %v292_v45 = vrot.slane %v290_v37, 5  ;;  %v641_v46 = vrot.slane %v7097_v21, 5  ;;  %v645_v47 = vrot.slane %v7104_v25, 5  ;;  %v7153_v61 = vld [vmem:[%s7071_s6 + $0x10] sm:$0xf] }
  0x1c   : > { %6212 = vmatpush3.bf16.msra.mxu1 %v6836_v6  ;;  %8793 = vst [vmem:[#allocation2_spill] sm:$0xff] %v7127_v39  ;;  %8794 = vst [vmem:[#allocation3_spill] sm:$0xff] %v7129_v40  ;;  %v279_v50 = vor.u32 %v278_v41, %v275_v36  ;;  %v298_v51 = vrot.slane %v296_v38, 5  ;;  %v2356_v52 = vshrl.u32 %v5562_v43, 16  ;;  %v2359_v53 = vshll.u32 %v5562_v43, 16  ;;  %v6841_v38 = vld [vmem:[%s8786_s1 + $0x2a8] sm:$0xff]  }
  0x1d   : > { %6404 = vmatpush3.bf16.msra.mxu0 %v6837_v7  ;;  %6221 = vmatprep.subr.bf16.mxu1 %v7115_v30  ;;  %v293_v54 = vor.u32 %v292_v45, %v289_v42  ;;  %v2365_v58 = vshll.u32 %v5563_v48, 16  ;;  %v2370_v59 = vshrl.u32 %v7145_v55, 16  ;;  %v2373_v60 = vshll.u32 %v7145_v55, 16  ;;  %v7161_v2 = vld [vmem:[%s7071_s6 + $0x14] sm:$0x1] }
  0x1e   : > { %6413 = vmatprep.subr.bf16.mxu0 %v7123_v35  ;;  %v280_v57 = vrot.slane %v279_v50, 4  ;;  %v7155_v63 = vrot.slane %v2356_v52, 4  ;;  %v7157_v0 = vrot.slane %v2359_v53, 5  ;;  %v2379_v1 = vshll.u32 %v7148_v56, 16  ;;  %v7167_v7 = vld [vmem:[%s7071_s6 + $0x18] sm:$0xf] }
  0x1f   : > { %v294_v62 = vrot.slane %v293_v54, 4  ;;  %v5616_v4 = vrot.slane %v5562_v43, 9  ;;  %v2587_v5 = vrot.slane %v5563_v48, 5  ;;  %v5617_v6 = vrot.slane %v7145_v55, 9  ;;  %v7173_v15 = vld [vmem:[%s7071_s6 + $0x1c] sm:$0x1] }
  0x20   : > { %v285_v3 = vsel %vm7140_vm6, %v280_v57, %v284_v44  ;;  %v2591_v11 = vrot.slane %v7148_v56, 5  ;;  %v301_v17 = vshrl.u32 %v7153_v61, 16  ;;  %v304_v18 = vshll.u32 %v7153_v61, 16  ;;  %v5566_v45 = vld [vmem:[%s7071_s6 + $0x30] sm:$0xf]  ;;  %v6869_v56 = vld [vmem:[%s8786_s1 + $0xb8] sm:$0xff]  }
  0x21   : > { %v299_v9 = vsel %vm7140_vm6, %v294_v62, %v298_v51  ;;  %v2588_v20 = vsel %vm7085_vm4, %v5616_v4, %v2587_v5  ;;  %v310_v23 = vshll.u32 %v7161_v2, 16  ;;  %v315_v27 = vshrl.u32 %v7167_v7, 16  ;;  %v5567_v50 = vld [vmem:[%s7071_s6 + $0x34] sm:$0x1]  ;;  %v5568_v51 = vld [vmem:[%s7071_s6 + $0x38] sm:$0xf] }
  0x22   : > { %v5310_v19 = vcombine.low %v285_v3, %v299_v9  ;;  %v2592_v28 = vsel %vm7085_vm4, %v5617_v6, %v2591_v11  ;;  %v303_v29 = vrot.slane %v301_v17, 4  ;;  %v306_v31 = vrot.slane %v304_v18, 5  ;;  %v5569_v57 = vld [vmem:[%s7071_s6 + $0x3c] sm:$0x1]  ;;  %v6843_v3 = vld [vmem:[%s8786_s1 + $0x2b0] sm:$0xff]  }
  0x23   : > { %v318_v32 = vshll.u32 %v7167_v7, 16  ;;  %v7185_v33 = vrot.slane %v2365_v58, 5  ;;  %v5631_v34 = vcombine.low %v2588_v20, %v2592_v28  ;;  %v317_v36 = vrot.slane %v315_v27, 4  ;;  %v7203_v6 = vld [vmem:[%s7071_s6 + $0x20] sm:$0xf] }
  0x24   : > { %6213 = vmatprep.mubr.msk.bf16.mxu1 %vm429_vm3, %v5310_v19  ;;  %v324_v37 = vshll.u32 %v7173_v15, 16  ;;  %v307_v41 = vor.u32 %v306_v31, %v303_v29  ;;  %v312_v42 = vrot.slane %v310_v23, 5  ;;  %v649_v44 = vrot.slane %v7161_v2, 5  ;;  %v7206_v9 = vld [vmem:[%s7071_s6 + $0x24] sm:$0x1]  ;;  %v6840_v23 = vld [vmem:[%s8786_s1 + $0x8] sm:$0xff]  }
  0x25   : > { %8797 = vst [vmem:[#allocation4_spill] sm:$0xff] %v7185_v33  ;;  %v320_v43 = vrot.slane %v318_v32, 5  ;;  %6406 = vmatmul.mubr.msk.bf16.vlgmr.msra.gmra.mrb[0].mxu0 %vm429_vm3, %v5631_v34  ;;  %v5618_v52 = vrot.slane %v5566_v45, 9  ;;  %v2595_v58 = vrot.slane %v5567_v50, 5  ;;  %v5619_v62 = vrot.slane %v5568_v51, 9  ;;  %v6860_v2 = vld [vmem:[%s8786_s1 + $0x98] sm:$0xff]  }
  0x26   : > { %v326_v48 = vrot.slane %v324_v37, 5  ;;  %v308_v53 = vrot.slane %v307_v41, 4  ;;  %6414 = vmatpush3.bf16.msra.mxu0 %v7123_v35  ;;  %v653_v4 = vrot.slane %v7173_v15, 5  ;;  %v2599_v5 = vrot.slane %v5569_v57, 5  ;;  %v7213_v18 = vld [vmem:[%s7071_s6 + $0x28] sm:$0xf] }
  0x27   : > { %v321_v54 = vor.u32 %v320_v43, %v317_v36  ;;  %6415 = vmatprep.subr.bf16.mxu0 %v6841_v38  ;;  %v2596_v17 = vsel %vm7085_vm4, %v5618_v52, %v2595_v58  ;;  %v7216_v19 = vld [vmem:[%s7071_s6 + $0x2c] sm:$0x1]  ;;  %v329_v20 = vshrl.u32 %v7203_v6, 16  ;;  %v332_v28 = vshll.u32 %v7203_v6, 16  ;;  %v5570_v41 = vld [vmem:[%s7071_s6 + $0x40] sm:$0xf] }
  0x28   : > { %v313_v11 = vsel %vm7140_vm6, %v308_v53, %v312_v42  ;;  %v2600_v27 = vsel %vm7085_vm4, %v5619_v62, %v2599_v5  ;;  %v338_v29 = vshll.u32 %v7206_v9, 16  ;;  %v343_v31 = vshrl.u32 %v7213_v18, 16  ;;  %v5571_v51 = vld [vmem:[%s7071_s6 + $0x44] sm:$0x1]  ;;  %v6845_v52 = vld [vmem:[%s8786_s1 + $0x2b8] sm:$0xff]   ;;  %v6842_v58 = vld [vmem:[%s8786_s1 + $0x10] sm:$0xff]  }
  0x29   : > { %v322_v35 = vrot.slane %v321_v54, 4  ;;  %v5632_v34 = vcombine.low %v2596_v17, %v2600_v27  ;;  %v331_v36 = vrot.slane %v329_v20, 4  ;;  %v346_v37 = vshll.u32 %v7213_v18, 16  ;;  %v5572_v53 = vld [vmem:[%s7071_s6 + $0x48] sm:$0xf] }
  0x2a   : > { %6416 = vmatpush3.bf16.msra.mxu0 %v6841_v38  ;;  %v334_v43 = vrot.slane %v332_v28, 5  ;;  %v340_v45 = vrot.slane %v338_v29, 5  ;;  %v345_v50 = vrot.slane %v343_v31, 4  ;;  %v5573_v54 = vld [vmem:[%s7071_s6 + $0x4c] sm:$0x1]  ;;  %v5620_v62 = vrot.slane %v5570_v41, 9 }
  0x2b   : > { %v327_v32 = vsel %vm7140_vm6, %v322_v35, %v326_v48  ;;  %6417 = vmatprep.subr.bf16.mxu0 %v6843_v3  ;;  %6409 = vmatprep.mubr.msk.bf16.mxu0 %vm429_vm3, %v5632_v34  ;;  %v348_v38 = vrot.slane %v346_v37, 5  ;;  %v352_v48 = vshll.u32 %v7216_v19, 16  ;;  %v2603_v5 = vrot.slane %v5571_v51, 5  ;;  %v7245_v27 = vld [vmem:[%s7071_s6 + $0x30] sm:$0xf] }
  0x2c   : > { %v5311_v42 = vcombine.low %v313_v11, %v327_v32  ;;  %v335_v57 = vor.u32 %v334_v43, %v331_v36  ;;  %v5621_v11 = vrot.slane %v5572_v53, 9  ;;  %v2607_v20 = vrot.slane %v5573_v54, 5  ;;  %v7250_v31 = vld [vmem:[%s7071_s6 + $0x34] sm:$0x1]  ;;  %v7253_v32 = vld [vmem:[%s7071_s6 + $0x38] sm:$0xf] }
  0x2d   : > { %v349_v35 = vor.u32 %v348_v38, %v345_v50  ;;  %v354_v17 = vrot.slane %v352_v48, 5  ;;  %v2604_v29 = vsel %vm7085_vm4, %v5620_v62, %v2603_v5  ;;  %v357_v34 = vshrl.u32 %v7245_v27, 16  ;;  %v7259_v37 = vld [vmem:[%s7071_s6 + $0x3c] sm:$0x1]  ;;  %v5652_v26 = vld [vmem:[%s7071_s6 + $0x88] sm:$0xf] }
  0x2e   : > { %6214 = vmatmul.mubr.msk.bf16.vlgmr.msra.gmra.mrb[0].mxu1 %vm429_vm3, %v5311_v42  ;;  %6418 = vmatpush3.bf16.msra.mxu0 %v6843_v3  ;;  %v336_v28 = vrot.slane %v335_v57, 4  ;;  %v360_v3 = vshll.u32 %v7245_v27, 16  ;;  %v366_v41 = vshll.u32 %v7250_v31, 16  ;;  %v6850_v42 = vld [vmem:[%s8786_s1 + $0x2e0] sm:$0xff]   ;;  %v371_v38 = vshrl.u32 %v7253_v32, 16  ;;  %v6844_v62 = vld [vmem:[%s8786_s1 + $0x18] sm:$0xff]  }
  0x2f   : > { %6222 = vmatpush3.bf16.msra.mxu1 %v7115_v30  ;;  %6419 = vmatprep.subr.bf16.mxu0 %v6845_v52  ;;  %v350_v36 = vrot.slane %v349_v35, 4  ;;  %v2608_v30 = vsel %vm7085_vm4, %v5621_v11, %v2607_v20  ;;  %v359_v51 = vrot.slane %v357_v34, 4  ;;  %v374_v57 = vshll.u32 %v7253_v32, 16  ;;  %v5657_v15 = vld [vmem:[%s7071_s6 + $0x9c] sm:$0x1] }
  0x30   : > { %6223 = vmatprep.subr.bf16.mxu1 %v6840_v23  ;;  %v341_v43 = vsel %vm7140_vm6, %v336_v28, %v340_v45  ;;  %v5633_v50 = vcombine.low %v2604_v29, %v2608_v30  ;;  %v362_v53 = vrot.slane %v360_v3, 5  ;;  %v368_v54 = vrot.slane %v366_v41, 5  ;;  %v5785_v40 = vld [vmem:[%s7071_s6 + $0xfc] sm:$0x1]  ;;  %v8557_v12 = vld [vmem:[%s7071_s6 + $0x110] sm:$0xf] }
  0x31   : > { %v355_v48 = vsel %vm7140_vm6, %v350_v36, %v354_v17  ;;  %v373_v5 = vrot.slane %v371_v38, 4  ;;  %v380_v11 = vshll.u32 %v7259_v37, 16  ;;  %v376_v20 = vrot.slane %v374_v57, 5  ;;  %v5644_v17 = vld [vmem:[%s7071_s6 + $0x68] sm:$0xf] }
  0x32   : > { %6420 = vmatpush3.bf16.msra.mxu0 %v6845_v52  ;;  %v5312_v45 = vcombine.low %v341_v43, %v355_v48  ;;  %v363_v35 = vor.u32 %v362_v53, %v359_v51  ;;  %v2911_v36 = vshrl.u32 %v5644_v17, 16  ;;  %v2914_v30 = vshll.u32 %v5644_v17, 16  ;;  %v7283_v51 = vld [vmem:[%s8786_s1 + $0x80] sm:$0xff]   ;;  %v5646_v53 = vld [vmem:[%s7071_s6 + $0x70] sm:$0xf] }
  0x33   : > { %6224 = vmatpush3.bf16.msra.mxu1 %v6840_v23  ;;  %6410 = vmatmul.mubr.msk.bf16.gmra.mrb[4].mxu0 %vm429_vm3, %v5633_v50  ;;  %v5642_v23 = vld [vmem:[%s7071_s6 + $0x60] sm:$0xf]  ;;  %v382_v34 = vrot.slane %v380_v11, 5  ;;  %v377_v41 = vor.u32 %v376_v20, %v373_v5  ;;  %v5648_v57 = vld [vmem:[%s7071_s6 + $0x78] sm:$0xf]  ;;  %v5325_v21 = vcombine.low %v7245_v27, %v7253_v32  ;;  %v5340_v55 = vrot.slane %v7245_v27, 9 }
  0x34   : > { %6225 = vmatprep.subr.bf16.mxu1 %v6842_v58  ;;  %v2897_v28 = vshrl.u32 %v5642_v23, 16  ;;  %v2900_v29 = vshll.u32 %v5642_v23, 16  ;;  %6429 = vmatprep.subr.bf16.mxu0 %v6850_v42  ;;  %v5666_v52 = vcombine.low %v5642_v23, %v5644_v17  ;;  %v364_v3 = vrot.slane %v363_v35, 4  ;;  %v6864_v27 = vld [vmem:[%s8786_s1 + $0x28] sm:$0xff]  }
  0x35   : > { %6217 = vmatprep.mubr.msk.bf16.mxu1 %vm429_vm3, %v5312_v45  ;;  %v2913_v38 = vrot.slane %v2911_v36, 4  ;;  %v2916_v48 = vrot.slane %v2914_v30, 5  ;;  %v378_v11 = vrot.slane %v377_v41, 4  ;;  %v5667_v5 = vcombine.low %v5646_v53, %v5648_v57 }
  0x36   : > { %v2899_v43 = vrot.slane %v2897_v28, 4  ;;  %v2902_v50 = vrot.slane %v2900_v29, 5  ;;  %6421 = vmatprep.mubr.msk.bf16.mxu0 %vm429_vm3, %v5666_v52  ;;  %v369_v45 = vsel %vm7140_vm6, %v364_v3, %v368_v54  ;;  %v5322_v23 = vcombine.low %v7092_v16, %v7101_v24  ;;  %v6853_v28 = vld [vmem:[%s8786_s1 + $0x2e8] sm:$0xff]  }
  0x37   : > { %6226 = vmatpush3.bf16.msra.mxu1 %v6842_v58  ;;  %v2925_v58 = vshrl.u32 %v5646_v53, 16  ;;  %v2928_v35 = vshll.u32 %v5646_v53, 16  ;;  %v2939_v20 = vshrl.u32 %v5648_v57, 16  ;;  %v2942_v17 = vshll.u32 %v5648_v57, 16  ;;  %v5650_v57 = vld [vmem:[%s7071_s6 + $0x80] sm:$0xf] }
  0x38   : > { %6227 = vmatprep.subr.bf16.mxu1 %v6844_v62  ;;  %v383_v29 = vsel %vm7140_vm6, %v378_v11, %v382_v34  ;;  %v2903_v52 = vor.u32 %v2902_v50, %v2899_v43  ;;  %v5334_v36 = vrot.slane %v7092_v16, 9  ;;  %v2917_v22 = vor.u32 %v2916_v48, %v2913_v38  ;;  %v6858_v50 = vld [vmem:[%s8786_s1 + $0x2f0] sm:$0xff]  }
  0x39   : > { %v2927_v54 = vrot.slane %v2925_v58, 4  ;;  %v5313_v30 = vcombine.low %v369_v45, %v383_v29  ;;  %v2930_v3 = vrot.slane %v2928_v35, 5  ;;  %v2941_v41 = vrot.slane %v2939_v20, 4  ;;  %v5654_v11 = vld [vmem:[%s7071_s6 + $0x90] sm:$0xf]  ;;  %v6861_v29 = vld [vmem:[%s8786_s1 + $0x2f8] sm:$0xff]  }
  0x3a   : > { %v2944_v53 = vrot.slane %v2942_v17, 5  ;;  %v2953_v34 = vshrl.u32 %v5650_v57, 16  ;;  %v2956_v16 = vshll.u32 %v5650_v57, 16  ;;  %v2967_v43 = vshrl.u32 %v5652_v26, 16 }
  0x3b   : > { %6228 = vmatpush3.bf16.msra.mxu1 %v6844_v62  ;;  %6422 = vmatmul.mubr.msk.bf16.vlgmr.msra.gmra.mrb[0].mxu0 %vm429_vm3, %v5667_v5  ;;  %v5668_v62 = vcombine.low %v5650_v57, %v5652_v26  ;;  %v2970_v45 = vshll.u32 %v5652_v26, 16  ;;  %v5656_v5 = vld [vmem:[%s7071_s6 + $0x98] sm:$0xf]  ;;  %v2931_v58 = vor.u32 %v2930_v3, %v2927_v54  ;;  %v2981_v26 = vshrl.u32 %v5654_v11, 16  ;;  %v6852_v3 = vld [vmem:[%s8786_s1 + $0x88] sm:$0xff]  }
  0x3c   : > { %6237 = vmatprep.subr.bf16.mxu1 %v7283_v51  ;;  %6430 = vmatpush3.bf16.msra.mxu0 %v6850_v42  ;;  %v7309_v42 = vrot.slane %v2903_v52, 4  ;;  %v2945_v38 = vor.u32 %v2944_v53, %v2941_v41  ;;  %v2955_v48 = vrot.slane %v2953_v34, 4  ;;  %v2958_v35 = vrot.slane %v2956_v16, 5 }
  0x3d   : > { %6218 = vmatmul.mubr.msk.bf16.gmra.mrb[4].mxu1 %vm429_vm3, %v5313_v30  ;;  %6431 = vmatprep.subr.bf16.mxu0 %v6853_v28  ;;  %v7312_v20 = vrot.slane %v2967_v43, 4  ;;  %v5669_v17 = vcombine.low %v5654_v11, %v5656_v5  ;;  %v2984_v30 = vshll.u32 %v5654_v11, 16  ;;  %v2995_v52 = vshrl.u32 %v5656_v5, 16 }
  0x3e   : > { %6229 = vmatprep.mubr.msk.bf16.mxu1 %vm429_vm3, %v5322_v23  ;;  %6425 = vmatprep.mubr.msk.bf16.mxu0 %vm429_vm3, %v5668_v62  ;;  %v2972_v23 = vrot.slane %v2970_v45, 5  ;;  %v5323_v54 = vcombine.low %v7153_v61, %v7167_v7  ;;  %v5324_v41 = vcombine.low %v7203_v6, %v7213_v18  ;;  %v2998_v53 = vshll.u32 %v5656_v5, 16  ;;  %v5643_v45 = vld [vmem:[%s7071_s6 + $0x64] sm:$0x1] }
  0x3f   : > { %v2918_v57 = vrot.slane %v2917_v22, 4  ;;  %v7326_v62 = vrot.slane %v2984_v30, 5  ;;  %v7328_v34 = vrot.slane %v2995_v52, 4  ;;  %v5335_v16 = vrot.slane %v7101_v24, 9  ;;  %v7338_v5 = vld [vmem:[%s8786_s1 + $0xa0] sm:$0xff]  }
  0x40   : > { %6432 = vmatpush3.bf16.msra.mxu0 %v6853_v28  ;;  %v7324_v28 = vrot.slane %v2981_v26, 4  ;;  %v7332_v43 = vrot.slane %v2998_v53, 5  ;;  %v2932_v11 = vrot.slane %v2931_v58, 4  ;;  %v5645_v22 = vld [vmem:[%s7071_s6 + $0x6c] sm:$0x1]  ;;  %v2906_v26 = vshll.u32 %v5643_v45, 16 }
  0x41   : > { %6433 = vmatprep.subr.bf16.mxu0 %v6858_v50  ;;  %v642_v24 = vsel %vm7085_vm4, %v5334_v36, %v641_v46  ;;  %v2946_v58 = vrot.slane %v2945_v38, 4  ;;  %v2920_v30 = vshll.u32 %v5645_v22, 16  ;;  %v5647_v52 = vld [vmem:[%s7071_s6 + $0x74] sm:$0x1]  ;;  %v2959_v53 = vor.u32 %v2958_v35, %v2955_v48  ;;  %v5649_v46 = vld [vmem:[%s7071_s6 + $0x7c] sm:$0x1] }
  0x42   : > { %v2908_v25 = vrot.slane %v2906_v26, 5  ;;  %v2934_v36 = vshll.u32 %v5647_v52, 16  ;;  %v6856_v38 = vld [vmem:[%s8786_s1 + $0x90] sm:$0xff]   ;;  %v2948_v48 = vshll.u32 %v5649_v46, 16  ;;  %v657_v26 = vrot.slane %v7206_v9, 5  ;;  %v6862_v46 = vld [vmem:[%s8786_s1 + $0x20] sm:$0xff]  }
  0x43   : > { %6426 = vmatmul.mubr.msk.bf16.gmra.mrb[4].mxu0 %vm429_vm3, %v5669_v17  ;;  %v646_v17 = vsel %vm7085_vm4, %v5335_v16, %v645_v47  ;;  %v2973_v47 = vor.u32 %v2972_v23, %v7312_v20  ;;  %v5337_v20 = vrot.slane %v7167_v7, 9  ;;  %v3001_v23 = vor.u32 %v7332_v43, %v7328_v34  ;;  %v5653_v34 = vld [vmem:[%s7071_s6 + $0x8c] sm:$0x1] }
  0x44   : > { %6434 = vmatpush3.bf16.msra.mxu0 %v6858_v50  ;;  %v5336_v50 = vrot.slane %v7153_v61, 9  ;;  %v5350_v61 = vcombine.low %v642_v24, %v646_v17  ;;  %v2909_v35 = vsel %vm7140_vm6, %v7309_v42, %v2908_v25  ;;  %v2950_v45 = vrot.slane %v2948_v48, 5  ;;  %v6867_v48 = vld [vmem:[%s8786_s1 + $0xb0] sm:$0xff]  }
  0x45   : > { %6230 = vmatmul.mubr.msk.bf16.vlgmr.msra.gmra.mrb[0].mxu1 %vm429_vm3, %v5323_v54  ;;  %6435 = vmatprep.subr.bf16.mxu0 %v6861_v29  ;;  %v2922_v54 = vrot.slane %v2920_v30, 5  ;;  %v2974_v43 = vrot.slane %v2973_v47, 4  ;;  %v2976_v22 = vshll.u32 %v5653_v34, 16  ;;  %v5339_v24 = vrot.slane %v7213_v18, 9  ;;  %v5655_v30 = vld [vmem:[%s7071_s6 + $0x94] sm:$0x1] }
  0x46   : > { %6238 = vmatpush3.bf16.msra.mxu1 %v7283_v51  ;;  %6233 = vmatprep.mubr.msk.bf16.mxu1 %vm429_vm3, %v5324_v41  ;;  %v2987_v51 = vor.u32 %v7326_v62, %v7324_v28  ;;  %v2936_v41 = vrot.slane %v2934_v36, 5  ;;  %v2960_v28 = vrot.slane %v2959_v53, 4  ;;  %v5651_v62 = vld [vmem:[%s7071_s6 + $0x84] sm:$0x1]  ;;  %v661_v17 = vrot.slane %v7216_v19, 5 }
  0x47   : > { %6239 = vmatprep.subr.bf16.mxu1 %v6852_v3  ;;  %v2923_v16 = vsel %vm7140_vm6, %v2918_v57, %v2922_v54  ;;  %v5338_v57 = vrot.slane %v7203_v6, 9  ;;  %v654_v6 = vsel %vm7085_vm4, %v5337_v20, %v653_v4  ;;  %v2978_v52 = vrot.slane %v2976_v22, 5 }
  0x48   : > { %6436 = vmatpush3.bf16.msra.mxu0 %v6861_v29  ;;  %v7376_v29 = vsel %vm7085_vm4, %v5336_v50, %v649_v44  ;;  %v5686_v42 = vcombine.low %v2909_v35, %v2923_v16  ;;  %v2937_v7 = vsel %vm7140_vm6, %v2932_v11, %v2936_v41  ;;  %v2951_v44 = vsel %vm7140_vm6, %v2946_v58, %v2950_v45  ;;  %v6865_v58 = vld [vmem:[%s8786_s1 + $0xa8] sm:$0xff]   ;;  %v7438_v16 = vld [vmem:[%s7071_s6 + $0xa0] sm:$0xf] }
  0x49   : > { %6445 = vmatprep.subr.bf16.mxu0 %v7338_v5  ;;  %v5687_v11 = vcombine.low %v2937_v7, %v2951_v44  ;;  %v658_v50 = vsel %vm7085_vm4, %v5338_v57, %v657_v26  ;;  %v2988_v53 = vrot.slane %v2987_v51, 4  ;;  %v662_v4 = vsel %vm7085_vm4, %v5339_v24, %v661_v17  ;;  %v7441_v45 = vld [vmem:[%s7071_s6 + $0xa8] sm:$0xf]  ;;  %v7458_v7 = vld [vmem:[%s7071_s6 + $0x58] sm:$0xf] }
  0x4a   : > { %6240 = vmatpush3.bf16.msra.mxu1 %v6852_v3  ;;  %v2962_v3 = vshll.u32 %v5651_v62, 16  ;;  %6437 = vmatprep.mubr.msk.bf16.mxu0 %vm429_vm3, %v5686_v42  ;;  %v2990_v18 = vshll.u32 %v5655_v30, 16  ;;  %v3002_v19 = vrot.slane %v3001_v23, 4  ;;  %v7409_v25 = vrot.slane %v2370_v59, 4  ;;  %v6866_v62 = vld [vmem:[%s8786_s1 + $0x30] sm:$0xff]   ;;  %v6874_v30 = vld [vmem:[%s8786_s1 + $0xe0] sm:$0xff]  }
  0x4b   : > { %6241 = vmatprep.subr.bf16.mxu1 %v6856_v38  ;;  %6438 = vmatmul.mubr.msk.bf16.vlgmr.msra.gmra.mrb[0].mxu0 %vm429_vm3, %v5687_v11  ;;  %v2979_v47 = vsel %vm7140_vm6, %v2974_v43, %v2978_v52  ;;  %v5351_v51 = vcombine.low %v7376_v29, %v654_v6  ;;  %v5352_v35 = vcombine.low %v658_v50, %v662_v4  ;;  %v5341_v20 = vrot.slane %v7253_v32, 9  ;;  %v7479_v26 = vld [vmem:[%s7071_s6 + $0xb0] sm:$0xf]  ;;  %v7482_v11 = vld [vmem:[%s7071_s6 + $0xb8] sm:$0xf] }
  0x4c   : > { %v2964_v9 = vrot.slane %v2962_v3, 5  ;;  %6446 = vmatpush3.bf16.msra.mxu0 %v7338_v5  ;;  %v2992_v54 = vrot.slane %v2990_v18, 5  ;;  %v669_v23 = vrot.slane %v7259_v37, 5  ;;  %v3296_v29 = vshrl.u32 %v7438_v16, 16  ;;  %v6868_v4 = vld [vmem:[%s8786_s1 + $0x38] sm:$0xff]  }
  0x4d   : > { %6234 = vmatmul.mubr.msk.bf16.gmra.mrb[4].mxu1 %vm429_vm3, %v5325_v21  ;;  %v3004_v21 = vshll.u32 %v5657_v15, 16  ;;  %6447 = vmatprep.subr.bf16.mxu0 %v6865_v58  ;;  %v7452_v42 = vrot.slane %v2379_v1, 5  ;;  %v5722_v32 = vcombine.low %v7438_v16, %v7441_v45  ;;  %v3299_v37 = vshll.u32 %v7438_v16, 16 }
  0x4e   : > { %6242 = vmatpush3.bf16.msra.mxu1 %v6856_v38  ;;  %6245 = vmatprep.mubr.msk.bf16.mxu1 %vm429_vm3, %v5350_v61  ;;  %v2965_v36 = vsel %vm7140_vm6, %v2960_v28, %v2964_v9  ;;  %v7421_v38 = vrot.slane %v2373_v60, 5  ;;  %v665_v60 = vrot.slane %v7250_v31, 5  ;;  %v2993_v5 = vsel %vm7140_vm6, %v2988_v53, %v2992_v54  ;;  %v7448_v28 = vld [vmem:[%s7071_s6 + $0x50] sm:$0xf] }
  0x4f   : > { %6243 = vmatprep.subr.bf16.mxu1 %v6860_v2  ;;  %v5688_v59 = vcombine.low %v2965_v36, %v2979_v47  ;;  %v3006_v61 = vrot.slane %v3004_v21, 5  ;;  %8798 = vst [vmem:[#allocation5_spill] sm:$0xff] %v7452_v42  ;;  %v3310_v1 = vshrl.u32 %v7441_v45, 16  ;;  %v959_v34 = vshrl.u32 %v7448_v28, 16  ;;  %v7508_v21 = vld [vmem:[%s7071_s6 + $0x68] sm:$0xf] }
  0x50   : > { %6448 = vmatpush3.bf16.msra.mxu0 %v6865_v58  ;;  %v962_v43 = vshll.u32 %v7448_v28, 16  ;;  %v973_v57 = vshrl.u32 %v7458_v7, 16  ;;  %v670_v44 = vsel %vm7085_vm4, %v5341_v20, %v669_v23  ;;  %v3313_v3 = vshll.u32 %v7441_v45, 16  ;;  %v6872_v23 = vld [vmem:[%s8786_s1 + $0x60] sm:$0xff]  }
  0x51   : > { %6441 = vmatprep.mubr.msk.bf16.mxu0 %vm429_vm3, %v5688_v59  ;;  %v3007_v41 = vsel %vm7140_vm6, %v3002_v19, %v3006_v61  ;;  %6449 = vmatprep.subr.bf16.mxu0 %v6867_v48  ;;  %v976_v22 = vshll.u32 %v7458_v7, 16  ;;  %v7485_v6 = vrot.slane %v959_v34, 4  ;;  %v3324_v24 = vshrl.u32 %v7479_v26, 16  ;;  %v7505_v19 = vld [vmem:[%s7071_s6 + $0x60] sm:$0xf] }
  0x52   : > { %6244 = vmatpush3.bf16.msra.mxu1 %v6860_v2  ;;  %v5689_v31 = vcombine.low %v2993_v5, %v3007_v41  ;;  %v666_v2 = vsel %vm7085_vm4, %v5340_v55, %v665_v60  ;;  %v3327_v17 = vshll.u32 %v7479_v26, 16  ;;  %v3298_v58 = vrot.slane %v3296_v29, 4  ;;  %v6877_v60 = vld [vmem:[%s8786_s1 + $0xe8] sm:$0xff]   ;;  %v7524_v5 = vld [vmem:[%s7071_s6 + $0xc0] sm:$0xf] }
  0x53   : > { %6253 = vmatprep.subr.bf16.mxu1 %v6862_v46  ;;  %v7493_v9 = vrot.slane %v962_v43, 5  ;;  %v7495_v52 = vrot.slane %v973_v57, 4  ;;  %v7497_v50 = vrot.slane %v976_v22, 5  ;;  %v3301_v15 = vrot.slane %v3299_v37, 5 }
  0x54   : > { %6442 = vmatmul.mubr.msk.bf16.gmra.mrb[4].mxu0 %vm429_vm3, %v5689_v31  ;;  %v5353_v53 = vcombine.low %v666_v2, %v670_v44  ;;  %v5386_v18 = vcombine.low %v7448_v28, %v7458_v7  ;;  %v987_v36 = vshrl.u32 %v7505_v19, 16  ;;  %v990_v47 = vshll.u32 %v7505_v19, 16  ;;  %v7539_v28 = vld [vmem:[%s7071_s6 + $0xc8] sm:$0xf] }
  0x55   : > { %6246 = vmatmul.mubr.msk.bf16.vlgmr.msra.gmra.mrb[0].mxu1 %vm429_vm3, %v5351_v51  ;;  %6450 = vmatpush3.bf16.msra.mxu0 %v6867_v48  ;;  %v1001_v59 = vshrl.u32 %v7508_v21, 16  ;;  %v5723_v54 = vcombine.low %v7479_v26, %v7482_v11  ;;  %v1004_v61 = vshll.u32 %v7508_v21, 16  ;;  %v3302_v48 = vor.u32 %v3301_v15, %v3298_v58  ;;  %v7560_v15 = vld [vmem:[%s7071_s6 + $0xd0] sm:$0xf] }
  0x56   : > { %6254 = vmatpush3.bf16.msra.mxu1 %v6862_v46  ;;  %6249 = vmatprep.mubr.msk.bf16.mxu1 %vm429_vm3, %v5352_v35  ;;  %v3338_v46 = vshrl.u32 %v7482_v11, 16  ;;  %v3312_v51 = vrot.slane %v3310_v1, 4  ;;  %v3341_v35 = vshll.u32 %v7482_v11, 16  ;;  %v7518_v55 = vrot.slane %v987_v36, 4  ;;  %v5372_v1 = vld [vmem:[%s7071_s6 + $0x78] sm:$0xf] }
  0x57   : > { %6255 = vmatprep.subr.bf16.mxu1 %v6864_v27  ;;  %6453 = vmatprep.mubr.msk.bf16.mxu0 %vm429_vm3, %v5722_v32  ;;  %v3315_v41 = vrot.slane %v3313_v3, 5  ;;  %v965_v20 = vor.u32 %v7493_v9, %v7485_v6  ;;  %v7534_v31 = vrot.slane %v1001_v59, 4  ;;  %v7536_v29 = vrot.slane %v1004_v61, 5  ;;  %v6882_v3 = vld [vmem:[%s8786_s1 + $0xf0] sm:$0xff]  }
  0x58   : > { %6451 = vmatprep.subr.bf16.mxu0 %v6869_v56  ;;  %v3352_v32 = vshrl.u32 %v7524_v5, 16  ;;  %v5724_v37 = vcombine.low %v7524_v5, %v7539_v28  ;;  %v3355_v7 = vshll.u32 %v7524_v5, 16  ;;  %v7548_v34 = vrot.slane %v3302_v48, 4  ;;  %v7636_v61 = vld [vmem:[%s7071_s6 + $0xb4] sm:$0x1] }
  0x59   : > { %6452 = vmatpush3.bf16.msra.mxu0 %v6869_v56  ;;  %v5370_v56 = vld [vmem:[%s7071_s6 + $0x70] sm:$0xf]  ;;  %v3316_v43 = vor.u32 %v3315_v41, %v3312_v51  ;;  %v3366_v57 = vshrl.u32 %v7539_v28, 16  ;;  %v1029_v44 = vshrl.u32 %v5372_v1, 16  ;;  %v5387_v22 = vcombine.low %v7505_v19, %v7508_v21  ;;  %v5374_v41 = vld [vmem:[%s7071_s6 + $0x80] sm:$0xf] }
  0x5a   : > { %6256 = vmatpush3.bf16.msra.mxu1 %v6864_v27  ;;  %6461 = vmatprep.subr.bf16.mxu0 %v6874_v30  ;;  %v7532_v27 = vrot.slane %v990_v47, 5  ;;  %v1015_v2 = vshrl.u32 %v5370_v56, 16  ;;  %v3369_v6 = vshll.u32 %v7539_v28, 16  ;;  %v5388_v58 = vcombine.low %v5370_v56, %v5372_v1 }
  0x5b   : > { %6257 = vmatprep.subr.bf16.mxu1 %v6866_v62  ;;  %v1032_v9 = vshll.u32 %v5372_v1, 16  ;;  %v7569_v19 = vrot.slane %v1029_v44, 4  ;;  %v7574_v21 = vrot.slane %v3316_v43, 4  ;;  %v5376_v1 = vld [vmem:[%s7071_s6 + $0x88] sm:$0xf]  ;;  %v1043_v43 = vshrl.u32 %v5374_v41, 16 }
  0x5c   : > { %6454 = vmatmul.mubr.msk.bf16.vlgmr.msra.gmra.mrb[0].mxu0 %vm429_vm3, %v5723_v54  ;;  %v1057_v44 = vshrl.u32 %v5376_v1, 16  ;;  %v3343_v59 = vrot.slane %v3341_v35, 5  ;;  %v5367_v35 = vld [vmem:[%s7071_s6 + $0x64] sm:$0x1] }
  0x5d   : > { %6250 = vmatmul.mubr.msk.bf16.gmra.mrb[4].mxu1 %vm429_vm3, %v5353_v53  ;;  %6462 = vmatpush3.bf16.msra.mxu0 %v6874_v30  ;;  %v6876_v53 = vld [vmem:[%s8786_s1 + $0x68] sm:$0xff]   ;;  %v7572_v30 = vld [vmem:[%s7071_s6 + $0xd8] sm:$0xf]  ;;  %v7576_v47 = vrot.slane %v1032_v9, 5  ;;  %v1060_v9 = vshll.u32 %v5376_v1, 16 }
  0x5e   : > { %6258 = vmatpush3.bf16.msra.mxu1 %v6866_v62  ;;  %6261 = vmatprep.mubr.msk.bf16.mxu1 %vm429_vm3, %v5386_v18  ;;  %v1018_v62 = vshll.u32 %v5370_v56, 16  ;;  %v7565_v18 = vrot.slane %v1015_v2, 4  ;;  %v5725_v48 = vcombine.low %v7560_v15, %v7572_v30  ;;  %v979_v56 = vor.u32 %v7497_v50, %v7495_v52  ;;  %v7603_v50 = vld [vmem:[%s7071_s6 + $0xa4] sm:$0x1] }
  0x5f   : > { %6259 = vmatprep.subr.bf16.mxu1 %v6868_v4  ;;  %6457 = vmatprep.mubr.msk.bf16.mxu0 %vm429_vm3, %v5724_v37  ;;  %v6885_v37 = vld [vmem:[%s8786_s1 + $0xf8] sm:$0xff]   ;;  %v1046_v2 = vshll.u32 %v5374_v41, 16 }
  0x60   : > { %6463 = vmatprep.subr.bf16.mxu0 %v6877_v60  ;;  %v7567_v36 = vrot.slane %v1018_v62, 5  ;;  %v6880_v62 = vld [vmem:[%s8786_s1 + $0x70] sm:$0xff]   ;;  %v980_v14 = vrot.slane %v979_v56, 4  ;;  %v6884_v56 = vld [vmem:[%s8786_s1 + $0x78] sm:$0xff]  }
  0x61   : > { %6464 = vmatpush3.bf16.msra.mxu0 %v6877_v60  ;;  %v7600_v52 = vrot.slane %v1046_v2, 5  ;;  %v993_v60 = vor.u32 %v7532_v27, %v7518_v55  ;;  %v3305_v2 = vshll.u32 %v7603_v50, 16  ;;  %v5389_v55 = vcombine.low %v5374_v41, %v5376_v1 }
  0x62   : > { %6260 = vmatpush3.bf16.msra.mxu1 %v6868_v4  ;;  %v7588_v4 = vrot.slane %v965_v20, 4  ;;  %6465 = vmatprep.subr.bf16.mxu0 %v6882_v3  ;;  %v7598_v20 = vrot.slane %v1043_v43, 4  ;;  %v7615_v43 = vld [vmem:[%s7071_s6 + $0xac] sm:$0x1] }
  0x63   : > { %6269 = vmatprep.subr.bf16.mxu1 %v6872_v23  ;;  %v3319_v27 = vshll.u32 %v7615_v43, 16 }
  0x64   : > { %6458 = vmatmul.mubr.msk.bf16.gmra.mrb[4].mxu0 %vm429_vm3, %v5725_v48  ;;  %v3326_v48 = vrot.slane %v3324_v24, 4  ;;  %v3340_v24 = vrot.slane %v3338_v46, 4 }
  0x65   : > { %6262 = vmatmul.mubr.msk.bf16.vlgmr.msra.gmra.mrb[0].mxu1 %vm429_vm3, %v5387_v22  ;;  %v1007_v22 = vor.u32 %v7536_v29, %v7534_v31  ;;  %6466 = vmatpush3.bf16.msra.mxu0 %v6882_v3  ;;  %v5363_v31 = vld [vmem:[%s7071_s6 + $0x54] sm:$0x1]  ;;  %v5365_v29 = vld [vmem:[%s7071_s6 + $0x5c] sm:$0x1]  ;;  %v3329_v3 = vrot.slane %v3327_v17, 5  ;;  %v3321_v1 = vrot.slane %v3319_v27, 5 }
  0x66   : > { %6270 = vmatpush3.bf16.msra.mxu1 %v6872_v23  ;;  %6265 = vmatprep.mubr.msk.bf16.mxu1 %vm429_vm3, %v5388_v58  ;;  %v7610_v23 = vrot.slane %v1057_v44, 4  ;;  %v7612_v58 = vrot.slane %v1060_v9, 5  ;;  %v1021_v44 = vor.u32 %v7567_v36, %v7565_v18  ;;  %v3307_v9 = vrot.slane %v3305_v2, 5 }
  0x67   : > { %6271 = vmatprep.subr.bf16.mxu1 %v6876_v53  ;;  %6467 = vmatprep.subr.bf16.mxu0 %v6885_v37  ;;  %v968_v51 = vshll.u32 %v5363_v31, 16  ;;  %v982_v41 = vshll.u32 %v5365_v29, 16  ;;  %v3330_v27 = vor.u32 %v3329_v3, %v3326_v48  ;;  %v3322_v46 = vsel %vm7140_vm6, %v7574_v21, %v3321_v1  ;;  %v6886_v21 = vld [vmem:[%s8786_s1 + $0x140] sm:$0xff]  }
  0x68   : > { %v3308_v2 = vsel %vm7140_vm6, %v7548_v34, %v3307_v9  ;;  %v3333_v29 = vshll.u32 %v7636_v61, 16  ;;  %v5369_v9 = vld [vmem:[%s7071_s6 + $0x6c] sm:$0x1]  ;;  %v3344_v3 = vor.u32 %v3343_v59, %v3340_v24  ;;  %v3354_v59 = vrot.slane %v3352_v32, 4 }
  0x69   : > { %v970_v31 = vrot.slane %v968_v51, 5  ;;  %v984_v17 = vrot.slane %v982_v41, 5  ;;  %6468 = vmatpush3.bf16.msra.mxu0 %v6885_v37  ;;  %v5742_v34 = vcombine.low %v3308_v2, %v3322_v46  ;;  %v3331_v48 = vrot.slane %v3330_v27, 4  ;;  %v7681_v46 = vld [vmem:[%s7071_s6 + $0xcc] sm:$0x1] }
  0x6a   : > { %6272 = vmatpush3.bf16.msra.mxu1 %v6876_v53  ;;  %v7648_v53 = vld [vmem:[%s7071_s6 + $0xbc] sm:$0x1]  ;;  %6477 = vmatprep.subr.bf16.mxu0 %v7621_v13  ;;  %v3335_v41 = vrot.slane %v3333_v29, 5  ;;  %v1008_v2 = vrot.slane %v1007_v22, 4  ;;  %v3345_v27 = vrot.slane %v3344_v3, 4  ;;  %v3357_v22 = vrot.slane %v3355_v7, 5 }
  0x6b   : > { %6273 = vmatprep.subr.bf16.mxu1 %v6880_v62  ;;  %v3347_v54 = vshll.u32 %v7648_v53, 16  ;;  %v971_v51 = vsel %vm7140_vm6, %v7588_v4, %v970_v31  ;;  %v985_v37 = vsel %vm7140_vm6, %v980_v14, %v984_v17  ;;  %6469 = vmatprep.mubr.msk.bf16.mxu0 %vm429_vm3, %v5742_v34  ;;  %v994_v14 = vrot.slane %v993_v60, 4  ;;  %v6888_v32 = vld [vmem:[%s8786_s1 + $0x148] sm:$0xff]   ;;  %v5373_v3 = vld [vmem:[%s7071_s6 + $0x7c] sm:$0x1] }
  0x6c   : > { %v996_v4 = vshll.u32 %v5367_v35, 16  ;;  %v1010_v31 = vshll.u32 %v5369_v9, 16  ;;  %v3336_v17 = vsel %vm7140_vm6, %v3331_v48, %v3335_v41  ;;  %v3371_v7 = vrot.slane %v3369_v6, 5  ;;  %v5371_v48 = vld [vmem:[%s7071_s6 + $0x74] sm:$0x1] }
  0x6d   : > { %6266 = vmatmul.mubr.msk.bf16.gmra.mrb[4].mxu1 %vm429_vm3, %v5389_v55  ;;  %v5406_v55 = vcombine.low %v971_v51, %v985_v37  ;;  %v3349_v1 = vrot.slane %v3347_v54, 5  ;;  %v6889_v51 = vld [vmem:[%s8786_s1 + $0x128] sm:$0xff]   ;;  %v3368_v37 = vrot.slane %v3366_v57, 4  ;;  %v3358_v41 = vor.u32 %v3357_v22, %v3354_v59  ;;  %v7709_v6 = vld [vmem:[%s7071_s6 + $0xdc] sm:$0x1]  ;;  %v6890_v22 = vld [vmem:[%s8786_s1 + $0x150] sm:$0xff]  }
  0x6e   : > { %6274 = vmatpush3.bf16.msra.mxu1 %v6880_v62  ;;  %v7674_v62 = vld [vmem:[%s7071_s6 + $0xc4] sm:$0x1]  ;;  %v998_v24 = vrot.slane %v996_v4, 5  ;;  %v1012_v60 = vrot.slane %v1010_v31, 5  ;;  %v8801_v36 = vshll.u32 %v7560_v15, 16 }
  0x6f   : > { %6275 = vmatprep.subr.bf16.mxu1 %v6884_v56  ;;  %6277 = vmatprep.mubr.msk.bf16.mxu1 %vm429_vm3, %v5406_v55  ;;  %v3361_v29 = vshll.u32 %v7674_v62, 16  ;;  %v3350_v34 = vsel %vm7140_vm6, %v3345_v27, %v3349_v1  ;;  %v3372_v31 = vor.u32 %v3371_v7, %v3368_v37  ;;  %v7706_v27 = vld [vmem:[%s7071_s6 + $0xd4] sm:$0x1]  ;;  %v3359_v54 = vrot.slane %v3358_v41, 4 }
  0x70   : > { %v5743_v35 = vcombine.low %v3336_v17, %v3350_v34  ;;  %v999_v9 = vsel %vm7140_vm6, %v994_v14, %v998_v24  ;;  %v1013_v55 = vsel %vm7140_vm6, %v1008_v2, %v1012_v60  ;;  %v1022_v14 = vrot.slane %v1021_v44, 4  ;;  %v6891_v7 = vld [vmem:[%s8786_s1 + $0x130] sm:$0xff]  }
  0x71   : > { %v5407_v1 = vcombine.low %v999_v9, %v1013_v55  ;;  %v3363_v4 = vrot.slane %v3361_v29, 5  ;;  %v1024_v17 = vshll.u32 %v5371_v48, 16  ;;  %v8799_v2 = vor.u32 %v7576_v47, %v7569_v19  ;;  %v5377_v55 = vld [vmem:[%s7071_s6 + $0x8c] sm:$0x1] }
  0x72   : > { %6276 = vmatpush3.bf16.msra.mxu1 %v6884_v56  ;;  %v3375_v56 = vshll.u32 %v7681_v46, 16  ;;  %6470 = vmatmul.mubr.msk.bf16.vlgmr.msra.gmra.mrb[0].mxu0 %vm429_vm3, %v5743_v35  ;;  %v3373_v24 = vrot.slane %v3372_v31, 4  ;;  %v1038_v60 = vshll.u32 %v5373_v3, 16  ;;  %v8800_v29 = vshrl.u32 %v7560_v15, 16 }
  0x73   : > { %6285 = vmatprep.subr.bf16.mxu1 %v6886_v21  ;;  %v1036_v59 = vrot.slane %v8799_v2, 4  ;;  %6478 = vmatpush3.bf16.msra.mxu0 %v7621_v13  ;;  %v3385_v44 = vrot.slane %v8801_v36, 5  ;;  %v3364_v19 = vsel %vm7140_vm6, %v3359_v54, %v3363_v4  ;;  %v1026_v47 = vrot.slane %v1024_v17, 5 }
  0x74   : > { %v3377_v57 = vrot.slane %v3375_v56, 5  ;;  %v3382_v18 = vrot.slane %v8800_v29, 4  ;;  %6479 = vmatprep.subr.bf16.mxu0 %v6889_v51  ;;  %v3389_v13 = vshll.u32 %v7706_v27, 16  ;;  %v8802_v34 = vshrl.u32 %v7572_v30, 16  ;;  %v5375_v56 = vld [vmem:[%s7071_s6 + $0x84] sm:$0x1] }
  0x75   : > { %6278 = vmatmul.mubr.msk.bf16.vlgmr.msra.gmra.mrb[0].mxu1 %vm429_vm3, %v5407_v1  ;;  %v1040_v48 = vrot.slane %v1038_v60, 5  ;;  %v8803_v54 = vshll.u32 %v7572_v30, 16  ;;  %v1027_v3 = vsel %vm7140_vm6, %v1022_v14, %v1026_v47  ;;  %v3403_v4 = vshll.u32 %v7709_v6, 16  ;;  %v7750_v60 = vld [vmem:[%s7071_s6 + $0x8] sm:$0xf] }
  0x76   : > { %6286 = vmatpush3.bf16.msra.mxu1 %v6886_v21  ;;  %v3396_v37 = vrot.slane %v8802_v34, 4  ;;  %v3378_v21 = vsel %vm7140_vm6, %v3373_v24, %v3377_v57  ;;  %v3386_v35 = vor.u32 %v3385_v44, %v3382_v18  ;;  %v3391_v1 = vrot.slane %v3389_v13, 5  ;;  %v7760_v44 = vld [vmem:[%s7071_s6 + $0x10] sm:$0xf] }
  0x77   : > { %6287 = vmatprep.subr.bf16.mxu1 %v6888_v32  ;;  %v3399_v9 = vrot.slane %v8803_v54, 5  ;;  %v5744_v41 = vcombine.low %v3364_v19, %v3378_v21  ;;  %6480 = vmatpush3.bf16.msra.mxu0 %v6889_v51  ;;  %v1041_v31 = vsel %vm7140_vm6, %v1036_v59, %v1040_v48  ;;  %v8804_v2 = vor.u32 %v7600_v52, %v7598_v20  ;;  %v6893_v59 = vld [vmem:[%s8786_s1 + $0x138] sm:$0xff]  }
  0x78   : > { %v3387_v17 = vrot.slane %v3386_v35, 4  ;;  %v5408_v14 = vcombine.low %v1027_v3, %v1041_v31  ;;  %v3405_v29 = vrot.slane %v3403_v4, 5  ;;  %v1052_v18 = vshll.u32 %v5375_v56, 16  ;;  %6481 = vmatprep.subr.bf16.mxu0 %v6891_v7  ;;  %v6892_v19 = vld [vmem:[%s8786_s1 + $0x158] sm:$0xff]   ;;  %v6896_v35 = vld [vmem:[%s8786_s1 + $0xc0] sm:$0xff]  }
  0x79   : > { %v3400_v57 = vor.u32 %v3399_v9, %v3396_v37  ;;  %v1050_v24 = vrot.slane %v8804_v2, 4  ;;  %6473 = vmatprep.mubr.msk.bf16.mxu0 %vm429_vm3, %v5744_v41  ;;  %v8805_v51 = vor.u32 %v7612_v58, %v7610_v23  ;;  %v5754_v23 = vrot.slane %v7438_v16, 9  ;;  %v7791_v54 = vld [vmem:[%s7071_s6 + $0x18] sm:$0xf]  ;;  %v7794_v9 = vld [vmem:[%s7071_s6 + $0x20] sm:$0xf] }
  0x7a   : > { %6288 = vmatpush3.bf16.msra.mxu1 %v6888_v32  ;;  %v3392_v20 = vsel %vm7140_vm6, %v3387_v17, %v3391_v1  ;;  %v1066_v32 = vshll.u32 %v5377_v55, 16  ;;  %6281 = vmatprep.mubr.msk.bf16.mxu1 %vm429_vm3, %v5408_v14  ;;  %v1054_v58 = vrot.slane %v1052_v18, 5  ;;  %v3547_v47 = vrot.slane %v7603_v50, 5  ;;  %v7821_v18 = vld [vmem:[%s7071_s6 + $0x30] sm:$0xf] }
  0x7b   : > { %v1064_v36 = vrot.slane %v8805_v51, 4  ;;  %6289 = vmatprep.subr.bf16.mxu1 %v6890_v22  ;;  %v3401_v52 = vrot.slane %v3400_v57, 4  ;;  %v5755_v13 = vrot.slane %v7441_v45, 9  ;;  %v3551_v34 = vrot.slane %v7615_v43, 5  ;;  %6482 = vmatpush3.bf16.msra.mxu0 %v6891_v7  ;;  %v7785_v7 = vld [vmem:[%s8786_s1 + $0x180] sm:$0xff]  }
  0x7c   : > { %v1068_v56 = vrot.slane %v1066_v32, 5  ;;  %v5442_v21 = vcombine.low %v7750_v60, %v7760_v44  ;;  %v1359_v16 = vshrl.u32 %v7750_v60, 16  ;;  %v1055_v50 = vsel %vm7140_vm6, %v1050_v24, %v1054_v58  ;;  %6483 = vmatprep.subr.bf16.mxu0 %v6893_v59 }
  0x7d   : > { %v3406_v37 = vsel %vm7140_vm6, %v3401_v52, %v3405_v29  ;;  %v3548_v45 = vsel %vm7085_vm4, %v5754_v23, %v3547_v47  ;;  %v1362_v43 = vshll.u32 %v7750_v60, 16  ;;  %v3552_v55 = vsel %vm7085_vm4, %v5755_v13, %v3551_v34  ;;  %v7811_v29 = vld [vmem:[%s7071_s6 + $0x28] sm:$0xf] }
  0x7e   : > { %v5745_v48 = vcombine.low %v3392_v20, %v3406_v37  ;;  %6290 = vmatpush3.bf16.msra.mxu1 %v6890_v22  ;;  %v1069_v22 = vsel %vm7140_vm6, %v1064_v36, %v1068_v56  ;;  %v1373_v41 = vshrl.u32 %v7760_v44, 16  ;;  %v1376_v3 = vshll.u32 %v7760_v44, 16  ;;  %v6899_v47 = vld [vmem:[%s8786_s1 + $0xc8] sm:$0xff]   ;;  %v7848_v56 = vld [vmem:[%s7071_s6 + $0x38] sm:$0xf] }
  0x7f   : > { %6291 = vmatprep.subr.bf16.mxu1 %v6892_v19  ;;  %v5409_v1 = vcombine.low %v1055_v50, %v1069_v22  ;;  %v5770_v4 = vcombine.low %v3548_v45, %v3552_v55  ;;  %v5756_v31 = vrot.slane %v7479_v26, 9  ;;  %v3555_v17 = vrot.slane %v7636_v61, 5  ;;  %6484 = vmatpush3.bf16.msra.mxu0 %v6893_v59  ;;  %v7855_v45 = vld [vmem:[%s7071_s6 + $0x40] sm:$0xf] }
  0x80   : > { %6474 = vmatmul.mubr.msk.bf16.gmra.mrb[4].mxu0 %vm429_vm3, %v5745_v48  ;;  %v5757_v57 = vrot.slane %v7482_v11, 9  ;;  %v3559_v2 = vrot.slane %v7648_v53, 5  ;;  %v5443_v24 = vcombine.low %v7791_v54, %v7794_v9  ;;  %v1387_v14 = vshrl.u32 %v7791_v54, 16  ;;  %6493 = vmatprep.subr.bf16.mxu0 %v6896_v35 }
  0x81   : > { %6282 = vmatmul.mubr.msk.bf16.gmra.mrb[4].mxu1 %vm429_vm3, %v5409_v1  ;;  %6485 = vmatprep.mubr.msk.bf16.mxu0 %vm429_vm3, %v5770_v4  ;;  %v3556_v26 = vsel %vm7085_vm4, %v5756_v31, %v3555_v17  ;;  %v1390_v61 = vshll.u32 %v7791_v54, 16  ;;  %v1401_v11 = vshrl.u32 %v7794_v9, 16  ;;  %v1404_v53 = vshll.u32 %v7794_v9, 16  ;;  %v5782_v4 = vld [vmem:[%s7071_s6 + $0xf0] sm:$0xf] }
  0x82   : > { %6292 = vmatpush3.bf16.msra.mxu1 %v6892_v19  ;;  %6293 = vmatprep.mubr.msk.bf16.mxu1 %vm429_vm3, %v5442_v21  ;;  %v3560_v51 = vsel %vm7085_vm4, %v5757_v57, %v3559_v2  ;;  %v5758_v36 = vrot.slane %v7524_v5, 9  ;;  %v3563_v59 = vrot.slane %v7674_v62, 5  ;;  %v5759_v20 = vrot.slane %v7539_v28, 9  ;;  %v6898_v21 = vld [vmem:[%s8786_s1 + $0x188] sm:$0xff]   ;;  %v5784_v57 = vld [vmem:[%s7071_s6 + $0xf8] sm:$0xf] }
  0x83   : > { %6301 = vmatprep.subr.bf16.mxu1 %v7785_v7  ;;  %v5771_v52 = vcombine.low %v3556_v26, %v3560_v51  ;;  %v3567_v32 = vrot.slane %v7681_v46, 5  ;;  %v5444_v19 = vcombine.low %v7811_v29, %v7821_v18  ;;  %v1415_v23 = vshrl.u32 %v7811_v29, 16  ;;  %v7876_v51 = vld [vmem:[%s7071_s6 + $0xc] sm:$0x1] }
  0x84   : > { %v3564_v5 = vsel %vm7085_vm4, %v5758_v36, %v3563_v59  ;;  %v1418_v62 = vshll.u32 %v7811_v29, 16  ;;  %v1429_v28 = vshrl.u32 %v7821_v18, 16  ;;  %v1432_v58 = vshll.u32 %v7821_v18, 16 }
  0x85   : > { %v3568_v46 = vsel %vm7085_vm4, %v5759_v20, %v3567_v32  ;;  %v5760_v13 = vrot.slane %v7560_v15, 9  ;;  %v3571_v34 = vrot.slane %v7706_v27, 5  ;;  %v5761_v37 = vrot.slane %v7572_v30, 9  ;;  %v6902_v27 = vld [vmem:[%s8786_s1 + $0xd0] sm:$0xff]  }
  0x86   : > { %v5772_v48 = vcombine.low %v3564_v5, %v3568_v46  ;;  %v3575_v50 = vrot.slane %v7709_v6, 5  ;;  %v1443_v22 = vshrl.u32 %v7848_v56, 16  ;;  %v1446_v15 = vshll.u32 %v7848_v56, 16  ;;  %v7884_v20 = vld [vmem:[%s7071_s6 + $0x14] sm:$0x1] }
  0x87   : > { %v3572_v30 = vsel %vm7085_vm4, %v5760_v13, %v3571_v34  ;;  %v5445_v17 = vcombine.low %v7848_v56, %v7855_v45  ;;  %v3865_v2 = vshrl.u32 %v5782_v4, 16  ;;  %v3868_v26 = vshll.u32 %v5782_v4, 16 }
  0x88   : > { %6486 = vmatmul.mubr.msk.bf16.vlgmr.msra.gmra.mrb[0].mxu0 %vm429_vm3, %v5771_v52  ;;  %v3576_v1 = vsel %vm7085_vm4, %v5761_v37, %v3575_v50  ;;  %v5806_v36 = vcombine.low %v5782_v4, %v5784_v57  ;;  %v3882_v59 = vshll.u32 %v5784_v57, 16  ;;  %v1361_v52 = vrot.slane %v1359_v16, 4 }
  0x89   : > { %6494 = vmatpush3.bf16.msra.mxu0 %v6896_v35  ;;  %6489 = vmatprep.mubr.msk.bf16.mxu0 %vm429_vm3, %v5772_v48  ;;  %v5773_v31 = vcombine.low %v3572_v30, %v3576_v1  ;;  %v6901_v35 = vld [vmem:[%s8786_s1 + $0x190] sm:$0xff]   ;;  %v7891_v32 = vrot.slane %v3865_v2, 4  ;;  %v1364_v5 = vrot.slane %v1362_v43, 5  ;;  %v1368_v46 = vshll.u32 %v7876_v51, 16  ;;  %v6904_v48 = vld [vmem:[%s8786_s1 + $0x198] sm:$0xff]  }
  0x8a   : > { %6294 = vmatmul.mubr.msk.bf16.vlgmr.msra.gmra.mrb[0].mxu1 %vm429_vm3, %v5443_v24  ;;  %6495 = vmatprep.subr.bf16.mxu0 %v6899_v47  ;;  %v3879_v24 = vshrl.u32 %v5784_v57, 16  ;;  %v7900_v16 = vrot.slane %v3882_v59, 5  ;;  %v1375_v34 = vrot.slane %v1373_v41, 4  ;;  %v1378_v37 = vrot.slane %v1376_v3, 5  ;;  %v7911_v30 = vld [vmem:[%s7071_s6 + $0x100] sm:$0xf] }
  0x8b   : > { %6302 = vmatpush3.bf16.msra.mxu1 %v7785_v7  ;;  %6297 = vmatprep.mubr.msk.bf16.mxu1 %vm429_vm3, %v5444_v19  ;;  %v6905_v7 = vld [vmem:[%s8786_s1 + $0xd8] sm:$0xff]   ;;  %v7893_v19 = vrot.slane %v3868_v26, 5  ;;  %v1365_v50 = vor.u32 %v1364_v5, %v1361_v52  ;;  %v1370_v43 = vrot.slane %v1368_v46, 5  ;;  %v5788_v1 = vld [vmem:[%s7071_s6 + $0x108] sm:$0xf]  ;;  %v3893_v57 = vshrl.u32 %v7911_v30, 16 }
  0x8c   : > { %6303 = vmatprep.subr.bf16.mxu1 %v6898_v21  ;;  %v7898_v13 = vrot.slane %v3879_v24, 4  ;;  %v1379_v41 = vor.u32 %v1378_v37, %v1375_v34  ;;  %v5807_v3 = vcombine.low %v7911_v30, %v5788_v1  ;;  %v3896_v2 = vshll.u32 %v7911_v30, 16  ;;  %v7921_v5 = vld [vmem:[%s7071_s6 + $0x1c] sm:$0x1]  ;;  %v7929_v37 = vld [vmem:[%s7071_s6 + $0x24] sm:$0x1] }
  0x8d   : > { %6496 = vmatpush3.bf16.msra.mxu0 %v6899_v47  ;;  %v1382_v47 = vshll.u32 %v7884_v20, 16  ;;  %v1366_v26 = vrot.slane %v1365_v50, 4  ;;  %v3907_v59 = vshrl.u32 %v5788_v1, 16  ;;  %v3910_v52 = vshll.u32 %v5788_v1, 16 }
  0x8e   : > { %6497 = vmatprep.subr.bf16.mxu0 %v6902_v27  ;;  %v7924_v46 = vrot.slane %v3893_v57, 4  ;;  %v7926_v34 = vrot.slane %v3896_v2, 5  ;;  %v1389_v30 = vrot.slane %v1387_v14, 4  ;;  %v1403_v1 = vrot.slane %v1401_v11, 4 }
  0x8f   : > { %6304 = vmatpush3.bf16.msra.mxu1 %v6898_v21  ;;  %v1384_v24 = vrot.slane %v1382_v47, 5  ;;  %v1380_v21 = vrot.slane %v1379_v41, 4  ;;  %v7936_v50 = vrot.slane %v3907_v59, 4  ;;  %v1392_v47 = vrot.slane %v1390_v61, 5  ;;  %v5790_v59 = vld [vmem:[%s7071_s6 + $0x110] sm:$0xf] }
  0x90   : > { %6305 = vmatprep.subr.bf16.mxu1 %v6901_v35  ;;  %6490 = vmatmul.mubr.msk.bf16.gmra.mrb[4].mxu0 %vm429_vm3, %v5773_v31  ;;  %v1371_v31 = vsel %vm7140_vm6, %v1366_v26, %v1370_v43  ;;  %v1396_v43 = vshll.u32 %v7921_v5, 16  ;;  %v1406_v41 = vrot.slane %v1404_v53, 5  ;;  %v1417_v2 = vrot.slane %v1415_v23, 4  ;;  %v6911_v23 = vld [vmem:[%s8786_s1 + $0x108] sm:$0xff]  }
  0x91   : > { %6498 = vmatpush3.bf16.msra.mxu0 %v6902_v27  ;;  %6501 = vmatprep.mubr.msk.bf16.mxu0 %vm429_vm3, %v5806_v36  ;;  %v7938_v27 = vrot.slane %v3910_v52, 5  ;;  %v6909_v36 = vld [vmem:[%s8786_s1 + $0x100] sm:$0xff]   ;;  %v1385_v14 = vsel %vm7140_vm6, %v1380_v21, %v1384_v24  ;;  %v1393_v61 = vor.u32 %v1392_v47, %v1389_v30  ;;  %v5792_v52 = vld [vmem:[%s7071_s6 + $0x118] sm:$0xf]  ;;  %v1420_v11 = vrot.slane %v1418_v62, 5 }
  0x92   : > { %6298 = vmatmul.mubr.msk.bf16.gmra.mrb[4].mxu1 %vm429_vm3, %v5445_v17  ;;  %6499 = vmatprep.subr.bf16.mxu0 %v6905_v7  ;;  %v6907_v17 = vld [vmem:[%s8786_s1 + $0x1c0] sm:$0xff]   ;;  %v5462_v57 = vcombine.low %v1371_v31, %v1385_v14  ;;  %v1398_v26 = vrot.slane %v1396_v43, 5  ;;  %v1407_v24 = vor.u32 %v1406_v41, %v1403_v1  ;;  %v3921_v31 = vshrl.u32 %v5790_v59, 16  ;;  %v7969_v47 = vld [vmem:[%s7071_s6 + $0x2c] sm:$0x1] }
  0x93   : > { %6306 = vmatpush3.bf16.msra.mxu1 %v6901_v35  ;;  %v1410_v35 = vshll.u32 %v7929_v37, 16  ;;  %v1394_v21 = vrot.slane %v1393_v61, 4  ;;  %v3924_v43 = vshll.u32 %v5790_v59, 16  ;;  %v3935_v62 = vshrl.u32 %v5792_v52, 16  ;;  %v7972_v41 = vld [vmem:[%s7071_s6 + $0x34] sm:$0x1] }
  0x94   : > { %6307 = vmatprep.subr.bf16.mxu1 %v6904_v48  ;;  %6309 = vmatprep.mubr.msk.bf16.mxu1 %vm429_vm3, %v5462_v57  ;;  %v1408_v14 = vrot.slane %v1407_v24, 4  ;;  %v3938_v1 = vshll.u32 %v5792_v52, 16  ;;  %v7977_v61 = vrot.slane %v3921_v31, 4  ;;  %v1424_v53 = vshll.u32 %v7969_v47, 16  ;;  %v6910_v24 = vld [vmem:[%s8786_s1 + $0x1c8] sm:$0xff]   ;;  %v6915_v31 = vld [vmem:[%s8786_s1 + $0x110] sm:$0xff]  }
  0x95   : > { %6500 = vmatpush3.bf16.msra.mxu0 %v6905_v7  ;;  %v1412_v30 = vrot.slane %v1410_v35, 5  ;;  %v5808_v7 = vcombine.low %v5790_v59, %v5792_v52  ;;  %v1399_v57 = vsel %vm7140_vm6, %v1394_v21, %v1398_v26  ;;  %v1421_v35 = vor.u32 %v1420_v11, %v1417_v2  ;;  %v5794_v52 = vld [vmem:[%s7071_s6 + $0x120] sm:$0xf] }
  0x96   : > { %6509 = vmatprep.subr.bf16.mxu0 %v6909_v36  ;;  %v7988_v59 = vrot.slane %v3935_v62, 4  ;;  %v7990_v26 = vrot.slane %v3938_v1, 5  ;;  %v1426_v21 = vrot.slane %v1424_v53, 5  ;;  %v3949_v62 = vshrl.u32 %v5794_v52, 16 }
  0x97   : > { %6308 = vmatpush3.bf16.msra.mxu1 %v6904_v48  ;;  %v1413_v48 = vsel %vm7140_vm6, %v1408_v14, %v1412_v30  ;;  %v1422_v11 = vrot.slane %v1421_v35, 4  ;;  %v5796_v30 = vld [vmem:[%s7071_s6 + $0x128] sm:$0xf]  ;;  %v1438_v14 = vshll.u32 %v7972_v41, 16  ;;  %v3952_v1 = vshll.u32 %v5794_v52, 16 }
  0x98   : > { %6317 = vmatprep.subr.bf16.mxu1 %v6907_v17  ;;  %6502 = vmatmul.mubr.msk.bf16.vlgmr.msra.gmra.mrb[0].mxu0 %vm429_vm3, %v5807_v3  ;;  %v7986_v3 = vrot.slane %v3924_v43, 5  ;;  %v5463_v2 = vcombine.low %v1399_v57, %v1413_v48  ;;  %v5809_v43 = vcombine.low %v5794_v52, %v5796_v30  ;;  %v3963_v57 = vshrl.u32 %v5796_v30, 16 }
  0x99   : > { %6510 = vmatpush3.bf16.msra.mxu0 %v6909_v36  ;;  %6505 = vmatprep.mubr.msk.bf16.mxu0 %vm429_vm3, %v5808_v7  ;;  %v1431_v36 = vrot.slane %v1429_v28, 4  ;;  %v1434_v7 = vrot.slane %v1432_v58, 5  ;;  %v1427_v53 = vsel %vm7140_vm6, %v1422_v11, %v1426_v21  ;;  %v6913_v28 = vld [vmem:[%s8786_s1 + $0x1d0] sm:$0xff]   ;;  %v3966_v35 = vshll.u32 %v5796_v30, 16  ;;  %v6917_v58 = vld [vmem:[%s8786_s1 + $0x118] sm:$0xff]  }
  0x9a   : > { %6511 = vmatprep.subr.bf16.mxu0 %v6911_v23  ;;  %6310 = vmatmul.mubr.msk.bf16.vlgmr.msra.gmra.mrb[0].mxu1 %vm429_vm3, %v5463_v2  ;;  %v1440_v4 = vrot.slane %v1438_v14, 5  ;;  %v8011_v6 = vrot.slane %v3949_v62, 4  ;;  %v8014_v2 = vld [vmem:[%s7071_s6 + $0x3c] sm:$0x1]  ;;  %v8017_v11 = vld [vmem:[%s7071_s6 + $0x44] sm:$0x1]  ;;  %v3899_v21 = vor.u32 %v7926_v34, %v7924_v46 }
  0x9b   : > { %6318 = vmatpush3.bf16.msra.mxu1 %v6907_v17  ;;  %v1435_v48 = vor.u32 %v1434_v7, %v1431_v36  ;;  %v8021_v52 = vrot.slane %v3952_v1, 5  ;;  %v8023_v30 = vrot.slane %v3963_v57, 4  ;;  %v8025_v55 = vrot.slane %v3966_v35, 5  ;;  %v8046_v57 = vld [vmem:[%s8786_s1 + $0x1e0] sm:$0xff]  }
  0x9c   : > { %6319 = vmatprep.subr.bf16.mxu1 %v6910_v24  ;;  %v1445_v17 = vrot.slane %v1443_v22, 4  ;;  %v1448_v36 = vrot.slane %v1446_v15, 5  ;;  %v1452_v7 = vshll.u32 %v8014_v2, 16  ;;  %v8806_v46 = vshrl.u32 %v7855_v45, 16  ;;  %v6916_v22 = vld [vmem:[%s8786_s1 + $0x1d8] sm:$0xff]  }
  0x9d   : > { %6512 = vmatpush3.bf16.msra.mxu0 %v6911_v23  ;;  %v1436_v23 = vrot.slane %v1435_v48, 4  ;;  %v8807_v14 = vshll.u32 %v7855_v45, 16  ;;  %v1466_v1 = vshll.u32 %v8017_v11, 16  ;;  %v3913_v15 = vor.u32 %v7938_v27, %v7936_v50 }
  0x9e   : > { %6513 = vmatprep.subr.bf16.mxu0 %v6915_v31  ;;  %v1459_v34 = vrot.slane %v8806_v46, 4  ;;  %v1449_v48 = vor.u32 %v1448_v36, %v1445_v17  ;;  %v1454_v46 = vrot.slane %v1452_v7, 5  ;;  %v8808_v50 = vor.u32 %v7893_v19, %v7891_v32  ;;  %v5789_v7 = vld [vmem:[%s7071_s6 + $0x10c] sm:$0x1] }
  0x9f   : > { %v1462_v62 = vrot.slane %v8807_v14, 5  ;;  %6320 = vmatpush3.bf16.msra.mxu1 %v6910_v24  ;;  %v1441_v35 = vsel %vm7140_vm6, %v1436_v23, %v1440_v4  ;;  %v5783_v14 = vld [vmem:[%s7071_s6 + $0xf4] sm:$0x1]  ;;  %v1468_v33 = vrot.slane %v1466_v1, 5  ;;  %v8809_v4 = vor.u32 %v7900_v16, %v7898_v13  ;;  %v5787_v23 = vld [vmem:[%s7071_s6 + $0x104] sm:$0x1] }
  0xa0   : > { %6506 = vmatmul.mubr.msk.bf16.gmra.mrb[4].mxu0 %vm429_vm3, %v5809_v43  ;;  %v3927_v43 = vor.u32 %v7986_v3, %v7977_v61  ;;  %v3872_v27 = vrot.slane %v8808_v50, 4  ;;  %v5464_v42 = vcombine.low %v1427_v53, %v1441_v35  ;;  %6321 = vmatprep.subr.bf16.mxu1 %v6913_v28  ;;  %v3874_v61 = vshll.u32 %v5783_v14, 16 }
  0xa1   : > { %6514 = vmatpush3.bf16.msra.mxu0 %v6915_v31  ;;  %v1463_v39 = vor.u32 %v1462_v62, %v1459_v34  ;;  %v1450_v24 = vrot.slane %v1449_v48, 4  ;;  %v3886_v3 = vrot.slane %v8809_v4, 4  ;;  %v3888_v17 = vshll.u32 %v5785_v40, 16  ;;  %v5791_v48 = vld [vmem:[%s7071_s6 + $0x114] sm:$0x1] }
  0xa2   : > { %6515 = vmatprep.subr.bf16.mxu0 %v6917_v58  ;;  %v5474_v31 = vrot.slane %v7750_v60, 9  ;;  %6313 = vmatprep.mubr.msk.bf16.mxu1 %vm429_vm3, %v5464_v42  ;;  %v3876_v19 = vrot.slane %v3874_v61, 5  ;;  %v1610_v53 = vrot.slane %v7876_v51, 5  ;;  %v5475_v36 = vrot.slane %v7760_v44, 9  ;;  %v5793_v61 = vld [vmem:[%s7071_s6 + $0x11c] sm:$0x1] }
  0xa3   : > { %v1464_v32 = vrot.slane %v1463_v39, 4  ;;  %v1455_v34 = vsel %vm7140_vm6, %v1450_v24, %v1454_v46  ;;  %6322 = vmatpush3.bf16.msra.mxu1 %v6913_v28  ;;  %v3890_v13 = vrot.slane %v3888_v17, 5  ;;  %v1614_v40 = vrot.slane %v7884_v20, 5 }
  0xa4   : > { %v3900_v16 = vrot.slane %v3899_v21, 4  ;;  %6323 = vmatprep.subr.bf16.mxu1 %v6916_v22  ;;  %v3877_v39 = vsel %vm7140_vm6, %v3872_v27, %v3876_v19  ;;  %v1611_v60 = vsel %vm7085_vm4, %v5474_v31, %v1610_v53  ;;  %v3902_v44 = vshll.u32 %v5787_v23, 16  ;;  %v6921_v53 = vld [vmem:[%s8786_s1 + $0x1e8] sm:$0xff]  }
  0xa5   : > { %6516 = vmatpush3.bf16.msra.mxu0 %v6917_v58  ;;  %v1469_v42 = vsel %vm7140_vm6, %v1464_v32, %v1468_v33  ;;  %v3891_v20 = vsel %vm7140_vm6, %v3886_v3, %v3890_v13  ;;  %v1615_v28 = vsel %vm7085_vm4, %v5475_v36, %v1614_v40  ;;  %v6918_v33 = vld [vmem:[%s8786_s1 + $0x160] sm:$0xff]   ;;  %v3914_v58 = vrot.slane %v3913_v15, 4  ;;  %v5797_v32 = vld [vmem:[%s7071_s6 + $0x12c] sm:$0x1] }
  0xa6   : > { %6525 = vmatprep.subr.bf16.mxu0 %v8046_v57  ;;  %v5465_v51 = vcombine.low %v1455_v34, %v1469_v42  ;;  %v5826_v21 = vcombine.low %v3877_v39, %v3891_v20  ;;  %v5490_v62 = vcombine.low %v1611_v60, %v1615_v28  ;;  %v3904_v1 = vrot.slane %v3902_v44, 5  ;;  %v6920_v40 = vld [vmem:[%s8786_s1 + $0x168] sm:$0xff]   ;;  %v8132_v44 = vld [vmem:[%s7071_s6 + $0xb0] sm:$0xf] }
  0xa7   : > { %v3916_v35 = vshll.u32 %v5789_v7, 16  ;;  %v5476_v46 = vrot.slane %v7791_v54, 9  ;;  %v1618_v14 = vrot.slane %v7921_v5, 5  ;;  %v5477_v50 = vrot.slane %v7794_v9, 9  ;;  %6324 = vmatpush3.bf16.msra.mxu1 %v6916_v22  ;;  %v5795_v22 = vld [vmem:[%s7071_s6 + $0x124] sm:$0x1] }
  0xa8   : > { %6314 = vmatmul.mubr.msk.bf16.gmra.mrb[4].mxu1 %vm429_vm3, %v5465_v51  ;;  %v1622_v27 = vrot.slane %v7929_v37, 5  ;;  %6517 = vmatprep.mubr.msk.bf16.mxu0 %vm429_vm3, %v5826_v21  ;;  %v3905_v15 = vsel %vm7140_vm6, %v3900_v16, %v3904_v1  ;;  %v3928_v4 = vrot.slane %v3927_v43, 4  ;;  %v3930_v3 = vshll.u32 %v5791_v48, 16  ;;  %v8129_v60 = vld [vmem:[%s7071_s6 + $0xa8] sm:$0xf]  ;;  %v6923_v20 = vld [vmem:[%s8786_s1 + $0x1f0] sm:$0xff]  }
  0xa9   : > { %v3918_v24 = vrot.slane %v3916_v35, 5  ;;  %6325 = vmatprep.mubr.msk.bf16.mxu1 %vm429_vm3, %v5490_v62  ;;  %6333 = vmatprep.subr.bf16.mxu1 %v6918_v33  ;;  %v1619_v54 = vsel %vm7085_vm4, %v5476_v46, %v1618_v14  ;;  %v3941_v5 = vor.u32 %v7990_v26, %v7988_v59  ;;  %v3944_v37 = vshll.u32 %v5793_v61, 16  ;;  %v5504_v48 = vld [vmem:[%s7071_s6 + $0x60] sm:$0xf] }
  0xaa   : > { %v1623_v9 = vsel %vm7085_vm4, %v5477_v50, %v1622_v27  ;;  %v3932_v43 = vrot.slane %v3930_v3, 5  ;;  %v5478_v23 = vrot.slane %v7811_v29, 9  ;;  %v1626_v34 = vrot.slane %v7969_v47, 5  ;;  %v6925_v50 = vld [vmem:[%s8786_s1 + $0x1f8] sm:$0xff]  }
  0xab   : > { %v3919_v17 = vsel %vm7140_vm6, %v3914_v58, %v3918_v24  ;;  %v5491_v31 = vcombine.low %v1619_v54, %v1623_v9  ;;  %v3942_v36 = vrot.slane %v3941_v5, 4  ;;  %v3946_v7 = vrot.slane %v3944_v37, 5  ;;  %v5502_v58 = vld [vmem:[%s7071_s6 + $0x58] sm:$0xf]  ;;  %v8172_v37 = vld [vmem:[%s7071_s6 + $0xc0] sm:$0xf] }
  0xac   : > { %v5827_v19 = vcombine.low %v3905_v15, %v3919_v17  ;;  %v3933_v59 = vsel %vm7140_vm6, %v3928_v4, %v3932_v43  ;;  %v5479_v26 = vrot.slane %v7821_v18, 9  ;;  %v1630_v13 = vrot.slane %v7972_v41, 5  ;;  %v8166_v24 = vld [vmem:[%s7071_s6 + $0xb8] sm:$0xf] }
  0xad   : > { %v3955_v29 = vor.u32 %v8021_v52, %v8011_v6  ;;  %v3947_v47 = vsel %vm7140_vm6, %v3942_v36, %v3946_v7  ;;  %v1627_v16 = vsel %vm7085_vm4, %v5478_v23, %v1626_v34  ;;  %v3958_v42 = vshll.u32 %v5795_v22, 16  ;;  %v6924_v4 = vld [vmem:[%s8786_s1 + $0x178] sm:$0xff]   ;;  %v6930_v23 = vld [vmem:[%s8786_s1 + $0x220] sm:$0xff]   ;;  %v5508_v36 = vld [vmem:[%s7071_s6 + $0x70] sm:$0xf] }
  0xae   : > { %6518 = vmatmul.mubr.msk.bf16.vlgmr.msra.gmra.mrb[0].mxu0 %vm429_vm3, %v5827_v19  ;;  %v3969_v18 = vor.u32 %v8025_v55, %v8023_v30  ;;  %v5828_v6 = vcombine.low %v3933_v59, %v3947_v47  ;;  %v1631_v41 = vsel %vm7085_vm4, %v5479_v26, %v1630_v13  ;;  %v3972_v39 = vshll.u32 %v5797_v32, 16  ;;  %v6922_v55 = vld [vmem:[%s8786_s1 + $0x170] sm:$0xff]   ;;  %v8182_v32 = vld [vmem:[%s7071_s6 + $0x68] sm:$0xf]  ;;  %v6928_v59 = vld [vmem:[%s8786_s1 + $0x1a0] sm:$0xff]  }
  0xaf   : > { %6526 = vmatpush3.bf16.msra.mxu0 %v8046_v57  ;;  %v3956_v52 = vrot.slane %v3955_v29, 4  ;;  %v5492_v51 = vcombine.low %v1627_v16, %v1631_v41  ;;  %v3960_v30 = vrot.slane %v3958_v42, 5  ;;  %v5480_v28 = vrot.slane %v7848_v56, 9  ;;  %v8210_v41 = vld [vmem:[%s7071_s6 + $0xd0] sm:$0xf] }
  0xb0   : > { %6326 = vmatmul.mubr.msk.bf16.vlgmr.msra.gmra.mrb[0].mxu1 %vm429_vm3, %v5491_v31  ;;  %6527 = vmatprep.subr.bf16.mxu0 %v6921_v53  ;;  %v3970_v57 = vrot.slane %v3969_v18, 4  ;;  %v3974_v21 = vrot.slane %v3972_v39, 5  ;;  %v1634_v62 = vrot.slane %v8014_v2, 5  ;;  %v5481_v1 = vrot.slane %v7855_v45, 9 }
  0xb1   : > { %6334 = vmatpush3.bf16.msra.mxu1 %v6918_v33  ;;  %6521 = vmatprep.mubr.msk.bf16.mxu0 %vm429_vm3, %v5828_v6  ;;  %v1638_v35 = vrot.slane %v8017_v11, 5  ;;  %v3961_v46 = vsel %vm7140_vm6, %v3956_v52, %v3960_v30  ;;  %v5862_v56 = vcombine.low %v8129_v60, %v8132_v44  ;;  %v4264_v33 = vshrl.u32 %v8129_v60, 16  ;;  %v8207_v6 = vld [vmem:[%s7071_s6 + $0xc8] sm:$0xf] }
  0xb2   : > { %6335 = vmatprep.subr.bf16.mxu1 %v6920_v40  ;;  %6329 = vmatprep.mubr.msk.bf16.mxu1 %vm429_vm3, %v5492_v51  ;;  %v4267_v14 = vshll.u32 %v8129_v60, 16  ;;  %v3975_v45 = vsel %vm7140_vm6, %v3970_v57, %v3974_v21  ;;  %v1635_v2 = vsel %vm7085_vm4, %v5480_v28, %v1634_v62  ;;  %v4278_v27 = vshrl.u32 %v8132_v44, 16  ;;  %v5510_v57 = vld [vmem:[%s7071_s6 + $0x78] sm:$0xf]  ;;  %v5512_v21 = vld [vmem:[%s7071_s6 + $0x80] sm:$0xf] }
  0xb3   : > { %6528 = vmatpush3.bf16.msra.mxu0 %v6921_v53  ;;  %v1639_v11 = vsel %vm7085_vm4, %v5481_v1, %v1638_v35  ;;  %v5829_v61 = vcombine.low %v3961_v46, %v3975_v45  ;;  %v5526_v3 = vcombine.low %v5502_v58, %v5504_v48  ;;  %v1928_v54 = vshrl.u32 %v5502_v58, 16  ;;  %v6932_v1 = vld [vmem:[%s8786_s1 + $0x1a8] sm:$0xff]  }
  0xb4   : > { %6529 = vmatprep.subr.bf16.mxu0 %v6923_v20  ;;  %v5493_v15 = vcombine.low %v1635_v2, %v1639_v11  ;;  %v1931_v9 = vshll.u32 %v5502_v58, 16  ;;  %v1942_v5 = vshrl.u32 %v5504_v48, 16  ;;  %v4281_v22 = vshll.u32 %v8132_v44, 16  ;;  %v8236_v11 = vld [vmem:[%s7071_s6 + $0xd8] sm:$0xf]  ;;  %v8346_v58 = vld [vmem:[%s8786_s1 + $0x260] sm:$0xff]  }
  0xb5   : > { %6336 = vmatpush3.bf16.msra.mxu1 %v6920_v40  ;;  %v1945_v17 = vshll.u32 %v5504_v48, 16  ;;  %v4292_v31 = vshrl.u32 %v8166_v24, 16  ;;  %v4295_v43 = vshll.u32 %v8166_v24, 16  ;;  %v8185_v19 = vrot.slane %v1928_v54, 4  ;;  %v8255_v54 = vld [vmem:[%s7071_s6 + $0x28] sm:$0xf] }
  0xb6   : > { %6337 = vmatprep.subr.bf16.mxu1 %v6922_v55  ;;  %6522 = vmatmul.mubr.msk.bf16.gmra.mrb[4].mxu0 %vm429_vm3, %v5829_v61  ;;  %v4306_v53 = vshrl.u32 %v8172_v37, 16  ;;  %v8190_v7 = vrot.slane %v1931_v9, 5  ;;  %v8192_v34 = vrot.slane %v1942_v5, 4  ;;  %v1956_v26 = vshrl.u32 %v8182_v32, 16  ;;  %v8244_v61 = vld [vmem:[%s7071_s6 + $0x10] sm:$0xf] }
  0xb7   : > { %6530 = vmatpush3.bf16.msra.mxu0 %v6923_v20  ;;  %6533 = vmatprep.mubr.msk.bf16.mxu0 %vm429_vm3, %v5862_v56  ;;  %v1959_v13 = vshll.u32 %v8182_v32, 16  ;;  %v1970_v29 = vshrl.u32 %v5508_v36, 16  ;;  %v1973_v40 = vshll.u32 %v5508_v36, 16  ;;  %v8200_v47 = vrot.slane %v1945_v17, 5  ;;  %v6941_v9 = vld [vmem:[%s8786_s1 + $0x238] sm:$0xff]  }
  0xb8   : > { %6330 = vmatmul.mubr.msk.bf16.gmra.mrb[4].mxu1 %vm429_vm3, %v5493_v15  ;;  %6531 = vmatprep.subr.bf16.mxu0 %v6925_v50  ;;  %v5863_v16 = vcombine.low %v8166_v24, %v8172_v37  ;;  %v4309_v42 = vshll.u32 %v8172_v37, 16  ;;  %v5527_v18 = vcombine.low %v8182_v32, %v5508_v36  ;;  %v8212_v52 = vrot.slane %v1956_v26, 4  ;;  %v8247_v15 = vld [vmem:[%s7071_s6 + $0x18] sm:$0xf]  ;;  %v8267_v36 = vld [vmem:[%s7071_s6 + $0xe0] sm:$0xf] }
  0xb9   : > { %6338 = vmatpush3.bf16.msra.mxu1 %v6922_v55  ;;  %6341 = vmatprep.mubr.msk.bf16.mxu1 %vm429_vm3, %v5526_v3  ;;  %v8214_v39 = vrot.slane %v1959_v13, 5  ;;  %v8216_v51 = vrot.slane %v1970_v29, 4  ;;  %v6933_v55 = vld [vmem:[%s8786_s1 + $0x228] sm:$0xff]   ;;  %v5864_v30 = vcombine.low %v8207_v6, %v8210_v41  ;;  %v8224_v20 = vrot.slane %v1973_v40, 5  ;;  %v8252_v3 = vld [vmem:[%s7071_s6 + $0x20] sm:$0xf] }
  0xba   : > { %6339 = vmatprep.subr.bf16.mxu1 %v6924_v4  ;;  %v1984_v62 = vshrl.u32 %v5510_v57, 16  ;;  %v5528_v35 = vcombine.low %v5510_v57, %v5512_v21  ;;  %v1987_v48 = vshll.u32 %v5510_v57, 16  ;;  %v1998_v46 = vshrl.u32 %v5512_v21, 16  ;;  %v6936_v13 = vld [vmem:[%s8786_s1 + $0x1b0] sm:$0xff]   ;;  %v5505_v2 = vld [vmem:[%s7071_s6 + $0x64] sm:$0x1] }
  0xbb   : > { %6532 = vmatpush3.bf16.msra.mxu0 %v6925_v50  ;;  %v2001_v56 = vshll.u32 %v5512_v21, 16  ;;  %v8241_v50 = vld [vmem:[%s8786_s1 + $0x230] sm:$0xff]   ;;  %v4266_v26 = vrot.slane %v4264_v33, 4  ;;  %v5865_v33 = vcombine.low %v8236_v11, %v8267_v36  ;;  %v1934_v57 = vor.u32 %v8190_v7, %v8185_v19 }
  0xbc   : > { %6541 = vmatprep.subr.bf16.mxu0 %v6930_v23  ;;  %v8260_v5 = vrot.slane %v1984_v62, 4  ;;  %v8262_v17 = vrot.slane %v1987_v48, 5  ;;  %v8264_v32 = vrot.slane %v1998_v46, 4  ;;  %v8288_v21 = vld [vmem:[%s7071_s6 + $0x30] sm:$0xf]  ;;  %v4269_v48 = vrot.slane %v4267_v14, 5 }
  0xbd   : > { %6340 = vmatpush3.bf16.msra.mxu1 %v6924_v4  ;;  %v8291_v62 = vld [vmem:[%s7071_s6 + $0x38] sm:$0xf]  ;;  %v1948_v4 = vor.u32 %v8200_v47, %v8192_v34  ;;  %v4280_v14 = vrot.slane %v4278_v27, 4  ;;  %v8318_v34 = vld [vmem:[%s7071_s6 + $0xac] sm:$0x1]  ;;  %v1935_v45 = vrot.slane %v1934_v57, 4 }
  0xbe   : > { %6349 = vmatprep.subr.bf16.mxu1 %v6928_v59  ;;  %6534 = vmatmul.mubr.msk.bf16.vlgmr.msra.gmra.mrb[0].mxu0 %vm429_vm3, %v5863_v16  ;;  %v8321_v47 = vld [vmem:[%s7071_s6 + $0xb4] sm:$0x1]  ;;  %v4273_v27 = vshll.u32 %v8318_v34, 16  ;;  %v8353_v57 = vld [vmem:[%s7071_s6 + $0xc4] sm:$0x1] }
  0xbf   : > { %6542 = vmatpush3.bf16.msra.mxu0 %v6930_v23  ;;  %6537 = vmatprep.mubr.msk.bf16.mxu0 %vm429_vm3, %v5864_v30  ;;  %v8272_v23 = vrot.slane %v2001_v56, 5  ;;  %v5516_v30 = vld [vmem:[%s7071_s6 + $0x90] sm:$0xf]  ;;  %v1949_v28 = vrot.slane %v1948_v4, 4  ;;  %v8364_v4 = vld [vmem:[%s8786_s1 + $0x280] sm:$0xff]  }
  0xc0   : > { %6342 = vmatmul.mubr.msk.bf16.vlgmr.msra.gmra.mrb[0].mxu1 %vm429_vm3, %v5527_v18  ;;  %6543 = vmatprep.subr.bf16.mxu0 %v6933_v55  ;;  %v5514_v18 = vld [vmem:[%s7071_s6 + $0x88] sm:$0xf]  ;;  %v2026_v56 = vshrl.u32 %v5516_v30, 16  ;;  %v2029_v7 = vshll.u32 %v5516_v30, 16 }
  0xc1   : > { %6350 = vmatpush3.bf16.msra.mxu1 %v6928_v59  ;;  %6345 = vmatprep.mubr.msk.bf16.mxu1 %vm429_vm3, %v5528_v35  ;;  %v2012_v46 = vshrl.u32 %v5514_v18, 16  ;;  %v2015_v35 = vshll.u32 %v5514_v18, 16  ;;  %v5529_v19 = vcombine.low %v5514_v18, %v5516_v30  ;;  %v4270_v30 = vor.u32 %v4269_v48, %v4266_v26 }
  0xc2   : > { %6351 = vmatprep.subr.bf16.mxu1 %v6932_v1  ;;  %v8308_v40 = vrot.slane %v2026_v56, 4  ;;  %v8315_v18 = vrot.slane %v2029_v7, 5  ;;  %v8329_v56 = vld [vmem:[%s7071_s6 + $0x48] sm:$0xf]  ;;  %v5503_v7 = vld [vmem:[%s7071_s6 + $0x5c] sm:$0x1]  ;;  %v1962_v26 = vor.u32 %v8214_v39, %v8212_v52 }
  0xc3   : > { %6544 = vmatpush3.bf16.msra.mxu0 %v6933_v55  ;;  %v8304_v59 = vrot.slane %v2012_v46, 4  ;;  %v8306_v16 = vrot.slane %v2015_v35, 5  ;;  %v6940_v55 = vld [vmem:[%s8786_s1 + $0x1b8] sm:$0xff]   ;;  %v4283_v46 = vrot.slane %v4281_v22, 5  ;;  %v8326_v35 = vld [vmem:[%s7071_s6 + $0x40] sm:$0xf]  ;;  %v1976_v22 = vor.u32 %v8224_v20, %v8216_v51 }
  0xc4   : > { %6545 = vmatprep.subr.bf16.mxu0 %v8241_v50  ;;  %8810 = vst [vmem:[#allocation6_spill] sm:$0xff] %v8329_v56  ;;  %v4271_v48 = vrot.slane %v4270_v30, 4  ;;  %v4275_v52 = vrot.slane %v4273_v27, 5  ;;  %v1951_v51 = vshll.u32 %v5505_v2, 16  ;;  %v8350_v30 = vld [vmem:[%s7071_s6 + $0xbc] sm:$0x1] }
  0xc5   : > { %6352 = vmatpush3.bf16.msra.mxu1 %v6932_v1  ;;  %v4287_v1 = vshll.u32 %v8321_v47, 16  ;;  %v4284_v29 = vor.u32 %v4283_v46, %v4280_v14  ;;  %v1990_v14 = vor.u32 %v8262_v17, %v8260_v5  ;;  %v4297_v5 = vrot.slane %v4295_v43, 5  ;;  %v8428_v46 = vld [vmem:[%s7071_s6 + $0xe4] sm:$0x1] }
  0xc6   : > { %6353 = vmatprep.subr.bf16.mxu1 %v6936_v13  ;;  %6538 = vmatmul.mubr.msk.bf16.gmra.mrb[4].mxu0 %vm429_vm3, %v5865_v33  ;;  %v1937_v33 = vshll.u32 %v5503_v7, 16  ;;  %v1953_v2 = vrot.slane %v1951_v51, 5  ;;  %v4301_v27 = vshll.u32 %v8350_v30, 16  ;;  %v5507_v7 = vld [vmem:[%s7071_s6 + $0x6c] sm:$0x1]  ;;  %v4311_v43 = vrot.slane %v4309_v42, 5 }
  0xc7   : > { %6546 = vmatpush3.bf16.msra.mxu0 %v8241_v50  ;;  %v4289_v39 = vrot.slane %v4287_v1, 5  ;;  %v4285_v20 = vrot.slane %v4284_v29, 4  ;;  %v4308_v1 = vrot.slane %v4306_v53, 4  ;;  %v1963_v51 = vrot.slane %v1962_v26, 4 }
  0xc8   : > { %6346 = vmatmul.mubr.msk.bf16.gmra.mrb[4].mxu1 %vm429_vm3, %v5529_v19  ;;  %6547 = vmatprep.subr.bf16.mxu0 %v6941_v9  ;;  %v1939_v50 = vrot.slane %v1937_v33, 5  ;;  %v4276_v19 = vsel %vm7140_vm6, %v4271_v48, %v4275_v52  ;;  %v4303_v52 = vrot.slane %v4301_v27, 5 }
  0xc9   : > { %6354 = vmatpush3.bf16.msra.mxu1 %v6936_v13  ;;  %v4294_v13 = vrot.slane %v4292_v31, 4  ;;  %v4290_v17 = vsel %vm7140_vm6, %v4285_v20, %v4289_v39  ;;  %v1954_v31 = vsel %vm7140_vm6, %v1949_v28, %v1953_v2  ;;  %v4315_v39 = vshll.u32 %v8353_v57, 16 }
  0xca   : > { %6355 = vmatprep.subr.bf16.mxu1 %v6940_v55  ;;  %v1940_v29 = vsel %vm7140_vm6, %v1935_v45, %v1939_v50  ;;  %v5882_v48 = vcombine.low %v4276_v19, %v4290_v17  ;;  %v4312_v28 = vor.u32 %v4311_v43, %v4308_v1  ;;  %v1965_v20 = vshll.u32 %v5507_v7, 16 }
  0xcb   : > { %6548 = vmatpush3.bf16.msra.mxu0 %v6941_v9  ;;  %v4298_v33 = vor.u32 %v4297_v5, %v4294_v13  ;;  %v5509_v9 = vld [vmem:[%s7071_s6 + $0x74] sm:$0x1]  ;;  %v5546_v45 = vcombine.low %v1940_v29, %v1954_v31  ;;  %v1977_v50 = vrot.slane %v1976_v22, 4  ;;  %v4317_v42 = vrot.slane %v4315_v39, 5  ;;  %v6944_v39 = vld [vmem:[%s8786_s1 + $0x288] sm:$0xff]  }
  0xcc   : > { %6557 = vmatprep.subr.bf16.mxu0 %v8346_v58  ;;  %6549 = vmatprep.mubr.msk.bf16.mxu0 %vm429_vm3, %v5882_v48  ;;  %v1979_v19 = vshll.u32 %v5509_v9, 16  ;;  %v4313_v5 = vrot.slane %v4312_v28, 4  ;;  %v1967_v17 = vrot.slane %v1965_v20, 5  ;;  %v8398_v22 = vld [vmem:[%s7071_s6 + $0xd4] sm:$0x1]  ;;  %v8811_v29 = vshrl.u32 %v8207_v6, 16 }
  0xcd   : > { %6356 = vmatpush3.bf16.msra.mxu1 %v6940_v55  ;;  %v4299_v53 = vrot.slane %v4298_v33, 4  ;;  %6357 = vmatprep.mubr.msk.bf16.mxu1 %vm429_vm3, %v5546_v45  ;;  %v8389_v55 = vld [vmem:[%s7071_s6 + $0xcc] sm:$0x1]  ;;  %v8812_v7 = vshll.u32 %v8207_v6, 16  ;;  %v8813_v33 = vshrl.u32 %v8210_v41, 16  ;;  %v4343_v20 = vshll.u32 %v8398_v22, 16 }
  0xce   : > { %6365 = vmatprep.subr.bf16.mxu1 %v8364_v4  ;;  %v4322_v27 = vrot.slane %v8811_v29, 4  ;;  %v1981_v1 = vrot.slane %v1979_v19, 5  ;;  %v4329_v31 = vshll.u32 %v8389_v55, 16  ;;  %v5511_v9 = vld [vmem:[%s7071_s6 + $0x7c] sm:$0x1]  ;;  %v4318_v45 = vsel %vm7140_vm6, %v4313_v5, %v4317_v42  ;;  %v6945_v42 = vld [vmem:[%s8786_s1 + $0x268] sm:$0xff]  }
  0xcf   : > { %v4304_v13 = vsel %vm7140_vm6, %v4299_v53, %v4303_v52  ;;  %v4325_v48 = vrot.slane %v8812_v7, 5  ;;  %v4336_v43 = vrot.slane %v8813_v33, 4  ;;  %v1968_v52 = vsel %vm7140_vm6, %v1963_v51, %v1967_v17  ;;  %v5513_v19 = vld [vmem:[%s7071_s6 + $0x84] sm:$0x1]  ;;  %v8425_v17 = vld [vmem:[%s7071_s6 + $0xdc] sm:$0x1] }
  0xd0   : > { %v8814_v53 = vshll.u32 %v8210_v41, 16  ;;  %v5883_v29 = vcombine.low %v4304_v13, %v4318_v45  ;;  %v1982_v7 = vsel %vm7140_vm6, %v1977_v50, %v1981_v1  ;;  %v4331_v51 = vrot.slane %v4329_v31, 5 }
  0xd1   : > { %v4326_v5 = vor.u32 %v4325_v48, %v4322_v27  ;;  %v5547_v33 = vcombine.low %v1968_v52, %v1982_v7  ;;  %v4345_v2 = vrot.slane %v4343_v20, 5  ;;  %v1993_v45 = vshll.u32 %v5511_v9, 16 }
  0xd2   : > { %v4339_v28 = vrot.slane %v8814_v53, 5  ;;  %v1991_v53 = vrot.slane %v1990_v14, 4  ;;  %6550 = vmatmul.mubr.msk.bf16.vlgmr.msra.gmra.mrb[0].mxu0 %vm429_vm3, %v5883_v29  ;;  %v8815_v50 = vor.u32 %v8272_v23, %v8264_v32  ;;  %v2007_v56 = vshll.u32 %v5513_v19, 16  ;;  %v6946_v14 = vld [vmem:[%s8786_s1 + $0x290] sm:$0xff]   ;;  %v5515_v23 = vld [vmem:[%s7071_s6 + $0x8c] sm:$0x1] }
  0xd3   : > { %v4327_v13 = vrot.slane %v4326_v5, 4  ;;  %6358 = vmatmul.mubr.msk.bf16.vlgmr.msra.gmra.mrb[0].mxu1 %vm429_vm3, %v5547_v33  ;;  %6558 = vmatpush3.bf16.msra.mxu0 %v8346_v58  ;;  %v8816_v48 = vshrl.u32 %v8236_v11, 16  ;;  %v4357_v32 = vshll.u32 %v8425_v17, 16  ;;  %v6947_v19 = vld [vmem:[%s8786_s1 + $0x270] sm:$0xff]   ;;  %v8819_v33 = vshll.u32 %v8267_v36, 16 }
  0xd4   : > { %v4340_v26 = vor.u32 %v4339_v28, %v4336_v43  ;;  %v2005_v1 = vrot.slane %v8815_v50, 4  ;;  %v8817_v43 = vshll.u32 %v8236_v11, 16  ;;  %6366 = vmatpush3.bf16.msra.mxu1 %v8364_v4  ;;  %6559 = vmatprep.subr.bf16.mxu0 %v6945_v42  ;;  %v2009_v52 = vrot.slane %v2007_v56, 5  ;;  %v5517_v29 = vld [vmem:[%s7071_s6 + $0x94] sm:$0x1] }
  0xd5   : > { %v4350_v31 = vrot.slane %v8816_v48, 4  ;;  %v4332_v58 = vsel %vm7140_vm6, %v4327_v13, %v4331_v51  ;;  %v8818_v28 = vshrl.u32 %v8267_v36, 16  ;;  %6367 = vmatprep.subr.bf16.mxu1 %v6944_v39  ;;  %v4359_v4 = vrot.slane %v4357_v32, 5  ;;  %v6949_v48 = vld [vmem:[%s8786_s1 + $0x278] sm:$0xff]  }
  0xd6   : > { %v4341_v27 = vrot.slane %v4340_v26, 4  ;;  %v4353_v9 = vrot.slane %v8817_v43, 5  ;;  %v1995_v26 = vrot.slane %v1993_v45, 5  ;;  %v4367_v50 = vrot.slane %v8819_v33, 5 }
  0xd7   : > { %v4364_v20 = vrot.slane %v8818_v28, 4  ;;  %v2010_v13 = vsel %vm7140_vm6, %v2005_v1, %v2009_v52  ;;  %v4371_v45 = vshll.u32 %v8428_v46, 16  ;;  %6560 = vmatpush3.bf16.msra.mxu0 %v6945_v42  ;;  %v8820_v43 = vor.u32 %v8306_v16, %v8304_v59  ;;  %v6948_v16 = vld [vmem:[%s8786_s1 + $0x298] sm:$0xff]  }
  0xd8   : > { %v4346_v7 = vsel %vm7140_vm6, %v4341_v27, %v4345_v2  ;;  %v4354_v5 = vor.u32 %v4353_v9, %v4350_v31  ;;  %v1996_v56 = vsel %vm7140_vm6, %v1991_v53, %v1995_v26  ;;  %6368 = vmatpush3.bf16.msra.mxu1 %v6944_v39  ;;  %v2021_v32 = vshll.u32 %v5515_v23, 16  ;;  %6561 = vmatprep.subr.bf16.mxu0 %v6947_v19 }
  0xd9   : > { %v5884_v51 = vcombine.low %v4332_v58, %v4346_v7  ;;  %v5548_v2 = vcombine.low %v1996_v56, %v2010_v13  ;;  %v4368_v31 = vor.u32 %v4367_v50, %v4364_v20  ;;  %v2019_v9 = vrot.slane %v8820_v43, 4  ;;  %6369 = vmatprep.subr.bf16.mxu1 %v6946_v14 }
  0xda   : > { %v4355_v27 = vrot.slane %v4354_v5, 4  ;;  %v4373_v53 = vrot.slane %v4371_v45, 5  ;;  %v8821_v1 = vor.u32 %v8315_v18, %v8308_v40  ;;  %v2035_v26 = vshll.u32 %v5517_v29, 16 }
  0xdb   : > { %6553 = vmatprep.mubr.msk.bf16.mxu0 %vm429_vm3, %v5884_v51  ;;  %6361 = vmatprep.mubr.msk.bf16.mxu1 %vm429_vm3, %v5548_v2  ;;  %v4369_v52 = vrot.slane %v4368_v31, 4  ;;  %v5894_v59 = vrot.slane %v8129_v60, 9  ;;  %v4515_v39 = vrot.slane %v8318_v34, 5  ;;  %v2023_v23 = vrot.slane %v2021_v32, 5  ;;  %v6954_v31 = vld [vmem:[%s8786_s1 + $0x2c8] sm:$0xff]  }
  0xdc   : > { %v2033_v58 = vrot.slane %v8821_v1, 4  ;;  %v4360_v42 = vsel %vm7140_vm6, %v4355_v27, %v4359_v4  ;;  %v2037_v40 = vrot.slane %v2035_v26, 5  ;;  %v5895_v18 = vrot.slane %v8132_v44, 9  ;;  %6562 = vmatpush3.bf16.msra.mxu0 %v6947_v19  ;;  %6370 = vmatpush3.bf16.msra.mxu1 %v6946_v14  ;;  %v6955_v32 = vld [vmem:[%s8786_s1 + $0x208] sm:$0xff]  }
  0xdd   : > { %v4519_v28 = vrot.slane %v8321_v47, 5  ;;  %v4374_v20 = vsel %vm7140_vm6, %v4369_v52, %v4373_v53  ;;  %v4516_v29 = vsel %vm7085_vm4, %v5894_v59, %v4515_v39  ;;  %v5896_v7 = vrot.slane %v8166_v24, 9  ;;  %6563 = vmatprep.subr.bf16.mxu0 %v6949_v48  ;;  %6371 = vmatprep.subr.bf16.mxu1 %v6948_v16  ;;  %v6951_v24 = vld [vmem:[%s8786_s1 + $0x2c0] sm:$0xff]   ;;  %v8554_v53 = vld [vmem:[%s7071_s6 + $0x108] sm:$0xf] }
  0xde   : > { %v4523_v60 = vrot.slane %v8350_v30, 5  ;;  %v5885_v5 = vcombine.low %v4360_v42, %v4374_v20  ;;  %v2024_v34 = vsel %vm7140_vm6, %v2019_v9, %v2023_v23  ;;  %v2038_v44 = vsel %vm7140_vm6, %v2033_v58, %v2037_v40 }
  0xdf   : > { %v5897_v47 = vrot.slane %v8172_v37, 9  ;;  %v5549_v4 = vcombine.low %v2024_v34, %v2038_v44  ;;  %v4520_v19 = vsel %vm7085_vm4, %v5895_v18, %v4519_v28  ;;  %v4527_v33 = vrot.slane %v8353_v57, 5  ;;  %v6952_v37 = vld [vmem:[%s8786_s1 + $0x200] sm:$0xff]  }
  0xe0   : > { %v4524_v30 = vsel %vm7085_vm4, %v5896_v7, %v4523_v60  ;;  %6554 = vmatmul.mubr.msk.bf16.gmra.mrb[4].mxu0 %vm429_vm3, %v5885_v5  ;;  %v5910_v14 = vcombine.low %v4516_v29, %v4520_v19  ;;  %v5898_v50 = vrot.slane %v8207_v6, 9  ;;  %v4531_v51 = vrot.slane %v8389_v55, 5  ;;  %6372 = vmatpush3.bf16.msra.mxu1 %v6948_v16 }
  0xe1   : > { %v5899_v56 = vrot.slane %v8210_v41, 9  ;;  %6362 = vmatmul.mubr.msk.bf16.gmra.mrb[4].mxu1 %vm429_vm3, %v5549_v4  ;;  %6564 = vmatpush3.bf16.msra.mxu0 %v6949_v48  ;;  %v4528_v57 = vsel %vm7085_vm4, %v5897_v47, %v4527_v33  ;;  %v4535_v13 = vrot.slane %v8398_v22, 5  ;;  %v5900_v45 = vrot.slane %v8236_v11, 9  ;;  %v8590_v47 = vld [vmem:[%s7071_s6 + $0x118] sm:$0xf]  ;;  %v6958_v4 = vld [vmem:[%s8786_s1 + $0x210] sm:$0xff]  }
  0xe2   : > { %v4539_v2 = vrot.slane %v8425_v17, 5  ;;  %6565 = vmatprep.mubr.msk.bf16.mxu0 %vm429_vm3, %v5910_v14  ;;  %v4532_v6 = vsel %vm7085_vm4, %v5898_v50, %v4531_v51  ;;  %v5901_v41 = vrot.slane %v8267_v36, 9  ;;  %v4543_v55 = vrot.slane %v8428_v46, 5  ;;  %6381 = vmatprep.subr.bf16.mxu1 %v6951_v24  ;;  %v8533_v36 = vld [vmem:[%s7071_s6 + $0xf8] sm:$0xf]  ;;  %v8828_v51 = vld [vmem:[#allocation4_spill] sm:$0xff] }
  0xe3   : > { %v2362_v48 = vor.u32 %v7157_v0, %v7155_v63  ;;  %v8822_v22 = vcombine.low %v8244_v61, %v8247_v15  ;;  %v4536_v11 = vsel %vm7085_vm4, %v5899_v56, %v4535_v13  ;;  %v8536_v46 = vld [vmem:[%s7071_s6 + $0x100] sm:$0xf]  ;;  %v2376_v63 = vor.u32 %v7421_v38, %v7409_v25  ;;  %6573 = vmatprep.subr.bf16.mxu0 %v6952_v37 }
  0xe4   : > { %v8530_v17 = vsel %vm7085_vm4, %v5900_v45, %v4539_v2  ;;  %v5911_v0 = vcombine.low %v4524_v30, %v4528_v57  ;;  %v5912_v61 = vcombine.low %v4532_v6, %v4536_v11  ;;  %v8542_v15 = vsel %vm7085_vm4, %v5901_v41, %v4543_v55  ;;  %v8600_v33 = vld [vmem:[%s7071_s6 + $0x120] sm:$0xf]  ;;  %v8831_v6 = vld [vmem:[#allocation5_spill] sm:$0xff] }
  0xe5   : > { %6373 = vmatprep.mubr.msk.bf16.mxu1 %vm429_vm3, %v8822_v22  ;;  %v4833_v27 = vshrl.u32 %v8533_v36, 16  ;;  %v5946_v43 = vcombine.low %v8533_v36, %v8536_v46  ;;  %v4836_v9 = vshll.u32 %v8533_v36, 16  ;;  %v4847_v25 = vshrl.u32 %v8536_v46, 16  ;;  %v8830_v13 = vld [vmem:[#allocation2_spill] sm:$0xff] }
  0xe6   : > { %v4850_v38 = vshll.u32 %v8536_v46, 16  ;;  %v5913_v1 = vcombine.low %v8530_v17, %v8542_v15  ;;  %v8823_v58 = vshrl.u32 %v7077_v8, 16  ;;  %v8824_v42 = vshll.u32 %v7077_v8, 16 }
  0xe7   : > { %v8825_v16 = vshrl.u32 %v7081_v10, 16  ;;  %v8570_v39 = vrot.slane %v4833_v27, 4  ;;  %v8572_v23 = vrot.slane %v4836_v9, 5  ;;  %v8574_v40 = vrot.slane %v4847_v25, 4 }
  0xe8   : > { %v2330_v26 = vrot.slane %v8823_v58, 4  ;;  %v2333_v52 = vrot.slane %v8824_v42, 5  ;;  %v8826_v18 = vshll.u32 %v7081_v10, 16  ;;  %6566 = vmatmul.mubr.msk.bf16.vlgmr.msra.gmra.mrb[0].mxu0 %vm429_vm3, %v5911_v0  ;;  %v8579_v20 = vrot.slane %v4850_v38, 5  ;;  %v6960_v0 = vld [vmem:[%s8786_s1 + $0x2d8] sm:$0xff]  }
  0xe9   : > { %v2344_v59 = vrot.slane %v8825_v16, 4  ;;  %v4861_v8 = vshrl.u32 %v8554_v53, 16  ;;  %v4864_v7 = vshll.u32 %v8554_v53, 16  ;;  %v8827_v60 = vcombine.low %v8252_v3, %v8255_v54  ;;  %6574 = vmatpush3.bf16.msra.mxu0 %v6952_v37  ;;  %6569 = vmatprep.mubr.msk.bf16.mxu0 %vm429_vm3, %v5912_v61  ;;  %v6961_v61 = vld [vmem:[%s8786_s1 + $0x218] sm:$0xff]   ;;  %v6978_v58 = vld [vmem:[%s7071_s6 + $0x34] sm:$0x1] }
  0xea   : > { %v2347_v28 = vrot.slane %v8826_v18, 5  ;;  %v2334_v29 = vor.u32 %v2333_v52, %v2330_v26  ;;  %v4875_v10 = vshrl.u32 %v8557_v12, 16  ;;  %v4878_v34 = vshll.u32 %v8557_v12, 16  ;;  %6575 = vmatprep.subr.bf16.mxu0 %v6955_v32  ;;  %v8650_v42 = vld [vmem:[%s7071_s6 + $0x128] sm:$0xf] }
  0xeb   : > { %6374 = vmatmul.mubr.msk.bf16.vlgmr.msra.gmra.mrb[0].mxu1 %vm429_vm3, %v8827_v60  ;;  %v2363_v44 = vrot.slane %v2362_v48, 4  ;;  %v5947_v3 = vcombine.low %v8554_v53, %v8557_v12  ;;  %v8597_v54 = vrot.slane %v4861_v8, 4  ;;  %v2377_v30 = vrot.slane %v2376_v63, 4  ;;  %v8832_v48 = vld [vmem:[#allocation3_spill] sm:$0xff] }
  0xec   : > { %v2348_v5 = vor.u32 %v2347_v28, %v2344_v59  ;;  %6382 = vmatpush3.bf16.msra.mxu1 %v6951_v24  ;;  %v2335_v19 = vrot.slane %v2334_v29, 4  ;;  %v6957_v24 = vld [vmem:[%s8786_s1 + $0x2d0] sm:$0xff]   ;;  %v8606_v37 = vrot.slane %v4864_v7, 5  ;;  %v8608_v50 = vrot.slane %v4875_v10, 4  ;;  %v8833_v29 = vld [vmem:[#allocation6_spill] sm:$0xff] }
  0xed   : > { %6383 = vmatprep.subr.bf16.mxu1 %v6954_v31  ;;  %v2368_v56 = vsel %vm7140_vm6, %v2363_v44, %v8828_v51  ;;  %v8829_v57 = vcombine.low %v8288_v21, %v8291_v62  ;;  %v8620_v2 = vrot.slane %v4878_v34, 5  ;;  %v2382_v41 = vsel %vm7140_vm6, %v2377_v30, %v8831_v6  ;;  %6576 = vmatpush3.bf16.msra.mxu0 %v6955_v32  ;;  %v8658_v28 = vld [vmem:[%s7071_s6 + $0x130] sm:$0xf] }
  0xee   : > { %v2349_v14 = vrot.slane %v2348_v5, 4  ;;  %v2340_v45 = vsel %vm7140_vm6, %v2335_v19, %v8830_v13  ;;  %v4889_v55 = vshrl.u32 %v8590_v47, 16  ;;  %v8629_v11 = vcombine.low %v2368_v56, %v2382_v41  ;;  %6577 = vmatprep.subr.bf16.mxu0 %v6958_v4 }
  0xef   : > { %6377 = vmatprep.mubr.msk.bf16.mxu1 %vm429_vm3, %v8829_v57  ;;  %v4892_v17 = vshll.u32 %v8590_v47, 16  ;;  %v4903_v63 = vshrl.u32 %v8600_v33, 16  ;;  %v5948_v27 = vcombine.low %v8590_v47, %v8600_v33  ;;  %v4906_v9 = vshll.u32 %v8600_v33, 16 }
  0xf0   : > { %v2354_v22 = vsel %vm7140_vm6, %v2349_v14, %v8832_v48  ;;  %6384 = vmatpush3.bf16.msra.mxu1 %v6954_v31  ;;  %v2384_v25 = vshrl.u32 %v8288_v21, 16  ;;  %v8643_v31 = vrot.slane %v4889_v55, 4  ;;  %v2387_v32 = vshll.u32 %v8288_v21, 16  ;;  %6570 = vmatmul.mubr.msk.bf16.gmra.mrb[4].mxu0 %vm429_vm3, %v5913_v1  ;;  %v6979_v1 = vld [vmem:[%s7071_s6 + $0x3c] sm:$0x1] }
  0xf1   : > { %v5602_v15 = vcombine.low %v2340_v45, %v2354_v22  ;;  %6385 = vmatprep.subr.bf16.mxu1 %v6957_v24  ;;  %v8645_v38 = vrot.slane %v4892_v17, 5  ;;  %v2393_v26 = vshll.u32 %v6978_v58, 16  ;;  %v8653_v52 = vrot.slane %v4903_v63, 4  ;;  %6578 = vmatpush3.bf16.msra.mxu0 %v6958_v4  ;;  %v6980_v22 = vld [vmem:[%s7071_s6 + $0x44] sm:$0x1] }
  0xf2   : > { %v2386_v16 = vrot.slane %v2384_v25, 4  ;;  %v2398_v59 = vshrl.u32 %v8291_v62, 16  ;;  %v2401_v18 = vshll.u32 %v8291_v62, 16  ;;  %v8834_v8 = vcombine.low %v8326_v35, %v8833_v29  ;;  %6579 = vmatprep.subr.bf16.mxu0 %v6961_v61  ;;  %v6964_v62 = vld [vmem:[%s8786_s1 + $0x240] sm:$0xff]   ;;  %6581 = vmatprep.mubr.msk.bf16.mxu0 %vm429_vm3, %v5946_v43  ;;  %v6965_v43 = vld [vmem:[%s8786_s1 + $0x248] sm:$0xff]  }
  0xf3   : > { %v8664_v21 = vrot.slane %v4906_v9, 5  ;;  %v2389_v7 = vrot.slane %v2387_v32, 5  ;;  %v2395_v60 = vrot.slane %v2393_v26, 5  ;;  %v2407_v5 = vshll.u32 %v6979_v1, 16  ;;  %v5925_v26 = vld [vmem:[%s7071_s6 + $0x104] sm:$0x1] }
  0xf4   : > { %6378 = vmatmul.mubr.msk.bf16.gmra.mrb[4].mxu1 %vm429_vm3, %v8834_v8  ;;  %v2400_v10 = vrot.slane %v2398_v59, 4  ;;  %v2403_v34 = vrot.slane %v2401_v18, 5  ;;  %v4917_v44 = vshrl.u32 %v8650_v42, 16  ;;  %v4920_v19 = vshll.u32 %v8650_v42, 16  ;;  %v6981_v18 = vld [vmem:[%s7071_s6 + $0x4c] sm:$0x1] }
  0xf5   : > { %6386 = vmatpush3.bf16.msra.mxu1 %v6957_v24  ;;  %v2390_v4 = vor.u32 %v2389_v7, %v2386_v16  ;;  %v2409_v30 = vrot.slane %v2407_v5, 5  ;;  %v4931_v24 = vshrl.u32 %v8658_v28, 16  ;;  %v4934_v14 = vshll.u32 %v8658_v28, 16  ;;  %6389 = vmatprep.mubr.msk.bf16.mxu1 %vm429_vm3, %v5602_v15  ;;  %v5923_v15 = vld [vmem:[%s7071_s6 + $0xfc] sm:$0x1]  ;;  %v6968_v16 = vld [vmem:[%s8786_s1 + $0x250] sm:$0xff]  }
  0xf6   : > { %6387 = vmatprep.subr.bf16.mxu1 %v6960_v0  ;;  %v2404_v51 = vor.u32 %v2403_v34, %v2400_v10  ;;  %v4919_v56 = vrot.slane %v4917_v44, 4  ;;  %v4922_v57 = vrot.slane %v4920_v19, 5  ;;  %v2412_v13 = vshrl.u32 %v8326_v35, 16  ;;  %6580 = vmatpush3.bf16.msra.mxu0 %v6961_v61  ;;  %v5927_v1 = vld [vmem:[%s7071_s6 + $0x10c] sm:$0x1] }
  0xf7   : > { %v2391_v45 = vrot.slane %v2390_v4, 4  ;;  %v8680_v6 = vrot.slane %v4931_v24, 4  ;;  %v8682_v36 = vrot.slane %v4934_v14, 5  ;;  %v2415_v46 = vshll.u32 %v8326_v35, 16  ;;  %6589 = vmatprep.subr.bf16.mxu0 %v6964_v62  ;;  %v5929_v5 = vld [vmem:[%s7071_s6 + $0x114] sm:$0x1] }
  0xf8   : > { %v2405_v41 = vrot.slane %v2404_v51, 4  ;;  %v4923_v55 = vor.u32 %v4922_v57, %v4919_v56  ;;  %v2414_v48 = vrot.slane %v2412_v13, 4  ;;  %v2421_v17 = vshll.u32 %v6980_v22, 16  ;;  %v5931_v44 = vld [vmem:[%s7071_s6 + $0x11c] sm:$0x1] }
  0xf9   : > { %6388 = vmatpush3.bf16.msra.mxu1 %v6960_v0  ;;  %v2396_v63 = vsel %vm7140_vm6, %v2391_v45, %v2395_v60  ;;  %v5949_v61 = vcombine.low %v8650_v42, %v8658_v28  ;;  %v2417_v35 = vrot.slane %v2415_v46, 5  ;;  %v2426_v0 = vshrl.u32 %v8833_v29, 16  ;;  %6582 = vmatmul.mubr.msk.bf16.vlgmr.msra.gmra.mrb[0].mxu0 %vm429_vm3, %v5947_v3  ;;  %v5933_v14 = vld [vmem:[%s7071_s6 + $0x124] sm:$0x1]  ;;  %v5935_v57 = vld [vmem:[%s7071_s6 + $0x12c] sm:$0x1] }
  0xfa   : > { %6605 = vmatprep.subr.bf16.mxu1 %v6964_v62  ;;  %v2410_v9 = vsel %vm7140_vm6, %v2405_v41, %v2409_v30  ;;  %v8701_v25 = vrot.slane %v4923_v55, 4  ;;  %v4937_v32 = vor.u32 %v8682_v36, %v8680_v6  ;;  %v2429_v58 = vshll.u32 %v8833_v29, 16  ;;  %6590 = vmatpush3.bf16.msra.mxu0 %v6964_v62 }
  0xfb   : > { %v5604_v42 = vcombine.low %v2396_v63, %v2410_v9  ;;  %v2418_v53 = vor.u32 %v2417_v35, %v2414_v48  ;;  %v2423_v12 = vrot.slane %v2421_v17, 5  ;;  %v2428_v3 = vrot.slane %v2426_v0, 4  ;;  %6591 = vmatprep.subr.bf16.mxu0 %v6965_v43  ;;  %6585 = vmatprep.mubr.msk.bf16.mxu0 %vm429_vm3, %v5948_v27 }
  0xfc   : > { %6390 = vmatmul.mubr.msk.bf16.vlgmr.msra.gmra.mrb[0].mxu1 %vm429_vm3, %v8629_v11  ;;  %v2431_v59 = vrot.slane %v2429_v58, 5  ;;  %v2435_v28 = vshll.u32 %v6981_v18, 16  ;;  %v4839_v11 = vor.u32 %v8572_v23, %v8570_v39  ;;  %v4842_v29 = vshll.u32 %v5923_v15, 16 }
  0xfd   : > { %6609 = vmatpush3.bf16.msra.mxu1 %v6964_v62  ;;  %v2419_v8 = vrot.slane %v2418_v53, 4  ;;  %v4853_v7 = vor.u32 %v8579_v20, %v8574_v40  ;;  %v4856_v60 = vshll.u32 %v5925_v26, 16  ;;  %v4867_v62 = vor.u32 %v8606_v37, %v8597_v54  ;;  %6393 = vmatprep.mubr.msk.bf16.mxu1 %vm429_vm3, %v5604_v42  ;;  %v6969_v54 = vld [vmem:[%s8786_s1 + $0x258] sm:$0xff]  }
  0xfe   : > { %6606 = vmatprep.subr.bf16.mxu1 %v6965_v43  ;;  %v2432_v39 = vor.u32 %v2431_v59, %v2428_v3  ;;  %v2437_v23 = vrot.slane %v2435_v28, 5  ;;  %v4840_v10 = vrot.slane %v4839_v11, 4  ;;  %v4844_v34 = vrot.slane %v4842_v29, 5  ;;  %6592 = vmatpush3.bf16.msra.mxu0 %v6965_v43 }
  0xff   : > { %v2424_v47 = vsel %vm7140_vm6, %v2419_v8, %v2423_v12  ;;  %v4854_v33 = vrot.slane %v4853_v7, 4  ;;  %v4858_v40 = vrot.slane %v4856_v60, 5  ;;  %v4868_v20 = vrot.slane %v4867_v62, 4  ;;  %6593 = vmatprep.subr.bf16.mxu0 %v6968_v16 }
 0x100   : > { %v2433_v27 = vrot.slane %v2432_v39, 4  ;;  %v4845_v37 = vsel %vm7140_vm6, %v4840_v10, %v4844_v34  ;;  %v4870_v19 = vshll.u32 %v5927_v1, 16  ;;  %v4881_v4 = vor.u32 %v8620_v2, %v8608_v50  ;;  %v5937_v50 = vld [vmem:[%s7071_s6 + $0x134] sm:$0x1]  ;;  %v5978_v39 = vld [vmem:[%s8787_s2] ss:$0 sm:$0xff] }
 0x101   : > { %6610 = vmatpush3.bf16.msra.mxu1 %v6965_v43  ;;  %v4859_v30 = vsel %vm7140_vm6, %v4854_v33, %v4858_v40  ;;  %v4884_v24 = vshll.u32 %v5929_v5, 16  ;;  %v4895_v51 = vor.u32 %v8645_v38, %v8643_v31  ;;  %v4898_v56 = vshll.u32 %v5931_v44, 16  ;;  %6586 = vmatmul.mubr.msk.bf16.gmra.mrb[4].mxu0 %vm429_vm3, %v5949_v61 }
 0x102   : > { %6607 = vmatprep.subr.bf16.mxu1 %v6968_v16  ;;  %v2438_v13 = vsel %vm7140_vm6, %v2433_v27, %v2437_v23  ;;  %v5966_v45 = vcombine.low %v4845_v37, %v4859_v30  ;;  %v4872_v46 = vrot.slane %v4870_v19, 5  ;;  %v4882_v43 = vrot.slane %v4881_v4, 4  ;;  %6594 = vmatpush3.bf16.msra.mxu0 %v6968_v16 }
 0x103   : > { %v5605_v2 = vcombine.low %v2424_v47, %v2438_v13  ;;  %v4886_v41 = vrot.slane %v4884_v24, 5  ;;  %v4896_v55 = vrot.slane %v4895_v51, 4  ;;  %v4900_v48 = vrot.slane %v4898_v56, 5  ;;  %6595 = vmatprep.subr.bf16.mxu0 %v6969_v54 }
 0x104   : > { %v4873_v31 = vsel %vm7140_vm6, %v4868_v20, %v4872_v46  ;;  %v4909_v38 = vor.u32 %v8664_v21, %v8653_v52  ;;  %v4912_v22 = vshll.u32 %v5933_v14, 16  ;;  %v4926_v17 = vshll.u32 %v5935_v57, 16  ;;  %6597 = vmatprep.mubr.msk.bf16.mxu0 %vm429_vm3, %v5966_v45 }
 0x105   : > { %6611 = vmatpush3.bf16.msra.mxu1 %v6968_v16  ;;  %v4938_v63 = vrot.slane %v4937_v32, 4  ;;  %v4887_v61 = vsel %vm7140_vm6, %v4882_v43, %v4886_v41  ;;  %v4901_v35 = vsel %vm7140_vm6, %v4896_v55, %v4900_v48  ;;  %v4940_v0 = vshll.u32 %v5937_v50, 16 }
 0x106   : > { %6394 = vmatmul.mubr.msk.bf16.gmra.mrb[4].mxu1 %vm429_vm3, %v5605_v2  ;;  %6608 = vmatprep.subr.bf16.mxu1 %v6969_v54  ;;  %v5967_v15 = vcombine.low %v4873_v31, %v4887_v61  ;;  %v4910_v52 = vrot.slane %v4909_v38, 4  ;;  %v4914_v21 = vrot.slane %v4912_v22, 5  ;;  %v4928_v9 = vrot.slane %v4926_v17, 5 }
 0x107   : > { %6596 = vmatpush3.bf16.msra.mxu0 %v6969_v54  ;;  %v4942_v58 = vrot.slane %v4940_v0, 5 }
 0x108   : > { %v4915_v6 = vsel %vm7140_vm6, %v4910_v52, %v4914_v21  ;;  %v4929_v36 = vsel %vm7140_vm6, %v8701_v25, %v4928_v9 }
 0x109   : > { %6612 = vmatpush3.bf16.msra.mxu1 %v6969_v54  ;;  %v5968_v32 = vcombine.low %v4901_v35, %v4915_v6  ;;  %v4943_v26 = vsel %vm7140_vm6, %v4938_v63, %v4942_v58 }
 0x10a   : > { %6598 = vmatmul.mubr.msk.bf16.vlgmr.msra.gmra.mrb[0].mxu0 %vm429_vm3, %v5967_v15  ;;  %v5969_v42 = vcombine.low %v4929_v36, %v4943_v26 }
 0x10b   : > { %6601 = vmatprep.mubr.msk.bf16.mxu1 %vm429_vm3, %v5968_v32 }
 0x10e   : > { %6602 = vmatmul.mubr.msk.bf16.vlgmr.msra.gmra.mrb[8].mxu1 %vm429_vm3, %v5969_v42 }
 0x1cf   : > { %v6391_v53 = vpop.f32.mrb[0].mxu1 }
 0x1d0   : > { %v2530_v12 = vpop.f32.mrb[1].mxu1 }
 0x1d1   : > { %v6392_v3 = vpop.f32.mrb[2].mxu1 }
 0x1d2   : > { %v2533_v16 = vpop.f32.mrb[3].mxu1 }
 0x1d4   : > { %v6587_v59 = vpop.f32.mrb[4].mxu0 }
 0x1d5   : > { %v4809_v18 = vpop.f32.mrb[5].mxu0 }
 0x1d6   : > { %v6588_v28 = vpop.f32.mrb[6].mxu0 }
 0x1d7   : > { %v4812_v25 = vpop.f32.mrb[7].mxu0 }
 0x1d9   : > { %v6395_v11 = vpop.f32.mrb[4].mxu1 }
 0x1da   : > { %v6617_v29 = vadd.f32 %v6587_v59, %v6395_v11  ;;  %v2546_v8 = vpop.f32.mrb[5].mxu1 }
 0x1db   : > { %v6619_v49 = vadd.f32 %v4809_v18, %v2546_v8  ;;  %v6396_v7 = vpop.f32.mrb[6].mxu1 }
 0x1dc   : > { %v6621_v60 = vadd.f32 %v6588_v28, %v6396_v7  ;;  %v2549_v1 = vpop.f32.mrb[7].mxu1 }
 0x1dd   : > { %v6623_v5 = vadd.f32 %v4812_v25, %v2549_v1  ;;  %v6599_v62 = vpop.f32.mrb[0].mxu0 }
 0x1de   : > { %v6613_v23 = vadd.f32 %v6599_v62, %v6391_v53  ;;  %v5035_v10 = vpop.f32.mrb[1].mxu0 }
 0x1df   : > { %v6614_v34 = vadd.f32 %v5035_v10, %v2530_v12  ;;  %v6600_v44 = vpop.f32.mrb[2].mxu0 }
 0x1e0   : > { %v5083_v47 = vadd.f32 %v6613_v23, %v5978_v39  ;;  %v6615_v40 = vadd.f32 %v6600_v44, %v6392_v3  ;;  %v5038_v20 = vpop.f32.mrb[3].mxu0 }
 0x1e1   : > { %v6603_v33 = vpop.f32.mrb[8].mxu1  ;;  %v5081_v27 = vadd.f32 %v6614_v34, %v5978_v39  ;;  %v6616_v19 = vadd.f32 %v5038_v20, %v2533_v16 }
 0x1e2   : > { %v6618_v54 = vadd.f32 %v6617_v29, %v6603_v33  ;;  %v5051_v37 = vpop.f32.mrb[9].mxu1  ;;  %v5099_v4 = vmul.f32 0.2, %v5083_v47  ;;  %v5084_v30 = vadd.f32 %v6615_v40, %v5978_v39  ;;  %vm5091_vm7 = vcmp.ge.f32.partialorder %v5083_v47, 0.0 }
 0x1e3   : > { %v6620_v24 = vadd.f32 %v6619_v49, %v5051_v37  ;;  %v6604_v14 = vpop.f32.mrb[10].mxu1  ;;  %v5082_v51 = vadd.f32 %v6616_v19, %v5978_v39  ;;  %v5097_v57 = vmul.f32 0.2, %v5081_v27  ;;  %vm5089_vm9 = vcmp.ge.f32.partialorder %v5081_v27, 0.0 }
 0x1e4   : > { %v5054_v56 = vpop.f32.mrb[11].mxu1  ;;  %v5087_v13 = vadd.f32 %v6618_v54, %v5978_v39  ;;  %vm5092_vm8 = vcmp.ge.f32.partialorder %v5084_v30, 0.0  ;;  %v5100_v45 = vmul.f32 0.2, %v5084_v30  ;;  %v5107_v43 = vsel %vm5091_vm7, %v5083_v47, %v5099_v4 }
 0x1e5   : > { %v5085_v46 = vadd.f32 %v6620_v24, %v5978_v39  ;;  %vm5090_vm10 = vcmp.ge.f32.partialorder %v5082_v51, 0.0  ;;  %v5098_v2 = vmul.f32 0.2, %v5082_v51  ;;  %v6622_v55 = vadd.f32 %v6621_v60, %v6604_v14 }
 0x1e6   : > { %v5108_v50 = vsel %vm5092_vm8, %v5084_v30, %v5100_v45  ;;  %v6624_v48 = vadd.f32 %v6623_v5, %v5054_v56  ;;  %v5105_v31 = vsel %vm5089_vm9, %v5081_v27, %v5097_v57  ;;  %v5103_v38 = vmul.f32 0.2, %v5087_v13 }
 0x1e7   : > { %v5990_v41 = vpack.c.bf16 %v5108_v50, %v5107_v43  ;;  %v5106_v22 = vsel %vm5090_vm10, %v5082_v51, %v5098_v2  ;;  %v5101_v17 = vmul.f32 0.2, %v5085_v46  ;;  %v5088_v61 = vadd.f32 %v6622_v55, %v5978_v39 }
 0x1e8   : > { %v5985_v63 = vpack.c.bf16 %v5106_v22, %v5105_v31  ;;  %v5086_v35 = vadd.f32 %v6624_v48, %v5978_v39  ;;  %vm5095_vm11 = vcmp.ge.f32.partialorder %v5087_v13, 0.0  ;;  %vm5093_vm12 = vcmp.ge.f32.partialorder %v5085_v46, 0.0 }
 0x1e9   : > { %6002 = vst [vmem:[%s238_s25 + $0x8] sm:$0xff] %v5990_v41   ;;  %vm5096_vm13 = vcmp.ge.f32.partialorder %v5088_v61, 0.0  ;;  %v5104_v0 = vmul.f32 0.2, %v5088_v61  ;;  %v5111_v52 = vsel %vm5095_vm11, %v5087_v13, %v5103_v38  ;;  %v5109_v21 = vsel %vm5093_vm12, %v5085_v46, %v5101_v17 }
 0x1ea   : > { %5986 = vst [vmem:[%s238_s25] sm:$0xff] %v5985_v63   ;;  %vm5094_vm14 = vcmp.ge.f32.partialorder %v5086_v35, 0.0  ;;  %v5102_v15 = vmul.f32 0.2, %v5086_v35 }
 0x1eb   : > { %v5112_v9 = vsel %vm5096_vm13, %v5088_v61, %v5104_v0 }
 0x1ec   : > { %v5110_v58 = vsel %vm5094_vm14, %v5086_v35, %v5102_v15  ;;  %v6000_v6 = vpack.c.bf16 %v5112_v9, %v5111_v52 }
 0x1ed   : > { %v5995_v36 = vpack.c.bf16 %v5110_v58, %v5109_v21 }
 0x1ee   : > { %6004 = vst [vmem:[%s238_s25 + $0x18] sm:$0xff] %v6000_v6  }
 0x1ef   : > { %6003 = vst [vmem:[%s238_s25 + $0x10] sm:$0xff] %v5995_v36  }
 0x1f0 PF: > { %s13_s14 = sadd.s32 1, %s7004_s14   ;;  %s8835_s12 = smov %s7000_s13 }
 0x1f1   : > { %p10_p5 = scmp.ge.s32.totalorder %s13_s14, 4   ;;  %s8836_s13 = smov %s8838_s15 }
 0x1f3   :  { %12 = sbr.rel (!%p10_p5) target bundleno = 2 (0x2), region = 102 }

// kernel: _lambda_.8
= control target key start
LH: loop header
LB: loop body
LE: loop exit
PB: predicated region body
PF: predicated region fallthrough
CT: control target
= control target key end

     0   :  { %s6115_s1 = inlined_call_operand.vmem [shape: bf16[3200,256], index: 1, kind: input, shape index: {}]   ;;  %s6116_s0 = inlined_call_operand.vmem [shape: bf16[32,3200], index: 0, kind: input, shape index: {}]   ;;  %s6117_s2 = inlined_call_operand.vmem [shape: f32[1,256], index: 2, kind: input, shape index: {}]   ;;  %s6118_s3 = inlined_call_operand.vmem [shape: bf16[32,256], index: 3, kind: output, shape index: {}]  }
   0x1   :  { %v4055_v0 = vld [vmem:[%s6115_s1 + $0x4] ss:$8 sps:$4 sm:$0xff]   ;;  %v4059_v2 = vld [vmem:[%s6115_s1] ss:$8 sps:$4 sm:$0xff]   ;;  %v4061_v4 = vld [vmem:[%s6115_s1 + $0x14] ss:$8 sps:$4 sm:$0xff]  }
   0x2   :  { %v4057_v1 = vld [vmem:[%s6115_s1 + $0x604] ss:$8 sps:$4 sm:$0xff]   ;;  %2731 = vmatprep.subr.bf16.mxu1 %v4055_v0  ;;  %v4060_v3 = vld [vmem:[%s6115_s1 + $0x600] ss:$8 sps:$4 sm:$0xff]   ;;  %v4063_v5 = vld [vmem:[%s6115_s1 + $0x614] ss:$8 sps:$4 sm:$0xff]  }
   0x3   :  { %3049 = vmatprep.subr.bf16.mxu0 %v4057_v1  ;;  %2732 = vmatpush1.bf16.msra.mxu1 %v4059_v2  ;;  %v4065_v6 = vld [vmem:[%s6115_s1 + $0x10] ss:$8 sps:$4 sm:$0xff]   ;;  %v4067_v8 = vld [vmem:[%s6115_s1 + $0x24] ss:$8 sps:$4 sm:$0xff]   ;;  %v4071_v10 = vld [vmem:[%s6115_s1 + $0x20] ss:$8 sps:$4 sm:$0xff]  }
   0x4   :  { %3050 = vmatpush1.bf16.msra.mxu0 %v4060_v3  ;;  %2733 = vmatprep.subr.bf16.mxu1 %v4061_v4  ;;  %v4066_v7 = vld [vmem:[%s6115_s1 + $0x610] ss:$8 sps:$4 sm:$0xff]   ;;  %v4069_v9 = vld [vmem:[%s6115_s1 + $0x624] ss:$8 sps:$4 sm:$0xff]   ;;  %v4072_v11 = vld [vmem:[%s6115_s1 + $0x620] ss:$8 sps:$4 sm:$0xff]  }
   0x5   :  { %3051 = vmatprep.subr.bf16.mxu0 %v4063_v5  ;;  %v4073_v12 = vld [vmem:[%s6115_s1 + $0x34] ss:$8 sps:$4 sm:$0xff]   ;;  %v4077_v14 = vld [vmem:[%s6115_s1 + $0x30] ss:$8 sps:$4 sm:$0xff]   ;;  %v4079_v16 = vld [vmem:[%s6115_s1 + $0x44] ss:$8 sps:$4 sm:$0xff]  }
   0x6   :  { %v4075_v13 = vld [vmem:[%s6115_s1 + $0x634] ss:$8 sps:$4 sm:$0xff]   ;;  %v4078_v15 = vld [vmem:[%s6115_s1 + $0x630] ss:$8 sps:$4 sm:$0xff]   ;;  %v4081_v17 = vld [vmem:[%s6115_s1 + $0x644] ss:$8 sps:$4 sm:$0xff]  }
   0x7   :  { %2734 = vmatpush1.bf16.msra.mxu1 %v4065_v6  ;;  %v4083_v18 = vld [vmem:[%s6115_s1 + $0x40] ss:$8 sps:$4 sm:$0xff]   ;;  %v4085_v20 = vld [vmem:[%s6115_s1 + $0x54] ss:$8 sps:$4 sm:$0xff]   ;;  %v4089_v22 = vld [vmem:[%s6115_s1 + $0x50] ss:$8 sps:$4 sm:$0xff]  }
   0x8   :  { %3052 = vmatpush1.bf16.msra.mxu0 %v4066_v7  ;;  %2735 = vmatprep.subr.bf16.mxu1 %v4067_v8  ;;  %v4084_v19 = vld [vmem:[%s6115_s1 + $0x640] ss:$8 sps:$4 sm:$0xff]   ;;  %v4087_v21 = vld [vmem:[%s6115_s1 + $0x654] ss:$8 sps:$4 sm:$0xff]   ;;  %v4090_v23 = vld [vmem:[%s6115_s1 + $0x650] ss:$8 sps:$4 sm:$0xff]  }
   0x9   :  { %3053 = vmatprep.subr.bf16.mxu0 %v4069_v9  ;;  %v4091_v24 = vld [vmem:[%s6115_s1 + $0x64] ss:$8 sps:$4 sm:$0xff]   ;;  %v4095_v26 = vld [vmem:[%s6115_s1 + $0x60] ss:$8 sps:$4 sm:$0xff]   ;;  %v4097_v28 = vld [vmem:[%s6115_s1 + $0x74] ss:$8 sps:$4 sm:$0xff]  }
   0xa   :  { %v4093_v25 = vld [vmem:[%s6115_s1 + $0x664] ss:$8 sps:$4 sm:$0xff]   ;;  %v4096_v27 = vld [vmem:[%s6115_s1 + $0x660] ss:$8 sps:$4 sm:$0xff]   ;;  %v4099_v29 = vld [vmem:[%s6115_s1 + $0x674] ss:$8 sps:$4 sm:$0xff]  }
   0xb   :  { %2736 = vmatpush1.bf16.msra.mxu1 %v4071_v10  ;;  %v4101_v30 = vld [vmem:[%s6115_s1 + $0x70] ss:$8 sps:$4 sm:$0xff]   ;;  %v4103_v32 = vld [vmem:[%s6115_s1 + $0x84] ss:$8 sps:$4 sm:$0xff]   ;;  %v4107_v34 = vld [vmem:[%s6115_s1 + $0x80] ss:$8 sps:$4 sm:$0xff]  }
   0xc   :  { %3054 = vmatpush1.bf16.msra.mxu0 %v4072_v11  ;;  %2737 = vmatprep.subr.bf16.mxu1 %v4073_v12  ;;  %v4102_v31 = vld [vmem:[%s6115_s1 + $0x670] ss:$8 sps:$4 sm:$0xff]   ;;  %v4105_v33 = vld [vmem:[%s6115_s1 + $0x684] ss:$8 sps:$4 sm:$0xff]   ;;  %v4108_v35 = vld [vmem:[%s6115_s1 + $0x680] ss:$8 sps:$4 sm:$0xff]  }
   0xd   :  { %3055 = vmatprep.subr.bf16.mxu0 %v4075_v13  ;;  %v4109_v36 = vld [vmem:[%s6115_s1 + $0x94] ss:$8 sps:$4 sm:$0xff]   ;;  %v4113_v38 = vld [vmem:[%s6115_s1 + $0x90] ss:$8 sps:$4 sm:$0xff]   ;;  %v4115_v40 = vld [vmem:[%s6115_s1 + $0xa4] ss:$8 sps:$4 sm:$0xff]  }
   0xe   :  { %v4111_v37 = vld [vmem:[%s6115_s1 + $0x694] ss:$8 sps:$4 sm:$0xff]   ;;  %v4114_v39 = vld [vmem:[%s6115_s1 + $0x690] ss:$8 sps:$4 sm:$0xff]   ;;  %v4117_v41 = vld [vmem:[%s6115_s1 + $0x6a4] ss:$8 sps:$4 sm:$0xff]  }
   0xf   :  { %2738 = vmatpush1.bf16.msra.mxu1 %v4077_v14  ;;  %v4119_v42 = vld [vmem:[%s6115_s1 + $0xa0] ss:$8 sps:$4 sm:$0xff]   ;;  %v4121_v44 = vld [vmem:[%s6115_s1 + $0xb4] ss:$8 sps:$4 sm:$0xff]   ;;  %v4125_v46 = vld [vmem:[%s6115_s1 + $0xb0] ss:$8 sps:$4 sm:$0xff]  }
  0x10   :  { %3056 = vmatpush1.bf16.msra.mxu0 %v4078_v15  ;;  %2739 = vmatprep.subr.bf16.mxu1 %v4079_v16  ;;  %v4120_v43 = vld [vmem:[%s6115_s1 + $0x6a0] ss:$8 sps:$4 sm:$0xff]   ;;  %v4123_v45 = vld [vmem:[%s6115_s1 + $0x6b4] ss:$8 sps:$4 sm:$0xff]   ;;  %v4126_v47 = vld [vmem:[%s6115_s1 + $0x6b0] ss:$8 sps:$4 sm:$0xff]  }
  0x11   :  { %3057 = vmatprep.subr.bf16.mxu0 %v4081_v17  ;;  %v4153_v48 = vld [vmem:[%s6116_s0 + $0x4] ss:$100 sps:$4 sm:$0xff]   ;;  %v4159_v51 = vld [vmem:[%s6116_s0 + $0x34] ss:$100 sps:$4 sm:$0xff]  }
  0x12   :  { %v4127_v49 = vld [vmem:[%s6115_s1 + $0xc4] ss:$8 sps:$4 sm:$0xff]   ;;  %2763 = vmatprep.mubr.bf16.mxu1 %v4153_v48  ;;  %v4131_v52 = vld [vmem:[%s6115_s1 + $0xc0] ss:$8 sps:$4 sm:$0xff]   ;;  %v4133_v54 = vld [vmem:[%s6115_s1 + $0xd4] ss:$8 sps:$4 sm:$0xff]   ;;  %3081 = vmatprep.mubr.bf16.mxu0 %v4159_v51 }
  0x13   :  { %2740 = vmatpush1.bf16.msra.mxu1 %v4083_v18  ;;  %v4129_v50 = vld [vmem:[%s6115_s1 + $0x6c4] ss:$8 sps:$4 sm:$0xff]   ;;  %v4132_v53 = vld [vmem:[%s6115_s1 + $0x6c0] ss:$8 sps:$4 sm:$0xff]   ;;  %v4135_v55 = vld [vmem:[%s6115_s1 + $0x6d4] ss:$8 sps:$4 sm:$0xff]  }
  0x14   :  { %3058 = vmatpush1.bf16.msra.mxu0 %v4084_v19  ;;  %2741 = vmatprep.subr.bf16.mxu1 %v4085_v20  ;;  %v4137_v56 = vld [vmem:[%s6115_s1 + $0xd0] ss:$8 sps:$4 sm:$0xff]   ;;  %v4139_v58 = vld [vmem:[%s6115_s1 + $0xe4] ss:$8 sps:$4 sm:$0xff]   ;;  %v4143_v60 = vld [vmem:[%s6115_s1 + $0xe0] ss:$8 sps:$4 sm:$0xff]  }
  0x15   :  { %3059 = vmatprep.subr.bf16.mxu0 %v4087_v21  ;;  %v4138_v57 = vld [vmem:[%s6115_s1 + $0x6d0] ss:$8 sps:$4 sm:$0xff]   ;;  %v4141_v59 = vld [vmem:[%s6115_s1 + $0x6e4] ss:$8 sps:$4 sm:$0xff]   ;;  %v4144_v61 = vld [vmem:[%s6115_s1 + $0x6e0] ss:$8 sps:$4 sm:$0xff]  }
  0x16   :  { %v4145_v62 = vld [vmem:[%s6115_s1 + $0xf4] ss:$8 sps:$4 sm:$0xff]   ;;  %v4149_v0 = vld [vmem:[%s6115_s1 + $0xf0] ss:$8 sps:$4 sm:$0xff]   ;;  %v4156_v2 = vld [vmem:[%s6115_s1 + $0x104] ss:$8 sps:$4 sm:$0xff]  }
  0x17   :  { %2742 = vmatpush1.bf16.msra.mxu1 %v4089_v22  ;;  %v4147_v63 = vld [vmem:[%s6115_s1 + $0x6f4] ss:$8 sps:$4 sm:$0xff]   ;;  %v4150_v1 = vld [vmem:[%s6115_s1 + $0x6f0] ss:$8 sps:$4 sm:$0xff]   ;;  %v4162_v3 = vld [vmem:[%s6115_s1 + $0x704] ss:$8 sps:$4 sm:$0xff]  }
  0x18   :  { %3060 = vmatpush1.bf16.msra.mxu0 %v4090_v23  ;;  %2743 = vmatprep.subr.bf16.mxu1 %v4091_v24  ;;  %v4151_v4 = vld [vmem:[%s6116_s0] ss:$100 sps:$4 sm:$0xff]   ;;  %v4157_v6 = vld [vmem:[%s6116_s0 + $0x30] ss:$100 sps:$4 sm:$0xff]  }
  0x19   :  { %3061 = vmatprep.subr.bf16.mxu0 %v4093_v25  ;;  %v4154_v5 = vld [vmem:[%s6115_s1 + $0x100] ss:$8 sps:$4 sm:$0xff]   ;;  %v4165_v8 = vld [vmem:[%s6115_s1 + $0x114] ss:$8 sps:$4 sm:$0xff]   ;;  %v4163_v10 = vld [vmem:[%s6115_s1 + $0x110] ss:$8 sps:$4 sm:$0xff]  }
  0x1a   :  { %v4160_v7 = vld [vmem:[%s6115_s1 + $0x700] ss:$8 sps:$4 sm:$0xff]   ;;  %v4168_v9 = vld [vmem:[%s6115_s1 + $0x714] ss:$8 sps:$4 sm:$0xff]   ;;  %v4166_v11 = vld [vmem:[%s6115_s1 + $0x710] ss:$8 sps:$4 sm:$0xff]  }
  0x1b   :  { %2744 = vmatpush1.bf16.msra.mxu1 %v4095_v26  ;;  %v4171_v12 = vld [vmem:[%s6115_s1 + $0x124] ss:$8 sps:$4 sm:$0xff]   ;;  %v4169_v14 = vld [vmem:[%s6115_s1 + $0x120] ss:$8 sps:$4 sm:$0xff]   ;;  %v4177_v16 = vld [vmem:[%s6115_s1 + $0x134] ss:$8 sps:$4 sm:$0xff]  }
  0x1c   :  { %3062 = vmatpush1.bf16.msra.mxu0 %v4096_v27  ;;  %2745 = vmatprep.subr.bf16.mxu1 %v4097_v28  ;;  %v4174_v13 = vld [vmem:[%s6115_s1 + $0x724] ss:$8 sps:$4 sm:$0xff]   ;;  %v4172_v15 = vld [vmem:[%s6115_s1 + $0x720] ss:$8 sps:$4 sm:$0xff]   ;;  %v4180_v17 = vld [vmem:[%s6115_s1 + $0x734] ss:$8 sps:$4 sm:$0xff]  }
  0x1d   :  { %3063 = vmatprep.subr.bf16.mxu0 %v4099_v29  ;;  %v4175_v18 = vld [vmem:[%s6115_s1 + $0x130] ss:$8 sps:$4 sm:$0xff]   ;;  %v4183_v20 = vld [vmem:[%s6115_s1 + $0x144] ss:$8 sps:$4 sm:$0xff]   ;;  %v4181_v22 = vld [vmem:[%s6115_s1 + $0x140] ss:$8 sps:$4 sm:$0xff]  }
  0x1e   :  { %v4178_v19 = vld [vmem:[%s6115_s1 + $0x730] ss:$8 sps:$4 sm:$0xff]   ;;  %v4186_v21 = vld [vmem:[%s6115_s1 + $0x744] ss:$8 sps:$4 sm:$0xff]   ;;  %v4184_v23 = vld [vmem:[%s6115_s1 + $0x740] ss:$8 sps:$4 sm:$0xff]  }
  0x1f   :  { %2746 = vmatpush1.bf16.msra.mxu1 %v4101_v30  ;;  %v4189_v24 = vld [vmem:[%s6115_s1 + $0x154] ss:$8 sps:$4 sm:$0xff]   ;;  %v4187_v26 = vld [vmem:[%s6115_s1 + $0x150] ss:$8 sps:$4 sm:$0xff]   ;;  %v4195_v29 = vld [vmem:[%s6115_s1 + $0x164] ss:$8 sps:$4 sm:$0xff]  }
  0x20   :  { %3064 = vmatpush1.bf16.msra.mxu0 %v4102_v31  ;;  %2747 = vmatprep.subr.bf16.mxu1 %v4103_v32  ;;  %v4192_v25 = vld [vmem:[%s6115_s1 + $0x754] ss:$8 sps:$4 sm:$0xff]   ;;  %v4190_v27 = vld [vmem:[%s6115_s1 + $0x750] ss:$8 sps:$4 sm:$0xff]   ;;  %v4198_v30 = vld [vmem:[%s6115_s1 + $0x764] ss:$8 sps:$4 sm:$0xff]  }
  0x21   :  { %3065 = vmatprep.subr.bf16.mxu0 %v4105_v33  ;;  %v4241_v28 = vld [vmem:[%s6116_s0 + $0xcc] ss:$100 sps:$4 sm:$0xff]   ;;  %v4246_v31 = vld [vmem:[%s6116_s0 + $0xfc] ss:$100 sps:$4 sm:$0xff]  }
  0x22   :  { %v4193_v32 = vld [vmem:[%s6115_s1 + $0x160] ss:$8 sps:$4 sm:$0xff]   ;;  %v4211_v48 = vld [vmem:[%s6115_s1 + $0x190] ss:$8 sps:$4 sm:$0xff]   ;;  %v4222_v51 = vld [vmem:[%s6115_s1 + $0x7a4] ss:$8 sps:$4 sm:$0xff]  }
  0x23   :  { %2748 = vmatpush1.bf16.msra.mxu1 %v4107_v34  ;;  %v4196_v33 = vld [vmem:[%s6115_s1 + $0x760] ss:$8 sps:$4 sm:$0xff]  }
  0x24   :  { %3066 = vmatpush1.bf16.msra.mxu0 %v4108_v35  ;;  %2749 = vmatprep.subr.bf16.mxu1 %v4109_v36  ;;  %v4251_v34 = vld [vmem:[%s6116_s0 + $0xc8] ss:$100 sps:$4 sm:$0xff]   ;;  %v4252_v35 = vld [vmem:[%s6116_s0 + $0xf8] ss:$100 sps:$4 sm:$0xff]  }
  0x25   :  { %3067 = vmatprep.subr.bf16.mxu0 %v4111_v37  ;;  %v4201_v36 = vld [vmem:[%s6115_s1 + $0x174] ss:$8 sps:$4 sm:$0xff]  }
  0x26   :  { %v4204_v37 = vld [vmem:[%s6115_s1 + $0x774] ss:$8 sps:$4 sm:$0xff]  }
  0x27   :  { %2750 = vmatpush1.bf16.msra.mxu1 %v4113_v38  ;;  %v4199_v38 = vld [vmem:[%s6115_s1 + $0x170] ss:$8 sps:$4 sm:$0xff]  }
  0x28   :  { %3068 = vmatpush1.bf16.msra.mxu0 %v4114_v39  ;;  %2751 = vmatprep.subr.bf16.mxu1 %v4115_v40  ;;  %v4202_v39 = vld [vmem:[%s6115_s1 + $0x770] ss:$8 sps:$4 sm:$0xff]  }
  0x29   :  { %3069 = vmatprep.subr.bf16.mxu0 %v4117_v41  ;;  %v4261_v40 = vld [vmem:[%s6116_s0 + $0xc] ss:$100 sps:$4 sm:$0xff]  }
  0x2a   :  { %v4207_v41 = vld [vmem:[%s6115_s1 + $0x184] ss:$8 sps:$4 sm:$0xff]  }
  0x2b   :  { %2752 = vmatpush1.bf16.msra.mxu1 %v4119_v42  ;;  %v4210_v42 = vld [vmem:[%s6115_s1 + $0x784] ss:$8 sps:$4 sm:$0xff]  }
  0x2c   :  { %3070 = vmatpush1.bf16.msra.mxu0 %v4120_v43  ;;  %2753 = vmatprep.subr.bf16.mxu1 %v4121_v44  ;;  %v4267_v43 = vld [vmem:[%s6116_s0 + $0x3c] ss:$100 sps:$4 sm:$0xff]  }
  0x2d   :  { %3071 = vmatprep.subr.bf16.mxu0 %v4123_v45  ;;  %v4205_v44 = vld [vmem:[%s6115_s1 + $0x180] ss:$8 sps:$4 sm:$0xff]  }
  0x2e   :  { %v4208_v45 = vld [vmem:[%s6115_s1 + $0x780] ss:$8 sps:$4 sm:$0xff]  }
  0x2f   :  { %2754 = vmatpush1.bf16.msra.mxu1 %v4125_v46  ;;  %v4213_v46 = vld [vmem:[%s6115_s1 + $0x194] ss:$8 sps:$4 sm:$0xff]  }
  0x30   :  { %3072 = vmatpush1.bf16.msra.mxu0 %v4126_v47  ;;  %2755 = vmatprep.subr.bf16.mxu1 %v4127_v49  ;;  %v4216_v47 = vld [vmem:[%s6115_s1 + $0x794] ss:$8 sps:$4 sm:$0xff]   ;;  %v4214_v49 = vld [vmem:[%s6115_s1 + $0x790] ss:$8 sps:$4 sm:$0xff]  }
  0x31   :  { %3073 = vmatprep.subr.bf16.mxu0 %v4129_v50  ;;  %v4219_v50 = vld [vmem:[%s6115_s1 + $0x1a4] ss:$8 sps:$4 sm:$0xff]  }
  0x33   :  { %2756 = vmatpush1.bf16.msra.mxu1 %v4131_v52  ;;  %v4217_v52 = vld [vmem:[%s6115_s1 + $0x1a0] ss:$8 sps:$4 sm:$0xff]  }
  0x34   :  { %3074 = vmatpush1.bf16.msra.mxu0 %v4132_v53  ;;  %2757 = vmatprep.subr.bf16.mxu1 %v4133_v54  ;;  %v4220_v53 = vld [vmem:[%s6115_s1 + $0x7a0] ss:$8 sps:$4 sm:$0xff]   ;;  %v4225_v54 = vld [vmem:[%s6115_s1 + $0x1b4] ss:$8 sps:$4 sm:$0xff]  }
  0x35   :  { %3075 = vmatprep.subr.bf16.mxu0 %v4135_v55  ;;  %v4228_v55 = vld [vmem:[%s6115_s1 + $0x7b4] ss:$8 sps:$4 sm:$0xff]  }
  0x37   :  { %2758 = vmatpush1.bf16.msra.mxu1 %v4137_v56  ;;  %v4223_v56 = vld [vmem:[%s6115_s1 + $0x1b0] ss:$8 sps:$4 sm:$0xff]  }
  0x38   :  { %3076 = vmatpush1.bf16.msra.mxu0 %v4138_v57  ;;  %2759 = vmatprep.subr.bf16.mxu1 %v4139_v58  ;;  %v4226_v57 = vld [vmem:[%s6115_s1 + $0x7b0] ss:$8 sps:$4 sm:$0xff]   ;;  %v4231_v58 = vld [vmem:[%s6115_s1 + $0x1c4] ss:$8 sps:$4 sm:$0xff]  }
  0x39   :  { %3077 = vmatprep.subr.bf16.mxu0 %v4141_v59  ;;  %v4234_v59 = vld [vmem:[%s6115_s1 + $0x7c4] ss:$8 sps:$4 sm:$0xff]  }
  0x3b   :  { %2760 = vmatpush1.bf16.msra.mxu1 %v4143_v60  ;;  %v4229_v60 = vld [vmem:[%s6115_s1 + $0x1c0] ss:$8 sps:$4 sm:$0xff]  }
  0x3c   :  { %3078 = vmatpush1.bf16.msra.mxu0 %v4144_v61  ;;  %2761 = vmatprep.subr.bf16.mxu1 %v4145_v62  ;;  %v4232_v61 = vld [vmem:[%s6115_s1 + $0x7c0] ss:$8 sps:$4 sm:$0xff]   ;;  %v4237_v62 = vld [vmem:[%s6115_s1 + $0x1d4] ss:$8 sps:$4 sm:$0xff]  }
  0x3d   :  { %3079 = vmatprep.subr.bf16.mxu0 %v4147_v63  ;;  %v4240_v63 = vld [vmem:[%s6115_s1 + $0x7d4] ss:$8 sps:$4 sm:$0xff]  }
  0x3f   :  { %2762 = vmatpush1.bf16.msra.mxu1 %v4149_v0  ;;  %v4235_v0 = vld [vmem:[%s6115_s1 + $0x1d0] ss:$8 sps:$4 sm:$0xff]  }
  0x40   :  { %3080 = vmatpush1.bf16.msra.mxu0 %v4150_v1  ;;  %2784 = vmatprep.subr.bf16.mxu1 %v4156_v2  ;;  %v4238_v1 = vld [vmem:[%s6115_s1 + $0x7d0] ss:$8 sps:$4 sm:$0xff]   ;;  %v4245_v2 = vld [vmem:[%s6115_s1 + $0x1e4] ss:$8 sps:$4 sm:$0xff]  }
  0x41   :  { %3102 = vmatprep.subr.bf16.mxu0 %v4162_v3  ;;  %v4250_v3 = vld [vmem:[%s6115_s1 + $0x7e4] ss:$8 sps:$4 sm:$0xff]  }
  0x42   :  { %2764 = vmatmul.mubr.bf16.vlgmr.msra.gmra.mrb[0].mxu1 %v4151_v4  ;;  %v4243_v4 = vld [vmem:[%s6115_s1 + $0x1e0] ss:$8 sps:$4 sm:$0xff]  }
  0x43   :  { %3082 = vmatmul.mubr.bf16.vlgmr.msra.gmra.mrb[0].mxu0 %v4157_v6  ;;  %2785 = vmatpush1.bf16.msra.mxu1 %v4154_v5  ;;  %v4248_v5 = vld [vmem:[%s6115_s1 + $0x7e0] ss:$8 sps:$4 sm:$0xff]   ;;  %v4255_v6 = vld [vmem:[%s6115_s1 + $0x1f4] ss:$8 sps:$4 sm:$0xff]  }
  0x44   :  { %3103 = vmatpush1.bf16.msra.mxu0 %v4160_v7  ;;  %2786 = vmatprep.subr.bf16.mxu1 %v4165_v8  ;;  %v4258_v7 = vld [vmem:[%s6115_s1 + $0x7f4] ss:$8 sps:$4 sm:$0xff]   ;;  %v4253_v8 = vld [vmem:[%s6115_s1 + $0x1f0] ss:$8 sps:$4 sm:$0xff]  }
  0x45   :  { %3104 = vmatprep.subr.bf16.mxu0 %v4168_v9  ;;  %2773 = vmatprep.mubr.bf16.mxu1 %v4241_v28  ;;  %v4256_v9 = vld [vmem:[%s6115_s1 + $0x7f0] ss:$8 sps:$4 sm:$0xff]   ;;  %v4285_v28 = vld [vmem:[%s6115_s1 + $0x234] ss:$8 sps:$4 sm:$0xff]  }
  0x46   :  { %3091 = vmatprep.mubr.bf16.mxu0 %v4246_v31  ;;  %v4286_v31 = vld [vmem:[%s6115_s1 + $0x830] ss:$8 sps:$4 sm:$0xff]  }
  0x47   :  { %2787 = vmatpush1.bf16.msra.mxu1 %v4163_v10  ;;  %v4264_v10 = vld [vmem:[%s6115_s1 + $0x204] ss:$8 sps:$4 sm:$0xff]  }
  0x48   :  { %3105 = vmatpush1.bf16.msra.mxu0 %v4166_v11  ;;  %2788 = vmatprep.subr.bf16.mxu1 %v4171_v12  ;;  %v4270_v11 = vld [vmem:[%s6115_s1 + $0x804] ss:$8 sps:$4 sm:$0xff]  }
  0x49   :  { %3106 = vmatprep.subr.bf16.mxu0 %v4174_v13  ;;  %v4259_v12 = vld [vmem:[%s6116_s0 + $0x8] ss:$100 sps:$4 sm:$0xff]  }
  0x4a   :  { %2774 = vmatmul.mubr.bf16.gmra.mrb[4].mxu1 %v4251_v34  ;;  %v4262_v13 = vld [vmem:[%s6115_s1 + $0x200] ss:$8 sps:$4 sm:$0xff]   ;;  %v4294_v34 = vld [vmem:[%s6115_s1 + $0x844] ss:$8 sps:$4 sm:$0xff]  }
  0x4b   :  { %2789 = vmatpush1.bf16.msra.mxu1 %v4169_v14  ;;  %3092 = vmatmul.mubr.bf16.gmra.mrb[4].mxu0 %v4252_v35  ;;  %v4265_v14 = vld [vmem:[%s6116_s0 + $0x38] ss:$100 sps:$4 sm:$0xff]   ;;  %v4375_v35 = vld [vmem:[%s6116_s0 + $0x44] ss:$100 sps:$4 sm:$0xff]  }
  0x4c   :  { %3107 = vmatpush1.bf16.msra.mxu0 %v4172_v15  ;;  %2790 = vmatprep.subr.bf16.mxu1 %v4177_v16  ;;  %v4268_v15 = vld [vmem:[%s6115_s1 + $0x800] ss:$8 sps:$4 sm:$0xff]   ;;  %v4273_v16 = vld [vmem:[%s6115_s1 + $0x214] ss:$8 sps:$4 sm:$0xff]  }
  0x4d   :  { %3108 = vmatprep.subr.bf16.mxu0 %v4180_v17  ;;  %2816 = vmatprep.mubr.bf16.mxu1 %v4261_v40  ;;  %v4276_v17 = vld [vmem:[%s6115_s1 + $0x814] ss:$8 sps:$4 sm:$0xff]   ;;  %v4295_v40 = vld [vmem:[%s6115_s1 + $0x250] ss:$8 sps:$4 sm:$0xff]  }
  0x4e   :  { %3134 = vmatprep.mubr.bf16.mxu0 %v4267_v43  ;;  %v4306_v43 = vld [vmem:[%s6115_s1 + $0x864] ss:$8 sps:$4 sm:$0xff]  }
  0x4f   :  { %2791 = vmatpush1.bf16.msra.mxu1 %v4175_v18  ;;  %v4271_v18 = vld [vmem:[%s6115_s1 + $0x210] ss:$8 sps:$4 sm:$0xff]  }
  0x50   :  { %3109 = vmatpush1.bf16.msra.mxu0 %v4178_v19  ;;  %2792 = vmatprep.subr.bf16.mxu1 %v4183_v20  ;;  %v4274_v19 = vld [vmem:[%s6115_s1 + $0x810] ss:$8 sps:$4 sm:$0xff]  }
  0x51   :  { %3110 = vmatprep.subr.bf16.mxu0 %v4186_v21  ;;  %v4349_v20 = vld [vmem:[%s6116_s0 + $0xd4] ss:$100 sps:$4 sm:$0xff]   ;;  %v4279_v21 = vld [vmem:[%s6115_s1 + $0x224] ss:$8 sps:$4 sm:$0xff]  }
  0x53   :  { %2793 = vmatpush1.bf16.msra.mxu1 %v4181_v22  ;;  %v4282_v22 = vld [vmem:[%s6115_s1 + $0x824] ss:$8 sps:$4 sm:$0xff]  }
  0x54   :  { %3111 = vmatpush1.bf16.msra.mxu0 %v4184_v23  ;;  %2794 = vmatprep.subr.bf16.mxu1 %v4189_v24  ;;  %v4354_v23 = vld [vmem:[%s6116_s0 + $0x104] ss:$100 sps:$4 sm:$0xff]  }
  0x55   :  { %3112 = vmatprep.subr.bf16.mxu0 %v4192_v25  ;;  %v4277_v24 = vld [vmem:[%s6115_s1 + $0x220] ss:$8 sps:$4 sm:$0xff]  }
  0x56   :  { %v4280_v25 = vld [vmem:[%s6115_s1 + $0x820] ss:$8 sps:$4 sm:$0xff]  }
  0x57   :  { %2795 = vmatpush1.bf16.msra.mxu1 %v4187_v26  ;;  %v4359_v26 = vld [vmem:[%s6116_s0 + $0xd0] ss:$100 sps:$4 sm:$0xff]  }
  0x58   :  { %3113 = vmatpush1.bf16.msra.mxu0 %v4190_v27  ;;  %2796 = vmatprep.subr.bf16.mxu1 %v4195_v29  ;;  %v4360_v27 = vld [vmem:[%s6116_s0 + $0x100] ss:$100 sps:$4 sm:$0xff]   ;;  %v4288_v29 = vld [vmem:[%s6115_s1 + $0x834] ss:$8 sps:$4 sm:$0xff]  }
  0x59   :  { %3114 = vmatprep.subr.bf16.mxu0 %v4198_v30  ;;  %v4283_v30 = vld [vmem:[%s6115_s1 + $0x230] ss:$8 sps:$4 sm:$0xff]  }
  0x5b   :  { %2797 = vmatpush1.bf16.msra.mxu1 %v4193_v32  ;;  %v4369_v32 = vld [vmem:[%s6116_s0 + $0x14] ss:$100 sps:$4 sm:$0xff]  }
  0x5c   :  { %3115 = vmatpush1.bf16.msra.mxu0 %v4196_v33  ;;  %2798 = vmatprep.subr.bf16.mxu1 %v4201_v36  ;;  %v4291_v33 = vld [vmem:[%s6115_s1 + $0x244] ss:$8 sps:$4 sm:$0xff]   ;;  %v4289_v36 = vld [vmem:[%s6115_s1 + $0x240] ss:$8 sps:$4 sm:$0xff]  }
  0x5d   :  { %3116 = vmatprep.subr.bf16.mxu0 %v4204_v37  ;;  %v4292_v37 = vld [vmem:[%s6115_s1 + $0x840] ss:$8 sps:$4 sm:$0xff]  }
  0x5f   :  { %2799 = vmatpush1.bf16.msra.mxu1 %v4199_v38  ;;  %v4297_v38 = vld [vmem:[%s6115_s1 + $0x254] ss:$8 sps:$4 sm:$0xff]  }
  0x60   :  { %3117 = vmatpush1.bf16.msra.mxu0 %v4202_v39  ;;  %2800 = vmatprep.subr.bf16.mxu1 %v4207_v41  ;;  %v4300_v39 = vld [vmem:[%s6115_s1 + $0x854] ss:$8 sps:$4 sm:$0xff]   ;;  %v4298_v41 = vld [vmem:[%s6115_s1 + $0x850] ss:$8 sps:$4 sm:$0xff]  }
  0x61   :  { %3118 = vmatprep.subr.bf16.mxu0 %v4210_v42  ;;  %v4303_v42 = vld [vmem:[%s6115_s1 + $0x264] ss:$8 sps:$4 sm:$0xff]  }
  0x63   :  { %2801 = vmatpush1.bf16.msra.mxu1 %v4205_v44  ;;  %v4301_v44 = vld [vmem:[%s6115_s1 + $0x260] ss:$8 sps:$4 sm:$0xff]  }
  0x64   :  { %3119 = vmatpush1.bf16.msra.mxu0 %v4208_v45  ;;  %2802 = vmatprep.subr.bf16.mxu1 %v4213_v46  ;;  %v4304_v45 = vld [vmem:[%s6115_s1 + $0x860] ss:$8 sps:$4 sm:$0xff]   ;;  %v4309_v46 = vld [vmem:[%s6115_s1 + $0x274] ss:$8 sps:$4 sm:$0xff]  }
  0x65   :  { %3120 = vmatprep.subr.bf16.mxu0 %v4216_v47  ;;  %v4312_v47 = vld [vmem:[%s6115_s1 + $0x874] ss:$8 sps:$4 sm:$0xff]  }
  0x67   :  { %2803 = vmatpush1.bf16.msra.mxu1 %v4211_v48  ;;  %v4307_v48 = vld [vmem:[%s6115_s1 + $0x270] ss:$8 sps:$4 sm:$0xff]  }
  0x68   :  { %3121 = vmatpush1.bf16.msra.mxu0 %v4214_v49  ;;  %2804 = vmatprep.subr.bf16.mxu1 %v4219_v50  ;;  %v4310_v49 = vld [vmem:[%s6115_s1 + $0x870] ss:$8 sps:$4 sm:$0xff]   ;;  %v4315_v50 = vld [vmem:[%s6115_s1 + $0x284] ss:$8 sps:$4 sm:$0xff]  }
  0x69   :  { %3122 = vmatprep.subr.bf16.mxu0 %v4222_v51  ;;  %v4318_v51 = vld [vmem:[%s6115_s1 + $0x884] ss:$8 sps:$4 sm:$0xff]  }
  0x6b   :  { %2805 = vmatpush1.bf16.msra.mxu1 %v4217_v52  ;;  %v4313_v52 = vld [vmem:[%s6115_s1 + $0x280] ss:$8 sps:$4 sm:$0xff]  }
  0x6c   :  { %3123 = vmatpush1.bf16.msra.mxu0 %v4220_v53  ;;  %2806 = vmatprep.subr.bf16.mxu1 %v4225_v54  ;;  %v4316_v53 = vld [vmem:[%s6115_s1 + $0x880] ss:$8 sps:$4 sm:$0xff]   ;;  %v4321_v54 = vld [vmem:[%s6115_s1 + $0x294] ss:$8 sps:$4 sm:$0xff]  }
  0x6d   :  { %3124 = vmatprep.subr.bf16.mxu0 %v4228_v55  ;;  %v4324_v55 = vld [vmem:[%s6115_s1 + $0x894] ss:$8 sps:$4 sm:$0xff]  }
  0x6f   :  { %2807 = vmatpush1.bf16.msra.mxu1 %v4223_v56  ;;  %v4319_v56 = vld [vmem:[%s6115_s1 + $0x290] ss:$8 sps:$4 sm:$0xff]  }
  0x70   :  { %3125 = vmatpush1.bf16.msra.mxu0 %v4226_v57  ;;  %2808 = vmatprep.subr.bf16.mxu1 %v4231_v58  ;;  %v4322_v57 = vld [vmem:[%s6115_s1 + $0x890] ss:$8 sps:$4 sm:$0xff]   ;;  %v4327_v58 = vld [vmem:[%s6115_s1 + $0x2a4] ss:$8 sps:$4 sm:$0xff]  }
  0x71   :  { %3126 = vmatprep.subr.bf16.mxu0 %v4234_v59  ;;  %v4330_v59 = vld [vmem:[%s6115_s1 + $0x8a4] ss:$8 sps:$4 sm:$0xff]  }
  0x73   :  { %2809 = vmatpush1.bf16.msra.mxu1 %v4229_v60  ;;  %v4325_v60 = vld [vmem:[%s6115_s1 + $0x2a0] ss:$8 sps:$4 sm:$0xff]  }
  0x74   :  { %3127 = vmatpush1.bf16.msra.mxu0 %v4232_v61  ;;  %2810 = vmatprep.subr.bf16.mxu1 %v4237_v62  ;;  %v4328_v61 = vld [vmem:[%s6115_s1 + $0x8a0] ss:$8 sps:$4 sm:$0xff]   ;;  %v4333_v62 = vld [vmem:[%s6115_s1 + $0x2b4] ss:$8 sps:$4 sm:$0xff]  }
  0x75   :  { %3128 = vmatprep.subr.bf16.mxu0 %v4240_v63  ;;  %v4336_v63 = vld [vmem:[%s6115_s1 + $0x8b4] ss:$8 sps:$4 sm:$0xff]  }
  0x77   :  { %2811 = vmatpush1.bf16.msra.mxu1 %v4235_v0  ;;  %v4331_v0 = vld [vmem:[%s6115_s1 + $0x2b0] ss:$8 sps:$4 sm:$0xff]  }
  0x78   :  { %3129 = vmatpush1.bf16.msra.mxu0 %v4238_v1  ;;  %2812 = vmatprep.subr.bf16.mxu1 %v4245_v2  ;;  %v4334_v1 = vld [vmem:[%s6115_s1 + $0x8b0] ss:$8 sps:$4 sm:$0xff]   ;;  %v4339_v2 = vld [vmem:[%s6115_s1 + $0x2c4] ss:$8 sps:$4 sm:$0xff]  }
  0x79   :  { %3130 = vmatprep.subr.bf16.mxu0 %v4250_v3  ;;  %v4342_v3 = vld [vmem:[%s6115_s1 + $0x8c4] ss:$8 sps:$4 sm:$0xff]  }
  0x7b   :  { %2813 = vmatpush1.bf16.msra.mxu1 %v4243_v4  ;;  %v4337_v4 = vld [vmem:[%s6115_s1 + $0x2c0] ss:$8 sps:$4 sm:$0xff]  }
  0x7c   :  { %3131 = vmatpush1.bf16.msra.mxu0 %v4248_v5  ;;  %2814 = vmatprep.subr.bf16.mxu1 %v4255_v6  ;;  %v4340_v5 = vld [vmem:[%s6115_s1 + $0x8c0] ss:$8 sps:$4 sm:$0xff]   ;;  %v4345_v6 = vld [vmem:[%s6115_s1 + $0x2d4] ss:$8 sps:$4 sm:$0xff]  }
  0x7d   :  { %3132 = vmatprep.subr.bf16.mxu0 %v4258_v7  ;;  %v4348_v7 = vld [vmem:[%s6115_s1 + $0x8d4] ss:$8 sps:$4 sm:$0xff]  }
  0x7f   :  { %2815 = vmatpush1.bf16.msra.mxu1 %v4253_v8  ;;  %v4343_v8 = vld [vmem:[%s6115_s1 + $0x2d0] ss:$8 sps:$4 sm:$0xff]  }
  0x80   :  { %3133 = vmatpush1.bf16.msra.mxu0 %v4256_v9  ;;  %2837 = vmatprep.subr.bf16.mxu1 %v4264_v10  ;;  %v4346_v9 = vld [vmem:[%s6115_s1 + $0x8d0] ss:$8 sps:$4 sm:$0xff]   ;;  %v4353_v10 = vld [vmem:[%s6115_s1 + $0x2e4] ss:$8 sps:$4 sm:$0xff]  }
  0x81   :  { %3155 = vmatprep.subr.bf16.mxu0 %v4270_v11  ;;  %v4358_v11 = vld [vmem:[%s6115_s1 + $0x8e4] ss:$8 sps:$4 sm:$0xff]  }
  0x82   :  { %2817 = vmatmul.mubr.bf16.vlgmr.msra.gmra.mrb[0].mxu1 %v4259_v12  ;;  %v4351_v12 = vld [vmem:[%s6115_s1 + $0x2e0] ss:$8 sps:$4 sm:$0xff]  }
  0x83   :  { %3135 = vmatmul.mubr.bf16.vlgmr.msra.gmra.mrb[0].mxu0 %v4265_v14  ;;  %2838 = vmatpush1.bf16.msra.mxu1 %v4262_v13  ;;  %v4356_v13 = vld [vmem:[%s6115_s1 + $0x8e0] ss:$8 sps:$4 sm:$0xff]   ;;  %v4363_v14 = vld [vmem:[%s6115_s1 + $0x2f4] ss:$8 sps:$4 sm:$0xff]  }
  0x84   :  { %3156 = vmatpush1.bf16.msra.mxu0 %v4268_v15  ;;  %2839 = vmatprep.subr.bf16.mxu1 %v4273_v16  ;;  %v4366_v15 = vld [vmem:[%s6115_s1 + $0x8f4] ss:$8 sps:$4 sm:$0xff]   ;;  %v4361_v16 = vld [vmem:[%s6115_s1 + $0x2f0] ss:$8 sps:$4 sm:$0xff]  }
  0x85   :  { %3157 = vmatprep.subr.bf16.mxu0 %v4276_v17  ;;  %2826 = vmatprep.mubr.bf16.mxu1 %v4349_v20  ;;  %v4364_v17 = vld [vmem:[%s6115_s1 + $0x8f0] ss:$8 sps:$4 sm:$0xff]  }
  0x86   :  { %3144 = vmatprep.mubr.bf16.mxu0 %v4354_v23  ;;  %v4367_v20 = vld [vmem:[%s6116_s0 + $0x10] ss:$100 sps:$4 sm:$0xff]   ;;  %v4376_v23 = vld [vmem:[%s6115_s1 + $0x900] ss:$8 sps:$4 sm:$0xff]  }
  0x87   :  { %2840 = vmatpush1.bf16.msra.mxu1 %v4271_v18  ;;  %v4372_v18 = vld [vmem:[%s6115_s1 + $0x304] ss:$8 sps:$4 sm:$0xff]  }
  0x88   :  { %3158 = vmatpush1.bf16.msra.mxu0 %v4274_v19  ;;  %2841 = vmatprep.subr.bf16.mxu1 %v4279_v21  ;;  %v4378_v19 = vld [vmem:[%s6115_s1 + $0x904] ss:$8 sps:$4 sm:$0xff]   ;;  %v4370_v21 = vld [vmem:[%s6115_s1 + $0x300] ss:$8 sps:$4 sm:$0xff]  }
  0x89   :  { %3159 = vmatprep.subr.bf16.mxu0 %v4282_v22  ;;  %v4373_v22 = vld [vmem:[%s6116_s0 + $0x40] ss:$100 sps:$4 sm:$0xff]  }
  0x8a   :  { %2827 = vmatmul.mubr.bf16.gmra.mrb[4].mxu1 %v4359_v26  ;;  %v4457_v26 = vld [vmem:[%s6116_s0 + $0xdc] ss:$100 sps:$4 sm:$0xff]  }
  0x8b   :  { %3145 = vmatmul.mubr.bf16.gmra.mrb[4].mxu0 %v4360_v27  ;;  %2842 = vmatpush1.bf16.msra.mxu1 %v4277_v24  ;;  %v4381_v24 = vld [vmem:[%s6115_s1 + $0x314] ss:$8 sps:$4 sm:$0xff]   ;;  %v4462_v27 = vld [vmem:[%s6116_s0 + $0x10c] ss:$100 sps:$4 sm:$0xff]  }
  0x8c   :  { %3160 = vmatpush1.bf16.msra.mxu0 %v4280_v25  ;;  %2843 = vmatprep.subr.bf16.mxu1 %v4285_v28  ;;  %v4384_v25 = vld [vmem:[%s6115_s1 + $0x914] ss:$8 sps:$4 sm:$0xff]   ;;  %v4379_v28 = vld [vmem:[%s6115_s1 + $0x310] ss:$8 sps:$4 sm:$0xff]  }
  0x8d   :  { %3161 = vmatprep.subr.bf16.mxu0 %v4288_v29  ;;  %2869 = vmatprep.mubr.bf16.mxu1 %v4369_v32  ;;  %v4382_v29 = vld [vmem:[%s6115_s1 + $0x910] ss:$8 sps:$4 sm:$0xff]   ;;  %v4385_v32 = vld [vmem:[%s6115_s1 + $0x320] ss:$8 sps:$4 sm:$0xff]  }
  0x8e   :  { %3187 = vmatprep.mubr.bf16.mxu0 %v4375_v35  ;;  %v4468_v35 = vld [vmem:[%s6116_s0 + $0x108] ss:$100 sps:$4 sm:$0xff]  }
  0x8f   :  { %2844 = vmatpush1.bf16.msra.mxu1 %v4283_v30  ;;  %v4387_v30 = vld [vmem:[%s6115_s1 + $0x324] ss:$8 sps:$4 sm:$0xff]  }
  0x90   :  { %3162 = vmatpush1.bf16.msra.mxu0 %v4286_v31  ;;  %2845 = vmatprep.subr.bf16.mxu1 %v4291_v33  ;;  %v4390_v31 = vld [vmem:[%s6115_s1 + $0x924] ss:$8 sps:$4 sm:$0xff]   ;;  %v4388_v33 = vld [vmem:[%s6115_s1 + $0x920] ss:$8 sps:$4 sm:$0xff]  }
  0x91   :  { %3163 = vmatprep.subr.bf16.mxu0 %v4294_v34  ;;  %v4467_v34 = vld [vmem:[%s6116_s0 + $0xd8] ss:$100 sps:$4 sm:$0xff]  }
  0x93   :  { %2846 = vmatpush1.bf16.msra.mxu1 %v4289_v36  ;;  %v4393_v36 = vld [vmem:[%s6115_s1 + $0x334] ss:$8 sps:$4 sm:$0xff]  }
  0x94   :  { %3164 = vmatpush1.bf16.msra.mxu0 %v4292_v37  ;;  %2847 = vmatprep.subr.bf16.mxu1 %v4297_v38  ;;  %v4396_v37 = vld [vmem:[%s6115_s1 + $0x934] ss:$8 sps:$4 sm:$0xff]  }
  0x95   :  { %3165 = vmatprep.subr.bf16.mxu0 %v4300_v39  ;;  %v4477_v38 = vld [vmem:[%s6116_s0 + $0x1c] ss:$100 sps:$4 sm:$0xff]   ;;  %v4483_v39 = vld [vmem:[%s6116_s0 + $0x4c] ss:$100 sps:$4 sm:$0xff]  }
  0x97   :  { %2848 = vmatpush1.bf16.msra.mxu1 %v4295_v40  ;;  %v4391_v40 = vld [vmem:[%s6115_s1 + $0x330] ss:$8 sps:$4 sm:$0xff]  }
  0x98   :  { %3166 = vmatpush1.bf16.msra.mxu0 %v4298_v41  ;;  %2849 = vmatprep.subr.bf16.mxu1 %v4303_v42  ;;  %v4394_v41 = vld [vmem:[%s6115_s1 + $0x930] ss:$8 sps:$4 sm:$0xff]   ;;  %v4399_v42 = vld [vmem:[%s6115_s1 + $0x344] ss:$8 sps:$4 sm:$0xff]  }
  0x99   :  { %3167 = vmatprep.subr.bf16.mxu0 %v4306_v43  ;;  %v4402_v43 = vld [vmem:[%s6115_s1 + $0x944] ss:$8 sps:$4 sm:$0xff]  }
  0x9b   :  { %2850 = vmatpush1.bf16.msra.mxu1 %v4301_v44  ;;  %v4397_v44 = vld [vmem:[%s6115_s1 + $0x340] ss:$8 sps:$4 sm:$0xff]  }
  0x9c   :  { %3168 = vmatpush1.bf16.msra.mxu0 %v4304_v45  ;;  %2851 = vmatprep.subr.bf16.mxu1 %v4309_v46  ;;  %v4400_v45 = vld [vmem:[%s6115_s1 + $0x940] ss:$8 sps:$4 sm:$0xff]   ;;  %v4405_v46 = vld [vmem:[%s6115_s1 + $0x354] ss:$8 sps:$4 sm:$0xff]  }
  0x9d   :  { %3169 = vmatprep.subr.bf16.mxu0 %v4312_v47  ;;  %v4408_v47 = vld [vmem:[%s6115_s1 + $0x954] ss:$8 sps:$4 sm:$0xff]  }
  0x9f   :  { %2852 = vmatpush1.bf16.msra.mxu1 %v4307_v48  ;;  %v4403_v48 = vld [vmem:[%s6115_s1 + $0x350] ss:$8 sps:$4 sm:$0xff]  }
  0xa0   :  { %3170 = vmatpush1.bf16.msra.mxu0 %v4310_v49  ;;  %2853 = vmatprep.subr.bf16.mxu1 %v4315_v50  ;;  %v4406_v49 = vld [vmem:[%s6115_s1 + $0x950] ss:$8 sps:$4 sm:$0xff]   ;;  %v4411_v50 = vld [vmem:[%s6115_s1 + $0x364] ss:$8 sps:$4 sm:$0xff]  }
  0xa1   :  { %3171 = vmatprep.subr.bf16.mxu0 %v4318_v51  ;;  %v4414_v51 = vld [vmem:[%s6115_s1 + $0x964] ss:$8 sps:$4 sm:$0xff]  }
  0xa3   :  { %2854 = vmatpush1.bf16.msra.mxu1 %v4313_v52  ;;  %v4409_v52 = vld [vmem:[%s6115_s1 + $0x360] ss:$8 sps:$4 sm:$0xff]  }
  0xa4   :  { %3172 = vmatpush1.bf16.msra.mxu0 %v4316_v53  ;;  %2855 = vmatprep.subr.bf16.mxu1 %v4321_v54  ;;  %v4412_v53 = vld [vmem:[%s6115_s1 + $0x960] ss:$8 sps:$4 sm:$0xff]   ;;  %v4417_v54 = vld [vmem:[%s6115_s1 + $0x374] ss:$8 sps:$4 sm:$0xff]  }
  0xa5   :  { %3173 = vmatprep.subr.bf16.mxu0 %v4324_v55  ;;  %v4420_v55 = vld [vmem:[%s6115_s1 + $0x974] ss:$8 sps:$4 sm:$0xff]  }
  0xa7   :  { %2856 = vmatpush1.bf16.msra.mxu1 %v4319_v56  ;;  %v4415_v56 = vld [vmem:[%s6115_s1 + $0x370] ss:$8 sps:$4 sm:$0xff]  }
  0xa8   :  { %3174 = vmatpush1.bf16.msra.mxu0 %v4322_v57  ;;  %2857 = vmatprep.subr.bf16.mxu1 %v4327_v58  ;;  %v4418_v57 = vld [vmem:[%s6115_s1 + $0x970] ss:$8 sps:$4 sm:$0xff]   ;;  %v4423_v58 = vld [vmem:[%s6115_s1 + $0x384] ss:$8 sps:$4 sm:$0xff]  }
  0xa9   :  { %3175 = vmatprep.subr.bf16.mxu0 %v4330_v59  ;;  %v4426_v59 = vld [vmem:[%s6115_s1 + $0x984] ss:$8 sps:$4 sm:$0xff]  }
  0xab   :  { %2858 = vmatpush1.bf16.msra.mxu1 %v4325_v60  ;;  %v4421_v60 = vld [vmem:[%s6115_s1 + $0x380] ss:$8 sps:$4 sm:$0xff]  }
  0xac   :  { %3176 = vmatpush1.bf16.msra.mxu0 %v4328_v61  ;;  %2859 = vmatprep.subr.bf16.mxu1 %v4333_v62  ;;  %v4424_v61 = vld [vmem:[%s6115_s1 + $0x980] ss:$8 sps:$4 sm:$0xff]   ;;  %v4429_v62 = vld [vmem:[%s6115_s1 + $0x394] ss:$8 sps:$4 sm:$0xff]  }
  0xad   :  { %3177 = vmatprep.subr.bf16.mxu0 %v4336_v63  ;;  %v4432_v63 = vld [vmem:[%s6115_s1 + $0x994] ss:$8 sps:$4 sm:$0xff]  }
  0xaf   :  { %2860 = vmatpush1.bf16.msra.mxu1 %v4331_v0  ;;  %v4427_v0 = vld [vmem:[%s6115_s1 + $0x390] ss:$8 sps:$4 sm:$0xff]  }
  0xb0   :  { %3178 = vmatpush1.bf16.msra.mxu0 %v4334_v1  ;;  %2861 = vmatprep.subr.bf16.mxu1 %v4339_v2  ;;  %v4430_v1 = vld [vmem:[%s6115_s1 + $0x990] ss:$8 sps:$4 sm:$0xff]   ;;  %v4435_v2 = vld [vmem:[%s6115_s1 + $0x3a4] ss:$8 sps:$4 sm:$0xff]  }
  0xb1   :  { %3179 = vmatprep.subr.bf16.mxu0 %v4342_v3  ;;  %v4438_v3 = vld [vmem:[%s6115_s1 + $0x9a4] ss:$8 sps:$4 sm:$0xff]  }
  0xb3   :  { %2862 = vmatpush1.bf16.msra.mxu1 %v4337_v4  ;;  %v4433_v4 = vld [vmem:[%s6115_s1 + $0x3a0] ss:$8 sps:$4 sm:$0xff]  }
  0xb4   :  { %3180 = vmatpush1.bf16.msra.mxu0 %v4340_v5  ;;  %2863 = vmatprep.subr.bf16.mxu1 %v4345_v6  ;;  %v4436_v5 = vld [vmem:[%s6115_s1 + $0x9a0] ss:$8 sps:$4 sm:$0xff]   ;;  %v4441_v6 = vld [vmem:[%s6115_s1 + $0x3b4] ss:$8 sps:$4 sm:$0xff]  }
  0xb5   :  { %3181 = vmatprep.subr.bf16.mxu0 %v4348_v7  ;;  %v4444_v7 = vld [vmem:[%s6115_s1 + $0x9b4] ss:$8 sps:$4 sm:$0xff]  }
  0xb7   :  { %2864 = vmatpush1.bf16.msra.mxu1 %v4343_v8  ;;  %v4439_v8 = vld [vmem:[%s6115_s1 + $0x3b0] ss:$8 sps:$4 sm:$0xff]  }
  0xb8   :  { %3182 = vmatpush1.bf16.msra.mxu0 %v4346_v9  ;;  %2865 = vmatprep.subr.bf16.mxu1 %v4353_v10  ;;  %v4442_v9 = vld [vmem:[%s6115_s1 + $0x9b0] ss:$8 sps:$4 sm:$0xff]   ;;  %v4447_v10 = vld [vmem:[%s6115_s1 + $0x3c4] ss:$8 sps:$4 sm:$0xff]  }
  0xb9   :  { %3183 = vmatprep.subr.bf16.mxu0 %v4358_v11  ;;  %v4450_v11 = vld [vmem:[%s6115_s1 + $0x9c4] ss:$8 sps:$4 sm:$0xff]  }
  0xbb   :  { %2866 = vmatpush1.bf16.msra.mxu1 %v4351_v12  ;;  %v4445_v12 = vld [vmem:[%s6115_s1 + $0x3c0] ss:$8 sps:$4 sm:$0xff]  }
  0xbc   :  { %3184 = vmatpush1.bf16.msra.mxu0 %v4356_v13  ;;  %2867 = vmatprep.subr.bf16.mxu1 %v4363_v14  ;;  %v4448_v13 = vld [vmem:[%s6115_s1 + $0x9c0] ss:$8 sps:$4 sm:$0xff]   ;;  %v4453_v14 = vld [vmem:[%s6115_s1 + $0x3d4] ss:$8 sps:$4 sm:$0xff]  }
  0xbd   :  { %3185 = vmatprep.subr.bf16.mxu0 %v4366_v15  ;;  %v4456_v15 = vld [vmem:[%s6115_s1 + $0x9d4] ss:$8 sps:$4 sm:$0xff]  }
  0xbf   :  { %2868 = vmatpush1.bf16.msra.mxu1 %v4361_v16  ;;  %v4451_v16 = vld [vmem:[%s6115_s1 + $0x3d0] ss:$8 sps:$4 sm:$0xff]  }
  0xc0   :  { %3186 = vmatpush1.bf16.msra.mxu0 %v4364_v17  ;;  %2890 = vmatprep.subr.bf16.mxu1 %v4372_v18  ;;  %v4454_v17 = vld [vmem:[%s6115_s1 + $0x9d0] ss:$8 sps:$4 sm:$0xff]   ;;  %v4461_v18 = vld [vmem:[%s6115_s1 + $0x3e4] ss:$8 sps:$4 sm:$0xff]  }
  0xc1   :  { %3208 = vmatprep.subr.bf16.mxu0 %v4378_v19  ;;  %v4466_v19 = vld [vmem:[%s6115_s1 + $0x9e4] ss:$8 sps:$4 sm:$0xff]  }
  0xc2   :  { %2870 = vmatmul.mubr.bf16.vlgmr.msra.gmra.mrb[0].mxu1 %v4367_v20  ;;  %v4459_v20 = vld [vmem:[%s6115_s1 + $0x3e0] ss:$8 sps:$4 sm:$0xff]  }
  0xc3   :  { %3188 = vmatmul.mubr.bf16.vlgmr.msra.gmra.mrb[0].mxu0 %v4373_v22  ;;  %2891 = vmatpush1.bf16.msra.mxu1 %v4370_v21  ;;  %v4464_v21 = vld [vmem:[%s6115_s1 + $0x9e0] ss:$8 sps:$4 sm:$0xff]   ;;  %v4471_v22 = vld [vmem:[%s6115_s1 + $0x3f4] ss:$8 sps:$4 sm:$0xff]  }
  0xc4   :  { %3209 = vmatpush1.bf16.msra.mxu0 %v4376_v23  ;;  %2892 = vmatprep.subr.bf16.mxu1 %v4381_v24  ;;  %v4474_v23 = vld [vmem:[%s6115_s1 + $0x9f4] ss:$8 sps:$4 sm:$0xff]   ;;  %v4469_v24 = vld [vmem:[%s6115_s1 + $0x3f0] ss:$8 sps:$4 sm:$0xff]  }
  0xc5   :  { %3210 = vmatprep.subr.bf16.mxu0 %v4384_v25  ;;  %2879 = vmatprep.mubr.bf16.mxu1 %v4457_v26  ;;  %v4472_v25 = vld [vmem:[%s6115_s1 + $0x9f0] ss:$8 sps:$4 sm:$0xff]   ;;  %v4480_v26 = vld [vmem:[%s6115_s1 + $0x404] ss:$8 sps:$4 sm:$0xff]  }
  0xc6   :  { %3197 = vmatprep.mubr.bf16.mxu0 %v4462_v27  ;;  %v4486_v27 = vld [vmem:[%s6115_s1 + $0xa04] ss:$8 sps:$4 sm:$0xff]  }
  0xc7   :  { %2893 = vmatpush1.bf16.msra.mxu1 %v4379_v28  ;;  %v4475_v28 = vld [vmem:[%s6116_s0 + $0x18] ss:$100 sps:$4 sm:$0xff]  }
  0xc8   :  { %3211 = vmatpush1.bf16.msra.mxu0 %v4382_v29  ;;  %2894 = vmatprep.subr.bf16.mxu1 %v4387_v30  ;;  %v4478_v29 = vld [vmem:[%s6115_s1 + $0x400] ss:$8 sps:$4 sm:$0xff]  }
  0xc9   :  { %3212 = vmatprep.subr.bf16.mxu0 %v4390_v31  ;;  %v4481_v30 = vld [vmem:[%s6116_s0 + $0x48] ss:$100 sps:$4 sm:$0xff]  }
  0xca   :  { %2880 = vmatmul.mubr.bf16.gmra.mrb[4].mxu1 %v4467_v34  ;;  %v4484_v31 = vld [vmem:[%s6115_s1 + $0xa00] ss:$8 sps:$4 sm:$0xff]  }
  0xcb   :  { %3198 = vmatmul.mubr.bf16.gmra.mrb[4].mxu0 %v4468_v35  ;;  %2895 = vmatpush1.bf16.msra.mxu1 %v4385_v32  ;;  %v4489_v32 = vld [vmem:[%s6115_s1 + $0x414] ss:$8 sps:$4 sm:$0xff]   ;;  %v4565_v34 = vld [vmem:[%s6116_s0 + $0xe4] ss:$100 sps:$4 sm:$0xff]  }
  0xcc   :  { %3213 = vmatpush1.bf16.msra.mxu0 %v4388_v33  ;;  %2896 = vmatprep.subr.bf16.mxu1 %v4393_v36  ;;  %v4492_v33 = vld [vmem:[%s6115_s1 + $0xa14] ss:$8 sps:$4 sm:$0xff]   ;;  %v4487_v36 = vld [vmem:[%s6115_s1 + $0x410] ss:$8 sps:$4 sm:$0xff]  }
  0xcd   :  { %3214 = vmatprep.subr.bf16.mxu0 %v4396_v37  ;;  %2922 = vmatprep.mubr.bf16.mxu1 %v4477_v38  ;;  %v4570_v35 = vld [vmem:[%s6116_s0 + $0x114] ss:$100 sps:$4 sm:$0xff]   ;;  %v4495_v38 = vld [vmem:[%s6115_s1 + $0x424] ss:$8 sps:$4 sm:$0xff]  }
  0xce   :  { %3240 = vmatprep.mubr.bf16.mxu0 %v4483_v39  ;;  %v4490_v37 = vld [vmem:[%s6115_s1 + $0xa10] ss:$8 sps:$4 sm:$0xff]   ;;  %v4498_v39 = vld [vmem:[%s6115_s1 + $0xa24] ss:$8 sps:$4 sm:$0xff]  }
  0xcf   :  { %2897 = vmatpush1.bf16.msra.mxu1 %v4391_v40  ;;  %v4493_v40 = vld [vmem:[%s6115_s1 + $0x420] ss:$8 sps:$4 sm:$0xff]  }
  0xd0   :  { %3215 = vmatpush1.bf16.msra.mxu0 %v4394_v41  ;;  %2898 = vmatprep.subr.bf16.mxu1 %v4399_v42  ;;  %v4496_v41 = vld [vmem:[%s6115_s1 + $0xa20] ss:$8 sps:$4 sm:$0xff]  }
  0xd1   :  { %3216 = vmatprep.subr.bf16.mxu0 %v4402_v43  ;;  %v4575_v42 = vld [vmem:[%s6116_s0 + $0xe0] ss:$100 sps:$4 sm:$0xff]   ;;  %v4576_v43 = vld [vmem:[%s6116_s0 + $0x110] ss:$100 sps:$4 sm:$0xff]  }
  0xd3   :  { %2899 = vmatpush1.bf16.msra.mxu1 %v4397_v44  ;;  %v4501_v44 = vld [vmem:[%s6115_s1 + $0x434] ss:$8 sps:$4 sm:$0xff]  }
  0xd4   :  { %3217 = vmatpush1.bf16.msra.mxu0 %v4400_v45  ;;  %2900 = vmatprep.subr.bf16.mxu1 %v4405_v46  ;;  %v4504_v45 = vld [vmem:[%s6115_s1 + $0xa34] ss:$8 sps:$4 sm:$0xff]   ;;  %v4585_v46 = vld [vmem:[%s6116_s0 + $0x24] ss:$100 sps:$4 sm:$0xff]  }
  0xd5   :  { %3218 = vmatprep.subr.bf16.mxu0 %v4408_v47  ;;  %v4591_v47 = vld [vmem:[%s6116_s0 + $0x54] ss:$100 sps:$4 sm:$0xff]  }
  0xd7   :  { %2901 = vmatpush1.bf16.msra.mxu1 %v4403_v48  ;;  %v4499_v48 = vld [vmem:[%s6115_s1 + $0x430] ss:$8 sps:$4 sm:$0xff]  }
  0xd8   :  { %3219 = vmatpush1.bf16.msra.mxu0 %v4406_v49  ;;  %2902 = vmatprep.subr.bf16.mxu1 %v4411_v50  ;;  %v4502_v49 = vld [vmem:[%s6115_s1 + $0xa30] ss:$8 sps:$4 sm:$0xff]   ;;  %v4507_v50 = vld [vmem:[%s6115_s1 + $0x444] ss:$8 sps:$4 sm:$0xff]  }
  0xd9   :  { %3220 = vmatprep.subr.bf16.mxu0 %v4414_v51  ;;  %v4510_v51 = vld [vmem:[%s6115_s1 + $0xa44] ss:$8 sps:$4 sm:$0xff]  }
  0xdb   :  { %2903 = vmatpush1.bf16.msra.mxu1 %v4409_v52  ;;  %v4505_v52 = vld [vmem:[%s6115_s1 + $0x440] ss:$8 sps:$4 sm:$0xff]  }
  0xdc   :  { %3221 = vmatpush1.bf16.msra.mxu0 %v4412_v53  ;;  %2904 = vmatprep.subr.bf16.mxu1 %v4417_v54  ;;  %v4508_v53 = vld [vmem:[%s6115_s1 + $0xa40] ss:$8 sps:$4 sm:$0xff]   ;;  %v4513_v54 = vld [vmem:[%s6115_s1 + $0x454] ss:$8 sps:$4 sm:$0xff]  }
  0xdd   :  { %3222 = vmatprep.subr.bf16.mxu0 %v4420_v55  ;;  %v4516_v55 = vld [vmem:[%s6115_s1 + $0xa54] ss:$8 sps:$4 sm:$0xff]  }
  0xdf   :  { %2905 = vmatpush1.bf16.msra.mxu1 %v4415_v56  ;;  %v4511_v56 = vld [vmem:[%s6115_s1 + $0x450] ss:$8 sps:$4 sm:$0xff]  }
  0xe0   :  { %3223 = vmatpush1.bf16.msra.mxu0 %v4418_v57  ;;  %2906 = vmatprep.subr.bf16.mxu1 %v4423_v58  ;;  %v4514_v57 = vld [vmem:[%s6115_s1 + $0xa50] ss:$8 sps:$4 sm:$0xff]   ;;  %v4519_v58 = vld [vmem:[%s6115_s1 + $0x464] ss:$8 sps:$4 sm:$0xff]  }
  0xe1   :  { %3224 = vmatprep.subr.bf16.mxu0 %v4426_v59  ;;  %v4522_v59 = vld [vmem:[%s6115_s1 + $0xa64] ss:$8 sps:$4 sm:$0xff]  }
  0xe3   :  { %2907 = vmatpush1.bf16.msra.mxu1 %v4421_v60  ;;  %v4517_v60 = vld [vmem:[%s6115_s1 + $0x460] ss:$8 sps:$4 sm:$0xff]  }
  0xe4   :  { %3225 = vmatpush1.bf16.msra.mxu0 %v4424_v61  ;;  %2908 = vmatprep.subr.bf16.mxu1 %v4429_v62  ;;  %v4520_v61 = vld [vmem:[%s6115_s1 + $0xa60] ss:$8 sps:$4 sm:$0xff]   ;;  %v4525_v62 = vld [vmem:[%s6115_s1 + $0x474] ss:$8 sps:$4 sm:$0xff]  }
  0xe5   :  { %3226 = vmatprep.subr.bf16.mxu0 %v4432_v63  ;;  %v4528_v63 = vld [vmem:[%s6115_s1 + $0xa74] ss:$8 sps:$4 sm:$0xff]  }
  0xe7   :  { %2909 = vmatpush1.bf16.msra.mxu1 %v4427_v0  ;;  %v4523_v0 = vld [vmem:[%s6115_s1 + $0x470] ss:$8 sps:$4 sm:$0xff]  }
  0xe8   :  { %3227 = vmatpush1.bf16.msra.mxu0 %v4430_v1  ;;  %2910 = vmatprep.subr.bf16.mxu1 %v4435_v2  ;;  %v4526_v1 = vld [vmem:[%s6115_s1 + $0xa70] ss:$8 sps:$4 sm:$0xff]   ;;  %v4531_v2 = vld [vmem:[%s6115_s1 + $0x484] ss:$8 sps:$4 sm:$0xff]  }
  0xe9   :  { %3228 = vmatprep.subr.bf16.mxu0 %v4438_v3  ;;  %v4534_v3 = vld [vmem:[%s6115_s1 + $0xa84] ss:$8 sps:$4 sm:$0xff]  }
  0xeb   :  { %2911 = vmatpush1.bf16.msra.mxu1 %v4433_v4  ;;  %v4529_v4 = vld [vmem:[%s6115_s1 + $0x480] ss:$8 sps:$4 sm:$0xff]  }
  0xec   :  { %3229 = vmatpush1.bf16.msra.mxu0 %v4436_v5  ;;  %2912 = vmatprep.subr.bf16.mxu1 %v4441_v6  ;;  %v4532_v5 = vld [vmem:[%s6115_s1 + $0xa80] ss:$8 sps:$4 sm:$0xff]   ;;  %v4537_v6 = vld [vmem:[%s6115_s1 + $0x494] ss:$8 sps:$4 sm:$0xff]  }
  0xed   :  { %3230 = vmatprep.subr.bf16.mxu0 %v4444_v7  ;;  %v4540_v7 = vld [vmem:[%s6115_s1 + $0xa94] ss:$8 sps:$4 sm:$0xff]  }
  0xef   :  { %2913 = vmatpush1.bf16.msra.mxu1 %v4439_v8  ;;  %v4535_v8 = vld [vmem:[%s6115_s1 + $0x490] ss:$8 sps:$4 sm:$0xff]  }
  0xf0   :  { %3231 = vmatpush1.bf16.msra.mxu0 %v4442_v9  ;;  %2914 = vmatprep.subr.bf16.mxu1 %v4447_v10  ;;  %v4538_v9 = vld [vmem:[%s6115_s1 + $0xa90] ss:$8 sps:$4 sm:$0xff]   ;;  %v4543_v10 = vld [vmem:[%s6115_s1 + $0x4a4] ss:$8 sps:$4 sm:$0xff]  }
  0xf1   :  { %3232 = vmatprep.subr.bf16.mxu0 %v4450_v11  ;;  %v4546_v11 = vld [vmem:[%s6115_s1 + $0xaa4] ss:$8 sps:$4 sm:$0xff]  }
  0xf3   :  { %2915 = vmatpush1.bf16.msra.mxu1 %v4445_v12  ;;  %v4541_v12 = vld [vmem:[%s6115_s1 + $0x4a0] ss:$8 sps:$4 sm:$0xff]  }
  0xf4   :  { %3233 = vmatpush1.bf16.msra.mxu0 %v4448_v13  ;;  %2916 = vmatprep.subr.bf16.mxu1 %v4453_v14  ;;  %v4544_v13 = vld [vmem:[%s6115_s1 + $0xaa0] ss:$8 sps:$4 sm:$0xff]   ;;  %v4549_v14 = vld [vmem:[%s6115_s1 + $0x4b4] ss:$8 sps:$4 sm:$0xff]  }
  0xf5   :  { %3234 = vmatprep.subr.bf16.mxu0 %v4456_v15  ;;  %v4552_v15 = vld [vmem:[%s6115_s1 + $0xab4] ss:$8 sps:$4 sm:$0xff]  }
  0xf7   :  { %2917 = vmatpush1.bf16.msra.mxu1 %v4451_v16  ;;  %v4547_v16 = vld [vmem:[%s6115_s1 + $0x4b0] ss:$8 sps:$4 sm:$0xff]  }
  0xf8   :  { %3235 = vmatpush1.bf16.msra.mxu0 %v4454_v17  ;;  %2918 = vmatprep.subr.bf16.mxu1 %v4461_v18  ;;  %v4550_v17 = vld [vmem:[%s6115_s1 + $0xab0] ss:$8 sps:$4 sm:$0xff]   ;;  %v4555_v18 = vld [vmem:[%s6115_s1 + $0x4c4] ss:$8 sps:$4 sm:$0xff]  }
  0xf9   :  { %3236 = vmatprep.subr.bf16.mxu0 %v4466_v19  ;;  %v4558_v19 = vld [vmem:[%s6115_s1 + $0xac4] ss:$8 sps:$4 sm:$0xff]  }
  0xfb   :  { %2919 = vmatpush1.bf16.msra.mxu1 %v4459_v20  ;;  %v4553_v20 = vld [vmem:[%s6115_s1 + $0x4c0] ss:$8 sps:$4 sm:$0xff]  }
  0xfc   :  { %3237 = vmatpush1.bf16.msra.mxu0 %v4464_v21  ;;  %2920 = vmatprep.subr.bf16.mxu1 %v4471_v22  ;;  %v4556_v21 = vld [vmem:[%s6115_s1 + $0xac0] ss:$8 sps:$4 sm:$0xff]   ;;  %v4561_v22 = vld [vmem:[%s6115_s1 + $0x4d4] ss:$8 sps:$4 sm:$0xff]  }
  0xfd   :  { %3238 = vmatprep.subr.bf16.mxu0 %v4474_v23  ;;  %v4564_v23 = vld [vmem:[%s6115_s1 + $0xad4] ss:$8 sps:$4 sm:$0xff]  }
  0xff   :  { %2921 = vmatpush1.bf16.msra.mxu1 %v4469_v24  ;;  %v4559_v24 = vld [vmem:[%s6115_s1 + $0x4d0] ss:$8 sps:$4 sm:$0xff]  }
 0x100   :  { %3239 = vmatpush1.bf16.msra.mxu0 %v4472_v25  ;;  %2943 = vmatprep.subr.bf16.mxu1 %v4480_v26  ;;  %v4562_v25 = vld [vmem:[%s6115_s1 + $0xad0] ss:$8 sps:$4 sm:$0xff]   ;;  %v4569_v26 = vld [vmem:[%s6115_s1 + $0x4e4] ss:$8 sps:$4 sm:$0xff]  }
 0x101   :  { %3261 = vmatprep.subr.bf16.mxu0 %v4486_v27  ;;  %v4574_v27 = vld [vmem:[%s6115_s1 + $0xae4] ss:$8 sps:$4 sm:$0xff]  }
 0x102   :  { %2923 = vmatmul.mubr.bf16.vlgmr.msra.gmra.mrb[0].mxu1 %v4475_v28  ;;  %v4567_v28 = vld [vmem:[%s6115_s1 + $0x4e0] ss:$8 sps:$4 sm:$0xff]  }
 0x103   :  { %3241 = vmatmul.mubr.bf16.vlgmr.msra.gmra.mrb[0].mxu0 %v4481_v30  ;;  %2944 = vmatpush1.bf16.msra.mxu1 %v4478_v29  ;;  %v4572_v29 = vld [vmem:[%s6115_s1 + $0xae0] ss:$8 sps:$4 sm:$0xff]   ;;  %v4579_v30 = vld [vmem:[%s6115_s1 + $0x4f4] ss:$8 sps:$4 sm:$0xff]  }
 0x104   :  { %3262 = vmatpush1.bf16.msra.mxu0 %v4484_v31  ;;  %2945 = vmatprep.subr.bf16.mxu1 %v4489_v32  ;;  %v4582_v31 = vld [vmem:[%s6115_s1 + $0xaf4] ss:$8 sps:$4 sm:$0xff]   ;;  %v4577_v32 = vld [vmem:[%s6115_s1 + $0x4f0] ss:$8 sps:$4 sm:$0xff]  }
 0x105   :  { %3263 = vmatprep.subr.bf16.mxu0 %v4492_v33  ;;  %2932 = vmatprep.mubr.bf16.mxu1 %v4565_v34  ;;  %v4580_v33 = vld [vmem:[%s6115_s1 + $0xaf0] ss:$8 sps:$4 sm:$0xff]   ;;  %v4588_v34 = vld [vmem:[%s6115_s1 + $0x504] ss:$8 sps:$4 sm:$0xff]  }
 0x106   :  { %3250 = vmatprep.mubr.bf16.mxu0 %v4570_v35  ;;  %v4594_v35 = vld [vmem:[%s6115_s1 + $0xb04] ss:$8 sps:$4 sm:$0xff]  }
 0x107   :  { %2946 = vmatpush1.bf16.msra.mxu1 %v4487_v36  ;;  %v4583_v36 = vld [vmem:[%s6116_s0 + $0x20] ss:$100 sps:$4 sm:$0xff]  }
 0x108   :  { %3264 = vmatpush1.bf16.msra.mxu0 %v4490_v37  ;;  %2947 = vmatprep.subr.bf16.mxu1 %v4495_v38  ;;  %v4589_v37 = vld [vmem:[%s6116_s0 + $0x50] ss:$100 sps:$4 sm:$0xff]   ;;  %v4586_v38 = vld [vmem:[%s6115_s1 + $0x500] ss:$8 sps:$4 sm:$0xff]  }
 0x109   :  { %3265 = vmatprep.subr.bf16.mxu0 %v4498_v39  ;;  %v4592_v39 = vld [vmem:[%s6115_s1 + $0xb00] ss:$8 sps:$4 sm:$0xff]  }
 0x10a   :  { %2933 = vmatmul.mubr.bf16.gmra.mrb[4].mxu1 %v4575_v42  ;;  %v4673_v42 = vld [vmem:[%s6116_s0 + $0xec] ss:$100 sps:$4 sm:$0xff]  }
 0x10b   :  { %3251 = vmatmul.mubr.bf16.gmra.mrb[4].mxu0 %v4576_v43  ;;  %2948 = vmatpush1.bf16.msra.mxu1 %v4493_v40  ;;  %v4597_v40 = vld [vmem:[%s6115_s1 + $0x514] ss:$8 sps:$4 sm:$0xff]  }
 0x10c   :  { %3266 = vmatpush1.bf16.msra.mxu0 %v4496_v41  ;;  %2949 = vmatprep.subr.bf16.mxu1 %v4501_v44  ;;  %v4600_v41 = vld [vmem:[%s6115_s1 + $0xb14] ss:$8 sps:$4 sm:$0xff]   ;;  %v4595_v44 = vld [vmem:[%s6115_s1 + $0x510] ss:$8 sps:$4 sm:$0xff]  }
 0x10d   :  { %3267 = vmatprep.subr.bf16.mxu0 %v4504_v45  ;;  %2975 = vmatprep.mubr.bf16.mxu1 %v4585_v46  ;;  %v4675_v43 = vld [vmem:[%s6116_s0 + $0x11c] ss:$100 sps:$4 sm:$0xff]   ;;  %v4598_v45 = vld [vmem:[%s6115_s1 + $0xb10] ss:$8 sps:$4 sm:$0xff]   ;;  %v4603_v46 = vld [vmem:[%s6115_s1 + $0x524] ss:$8 sps:$4 sm:$0xff]  }
 0x10e   :  { %3293 = vmatprep.mubr.bf16.mxu0 %v4591_v47  ;;  %v4606_v47 = vld [vmem:[%s6115_s1 + $0xb24] ss:$8 sps:$4 sm:$0xff]  }
 0x10f   :  { %2950 = vmatpush1.bf16.msra.mxu1 %v4499_v48  ;;  %v4677_v48 = vld [vmem:[%s6116_s0 + $0xe8] ss:$100 sps:$4 sm:$0xff]  }
 0x110   :  { %3268 = vmatpush1.bf16.msra.mxu0 %v4502_v49  ;;  %2951 = vmatprep.subr.bf16.mxu1 %v4507_v50  ;;  %v4681_v49 = vld [vmem:[%s6116_s0 + $0x118] ss:$100 sps:$4 sm:$0xff]   ;;  %v4601_v50 = vld [vmem:[%s6115_s1 + $0x520] ss:$8 sps:$4 sm:$0xff]  }
 0x111   :  { %3269 = vmatprep.subr.bf16.mxu0 %v4510_v51  ;;  %v4604_v51 = vld [vmem:[%s6115_s1 + $0xb20] ss:$8 sps:$4 sm:$0xff]  }
 0x113   :  { %2952 = vmatpush1.bf16.msra.mxu1 %v4505_v52  ;;  %v4609_v52 = vld [vmem:[%s6115_s1 + $0x534] ss:$8 sps:$4 sm:$0xff]  }
 0x114   :  { %3270 = vmatpush1.bf16.msra.mxu0 %v4508_v53  ;;  %2953 = vmatprep.subr.bf16.mxu1 %v4513_v54  ;;  %v4612_v53 = vld [vmem:[%s6115_s1 + $0xb34] ss:$8 sps:$4 sm:$0xff]   ;;  %v4693_v54 = vld [vmem:[%s6116_s0 + $0x2c] ss:$100 sps:$4 sm:$0xff]  }
 0x115   :  { %3271 = vmatprep.subr.bf16.mxu0 %v4516_v55  ;;  %v4696_v55 = vld [vmem:[%s6116_s0 + $0x5c] ss:$100 sps:$4 sm:$0xff]  }
 0x117   :  { %2954 = vmatpush1.bf16.msra.mxu1 %v4511_v56  ;;  %v4607_v56 = vld [vmem:[%s6115_s1 + $0x530] ss:$8 sps:$4 sm:$0xff]  }
 0x118   :  { %3272 = vmatpush1.bf16.msra.mxu0 %v4514_v57  ;;  %2955 = vmatprep.subr.bf16.mxu1 %v4519_v58  ;;  %v4610_v57 = vld [vmem:[%s6115_s1 + $0xb30] ss:$8 sps:$4 sm:$0xff]   ;;  %v4615_v58 = vld [vmem:[%s6115_s1 + $0x544] ss:$8 sps:$4 sm:$0xff]  }
 0x119   :  { %3273 = vmatprep.subr.bf16.mxu0 %v4522_v59  ;;  %v4618_v59 = vld [vmem:[%s6115_s1 + $0xb44] ss:$8 sps:$4 sm:$0xff]  }
 0x11b   :  { %2956 = vmatpush1.bf16.msra.mxu1 %v4517_v60  ;;  %v4613_v60 = vld [vmem:[%s6115_s1 + $0x540] ss:$8 sps:$4 sm:$0xff]  }
 0x11c   :  { %3274 = vmatpush1.bf16.msra.mxu0 %v4520_v61  ;;  %2957 = vmatprep.subr.bf16.mxu1 %v4525_v62  ;;  %v4616_v61 = vld [vmem:[%s6115_s1 + $0xb40] ss:$8 sps:$4 sm:$0xff]   ;;  %v4621_v62 = vld [vmem:[%s6115_s1 + $0x554] ss:$8 sps:$4 sm:$0xff]  }
 0x11d   :  { %3275 = vmatprep.subr.bf16.mxu0 %v4528_v63  ;;  %v4624_v63 = vld [vmem:[%s6115_s1 + $0xb54] ss:$8 sps:$4 sm:$0xff]  }
 0x11f   :  { %2958 = vmatpush1.bf16.msra.mxu1 %v4523_v0  ;;  %v4619_v0 = vld [vmem:[%s6115_s1 + $0x550] ss:$8 sps:$4 sm:$0xff]  }
 0x120   :  { %3276 = vmatpush1.bf16.msra.mxu0 %v4526_v1  ;;  %2959 = vmatprep.subr.bf16.mxu1 %v4531_v2  ;;  %v4622_v1 = vld [vmem:[%s6115_s1 + $0xb50] ss:$8 sps:$4 sm:$0xff]   ;;  %v4627_v2 = vld [vmem:[%s6115_s1 + $0x564] ss:$8 sps:$4 sm:$0xff]  }
 0x121   :  { %3277 = vmatprep.subr.bf16.mxu0 %v4534_v3  ;;  %v4630_v3 = vld [vmem:[%s6115_s1 + $0xb64] ss:$8 sps:$4 sm:$0xff]  }
 0x123   :  { %2960 = vmatpush1.bf16.msra.mxu1 %v4529_v4  ;;  %v4625_v4 = vld [vmem:[%s6115_s1 + $0x560] ss:$8 sps:$4 sm:$0xff]  }
 0x124   :  { %3278 = vmatpush1.bf16.msra.mxu0 %v4532_v5  ;;  %2961 = vmatprep.subr.bf16.mxu1 %v4537_v6  ;;  %v4628_v5 = vld [vmem:[%s6115_s1 + $0xb60] ss:$8 sps:$4 sm:$0xff]   ;;  %v4633_v6 = vld [vmem:[%s6115_s1 + $0x574] ss:$8 sps:$4 sm:$0xff]  }
 0x125   :  { %3279 = vmatprep.subr.bf16.mxu0 %v4540_v7  ;;  %v4636_v7 = vld [vmem:[%s6115_s1 + $0xb74] ss:$8 sps:$4 sm:$0xff]  }
 0x127   :  { %2962 = vmatpush1.bf16.msra.mxu1 %v4535_v8  ;;  %v4631_v8 = vld [vmem:[%s6115_s1 + $0x570] ss:$8 sps:$4 sm:$0xff]  }
 0x128   :  { %3280 = vmatpush1.bf16.msra.mxu0 %v4538_v9  ;;  %2963 = vmatprep.subr.bf16.mxu1 %v4543_v10  ;;  %v4634_v9 = vld [vmem:[%s6115_s1 + $0xb70] ss:$8 sps:$4 sm:$0xff]   ;;  %v4639_v10 = vld [vmem:[%s6115_s1 + $0x584] ss:$8 sps:$4 sm:$0xff]  }
 0x129   :  { %3281 = vmatprep.subr.bf16.mxu0 %v4546_v11  ;;  %v4642_v11 = vld [vmem:[%s6115_s1 + $0xb84] ss:$8 sps:$4 sm:$0xff]  }
 0x12b   :  { %2964 = vmatpush1.bf16.msra.mxu1 %v4541_v12  ;;  %v4637_v12 = vld [vmem:[%s6115_s1 + $0x580] ss:$8 sps:$4 sm:$0xff]  }
 0x12c   :  { %3282 = vmatpush1.bf16.msra.mxu0 %v4544_v13  ;;  %2965 = vmatprep.subr.bf16.mxu1 %v4549_v14  ;;  %v4640_v13 = vld [vmem:[%s6115_s1 + $0xb80] ss:$8 sps:$4 sm:$0xff]   ;;  %v4645_v14 = vld [vmem:[%s6115_s1 + $0x594] ss:$8 sps:$4 sm:$0xff]  }
 0x12d   :  { %3283 = vmatprep.subr.bf16.mxu0 %v4552_v15  ;;  %v4648_v15 = vld [vmem:[%s6115_s1 + $0xb94] ss:$8 sps:$4 sm:$0xff]  }
 0x12f   :  { %2966 = vmatpush1.bf16.msra.mxu1 %v4547_v16  ;;  %v4643_v16 = vld [vmem:[%s6115_s1 + $0x590] ss:$8 sps:$4 sm:$0xff]  }
 0x130   :  { %3284 = vmatpush1.bf16.msra.mxu0 %v4550_v17  ;;  %2967 = vmatprep.subr.bf16.mxu1 %v4555_v18  ;;  %v4646_v17 = vld [vmem:[%s6115_s1 + $0xb90] ss:$8 sps:$4 sm:$0xff]   ;;  %v4651_v18 = vld [vmem:[%s6115_s1 + $0x5a4] ss:$8 sps:$4 sm:$0xff]  }
 0x131   :  { %3285 = vmatprep.subr.bf16.mxu0 %v4558_v19  ;;  %v4654_v19 = vld [vmem:[%s6115_s1 + $0xba4] ss:$8 sps:$4 sm:$0xff]  }
 0x133   :  { %2968 = vmatpush1.bf16.msra.mxu1 %v4553_v20  ;;  %v4649_v20 = vld [vmem:[%s6115_s1 + $0x5a0] ss:$8 sps:$4 sm:$0xff]  }
 0x134   :  { %3286 = vmatpush1.bf16.msra.mxu0 %v4556_v21  ;;  %2969 = vmatprep.subr.bf16.mxu1 %v4561_v22  ;;  %v4652_v21 = vld [vmem:[%s6115_s1 + $0xba0] ss:$8 sps:$4 sm:$0xff]   ;;  %v4657_v22 = vld [vmem:[%s6115_s1 + $0x5b4] ss:$8 sps:$4 sm:$0xff]  }
 0x135   :  { %3287 = vmatprep.subr.bf16.mxu0 %v4564_v23  ;;  %v4660_v23 = vld [vmem:[%s6115_s1 + $0xbb4] ss:$8 sps:$4 sm:$0xff]  }
 0x137   :  { %2970 = vmatpush1.bf16.msra.mxu1 %v4559_v24  ;;  %v4655_v24 = vld [vmem:[%s6115_s1 + $0x5b0] ss:$8 sps:$4 sm:$0xff]  }
 0x138   :  { %3288 = vmatpush1.bf16.msra.mxu0 %v4562_v25  ;;  %2971 = vmatprep.subr.bf16.mxu1 %v4569_v26  ;;  %v4658_v25 = vld [vmem:[%s6115_s1 + $0xbb0] ss:$8 sps:$4 sm:$0xff]   ;;  %v4663_v26 = vld [vmem:[%s6115_s1 + $0x5c4] ss:$8 sps:$4 sm:$0xff]  }
 0x139   :  { %3289 = vmatprep.subr.bf16.mxu0 %v4574_v27  ;;  %v4666_v27 = vld [vmem:[%s6115_s1 + $0xbc4] ss:$8 sps:$4 sm:$0xff]  }
 0x13b   :  { %2972 = vmatpush1.bf16.msra.mxu1 %v4567_v28  ;;  %v4661_v28 = vld [vmem:[%s6115_s1 + $0x5c0] ss:$8 sps:$4 sm:$0xff]  }
 0x13c   :  { %3290 = vmatpush1.bf16.msra.mxu0 %v4572_v29  ;;  %2973 = vmatprep.subr.bf16.mxu1 %v4579_v30  ;;  %v4664_v29 = vld [vmem:[%s6115_s1 + $0xbc0] ss:$8 sps:$4 sm:$0xff]   ;;  %v4669_v30 = vld [vmem:[%s6115_s1 + $0x5d4] ss:$8 sps:$4 sm:$0xff]  }
 0x13d   :  { %3291 = vmatprep.subr.bf16.mxu0 %v4582_v31  ;;  %v4672_v31 = vld [vmem:[%s6115_s1 + $0xbd4] ss:$8 sps:$4 sm:$0xff]  }
 0x13f   :  { %2974 = vmatpush1.bf16.msra.mxu1 %v4577_v32  ;;  %v4667_v32 = vld [vmem:[%s6115_s1 + $0x5d0] ss:$8 sps:$4 sm:$0xff]  }
 0x140   :  { %3292 = vmatpush1.bf16.msra.mxu0 %v4580_v33  ;;  %2996 = vmatprep.subr.bf16.mxu1 %v4588_v34  ;;  %v4670_v33 = vld [vmem:[%s6115_s1 + $0xbd0] ss:$8 sps:$4 sm:$0xff]   ;;  %v4680_v34 = vld [vmem:[%s6115_s1 + $0x5e4] ss:$8 sps:$4 sm:$0xff]  }
 0x141   :  { %3314 = vmatprep.subr.bf16.mxu0 %v4594_v35  ;;  %v4684_v35 = vld [vmem:[%s6115_s1 + $0xbe4] ss:$8 sps:$4 sm:$0xff]  }
 0x142   :  { %2976 = vmatmul.mubr.bf16.vlgmr.msra.gmra.mrb[0].mxu1 %v4583_v36  ;;  %v4678_v36 = vld [vmem:[%s6115_s1 + $0x5e0] ss:$8 sps:$4 sm:$0xff]  }
 0x143   :  { %3294 = vmatmul.mubr.bf16.vlgmr.msra.gmra.mrb[0].mxu0 %v4589_v37  ;;  %2997 = vmatpush1.bf16.msra.mxu1 %v4586_v38  ;;  %v4682_v37 = vld [vmem:[%s6115_s1 + $0xbe0] ss:$8 sps:$4 sm:$0xff]   ;;  %v4687_v38 = vld [vmem:[%s6115_s1 + $0x5f4] ss:$8 sps:$4 sm:$0xff]  }
 0x144   :  { %3315 = vmatpush1.bf16.msra.mxu0 %v4592_v39  ;;  %2998 = vmatprep.subr.bf16.mxu1 %v4597_v40  ;;  %v4690_v39 = vld [vmem:[%s6115_s1 + $0xbf4] ss:$8 sps:$4 sm:$0xff]   ;;  %v4685_v40 = vld [vmem:[%s6115_s1 + $0x5f0] ss:$8 sps:$4 sm:$0xff]  }
 0x145   :  { %3316 = vmatprep.subr.bf16.mxu0 %v4600_v41  ;;  %2985 = vmatprep.mubr.bf16.mxu1 %v4673_v42  ;;  %v4688_v41 = vld [vmem:[%s6115_s1 + $0xbf0] ss:$8 sps:$4 sm:$0xff]   ;;  %v4699_v42 = vld [vmem:[%s6115_s1 + $0xc04] ss:$8 sps:$4 sm:$0xff]  }
 0x146   :  { %3303 = vmatprep.mubr.bf16.mxu0 %v4675_v43  ;;  %v4691_v43 = vld [vmem:[%s6116_s0 + $0x28] ss:$100 sps:$4 sm:$0xff]  }
 0x147   :  { %2999 = vmatpush1.bf16.msra.mxu1 %v4595_v44  ;;  %v4694_v44 = vld [vmem:[%s6116_s0 + $0x58] ss:$100 sps:$4 sm:$0xff]  }
 0x148   :  { %3317 = vmatpush1.bf16.msra.mxu0 %v4598_v45  ;;  %3000 = vmatprep.subr.bf16.mxu1 %v4603_v46  ;;  %v4697_v45 = vld [vmem:[%s6115_s1 + $0xc00] ss:$8 sps:$4 sm:$0xff]   ;;  %v4702_v46 = vld [vmem:[%s6115_s1 + $0xc14] ss:$8 sps:$4 sm:$0xff]  }
 0x149   :  { %3318 = vmatprep.subr.bf16.mxu0 %v4606_v47  ;;  %v4703_v47 = vld [vmem:[%s6116_s0 + $0xf4] ss:$100 sps:$4 sm:$0xff]  }
 0x14a   :  { %2986 = vmatmul.mubr.bf16.gmra.mrb[4].mxu1 %v4677_v48  ;;  %v4705_v48 = vld [vmem:[%s6116_s0 + $0x124] ss:$100 sps:$4 sm:$0xff]  }
 0x14b   :  { %3304 = vmatmul.mubr.bf16.gmra.mrb[4].mxu0 %v4681_v49  ;;  %3001 = vmatpush1.bf16.msra.mxu1 %v4601_v50  ;;  %v4700_v49 = vld [vmem:[%s6115_s1 + $0xc10] ss:$8 sps:$4 sm:$0xff]   ;;  %v4711_v50 = vld [vmem:[%s6115_s1 + $0xc24] ss:$8 sps:$4 sm:$0xff]  }
 0x14c   :  { %3319 = vmatpush1.bf16.msra.mxu0 %v4604_v51  ;;  %3002 = vmatprep.subr.bf16.mxu1 %v4609_v52  ;;  %v4707_v51 = vld [vmem:[%s6116_s0 + $0xf0] ss:$100 sps:$4 sm:$0xff]   ;;  %v4708_v52 = vld [vmem:[%s6116_s0 + $0x120] ss:$100 sps:$4 sm:$0xff]  }
 0x14d   :  { %3320 = vmatprep.subr.bf16.mxu0 %v4612_v53  ;;  %3028 = vmatprep.mubr.bf16.mxu1 %v4693_v54  ;;  %v4709_v53 = vld [vmem:[%s6115_s1 + $0xc20] ss:$8 sps:$4 sm:$0xff]   ;;  %v4714_v54 = vld [vmem:[%s6115_s1 + $0xc34] ss:$8 sps:$4 sm:$0xff]  }
 0x14e   :  { %3346 = vmatprep.mubr.bf16.mxu0 %v4696_v55  ;;  %v4712_v55 = vld [vmem:[%s6115_s1 + $0xc30] ss:$8 sps:$4 sm:$0xff]  }
 0x14f   :  { %3003 = vmatpush1.bf16.msra.mxu1 %v4607_v56  ;;  %v4717_v56 = vld [vmem:[%s6115_s1 + $0xc44] ss:$8 sps:$4 sm:$0xff]  }
 0x150   :  { %3321 = vmatpush1.bf16.msra.mxu0 %v4610_v57  ;;  %3004 = vmatprep.subr.bf16.mxu1 %v4615_v58  ;;  %v4729_v57 = vmov 0   ;;  %v4715_v58 = vld [vmem:[%s6115_s1 + $0xc40] ss:$8 sps:$4 sm:$0xff]  }
 0x151   :  { %3322 = vmatprep.subr.bf16.mxu0 %v4618_v59  ;;  %v4720_v59 = vld [vmem:[%s6115_s1 + $0xc54] ss:$8 sps:$4 sm:$0xff]  }
 0x153   :  { %3005 = vmatpush1.bf16.msra.mxu1 %v4613_v60  ;;  %v4718_v60 = vld [vmem:[%s6115_s1 + $0xc50] ss:$8 sps:$4 sm:$0xff]  }
 0x154   :  { %3323 = vmatpush1.bf16.msra.mxu0 %v4616_v61  ;;  %3006 = vmatprep.subr.bf16.mxu1 %v4621_v62  ;;  %v4723_v61 = vld [vmem:[%s6115_s1 + $0xc64] ss:$8 sps:$4 sm:$0xff]   ;;  %v4721_v62 = vld [vmem:[%s6115_s1 + $0xc60] ss:$8 sps:$4 sm:$0xff]  }
 0x155   :  { %3324 = vmatprep.subr.bf16.mxu0 %v4624_v63  ;;  %v4726_v63 = vld [vmem:[%s6115_s1 + $0xc74] ss:$8 sps:$4 sm:$0xff]  }
 0x157   :  { %3007 = vmatpush1.bf16.msra.mxu1 %v4619_v0  ;;  %v4724_v0 = vld [vmem:[%s6115_s1 + $0xc70] ss:$8 sps:$4 sm:$0xff]  }
 0x158   :  { %3325 = vmatpush1.bf16.msra.mxu0 %v4622_v1  ;;  %3008 = vmatprep.subr.bf16.mxu1 %v4627_v2  ;;  %v4727_v1 = vld [vmem:[%s6116_s0 + $0x60] ss:$100 sps:$4 sm:$0xff]   ;;  %v4728_v2 = vld [vmem:[%s6116_s0 + $0x128] ss:$100 sps:$4 sm:$0xff]  }
 0x159   :  { %3326 = vmatprep.subr.bf16.mxu0 %v4630_v3  ;;  %v469_v3 = vlaneseq }
 0x15b   :  { %3009 = vmatpush1.bf16.msra.mxu1 %v4625_v4  ;;  %v470_v4 = vshrl.u32 %v469_v3, 7 }
 0x15c   :  { %3327 = vmatpush1.bf16.msra.mxu0 %v4628_v5  ;;  %3010 = vmatprep.subr.bf16.mxu1 %v4633_v6 }
 0x15d   :  { %3328 = vmatprep.subr.bf16.mxu0 %v4636_v7 }
 0x15f   :  { %3011 = vmatpush1.bf16.msra.mxu1 %v4631_v8  ;;  %v471_v8 = vsub.s32 0, %v470_v4 }
 0x160   :  { %3329 = vmatpush1.bf16.msra.mxu0 %v4634_v9  ;;  %3012 = vmatprep.subr.bf16.mxu1 %v4639_v10  ;;  %v467_v10 = vld [vmem:[%s6117_s2] sm:$0x3] }
 0x161   :  { %3330 = vmatprep.subr.bf16.mxu0 %v4642_v11  ;;  %v475_v11 = vsub.s32 1, %v470_v4 }
 0x163   :  { %3013 = vmatpush1.bf16.msra.mxu1 %v4637_v12  ;;  %v472_v12 = vrot.slane %v467_v10, %v471_v8 }
 0x164   :  { %3331 = vmatpush1.bf16.msra.mxu0 %v4640_v13  ;;  %3014 = vmatprep.subr.bf16.mxu1 %v4645_v14  ;;  %v476_v13 = vrot.slane %v467_v10, %v475_v11 }
 0x165   :  { %3332 = vmatprep.subr.bf16.mxu0 %v4648_v15 }
 0x167   :  { %3015 = vmatpush1.bf16.msra.mxu1 %v4643_v16 }
 0x168   :  { %3333 = vmatpush1.bf16.msra.mxu0 %v4646_v17  ;;  %3016 = vmatprep.subr.bf16.mxu1 %v4651_v18 }
 0x169   :  { %3334 = vmatprep.subr.bf16.mxu0 %v4654_v19 }
 0x16b   :  { %3017 = vmatpush1.bf16.msra.mxu1 %v4649_v20 }
 0x16c   :  { %3335 = vmatpush1.bf16.msra.mxu0 %v4652_v21  ;;  %3018 = vmatprep.subr.bf16.mxu1 %v4657_v22 }
 0x16d   :  { %3336 = vmatprep.subr.bf16.mxu0 %v4660_v23 }
 0x16f   :  { %3019 = vmatpush1.bf16.msra.mxu1 %v4655_v24 }
 0x170   :  { %3337 = vmatpush1.bf16.msra.mxu0 %v4658_v25  ;;  %3020 = vmatprep.subr.bf16.mxu1 %v4663_v26 }
 0x171   :  { %3338 = vmatprep.subr.bf16.mxu0 %v4666_v27 }
 0x173   :  { %3021 = vmatpush1.bf16.msra.mxu1 %v4661_v28 }
 0x174   :  { %3339 = vmatpush1.bf16.msra.mxu0 %v4664_v29  ;;  %3022 = vmatprep.subr.bf16.mxu1 %v4669_v30 }
 0x175   :  { %3340 = vmatprep.subr.bf16.mxu0 %v4672_v31 }
 0x177   :  { %3023 = vmatpush1.bf16.msra.mxu1 %v4667_v32 }
 0x178   :  { %3341 = vmatpush1.bf16.msra.mxu0 %v4670_v33  ;;  %3024 = vmatprep.subr.bf16.mxu1 %v4680_v34 }
 0x179   :  { %3342 = vmatprep.subr.bf16.mxu0 %v4684_v35 }
 0x17b   :  { %3025 = vmatpush1.bf16.msra.mxu1 %v4678_v36 }
 0x17c   :  { %3343 = vmatpush1.bf16.msra.mxu0 %v4682_v37  ;;  %3026 = vmatprep.subr.bf16.mxu1 %v4687_v38 }
 0x17d   :  { %3344 = vmatprep.subr.bf16.mxu0 %v4690_v39 }
 0x17f   :  { %3027 = vmatpush1.bf16.msra.mxu1 %v4685_v40 }
 0x180   :  { %3345 = vmatpush1.bf16.msra.mxu0 %v4688_v41  ;;  %3934 = vmatprep.subr.bf16.mxu1 %v4699_v42 }
 0x181   :  { %3367 = vmatprep.subr.bf16.mxu0 %v4699_v42 }
 0x182   :  { %3029 = vmatmul.mubr.bf16.vlgmr.msra.gmra.mrb[0].mxu1 %v4691_v43 }
 0x183   :  { %3347 = vmatmul.mubr.bf16.vlgmr.msra.gmra.mrb[0].mxu0 %v4694_v44  ;;  %3942 = vmatpush1.bf16.msra.mxu1 %v4697_v45 }
 0x184   :  { %3368 = vmatpush1.bf16.msra.mxu0 %v4697_v45  ;;  %3935 = vmatprep.subr.bf16.mxu1 %v4702_v46 }
 0x185   :  { %3369 = vmatprep.subr.bf16.mxu0 %v4702_v46  ;;  %3038 = vmatprep.mubr.bf16.mxu1 %v4703_v47 }
 0x186   :  { %3356 = vmatprep.mubr.bf16.mxu0 %v4705_v48 }
 0x187   :  { %3943 = vmatpush1.bf16.msra.mxu1 %v4700_v49 }
 0x188   :  { %3370 = vmatpush1.bf16.msra.mxu0 %v4700_v49  ;;  %3936 = vmatprep.subr.bf16.mxu1 %v4711_v50 }
 0x189   :  { %3371 = vmatprep.subr.bf16.mxu0 %v4711_v50 }
 0x18a   :  { %3039 = vmatmul.mubr.bf16.gmra.mrb[4].mxu1 %v4707_v51 }
 0x18b   :  { %3357 = vmatmul.mubr.bf16.gmra.mrb[4].mxu0 %v4708_v52  ;;  %3944 = vmatpush1.bf16.msra.mxu1 %v4709_v53 }
 0x18c   :  { %3372 = vmatpush1.bf16.msra.mxu0 %v4709_v53  ;;  %3937 = vmatprep.subr.bf16.mxu1 %v4714_v54 }
 0x18d   :  { %3373 = vmatprep.subr.bf16.mxu0 %v4714_v54  ;;  %3399 = vmatprep.mubr.bf16.mxu0 %v4729_v57 }
 0x18e   :  { %3409 = vmatprep.mubr.bf16.mxu1 %v4729_v57 }
 0x18f   :  { %3945 = vmatpush1.bf16.msra.mxu1 %v4712_v55 }
 0x190   :  { %3374 = vmatpush1.bf16.msra.mxu0 %v4712_v55  ;;  %3938 = vmatprep.subr.bf16.mxu1 %v4717_v56 }
 0x191   :  { %3375 = vmatprep.subr.bf16.mxu0 %v4717_v56 }
 0x193   :  { %3946 = vmatpush1.bf16.msra.mxu1 %v4715_v58 }
 0x194   :  { %3376 = vmatpush1.bf16.msra.mxu0 %v4715_v58  ;;  %3939 = vmatprep.subr.bf16.mxu1 %v4720_v59 }
 0x195   :  { %3377 = vmatprep.subr.bf16.mxu0 %v4720_v59 }
 0x197   :  { %3947 = vmatpush1.bf16.msra.mxu1 %v4718_v60 }
 0x198   :  { %3378 = vmatpush1.bf16.msra.mxu0 %v4718_v60  ;;  %3940 = vmatprep.subr.bf16.mxu1 %v4723_v61 }
 0x199   :  { %3379 = vmatprep.subr.bf16.mxu0 %v4723_v61 }
 0x19b   :  { %3948 = vmatpush1.bf16.msra.mxu1 %v4721_v62 }
 0x19c   :  { %3380 = vmatpush1.bf16.msra.mxu0 %v4721_v62  ;;  %3941 = vmatprep.subr.bf16.mxu1 %v4726_v63 }
 0x19d   :  { %3381 = vmatprep.subr.bf16.mxu0 %v4726_v63 }
 0x19f   :  { %3949 = vmatpush1.bf16.msra.mxu1 %v4724_v0 }
 0x1a0   :  { %3382 = vmatpush1.bf16.msra.mxu0 %v4724_v0 }
 0x1a2   :  { %3410 = vmatmul.mubr.bf16.vlgmr.msra.gmra.mrb[8].mxu1 %v4728_v2 }
 0x1a3   :  { %3400 = vmatmul.mubr.bf16.vlgmr.msra.gmra.mrb[0].mxu0 %v4727_v1 }
 0x255   :  { %v3030_v5 = vpop.f32.mrb[0].mxu1 }
 0x256   :  { %v3032_v6 = vpop.f32.mrb[1].mxu1  ;;  %v3950_v30 = vadd.f32 %v3030_v5, %v472_v12 }
 0x257   :  { %v3034_v7 = vpop.f32.mrb[2].mxu1  ;;  %v3952_v31 = vadd.f32 %v3032_v6, %v476_v13 }
 0x258   :  { %v3036_v9 = vpop.f32.mrb[3].mxu1  ;;  %v3954_v38 = vadd.f32 %v3034_v7, %v472_v12 }
 0x259   :  { %v3956_v39 = vadd.f32 %v3036_v9, %v476_v13 }
 0x25d   :  { %v3040_v14 = vpop.f32.mrb[4].mxu1 }
 0x25e   :  { %v3358_v15 = vpop.f32.mrb[4].mxu0  ;;  %v3958_v16 = vadd.f32 %v3040_v14, %v472_v12  ;;  %v3042_v17 = vpop.f32.mrb[5].mxu1 }
 0x25f   :  { %v3360_v18 = vpop.f32.mrb[5].mxu0  ;;  %v3961_v19 = vadd.f32 %v3042_v17, %v476_v13  ;;  %v3044_v20 = vpop.f32.mrb[6].mxu1 }
 0x260   :  { %v3362_v21 = vpop.f32.mrb[6].mxu0  ;;  %v3959_v22 = vadd.f32 %v3958_v16, %v3358_v15  ;;  %v3964_v23 = vadd.f32 %v3044_v20, %v472_v12  ;;  %v3046_v24 = vpop.f32.mrb[7].mxu1 }
 0x261   :  { %v3364_v25 = vpop.f32.mrb[7].mxu0  ;;  %v3962_v26 = vadd.f32 %v3961_v19, %v3360_v18  ;;  %v3967_v27 = vadd.f32 %v3046_v24, %v476_v13 }
 0x262   :  { %v3965_v28 = vadd.f32 %v3964_v23, %v3362_v21 }
 0x263   :  { %v3968_v29 = vadd.f32 %v3967_v27, %v3364_v25 }
 0x275   :  { %v3411_v33 = vpop.f32.mrb[8].mxu1 }
 0x276   :  { %v3401_v32 = vpop.f32.mrb[0].mxu0  ;;  %v3960_v35 = vadd.f32 %v3959_v22, %v3411_v33  ;;  %v3413_v37 = vpop.f32.mrb[9].mxu1 }
 0x277   :  { %v3951_v34 = vadd.f32 %v3950_v30, %v3401_v32  ;;  %v3403_v36 = vpop.f32.mrb[1].mxu0  ;;  %v3963_v41 = vadd.f32 %v3962_v26, %v3413_v37  ;;  %v3415_v43 = vpop.f32.mrb[10].mxu1 }
 0x278   :  { %v3953_v40 = vadd.f32 %v3952_v31, %v3403_v36  ;;  %v3405_v42 = vpop.f32.mrb[2].mxu0  ;;  %vm3424_vm1 = vcmp.ge.f32.partialorder %v3960_v35, 0.0  ;;  %v3432_v45 = vmul.f32 0.2, %v3960_v35  ;;  %v3966_v51 = vadd.f32 %v3965_v28, %v3415_v43  ;;  %v3417_v53 = vpop.f32.mrb[11].mxu1 }
 0x279   :  { %vm3420_vm0 = vcmp.ge.f32.partialorder %v3951_v34, 0.0  ;;  %v3428_v44 = vmul.f32 0.2, %v3951_v34  ;;  %vm3425_vm3 = vcmp.ge.f32.partialorder %v3963_v41, 0.0  ;;  %v3433_v47 = vmul.f32 0.2, %v3963_v41 }
 0x27a   :  { %vm3421_vm2 = vcmp.ge.f32.partialorder %v3953_v40, 0.0  ;;  %v3429_v46 = vmul.f32 0.2, %v3953_v40  ;;  %v3440_v49 = vsel %vm3424_vm1, %v3960_v35, %v3432_v45  ;;  %v3955_v50 = vadd.f32 %v3954_v38, %v3405_v42  ;;  %v3407_v52 = vpop.f32.mrb[3].mxu0 }
 0x27b   :  { %v3436_v48 = vsel %vm3420_vm0, %v3951_v34, %v3428_v44  ;;  %v3441_v55 = vsel %vm3425_vm3, %v3963_v41, %v3433_v47  ;;  %v3957_v56 = vadd.f32 %v3956_v39, %v3407_v52  ;;  %v3969_v57 = vadd.f32 %v3968_v29, %v3417_v53 }
 0x27c   :  { %v3437_v54 = vsel %vm3421_vm2, %v3953_v40, %v3429_v46  ;;  %v3932_v59 = vpack.c.bf16 %v3441_v55, %v3440_v49  ;;  %vm3422_vm4 = vcmp.ge.f32.partialorder %v3955_v50, 0.0  ;;  %v3430_v60 = vmul.f32 0.2, %v3955_v50 }
 0x27d   :  { %v3930_v58 = vpack.c.bf16 %v3437_v54, %v3436_v48  ;;  %vm3426_vm5 = vcmp.ge.f32.partialorder %v3966_v51, 0.0  ;;  %v3434_v61 = vmul.f32 0.2, %v3966_v51  ;;  %vm3423_vm6 = vcmp.ge.f32.partialorder %v3957_v56, 0.0 }
 0x27e   :  { %v3431_v62 = vmul.f32 0.2, %v3957_v56  ;;  %3470 = vst [vmem:[%s6118_s3 + $0x10] sm:$0xff] %v3932_v59  ;;  %v3438_v63 = vsel %vm3422_vm4, %v3955_v50, %v3430_v60  ;;  %vm3427_vm7 = vcmp.ge.f32.partialorder %v3969_v57, 0.0  ;;  %v3435_v0 = vmul.f32 0.2, %v3969_v57 }
 0x27f   :  { %3468 = vst [vmem:[%s6118_s3] sm:$0xff] %v3930_v58  ;;  %v3442_v1 = vsel %vm3426_vm5, %v3966_v51, %v3434_v61 }
 0x280   :  { %v3439_v2 = vsel %vm3423_vm6, %v3957_v56, %v3431_v62  ;;  %v3443_v4 = vsel %vm3427_vm7, %v3969_v57, %v3435_v0 }
 0x281   :  { %v3931_v3 = vpack.c.bf16 %v3439_v2, %v3438_v63  ;;  %v3933_v5 = vpack.c.bf16 %v3443_v4, %v3442_v1 }
 0x283   :  { %3469 = vst [vmem:[%s6118_s3 + $0x8] sm:$0xff] %v3931_v3  ;;  %3471 = vst [vmem:[%s6118_s3 + $0x18] sm:$0xff] %v3933_v5 }

// kernel: _lambda_.9
= control target key start
LH: loop header
LB: loop body
LE: loop exit
PB: predicated region body
PF: predicated region fallthrough
CT: control target
= control target key end

     0   :  { %s10907_s1 = inlined_call_operand.vmem [shape: bf16[6400,256], index: 1, kind: input, shape index: {}]   ;;  %s10908_s0 = inlined_call_operand.vmem [shape: bf16[8,6400], index: 0, kind: input, shape index: {}]   ;;  %s10909_s2 = inlined_call_operand.vmem [shape: f32[1,256], index: 2, kind: input, shape index: {}]   ;;  %s10910_s3 = inlined_call_operand.vmem [shape: bf16[8,256], index: 3, kind: output, shape index: {}]  }
   0x1   :  { %v7018_v0 = vld [vmem:[%s10907_s1 + $0x4] ss:$8 sps:$4 sm:$0xff]   ;;  %v7022_v2 = vld [vmem:[%s10907_s1] ss:$8 sps:$4 sm:$0xff]   ;;  %v7024_v4 = vld [vmem:[%s10907_s1 + $0x14] ss:$8 sps:$4 sm:$0xff]  }
   0x2   :  { %v7020_v1 = vld [vmem:[%s10907_s1 + $0xc04] ss:$8 sps:$4 sm:$0xff]   ;;  %5026 = vmatprep.subr.bf16.mxu1 %v7018_v0  ;;  %v7023_v3 = vld [vmem:[%s10907_s1 + $0xc00] ss:$8 sps:$4 sm:$0xff]   ;;  %v7026_v5 = vld [vmem:[%s10907_s1 + $0xc14] ss:$8 sps:$4 sm:$0xff]  }
   0x3   :  { %5518 = vmatprep.subr.bf16.mxu0 %v7020_v1  ;;  %5027 = vmatpush1.bf16.msra.mxu1 %v7022_v2  ;;  %v7028_v6 = vld [vmem:[%s10907_s1 + $0x10] ss:$8 sps:$4 sm:$0xff]   ;;  %v7030_v8 = vld [vmem:[%s10907_s1 + $0x24] ss:$8 sps:$4 sm:$0xff]   ;;  %v7034_v10 = vld [vmem:[%s10907_s1 + $0x20] ss:$8 sps:$4 sm:$0xff]  }
   0x4   :  { %5519 = vmatpush1.bf16.msra.mxu0 %v7023_v3  ;;  %5028 = vmatprep.subr.bf16.mxu1 %v7024_v4  ;;  %v7029_v7 = vld [vmem:[%s10907_s1 + $0xc10] ss:$8 sps:$4 sm:$0xff]   ;;  %v7032_v9 = vld [vmem:[%s10907_s1 + $0xc24] ss:$8 sps:$4 sm:$0xff]   ;;  %v7035_v11 = vld [vmem:[%s10907_s1 + $0xc20] ss:$8 sps:$4 sm:$0xff]  }
   0x5   :  { %5520 = vmatprep.subr.bf16.mxu0 %v7026_v5  ;;  %v7036_v12 = vld [vmem:[%s10907_s1 + $0x34] ss:$8 sps:$4 sm:$0xff]   ;;  %v7040_v14 = vld [vmem:[%s10907_s1 + $0x30] ss:$8 sps:$4 sm:$0xff]   ;;  %v7042_v16 = vld [vmem:[%s10907_s1 + $0x44] ss:$8 sps:$4 sm:$0xff]  }
   0x6   :  { %v7038_v13 = vld [vmem:[%s10907_s1 + $0xc34] ss:$8 sps:$4 sm:$0xff]   ;;  %v7041_v15 = vld [vmem:[%s10907_s1 + $0xc30] ss:$8 sps:$4 sm:$0xff]   ;;  %v7044_v17 = vld [vmem:[%s10907_s1 + $0xc44] ss:$8 sps:$4 sm:$0xff]  }
   0x7   :  { %5029 = vmatpush1.bf16.msra.mxu1 %v7028_v6  ;;  %v7046_v18 = vld [vmem:[%s10907_s1 + $0x40] ss:$8 sps:$4 sm:$0xff]   ;;  %v7048_v20 = vld [vmem:[%s10907_s1 + $0x54] ss:$8 sps:$4 sm:$0xff]   ;;  %v7052_v22 = vld [vmem:[%s10907_s1 + $0x50] ss:$8 sps:$4 sm:$0xff]  }
   0x8   :  { %5521 = vmatpush1.bf16.msra.mxu0 %v7029_v7  ;;  %5030 = vmatprep.subr.bf16.mxu1 %v7030_v8  ;;  %v7047_v19 = vld [vmem:[%s10907_s1 + $0xc40] ss:$8 sps:$4 sm:$0xff]   ;;  %v7050_v21 = vld [vmem:[%s10907_s1 + $0xc54] ss:$8 sps:$4 sm:$0xff]   ;;  %v7053_v23 = vld [vmem:[%s10907_s1 + $0xc50] ss:$8 sps:$4 sm:$0xff]  }
   0x9   :  { %5522 = vmatprep.subr.bf16.mxu0 %v7032_v9  ;;  %v7054_v24 = vld [vmem:[%s10907_s1 + $0x64] ss:$8 sps:$4 sm:$0xff]   ;;  %v7058_v26 = vld [vmem:[%s10907_s1 + $0x60] ss:$8 sps:$4 sm:$0xff]   ;;  %v7060_v28 = vld [vmem:[%s10907_s1 + $0x74] ss:$8 sps:$4 sm:$0xff]  }
   0xa   :  { %v7056_v25 = vld [vmem:[%s10907_s1 + $0xc64] ss:$8 sps:$4 sm:$0xff]   ;;  %v7059_v27 = vld [vmem:[%s10907_s1 + $0xc60] ss:$8 sps:$4 sm:$0xff]   ;;  %v7062_v29 = vld [vmem:[%s10907_s1 + $0xc74] ss:$8 sps:$4 sm:$0xff]  }
   0xb   :  { %5031 = vmatpush1.bf16.msra.mxu1 %v7034_v10  ;;  %v7064_v30 = vld [vmem:[%s10907_s1 + $0x70] ss:$8 sps:$4 sm:$0xff]   ;;  %v7066_v32 = vld [vmem:[%s10907_s1 + $0x84] ss:$8 sps:$4 sm:$0xff]   ;;  %v7070_v34 = vld [vmem:[%s10907_s1 + $0x80] ss:$8 sps:$4 sm:$0xff]  }
   0xc   :  { %5523 = vmatpush1.bf16.msra.mxu0 %v7035_v11  ;;  %5032 = vmatprep.subr.bf16.mxu1 %v7036_v12  ;;  %v7065_v31 = vld [vmem:[%s10907_s1 + $0xc70] ss:$8 sps:$4 sm:$0xff]   ;;  %v7068_v33 = vld [vmem:[%s10907_s1 + $0xc84] ss:$8 sps:$4 sm:$0xff]   ;;  %v7071_v35 = vld [vmem:[%s10907_s1 + $0xc80] ss:$8 sps:$4 sm:$0xff]  }
   0xd   :  { %5524 = vmatprep.subr.bf16.mxu0 %v7038_v13  ;;  %v7072_v36 = vld [vmem:[%s10907_s1 + $0x94] ss:$8 sps:$4 sm:$0xff]   ;;  %v7076_v38 = vld [vmem:[%s10907_s1 + $0x90] ss:$8 sps:$4 sm:$0xff]   ;;  %v7078_v40 = vld [vmem:[%s10907_s1 + $0xa4] ss:$8 sps:$4 sm:$0xff]  }
   0xe   :  { %v7074_v37 = vld [vmem:[%s10907_s1 + $0xc94] ss:$8 sps:$4 sm:$0xff]   ;;  %v7077_v39 = vld [vmem:[%s10907_s1 + $0xc90] ss:$8 sps:$4 sm:$0xff]   ;;  %v7080_v41 = vld [vmem:[%s10907_s1 + $0xca4] ss:$8 sps:$4 sm:$0xff]  }
   0xf   :  { %5033 = vmatpush1.bf16.msra.mxu1 %v7040_v14  ;;  %v7082_v42 = vld [vmem:[%s10907_s1 + $0xa0] ss:$8 sps:$4 sm:$0xff]   ;;  %v7084_v44 = vld [vmem:[%s10907_s1 + $0xb4] ss:$8 sps:$4 sm:$0xff]   ;;  %v7088_v47 = vld [vmem:[%s10907_s1 + $0xb0] ss:$8 sps:$4 sm:$0xff]  }
  0x10   :  { %5525 = vmatpush1.bf16.msra.mxu0 %v7041_v15  ;;  %5034 = vmatprep.subr.bf16.mxu1 %v7042_v16  ;;  %v7083_v43 = vld [vmem:[%s10907_s1 + $0xca0] ss:$8 sps:$4 sm:$0xff]   ;;  %v7086_v45 = vld [vmem:[%s10907_s1 + $0xcb4] ss:$8 sps:$4 sm:$0xff]   ;;  %v7089_v49 = vld [vmem:[%s10907_s1 + $0xcb0] ss:$8 sps:$4 sm:$0xff]  }
  0x11   :  { %5526 = vmatprep.subr.bf16.mxu0 %v7044_v17  ;;  %v14_v46 = vld [vmem:[%s10908_s0] sm:$0xff]  ;;  %v7096_v56 = vld [vmem:[%s10907_s1 + $0xd4] ss:$8 sps:$4 sm:$0xff]   ;;  %v7100_v58 = vld [vmem:[%s10907_s1 + $0xd0] ss:$8 sps:$4 sm:$0xff]  }
  0x12   :  { %v6071_v48 = vcombine.high %v14_v46, %v14_v46  ;;  %v26_v50 = vld [vmem:[%s10908_s0 + $0x60] sm:$0xff]  ;;  %v7098_v57 = vld [vmem:[%s10907_s1 + $0xcd4] ss:$8 sps:$4 sm:$0xff]   ;;  %v7101_v59 = vld [vmem:[%s10907_s1 + $0xcd0] ss:$8 sps:$4 sm:$0xff]   ;;  %v6070_v6 = vcombine.low %v14_v46, %v14_v46 }
  0x13   :  { %5035 = vmatpush1.bf16.msra.mxu1 %v7046_v18  ;;  %v7090_v51 = vld [vmem:[%s10907_s1 + $0xc4] ss:$8 sps:$4 sm:$0xff]   ;;  %v6095_v53 = vcombine.high %v26_v50, %v26_v50  ;;  %v7094_v54 = vld [vmem:[%s10907_s1 + $0xc0] ss:$8 sps:$4 sm:$0xff]   ;;  %v7108_v0 = vld [vmem:[%s10907_s1 + $0xf4] ss:$8 sps:$4 sm:$0xff]   ;;  %v6094_v7 = vcombine.low %v26_v50, %v26_v50 }
  0x14   :  { %5527 = vmatpush1.bf16.msra.mxu0 %v7047_v19  ;;  %5036 = vmatprep.subr.bf16.mxu1 %v7048_v20  ;;  %v7092_v52 = vld [vmem:[%s10907_s1 + $0xcc4] ss:$8 sps:$4 sm:$0xff]   ;;  %v7095_v55 = vld [vmem:[%s10907_s1 + $0xcc0] ss:$8 sps:$4 sm:$0xff]   ;;  %v7110_v1 = vld [vmem:[%s10907_s1 + $0xcf4] ss:$8 sps:$4 sm:$0xff]  }
  0x15   :  { %5528 = vmatprep.subr.bf16.mxu0 %v7050_v21  ;;  %5058 = vmatprep.mubr.bf16.mxu1 %v6071_v48  ;;  %v7102_v60 = vld [vmem:[%s10907_s1 + $0xe4] ss:$8 sps:$4 sm:$0xff]   ;;  %v7106_v62 = vld [vmem:[%s10907_s1 + $0xe0] ss:$8 sps:$4 sm:$0xff]   ;;  %v7112_v2 = vld [vmem:[%s10907_s1 + $0xf0] ss:$8 sps:$4 sm:$0xff]  }
  0x16   :  { %5550 = vmatprep.mubr.bf16.mxu0 %v6095_v53  ;;  %v7104_v61 = vld [vmem:[%s10907_s1 + $0xce4] ss:$8 sps:$4 sm:$0xff]   ;;  %v7107_v63 = vld [vmem:[%s10907_s1 + $0xce0] ss:$8 sps:$4 sm:$0xff]   ;;  %v7113_v3 = vld [vmem:[%s10907_s1 + $0xcf0] ss:$8 sps:$4 sm:$0xff]  }
  0x17   :  { %5037 = vmatpush1.bf16.msra.mxu1 %v7052_v22  ;;  %v7118_v4 = vld [vmem:[%s10907_s1 + $0x104] ss:$8 sps:$4 sm:$0xff]   ;;  %v7116_v8 = vld [vmem:[%s10907_s1 + $0x100] ss:$8 sps:$4 sm:$0xff]   ;;  %v7126_v10 = vld [vmem:[%s10907_s1 + $0x114] ss:$8 sps:$4 sm:$0xff]  }
  0x18   :  { %5529 = vmatpush1.bf16.msra.mxu0 %v7053_v23  ;;  %5038 = vmatprep.subr.bf16.mxu1 %v7054_v24  ;;  %v7123_v5 = vld [vmem:[%s10907_s1 + $0xd04] ss:$8 sps:$4 sm:$0xff]   ;;  %v7121_v9 = vld [vmem:[%s10907_s1 + $0xd00] ss:$8 sps:$4 sm:$0xff]   ;;  %v7129_v11 = vld [vmem:[%s10907_s1 + $0xd14] ss:$8 sps:$4 sm:$0xff]  }
  0x19   :  { %5530 = vmatprep.subr.bf16.mxu0 %v7056_v25  ;;  %v7124_v12 = vld [vmem:[%s10907_s1 + $0x110] ss:$8 sps:$4 sm:$0xff]   ;;  %v7132_v14 = vld [vmem:[%s10907_s1 + $0x124] ss:$8 sps:$4 sm:$0xff]   ;;  %v7130_v16 = vld [vmem:[%s10907_s1 + $0x120] ss:$8 sps:$4 sm:$0xff]  }
  0x1a   :  { %v7127_v13 = vld [vmem:[%s10907_s1 + $0xd10] ss:$8 sps:$4 sm:$0xff]   ;;  %v7135_v15 = vld [vmem:[%s10907_s1 + $0xd24] ss:$8 sps:$4 sm:$0xff]   ;;  %v7133_v17 = vld [vmem:[%s10907_s1 + $0xd20] ss:$8 sps:$4 sm:$0xff]  }
  0x1b   :  { %5039 = vmatpush1.bf16.msra.mxu1 %v7058_v26  ;;  %v7138_v18 = vld [vmem:[%s10907_s1 + $0x134] ss:$8 sps:$4 sm:$0xff]   ;;  %v7136_v20 = vld [vmem:[%s10907_s1 + $0x130] ss:$8 sps:$4 sm:$0xff]   ;;  %v7144_v22 = vld [vmem:[%s10907_s1 + $0x144] ss:$8 sps:$4 sm:$0xff]  }
  0x1c   :  { %5531 = vmatpush1.bf16.msra.mxu0 %v7059_v27  ;;  %5040 = vmatprep.subr.bf16.mxu1 %v7060_v28  ;;  %v7141_v19 = vld [vmem:[%s10907_s1 + $0xd34] ss:$8 sps:$4 sm:$0xff]   ;;  %v7139_v21 = vld [vmem:[%s10907_s1 + $0xd30] ss:$8 sps:$4 sm:$0xff]   ;;  %v7147_v23 = vld [vmem:[%s10907_s1 + $0xd44] ss:$8 sps:$4 sm:$0xff]  }
  0x1d   :  { %5532 = vmatprep.subr.bf16.mxu0 %v7062_v29  ;;  %v7142_v24 = vld [vmem:[%s10907_s1 + $0x140] ss:$8 sps:$4 sm:$0xff]   ;;  %v7150_v26 = vld [vmem:[%s10907_s1 + $0x154] ss:$8 sps:$4 sm:$0xff]   ;;  %v7148_v28 = vld [vmem:[%s10907_s1 + $0x150] ss:$8 sps:$4 sm:$0xff]  }
  0x1e   :  { %v7145_v25 = vld [vmem:[%s10907_s1 + $0xd40] ss:$8 sps:$4 sm:$0xff]   ;;  %v7153_v27 = vld [vmem:[%s10907_s1 + $0xd54] ss:$8 sps:$4 sm:$0xff]   ;;  %v7151_v29 = vld [vmem:[%s10907_s1 + $0xd50] ss:$8 sps:$4 sm:$0xff]  }
  0x1f   :  { %5041 = vmatpush1.bf16.msra.mxu1 %v7064_v30  ;;  %v7156_v30 = vld [vmem:[%s10907_s1 + $0x164] ss:$8 sps:$4 sm:$0xff]   ;;  %v7174_v46 = vld [vmem:[%s10907_s1 + $0x194] ss:$8 sps:$4 sm:$0xff]   ;;  %v7172_v48 = vld [vmem:[%s10907_s1 + $0x190] ss:$8 sps:$4 sm:$0xff]  }
  0x20   :  { %5533 = vmatpush1.bf16.msra.mxu0 %v7065_v31  ;;  %5042 = vmatprep.subr.bf16.mxu1 %v7066_v32  ;;  %v7159_v31 = vld [vmem:[%s10907_s1 + $0xd64] ss:$8 sps:$4 sm:$0xff]   ;;  %v7181_v53 = vld [vmem:[%s10907_s1 + $0xda0] ss:$8 sps:$4 sm:$0xff]  }
  0x21   :  { %5534 = vmatprep.subr.bf16.mxu0 %v7068_v33  ;;  %v8567_v32 = vld [vmem:[%s10908_s0 + $0x8] sm:$0xff] }
  0x22   :  { %v7154_v33 = vld [vmem:[%s10907_s1 + $0x160] ss:$8 sps:$4 sm:$0xff]   ;;  %v7180_v50 = vld [vmem:[%s10907_s1 + $0x1a4] ss:$8 sps:$4 sm:$0xff]  }
  0x23   :  { %5043 = vmatpush1.bf16.msra.mxu1 %v7070_v34  ;;  %v7157_v34 = vld [vmem:[%s10907_s1 + $0xd60] ss:$8 sps:$4 sm:$0xff]  }
  0x24   :  { %5535 = vmatpush1.bf16.msra.mxu0 %v7071_v35  ;;  %5044 = vmatprep.subr.bf16.mxu1 %v7072_v36  ;;  %v6073_v35 = vcombine.high %v8567_v32, %v8567_v32  ;;  %v8580_v36 = vld [vmem:[%s10908_s0 + $0x68] sm:$0xff] }
  0x25   :  { %5536 = vmatprep.subr.bf16.mxu0 %v7074_v37  ;;  %v7162_v37 = vld [vmem:[%s10907_s1 + $0x174] ss:$8 sps:$4 sm:$0xff]  }
  0x27   :  { %5045 = vmatpush1.bf16.msra.mxu1 %v7076_v38  ;;  %v6097_v38 = vcombine.high %v8580_v36, %v8580_v36 }
  0x28   :  { %5537 = vmatpush1.bf16.msra.mxu0 %v7077_v39  ;;  %5046 = vmatprep.subr.bf16.mxu1 %v7078_v40  ;;  %v7165_v39 = vld [vmem:[%s10907_s1 + $0xd74] ss:$8 sps:$4 sm:$0xff]   ;;  %v7160_v40 = vld [vmem:[%s10907_s1 + $0x170] ss:$8 sps:$4 sm:$0xff]  }
  0x29   :  { %5538 = vmatprep.subr.bf16.mxu0 %v7080_v41  ;;  %v7163_v41 = vld [vmem:[%s10907_s1 + $0xd70] ss:$8 sps:$4 sm:$0xff]  }
  0x2b   :  { %5047 = vmatpush1.bf16.msra.mxu1 %v7082_v42  ;;  %v7168_v42 = vld [vmem:[%s10907_s1 + $0x184] ss:$8 sps:$4 sm:$0xff]  }
  0x2c   :  { %5539 = vmatpush1.bf16.msra.mxu0 %v7083_v43  ;;  %5048 = vmatprep.subr.bf16.mxu1 %v7084_v44  ;;  %v7171_v43 = vld [vmem:[%s10907_s1 + $0xd84] ss:$8 sps:$4 sm:$0xff]   ;;  %v7166_v44 = vld [vmem:[%s10907_s1 + $0x180] ss:$8 sps:$4 sm:$0xff]  }
  0x2d   :  { %5540 = vmatprep.subr.bf16.mxu0 %v7086_v45  ;;  %v7169_v45 = vld [vmem:[%s10907_s1 + $0xd80] ss:$8 sps:$4 sm:$0xff]  }
  0x2f   :  { %5049 = vmatpush1.bf16.msra.mxu1 %v7088_v47  ;;  %v7177_v47 = vld [vmem:[%s10907_s1 + $0xd94] ss:$8 sps:$4 sm:$0xff]  }
  0x30   :  { %5541 = vmatpush1.bf16.msra.mxu0 %v7089_v49  ;;  %5050 = vmatprep.subr.bf16.mxu1 %v7090_v51  ;;  %v7175_v49 = vld [vmem:[%s10907_s1 + $0xd90] ss:$8 sps:$4 sm:$0xff]   ;;  %v7183_v51 = vld [vmem:[%s10907_s1 + $0xda4] ss:$8 sps:$4 sm:$0xff]  }
  0x31   :  { %5542 = vmatprep.subr.bf16.mxu0 %v7092_v52  ;;  %v7178_v52 = vld [vmem:[%s10907_s1 + $0x1a0] ss:$8 sps:$4 sm:$0xff]  }
  0x33   :  { %5051 = vmatpush1.bf16.msra.mxu1 %v7094_v54  ;;  %v7186_v54 = vld [vmem:[%s10907_s1 + $0x1b4] ss:$8 sps:$4 sm:$0xff]  }
  0x34   :  { %5543 = vmatpush1.bf16.msra.mxu0 %v7095_v55  ;;  %5052 = vmatprep.subr.bf16.mxu1 %v7096_v56  ;;  %v7189_v55 = vld [vmem:[%s10907_s1 + $0xdb4] ss:$8 sps:$4 sm:$0xff]   ;;  %v7184_v56 = vld [vmem:[%s10907_s1 + $0x1b0] ss:$8 sps:$4 sm:$0xff]  }
  0x35   :  { %5544 = vmatprep.subr.bf16.mxu0 %v7098_v57  ;;  %v7187_v57 = vld [vmem:[%s10907_s1 + $0xdb0] ss:$8 sps:$4 sm:$0xff]  }
  0x37   :  { %5053 = vmatpush1.bf16.msra.mxu1 %v7100_v58  ;;  %v7192_v58 = vld [vmem:[%s10907_s1 + $0x1c4] ss:$8 sps:$4 sm:$0xff]  }
  0x38   :  { %5545 = vmatpush1.bf16.msra.mxu0 %v7101_v59  ;;  %5054 = vmatprep.subr.bf16.mxu1 %v7102_v60  ;;  %v7195_v59 = vld [vmem:[%s10907_s1 + $0xdc4] ss:$8 sps:$4 sm:$0xff]   ;;  %v7190_v60 = vld [vmem:[%s10907_s1 + $0x1c0] ss:$8 sps:$4 sm:$0xff]  }
  0x39   :  { %5546 = vmatprep.subr.bf16.mxu0 %v7104_v61  ;;  %v7193_v61 = vld [vmem:[%s10907_s1 + $0xdc0] ss:$8 sps:$4 sm:$0xff]  }
  0x3b   :  { %5055 = vmatpush1.bf16.msra.mxu1 %v7106_v62  ;;  %v7198_v62 = vld [vmem:[%s10907_s1 + $0x1d4] ss:$8 sps:$4 sm:$0xff]  }
  0x3c   :  { %5547 = vmatpush1.bf16.msra.mxu0 %v7107_v63  ;;  %5056 = vmatprep.subr.bf16.mxu1 %v7108_v0  ;;  %v7201_v63 = vld [vmem:[%s10907_s1 + $0xdd4] ss:$8 sps:$4 sm:$0xff]   ;;  %v7196_v0 = vld [vmem:[%s10907_s1 + $0x1d0] ss:$8 sps:$4 sm:$0xff]  }
  0x3d   :  { %5548 = vmatprep.subr.bf16.mxu0 %v7110_v1  ;;  %v7199_v1 = vld [vmem:[%s10907_s1 + $0xdd0] ss:$8 sps:$4 sm:$0xff]  }
  0x3f   :  { %5057 = vmatpush1.bf16.msra.mxu1 %v7112_v2  ;;  %v7204_v2 = vld [vmem:[%s10907_s1 + $0x1e4] ss:$8 sps:$4 sm:$0xff]  }
  0x40   :  { %5549 = vmatpush1.bf16.msra.mxu0 %v7113_v3  ;;  %5067 = vmatprep.subr.bf16.mxu1 %v7118_v4  ;;  %v7207_v3 = vld [vmem:[%s10907_s1 + $0xde4] ss:$8 sps:$4 sm:$0xff]   ;;  %v7202_v4 = vld [vmem:[%s10907_s1 + $0x1e0] ss:$8 sps:$4 sm:$0xff]  }
  0x41   :  { %5559 = vmatprep.subr.bf16.mxu0 %v7123_v5  ;;  %v7205_v5 = vld [vmem:[%s10907_s1 + $0xde0] ss:$8 sps:$4 sm:$0xff]  }
  0x42   :  { %5059 = vmatmul.mubr.bf16.vlgmr.msra.gmra.mrb[0].mxu1 %v6070_v6  ;;  %v7210_v6 = vld [vmem:[%s10907_s1 + $0x1f4] ss:$8 sps:$4 sm:$0xff]  }
  0x43   :  { %5551 = vmatmul.mubr.bf16.vlgmr.msra.gmra.mrb[0].mxu0 %v6094_v7  ;;  %5068 = vmatpush1.bf16.msra.mxu1 %v7116_v8  ;;  %v7213_v7 = vld [vmem:[%s10907_s1 + $0xdf4] ss:$8 sps:$4 sm:$0xff]   ;;  %v7208_v8 = vld [vmem:[%s10907_s1 + $0x1f0] ss:$8 sps:$4 sm:$0xff]  }
  0x44   :  { %5560 = vmatpush1.bf16.msra.mxu0 %v7121_v9  ;;  %5069 = vmatprep.subr.bf16.mxu1 %v7126_v10  ;;  %v7211_v9 = vld [vmem:[%s10907_s1 + $0xdf0] ss:$8 sps:$4 sm:$0xff]   ;;  %v7218_v10 = vld [vmem:[%s10907_s1 + $0x204] ss:$8 sps:$4 sm:$0xff]  }
  0x45   :  { %5561 = vmatprep.subr.bf16.mxu0 %v7129_v11  ;;  %5099 = vmatprep.mubr.bf16.mxu1 %v6073_v35  ;;  %v7223_v11 = vld [vmem:[%s10907_s1 + $0xe04] ss:$8 sps:$4 sm:$0xff]   ;;  %v7245_v35 = vld [vmem:[%s10907_s1 + $0xe40] ss:$8 sps:$4 sm:$0xff]  }
  0x46   :  { %5591 = vmatprep.mubr.bf16.mxu0 %v6097_v38  ;;  %v7248_v38 = vld [vmem:[%s10907_s1 + $0x250] ss:$8 sps:$4 sm:$0xff]  }
  0x47   :  { %5070 = vmatpush1.bf16.msra.mxu1 %v7124_v12  ;;  %v6072_v12 = vcombine.low %v8567_v32, %v8567_v32  ;;  %v7244_v32 = vld [vmem:[%s10907_s1 + $0x244] ss:$8 sps:$4 sm:$0xff]  }
  0x48   :  { %5562 = vmatpush1.bf16.msra.mxu0 %v7127_v13  ;;  %5071 = vmatprep.subr.bf16.mxu1 %v7132_v14  ;;  %v7216_v13 = vld [vmem:[%s10907_s1 + $0x200] ss:$8 sps:$4 sm:$0xff]   ;;  %v6096_v14 = vcombine.low %v8580_v36, %v8580_v36  ;;  %v7250_v36 = vld [vmem:[%s10907_s1 + $0x254] ss:$8 sps:$4 sm:$0xff]  }
  0x49   :  { %5563 = vmatprep.subr.bf16.mxu0 %v7135_v15  ;;  %v7221_v15 = vld [vmem:[%s10907_s1 + $0xe00] ss:$8 sps:$4 sm:$0xff]  }
  0x4b   :  { %5072 = vmatpush1.bf16.msra.mxu1 %v7130_v16  ;;  %v7226_v16 = vld [vmem:[%s10907_s1 + $0x214] ss:$8 sps:$4 sm:$0xff]  }
  0x4c   :  { %5564 = vmatpush1.bf16.msra.mxu0 %v7133_v17  ;;  %5073 = vmatprep.subr.bf16.mxu1 %v7138_v18  ;;  %v7229_v17 = vld [vmem:[%s10907_s1 + $0xe14] ss:$8 sps:$4 sm:$0xff]  }
  0x4d   :  { %5565 = vmatprep.subr.bf16.mxu0 %v7141_v19  ;;  %v8717_v18 = vld [vmem:[%s10908_s0 + $0x10] sm:$0xff] }
  0x4e   :  { %v6075_v19 = vcombine.high %v8717_v18, %v8717_v18 }
  0x4f   :  { %5074 = vmatpush1.bf16.msra.mxu1 %v7136_v20  ;;  %v8724_v20 = vld [vmem:[%s10908_s0 + $0x70] sm:$0xff] }
  0x50   :  { %5566 = vmatpush1.bf16.msra.mxu0 %v7139_v21  ;;  %5075 = vmatprep.subr.bf16.mxu1 %v7144_v22  ;;  %v7224_v21 = vld [vmem:[%s10907_s1 + $0x210] ss:$8 sps:$4 sm:$0xff]  }
  0x51   :  { %5567 = vmatprep.subr.bf16.mxu0 %v7147_v23  ;;  %v7227_v22 = vld [vmem:[%s10907_s1 + $0xe10] ss:$8 sps:$4 sm:$0xff]   ;;  %v6099_v23 = vcombine.high %v8724_v20, %v8724_v20 }
  0x53   :  { %5076 = vmatpush1.bf16.msra.mxu1 %v7142_v24  ;;  %v7232_v24 = vld [vmem:[%s10907_s1 + $0x224] ss:$8 sps:$4 sm:$0xff]  }
  0x54   :  { %5568 = vmatpush1.bf16.msra.mxu0 %v7145_v25  ;;  %5077 = vmatprep.subr.bf16.mxu1 %v7150_v26  ;;  %v7235_v25 = vld [vmem:[%s10907_s1 + $0xe24] ss:$8 sps:$4 sm:$0xff]   ;;  %v7230_v26 = vld [vmem:[%s10907_s1 + $0x220] ss:$8 sps:$4 sm:$0xff]  }
  0x55   :  { %5569 = vmatprep.subr.bf16.mxu0 %v7153_v27  ;;  %v7233_v27 = vld [vmem:[%s10907_s1 + $0xe20] ss:$8 sps:$4 sm:$0xff]  }
  0x57   :  { %5078 = vmatpush1.bf16.msra.mxu1 %v7148_v28  ;;  %v7238_v28 = vld [vmem:[%s10907_s1 + $0x234] ss:$8 sps:$4 sm:$0xff]  }
  0x58   :  { %5570 = vmatpush1.bf16.msra.mxu0 %v7151_v29  ;;  %5079 = vmatprep.subr.bf16.mxu1 %v7156_v30  ;;  %v7241_v29 = vld [vmem:[%s10907_s1 + $0xe34] ss:$8 sps:$4 sm:$0xff]   ;;  %v7236_v30 = vld [vmem:[%s10907_s1 + $0x230] ss:$8 sps:$4 sm:$0xff]  }
  0x59   :  { %5571 = vmatprep.subr.bf16.mxu0 %v7159_v31  ;;  %v7239_v31 = vld [vmem:[%s10907_s1 + $0xe30] ss:$8 sps:$4 sm:$0xff]  }
  0x5b   :  { %5080 = vmatpush1.bf16.msra.mxu1 %v7154_v33  ;;  %v7247_v33 = vld [vmem:[%s10907_s1 + $0xe44] ss:$8 sps:$4 sm:$0xff]  }
  0x5c   :  { %5572 = vmatpush1.bf16.msra.mxu0 %v7157_v34  ;;  %5081 = vmatprep.subr.bf16.mxu1 %v7162_v37  ;;  %v7242_v34 = vld [vmem:[%s10907_s1 + $0x240] ss:$8 sps:$4 sm:$0xff]   ;;  %v7253_v37 = vld [vmem:[%s10907_s1 + $0xe54] ss:$8 sps:$4 sm:$0xff]  }
  0x5d   :  { %5573 = vmatprep.subr.bf16.mxu0 %v7165_v39  ;;  %v7251_v39 = vld [vmem:[%s10907_s1 + $0xe50] ss:$8 sps:$4 sm:$0xff]  }
  0x5f   :  { %5082 = vmatpush1.bf16.msra.mxu1 %v7160_v40  ;;  %v7256_v40 = vld [vmem:[%s10907_s1 + $0x264] ss:$8 sps:$4 sm:$0xff]  }
  0x60   :  { %5574 = vmatpush1.bf16.msra.mxu0 %v7163_v41  ;;  %5083 = vmatprep.subr.bf16.mxu1 %v7168_v42  ;;  %v7259_v41 = vld [vmem:[%s10907_s1 + $0xe64] ss:$8 sps:$4 sm:$0xff]   ;;  %v7254_v42 = vld [vmem:[%s10907_s1 + $0x260] ss:$8 sps:$4 sm:$0xff]  }
  0x61   :  { %5575 = vmatprep.subr.bf16.mxu0 %v7171_v43  ;;  %v7257_v43 = vld [vmem:[%s10907_s1 + $0xe60] ss:$8 sps:$4 sm:$0xff]  }
  0x63   :  { %5084 = vmatpush1.bf16.msra.mxu1 %v7166_v44  ;;  %v7262_v44 = vld [vmem:[%s10907_s1 + $0x274] ss:$8 sps:$4 sm:$0xff]  }
  0x64   :  { %5576 = vmatpush1.bf16.msra.mxu0 %v7169_v45  ;;  %5085 = vmatprep.subr.bf16.mxu1 %v7174_v46  ;;  %v7265_v45 = vld [vmem:[%s10907_s1 + $0xe74] ss:$8 sps:$4 sm:$0xff]   ;;  %v7260_v46 = vld [vmem:[%s10907_s1 + $0x270] ss:$8 sps:$4 sm:$0xff]  }
  0x65   :  { %5577 = vmatprep.subr.bf16.mxu0 %v7177_v47  ;;  %v7263_v47 = vld [vmem:[%s10907_s1 + $0xe70] ss:$8 sps:$4 sm:$0xff]  }
  0x67   :  { %5086 = vmatpush1.bf16.msra.mxu1 %v7172_v48  ;;  %v7268_v48 = vld [vmem:[%s10907_s1 + $0x284] ss:$8 sps:$4 sm:$0xff]  }
  0x68   :  { %5578 = vmatpush1.bf16.msra.mxu0 %v7175_v49  ;;  %5087 = vmatprep.subr.bf16.mxu1 %v7180_v50  ;;  %v7271_v49 = vld [vmem:[%s10907_s1 + $0xe84] ss:$8 sps:$4 sm:$0xff]   ;;  %v7266_v50 = vld [vmem:[%s10907_s1 + $0x280] ss:$8 sps:$4 sm:$0xff]  }
  0x69   :  { %5579 = vmatprep.subr.bf16.mxu0 %v7183_v51  ;;  %v7269_v51 = vld [vmem:[%s10907_s1 + $0xe80] ss:$8 sps:$4 sm:$0xff]  }
  0x6b   :  { %5088 = vmatpush1.bf16.msra.mxu1 %v7178_v52  ;;  %v7274_v52 = vld [vmem:[%s10907_s1 + $0x294] ss:$8 sps:$4 sm:$0xff]  }
  0x6c   :  { %5580 = vmatpush1.bf16.msra.mxu0 %v7181_v53  ;;  %5089 = vmatprep.subr.bf16.mxu1 %v7186_v54  ;;  %v7277_v53 = vld [vmem:[%s10907_s1 + $0xe94] ss:$8 sps:$4 sm:$0xff]   ;;  %v7272_v54 = vld [vmem:[%s10907_s1 + $0x290] ss:$8 sps:$4 sm:$0xff]  }
  0x6d   :  { %5581 = vmatprep.subr.bf16.mxu0 %v7189_v55  ;;  %v7275_v55 = vld [vmem:[%s10907_s1 + $0xe90] ss:$8 sps:$4 sm:$0xff]  }
  0x6f   :  { %5090 = vmatpush1.bf16.msra.mxu1 %v7184_v56  ;;  %v7280_v56 = vld [vmem:[%s10907_s1 + $0x2a4] ss:$8 sps:$4 sm:$0xff]  }
  0x70   :  { %5582 = vmatpush1.bf16.msra.mxu0 %v7187_v57  ;;  %5091 = vmatprep.subr.bf16.mxu1 %v7192_v58  ;;  %v7283_v57 = vld [vmem:[%s10907_s1 + $0xea4] ss:$8 sps:$4 sm:$0xff]   ;;  %v7278_v58 = vld [vmem:[%s10907_s1 + $0x2a0] ss:$8 sps:$4 sm:$0xff]  }
  0x71   :  { %5583 = vmatprep.subr.bf16.mxu0 %v7195_v59  ;;  %v7281_v59 = vld [vmem:[%s10907_s1 + $0xea0] ss:$8 sps:$4 sm:$0xff]  }
  0x73   :  { %5092 = vmatpush1.bf16.msra.mxu1 %v7190_v60  ;;  %v7286_v60 = vld [vmem:[%s10907_s1 + $0x2b4] ss:$8 sps:$4 sm:$0xff]  }
  0x74   :  { %5584 = vmatpush1.bf16.msra.mxu0 %v7193_v61  ;;  %5093 = vmatprep.subr.bf16.mxu1 %v7198_v62  ;;  %v7289_v61 = vld [vmem:[%s10907_s1 + $0xeb4] ss:$8 sps:$4 sm:$0xff]   ;;  %v7284_v62 = vld [vmem:[%s10907_s1 + $0x2b0] ss:$8 sps:$4 sm:$0xff]  }
  0x75   :  { %5585 = vmatprep.subr.bf16.mxu0 %v7201_v63  ;;  %v7287_v63 = vld [vmem:[%s10907_s1 + $0xeb0] ss:$8 sps:$4 sm:$0xff]  }
  0x77   :  { %5094 = vmatpush1.bf16.msra.mxu1 %v7196_v0  ;;  %v7292_v0 = vld [vmem:[%s10907_s1 + $0x2c4] ss:$8 sps:$4 sm:$0xff]  }
  0x78   :  { %5586 = vmatpush1.bf16.msra.mxu0 %v7199_v1  ;;  %5095 = vmatprep.subr.bf16.mxu1 %v7204_v2  ;;  %v7295_v1 = vld [vmem:[%s10907_s1 + $0xec4] ss:$8 sps:$4 sm:$0xff]   ;;  %v7290_v2 = vld [vmem:[%s10907_s1 + $0x2c0] ss:$8 sps:$4 sm:$0xff]  }
  0x79   :  { %5587 = vmatprep.subr.bf16.mxu0 %v7207_v3  ;;  %v7293_v3 = vld [vmem:[%s10907_s1 + $0xec0] ss:$8 sps:$4 sm:$0xff]  }
  0x7b   :  { %5096 = vmatpush1.bf16.msra.mxu1 %v7202_v4  ;;  %v7298_v4 = vld [vmem:[%s10907_s1 + $0x2d4] ss:$8 sps:$4 sm:$0xff]  }
  0x7c   :  { %5588 = vmatpush1.bf16.msra.mxu0 %v7205_v5  ;;  %5097 = vmatprep.subr.bf16.mxu1 %v7210_v6  ;;  %v7301_v5 = vld [vmem:[%s10907_s1 + $0xed4] ss:$8 sps:$4 sm:$0xff]   ;;  %v7296_v6 = vld [vmem:[%s10907_s1 + $0x2d0] ss:$8 sps:$4 sm:$0xff]  }
  0x7d   :  { %5589 = vmatprep.subr.bf16.mxu0 %v7213_v7  ;;  %v7299_v7 = vld [vmem:[%s10907_s1 + $0xed0] ss:$8 sps:$4 sm:$0xff]  }
  0x7f   :  { %5098 = vmatpush1.bf16.msra.mxu1 %v7208_v8  ;;  %v7304_v8 = vld [vmem:[%s10907_s1 + $0x2e4] ss:$8 sps:$4 sm:$0xff]  }
  0x80   :  { %5590 = vmatpush1.bf16.msra.mxu0 %v7211_v9  ;;  %5108 = vmatprep.subr.bf16.mxu1 %v7218_v10  ;;  %v7307_v9 = vld [vmem:[%s10907_s1 + $0xee4] ss:$8 sps:$4 sm:$0xff]   ;;  %v7302_v10 = vld [vmem:[%s10907_s1 + $0x2e0] ss:$8 sps:$4 sm:$0xff]  }
  0x81   :  { %5600 = vmatprep.subr.bf16.mxu0 %v7223_v11  ;;  %v7305_v11 = vld [vmem:[%s10907_s1 + $0xee0] ss:$8 sps:$4 sm:$0xff]  }
  0x82   :  { %5100 = vmatmul.mubr.bf16.vlgmr.msra.gmra.mrb[0].mxu1 %v6072_v12  ;;  %v7310_v12 = vld [vmem:[%s10907_s1 + $0x2f4] ss:$8 sps:$4 sm:$0xff]  }
  0x83   :  { %5592 = vmatmul.mubr.bf16.vlgmr.msra.gmra.mrb[0].mxu0 %v6096_v14  ;;  %5109 = vmatpush1.bf16.msra.mxu1 %v7216_v13  ;;  %v7313_v13 = vld [vmem:[%s10907_s1 + $0xef4] ss:$8 sps:$4 sm:$0xff]   ;;  %v7308_v14 = vld [vmem:[%s10907_s1 + $0x2f0] ss:$8 sps:$4 sm:$0xff]  }
  0x84   :  { %5601 = vmatpush1.bf16.msra.mxu0 %v7221_v15  ;;  %5110 = vmatprep.subr.bf16.mxu1 %v7226_v16  ;;  %v7311_v15 = vld [vmem:[%s10907_s1 + $0xef0] ss:$8 sps:$4 sm:$0xff]   ;;  %v7318_v16 = vld [vmem:[%s10907_s1 + $0x304] ss:$8 sps:$4 sm:$0xff]  }
  0x85   :  { %5602 = vmatprep.subr.bf16.mxu0 %v7229_v17  ;;  %5140 = vmatprep.mubr.bf16.mxu1 %v6075_v19  ;;  %v7323_v17 = vld [vmem:[%s10907_s1 + $0xf04] ss:$8 sps:$4 sm:$0xff]   ;;  %v7316_v19 = vld [vmem:[%s10907_s1 + $0x300] ss:$8 sps:$4 sm:$0xff]  }
  0x86   :  { %5632 = vmatprep.mubr.bf16.mxu0 %v6099_v23  ;;  %v6098_v23 = vcombine.low %v8724_v20, %v8724_v20 }
  0x87   :  { %5111 = vmatpush1.bf16.msra.mxu1 %v7224_v21  ;;  %v7321_v21 = vld [vmem:[%s10907_s1 + $0xf00] ss:$8 sps:$4 sm:$0xff]  }
  0x88   :  { %5603 = vmatpush1.bf16.msra.mxu0 %v7227_v22  ;;  %5112 = vmatprep.subr.bf16.mxu1 %v7232_v24  ;;  %v6074_v22 = vcombine.low %v8717_v18, %v8717_v18  ;;  %v8921_v24 = vld [vmem:[%s10908_s0 + $0x18] sm:$0xff] }
  0x89   :  { %5604 = vmatprep.subr.bf16.mxu0 %v7235_v25  ;;  %v8926_v25 = vld [vmem:[%s10908_s0 + $0x78] sm:$0xff]  ;;  %v6077_v20 = vcombine.high %v8921_v24, %v8921_v24 }
  0x8a   :  { %v7329_v18 = vld [vmem:[%s10907_s1 + $0xf14] ss:$8 sps:$4 sm:$0xff]  }
  0x8b   :  { %5113 = vmatpush1.bf16.msra.mxu1 %v7230_v26  ;;  %v7326_v26 = vld [vmem:[%s10907_s1 + $0x314] ss:$8 sps:$4 sm:$0xff]  }
  0x8c   :  { %5605 = vmatpush1.bf16.msra.mxu0 %v7233_v27  ;;  %5114 = vmatprep.subr.bf16.mxu1 %v7238_v28  ;;  %v6101_v27 = vcombine.high %v8926_v25, %v8926_v25  ;;  %v7324_v28 = vld [vmem:[%s10907_s1 + $0x310] ss:$8 sps:$4 sm:$0xff]  }
  0x8d   :  { %5606 = vmatprep.subr.bf16.mxu0 %v7241_v29  ;;  %v7327_v29 = vld [vmem:[%s10907_s1 + $0xf10] ss:$8 sps:$4 sm:$0xff]  }
  0x8f   :  { %5115 = vmatpush1.bf16.msra.mxu1 %v7236_v30  ;;  %v7332_v30 = vld [vmem:[%s10907_s1 + $0x324] ss:$8 sps:$4 sm:$0xff]  }
  0x90   :  { %5607 = vmatpush1.bf16.msra.mxu0 %v7239_v31  ;;  %5116 = vmatprep.subr.bf16.mxu1 %v7244_v32  ;;  %v7335_v31 = vld [vmem:[%s10907_s1 + $0xf24] ss:$8 sps:$4 sm:$0xff]   ;;  %v7330_v32 = vld [vmem:[%s10907_s1 + $0x320] ss:$8 sps:$4 sm:$0xff]  }
  0x91   :  { %5608 = vmatprep.subr.bf16.mxu0 %v7247_v33  ;;  %v7333_v33 = vld [vmem:[%s10907_s1 + $0xf20] ss:$8 sps:$4 sm:$0xff]  }
  0x93   :  { %5117 = vmatpush1.bf16.msra.mxu1 %v7242_v34  ;;  %v7338_v34 = vld [vmem:[%s10907_s1 + $0x334] ss:$8 sps:$4 sm:$0xff]  }
  0x94   :  { %5609 = vmatpush1.bf16.msra.mxu0 %v7245_v35  ;;  %5118 = vmatprep.subr.bf16.mxu1 %v7250_v36  ;;  %v7341_v35 = vld [vmem:[%s10907_s1 + $0xf34] ss:$8 sps:$4 sm:$0xff]   ;;  %v7336_v36 = vld [vmem:[%s10907_s1 + $0x330] ss:$8 sps:$4 sm:$0xff]  }
  0x95   :  { %5610 = vmatprep.subr.bf16.mxu0 %v7253_v37  ;;  %v7339_v37 = vld [vmem:[%s10907_s1 + $0xf30] ss:$8 sps:$4 sm:$0xff]  }
  0x97   :  { %5119 = vmatpush1.bf16.msra.mxu1 %v7248_v38  ;;  %v7344_v38 = vld [vmem:[%s10907_s1 + $0x344] ss:$8 sps:$4 sm:$0xff]  }
  0x98   :  { %5611 = vmatpush1.bf16.msra.mxu0 %v7251_v39  ;;  %5120 = vmatprep.subr.bf16.mxu1 %v7256_v40  ;;  %v7347_v39 = vld [vmem:[%s10907_s1 + $0xf44] ss:$8 sps:$4 sm:$0xff]   ;;  %v7342_v40 = vld [vmem:[%s10907_s1 + $0x340] ss:$8 sps:$4 sm:$0xff]  }
  0x99   :  { %5612 = vmatprep.subr.bf16.mxu0 %v7259_v41  ;;  %v7345_v41 = vld [vmem:[%s10907_s1 + $0xf40] ss:$8 sps:$4 sm:$0xff]  }
  0x9b   :  { %5121 = vmatpush1.bf16.msra.mxu1 %v7254_v42  ;;  %v7350_v42 = vld [vmem:[%s10907_s1 + $0x354] ss:$8 sps:$4 sm:$0xff]  }
  0x9c   :  { %5613 = vmatpush1.bf16.msra.mxu0 %v7257_v43  ;;  %5122 = vmatprep.subr.bf16.mxu1 %v7262_v44  ;;  %v7353_v43 = vld [vmem:[%s10907_s1 + $0xf54] ss:$8 sps:$4 sm:$0xff]   ;;  %v7348_v44 = vld [vmem:[%s10907_s1 + $0x350] ss:$8 sps:$4 sm:$0xff]  }
  0x9d   :  { %5614 = vmatprep.subr.bf16.mxu0 %v7265_v45  ;;  %v7351_v45 = vld [vmem:[%s10907_s1 + $0xf50] ss:$8 sps:$4 sm:$0xff]  }
  0x9f   :  { %5123 = vmatpush1.bf16.msra.mxu1 %v7260_v46  ;;  %v7356_v46 = vld [vmem:[%s10907_s1 + $0x364] ss:$8 sps:$4 sm:$0xff]  }
  0xa0   :  { %5615 = vmatpush1.bf16.msra.mxu0 %v7263_v47  ;;  %5124 = vmatprep.subr.bf16.mxu1 %v7268_v48  ;;  %v7359_v47 = vld [vmem:[%s10907_s1 + $0xf64] ss:$8 sps:$4 sm:$0xff]   ;;  %v7354_v48 = vld [vmem:[%s10907_s1 + $0x360] ss:$8 sps:$4 sm:$0xff]  }
  0xa1   :  { %5616 = vmatprep.subr.bf16.mxu0 %v7271_v49  ;;  %v7357_v49 = vld [vmem:[%s10907_s1 + $0xf60] ss:$8 sps:$4 sm:$0xff]  }
  0xa3   :  { %5125 = vmatpush1.bf16.msra.mxu1 %v7266_v50  ;;  %v7362_v50 = vld [vmem:[%s10907_s1 + $0x374] ss:$8 sps:$4 sm:$0xff]  }
  0xa4   :  { %5617 = vmatpush1.bf16.msra.mxu0 %v7269_v51  ;;  %5126 = vmatprep.subr.bf16.mxu1 %v7274_v52  ;;  %v7365_v51 = vld [vmem:[%s10907_s1 + $0xf74] ss:$8 sps:$4 sm:$0xff]   ;;  %v7360_v52 = vld [vmem:[%s10907_s1 + $0x370] ss:$8 sps:$4 sm:$0xff]  }
  0xa5   :  { %5618 = vmatprep.subr.bf16.mxu0 %v7277_v53  ;;  %v7363_v53 = vld [vmem:[%s10907_s1 + $0xf70] ss:$8 sps:$4 sm:$0xff]  }
  0xa7   :  { %5127 = vmatpush1.bf16.msra.mxu1 %v7272_v54  ;;  %v7368_v54 = vld [vmem:[%s10907_s1 + $0x384] ss:$8 sps:$4 sm:$0xff]  }
  0xa8   :  { %5619 = vmatpush1.bf16.msra.mxu0 %v7275_v55  ;;  %5128 = vmatprep.subr.bf16.mxu1 %v7280_v56  ;;  %v7371_v55 = vld [vmem:[%s10907_s1 + $0xf84] ss:$8 sps:$4 sm:$0xff]   ;;  %v7366_v56 = vld [vmem:[%s10907_s1 + $0x380] ss:$8 sps:$4 sm:$0xff]  }
  0xa9   :  { %5620 = vmatprep.subr.bf16.mxu0 %v7283_v57  ;;  %v7369_v57 = vld [vmem:[%s10907_s1 + $0xf80] ss:$8 sps:$4 sm:$0xff]  }
  0xab   :  { %5129 = vmatpush1.bf16.msra.mxu1 %v7278_v58  ;;  %v7374_v58 = vld [vmem:[%s10907_s1 + $0x394] ss:$8 sps:$4 sm:$0xff]  }
  0xac   :  { %5621 = vmatpush1.bf16.msra.mxu0 %v7281_v59  ;;  %5130 = vmatprep.subr.bf16.mxu1 %v7286_v60  ;;  %v7377_v59 = vld [vmem:[%s10907_s1 + $0xf94] ss:$8 sps:$4 sm:$0xff]   ;;  %v7372_v60 = vld [vmem:[%s10907_s1 + $0x390] ss:$8 sps:$4 sm:$0xff]  }
  0xad   :  { %5622 = vmatprep.subr.bf16.mxu0 %v7289_v61  ;;  %v7375_v61 = vld [vmem:[%s10907_s1 + $0xf90] ss:$8 sps:$4 sm:$0xff]  }
  0xaf   :  { %5131 = vmatpush1.bf16.msra.mxu1 %v7284_v62  ;;  %v7380_v62 = vld [vmem:[%s10907_s1 + $0x3a4] ss:$8 sps:$4 sm:$0xff]  }
  0xb0   :  { %5623 = vmatpush1.bf16.msra.mxu0 %v7287_v63  ;;  %5132 = vmatprep.subr.bf16.mxu1 %v7292_v0  ;;  %v7383_v63 = vld [vmem:[%s10907_s1 + $0xfa4] ss:$8 sps:$4 sm:$0xff]   ;;  %v7378_v0 = vld [vmem:[%s10907_s1 + $0x3a0] ss:$8 sps:$4 sm:$0xff]  }
  0xb1   :  { %5624 = vmatprep.subr.bf16.mxu0 %v7295_v1  ;;  %v7381_v1 = vld [vmem:[%s10907_s1 + $0xfa0] ss:$8 sps:$4 sm:$0xff]  }
  0xb3   :  { %5133 = vmatpush1.bf16.msra.mxu1 %v7290_v2  ;;  %v7386_v2 = vld [vmem:[%s10907_s1 + $0x3b4] ss:$8 sps:$4 sm:$0xff]  }
  0xb4   :  { %5625 = vmatpush1.bf16.msra.mxu0 %v7293_v3  ;;  %5134 = vmatprep.subr.bf16.mxu1 %v7298_v4  ;;  %v7389_v3 = vld [vmem:[%s10907_s1 + $0xfb4] ss:$8 sps:$4 sm:$0xff]   ;;  %v7384_v4 = vld [vmem:[%s10907_s1 + $0x3b0] ss:$8 sps:$4 sm:$0xff]  }
  0xb5   :  { %5626 = vmatprep.subr.bf16.mxu0 %v7301_v5  ;;  %v7387_v5 = vld [vmem:[%s10907_s1 + $0xfb0] ss:$8 sps:$4 sm:$0xff]  }
  0xb7   :  { %5135 = vmatpush1.bf16.msra.mxu1 %v7296_v6  ;;  %v7392_v6 = vld [vmem:[%s10907_s1 + $0x3c4] ss:$8 sps:$4 sm:$0xff]  }
  0xb8   :  { %5627 = vmatpush1.bf16.msra.mxu0 %v7299_v7  ;;  %5136 = vmatprep.subr.bf16.mxu1 %v7304_v8  ;;  %v7395_v7 = vld [vmem:[%s10907_s1 + $0xfc4] ss:$8 sps:$4 sm:$0xff]   ;;  %v7390_v8 = vld [vmem:[%s10907_s1 + $0x3c0] ss:$8 sps:$4 sm:$0xff]  }
  0xb9   :  { %5628 = vmatprep.subr.bf16.mxu0 %v7307_v9  ;;  %v7393_v9 = vld [vmem:[%s10907_s1 + $0xfc0] ss:$8 sps:$4 sm:$0xff]  }
  0xbb   :  { %5137 = vmatpush1.bf16.msra.mxu1 %v7302_v10  ;;  %v7398_v10 = vld [vmem:[%s10907_s1 + $0x3d4] ss:$8 sps:$4 sm:$0xff]  }
  0xbc   :  { %5629 = vmatpush1.bf16.msra.mxu0 %v7305_v11  ;;  %5138 = vmatprep.subr.bf16.mxu1 %v7310_v12  ;;  %v7401_v11 = vld [vmem:[%s10907_s1 + $0xfd4] ss:$8 sps:$4 sm:$0xff]   ;;  %v7396_v12 = vld [vmem:[%s10907_s1 + $0x3d0] ss:$8 sps:$4 sm:$0xff]  }
  0xbd   :  { %5630 = vmatprep.subr.bf16.mxu0 %v7313_v13  ;;  %v7399_v13 = vld [vmem:[%s10907_s1 + $0xfd0] ss:$8 sps:$4 sm:$0xff]  }
  0xbf   :  { %5139 = vmatpush1.bf16.msra.mxu1 %v7308_v14  ;;  %v7404_v14 = vld [vmem:[%s10907_s1 + $0x3e4] ss:$8 sps:$4 sm:$0xff]  }
  0xc0   :  { %5631 = vmatpush1.bf16.msra.mxu0 %v7311_v15  ;;  %5149 = vmatprep.subr.bf16.mxu1 %v7318_v16  ;;  %v7407_v15 = vld [vmem:[%s10907_s1 + $0xfe4] ss:$8 sps:$4 sm:$0xff]   ;;  %v7402_v16 = vld [vmem:[%s10907_s1 + $0x3e0] ss:$8 sps:$4 sm:$0xff]  }
  0xc1   :  { %5641 = vmatprep.subr.bf16.mxu0 %v7323_v17  ;;  %v7405_v17 = vld [vmem:[%s10907_s1 + $0xfe0] ss:$8 sps:$4 sm:$0xff]  }
  0xc2   :  { %5141 = vmatmul.mubr.bf16.vlgmr.msra.gmra.mrb[0].mxu1 %v6074_v22  ;;  %v7408_v22 = vld [vmem:[%s10907_s1 + $0x3f0] ss:$8 sps:$4 sm:$0xff]  }
  0xc3   :  { %5633 = vmatmul.mubr.bf16.vlgmr.msra.gmra.mrb[0].mxu0 %v6098_v23  ;;  %5150 = vmatpush1.bf16.msra.mxu1 %v7316_v19  ;;  %v7410_v19 = vld [vmem:[%s10907_s1 + $0x3f4] ss:$8 sps:$4 sm:$0xff]   ;;  %v7411_v23 = vld [vmem:[%s10907_s1 + $0xff0] ss:$8 sps:$4 sm:$0xff]  }
  0xc4   :  { %5642 = vmatpush1.bf16.msra.mxu0 %v7321_v21  ;;  %5151 = vmatprep.subr.bf16.mxu1 %v7326_v26  ;;  %v7413_v21 = vld [vmem:[%s10907_s1 + $0xff4] ss:$8 sps:$4 sm:$0xff]   ;;  %v7418_v26 = vld [vmem:[%s10907_s1 + $0x404] ss:$8 sps:$4 sm:$0xff]  }
  0xc5   :  { %5643 = vmatprep.subr.bf16.mxu0 %v7329_v18  ;;  %5181 = vmatprep.mubr.bf16.mxu1 %v6077_v20  ;;  %v7423_v18 = vld [vmem:[%s10907_s1 + $0x1004] ss:$8 sps:$4 sm:$0xff]  }
  0xc6   :  { %5673 = vmatprep.mubr.bf16.mxu0 %v6101_v27  ;;  %v9121_v20 = vld [vmem:[%s10908_s0 + $0x20] sm:$0xff]  ;;  %v6076_v27 = vcombine.low %v8921_v24, %v8921_v24  ;;  %v7426_v24 = vld [vmem:[%s10907_s1 + $0x414] ss:$8 sps:$4 sm:$0xff]  }
  0xc7   :  { %5152 = vmatpush1.bf16.msra.mxu1 %v7324_v28  ;;  %v6100_v28 = vcombine.low %v8926_v25, %v8926_v25  ;;  %v7429_v25 = vld [vmem:[%s10907_s1 + $0x1014] ss:$8 sps:$4 sm:$0xff]  }
  0xc8   :  { %5644 = vmatpush1.bf16.msra.mxu0 %v7327_v29  ;;  %5153 = vmatprep.subr.bf16.mxu1 %v7332_v30  ;;  %v9130_v29 = vld [vmem:[%s10908_s0 + $0x80] sm:$0xff] }
  0xc9   :  { %5645 = vmatprep.subr.bf16.mxu0 %v7335_v31  ;;  %v7416_v30 = vld [vmem:[%s10907_s1 + $0x400] ss:$8 sps:$4 sm:$0xff]  }
  0xca   :  { %v7421_v31 = vld [vmem:[%s10907_s1 + $0x1000] ss:$8 sps:$4 sm:$0xff]  }
  0xcb   :  { %5154 = vmatpush1.bf16.msra.mxu1 %v7330_v32  ;;  %v6079_v32 = vcombine.high %v9121_v20, %v9121_v20 }
  0xcc   :  { %5646 = vmatpush1.bf16.msra.mxu0 %v7333_v33  ;;  %5155 = vmatprep.subr.bf16.mxu1 %v7338_v34  ;;  %v6103_v33 = vcombine.high %v9130_v29, %v9130_v29  ;;  %v7424_v34 = vld [vmem:[%s10907_s1 + $0x410] ss:$8 sps:$4 sm:$0xff]  }
  0xcd   :  { %5647 = vmatprep.subr.bf16.mxu0 %v7341_v35  ;;  %v7427_v35 = vld [vmem:[%s10907_s1 + $0x1010] ss:$8 sps:$4 sm:$0xff]  }
  0xcf   :  { %5156 = vmatpush1.bf16.msra.mxu1 %v7336_v36  ;;  %v7432_v36 = vld [vmem:[%s10907_s1 + $0x424] ss:$8 sps:$4 sm:$0xff]  }
  0xd0   :  { %5648 = vmatpush1.bf16.msra.mxu0 %v7339_v37  ;;  %5157 = vmatprep.subr.bf16.mxu1 %v7344_v38  ;;  %v7435_v37 = vld [vmem:[%s10907_s1 + $0x1024] ss:$8 sps:$4 sm:$0xff]   ;;  %v7430_v38 = vld [vmem:[%s10907_s1 + $0x420] ss:$8 sps:$4 sm:$0xff]  }
  0xd1   :  { %5649 = vmatprep.subr.bf16.mxu0 %v7347_v39  ;;  %v7433_v39 = vld [vmem:[%s10907_s1 + $0x1020] ss:$8 sps:$4 sm:$0xff]  }
  0xd3   :  { %5158 = vmatpush1.bf16.msra.mxu1 %v7342_v40  ;;  %v7438_v40 = vld [vmem:[%s10907_s1 + $0x434] ss:$8 sps:$4 sm:$0xff]  }
  0xd4   :  { %5650 = vmatpush1.bf16.msra.mxu0 %v7345_v41  ;;  %5159 = vmatprep.subr.bf16.mxu1 %v7350_v42  ;;  %v7441_v41 = vld [vmem:[%s10907_s1 + $0x1034] ss:$8 sps:$4 sm:$0xff]   ;;  %v7436_v42 = vld [vmem:[%s10907_s1 + $0x430] ss:$8 sps:$4 sm:$0xff]  }
  0xd5   :  { %5651 = vmatprep.subr.bf16.mxu0 %v7353_v43  ;;  %v7439_v43 = vld [vmem:[%s10907_s1 + $0x1030] ss:$8 sps:$4 sm:$0xff]  }
  0xd7   :  { %5160 = vmatpush1.bf16.msra.mxu1 %v7348_v44  ;;  %v7444_v44 = vld [vmem:[%s10907_s1 + $0x444] ss:$8 sps:$4 sm:$0xff]  }
  0xd8   :  { %5652 = vmatpush1.bf16.msra.mxu0 %v7351_v45  ;;  %5161 = vmatprep.subr.bf16.mxu1 %v7356_v46  ;;  %v7447_v45 = vld [vmem:[%s10907_s1 + $0x1044] ss:$8 sps:$4 sm:$0xff]   ;;  %v7442_v46 = vld [vmem:[%s10907_s1 + $0x440] ss:$8 sps:$4 sm:$0xff]  }
  0xd9   :  { %5653 = vmatprep.subr.bf16.mxu0 %v7359_v47  ;;  %v7445_v47 = vld [vmem:[%s10907_s1 + $0x1040] ss:$8 sps:$4 sm:$0xff]  }
  0xdb   :  { %5162 = vmatpush1.bf16.msra.mxu1 %v7354_v48  ;;  %v7450_v48 = vld [vmem:[%s10907_s1 + $0x454] ss:$8 sps:$4 sm:$0xff]  }
  0xdc   :  { %5654 = vmatpush1.bf16.msra.mxu0 %v7357_v49  ;;  %5163 = vmatprep.subr.bf16.mxu1 %v7362_v50  ;;  %v7453_v49 = vld [vmem:[%s10907_s1 + $0x1054] ss:$8 sps:$4 sm:$0xff]   ;;  %v7448_v50 = vld [vmem:[%s10907_s1 + $0x450] ss:$8 sps:$4 sm:$0xff]  }
  0xdd   :  { %5655 = vmatprep.subr.bf16.mxu0 %v7365_v51  ;;  %v7451_v51 = vld [vmem:[%s10907_s1 + $0x1050] ss:$8 sps:$4 sm:$0xff]  }
  0xdf   :  { %5164 = vmatpush1.bf16.msra.mxu1 %v7360_v52  ;;  %v7456_v52 = vld [vmem:[%s10907_s1 + $0x464] ss:$8 sps:$4 sm:$0xff]  }
  0xe0   :  { %5656 = vmatpush1.bf16.msra.mxu0 %v7363_v53  ;;  %5165 = vmatprep.subr.bf16.mxu1 %v7368_v54  ;;  %v7459_v53 = vld [vmem:[%s10907_s1 + $0x1064] ss:$8 sps:$4 sm:$0xff]   ;;  %v7454_v54 = vld [vmem:[%s10907_s1 + $0x460] ss:$8 sps:$4 sm:$0xff]  }
  0xe1   :  { %5657 = vmatprep.subr.bf16.mxu0 %v7371_v55  ;;  %v7457_v55 = vld [vmem:[%s10907_s1 + $0x1060] ss:$8 sps:$4 sm:$0xff]  }
  0xe3   :  { %5166 = vmatpush1.bf16.msra.mxu1 %v7366_v56  ;;  %v7462_v56 = vld [vmem:[%s10907_s1 + $0x474] ss:$8 sps:$4 sm:$0xff]  }
  0xe4   :  { %5658 = vmatpush1.bf16.msra.mxu0 %v7369_v57  ;;  %5167 = vmatprep.subr.bf16.mxu1 %v7374_v58  ;;  %v7465_v57 = vld [vmem:[%s10907_s1 + $0x1074] ss:$8 sps:$4 sm:$0xff]   ;;  %v7460_v58 = vld [vmem:[%s10907_s1 + $0x470] ss:$8 sps:$4 sm:$0xff]  }
  0xe5   :  { %5659 = vmatprep.subr.bf16.mxu0 %v7377_v59  ;;  %v7463_v59 = vld [vmem:[%s10907_s1 + $0x1070] ss:$8 sps:$4 sm:$0xff]  }
  0xe7   :  { %5168 = vmatpush1.bf16.msra.mxu1 %v7372_v60  ;;  %v7468_v60 = vld [vmem:[%s10907_s1 + $0x484] ss:$8 sps:$4 sm:$0xff]  }
  0xe8   :  { %5660 = vmatpush1.bf16.msra.mxu0 %v7375_v61  ;;  %5169 = vmatprep.subr.bf16.mxu1 %v7380_v62  ;;  %v7471_v61 = vld [vmem:[%s10907_s1 + $0x1084] ss:$8 sps:$4 sm:$0xff]   ;;  %v7466_v62 = vld [vmem:[%s10907_s1 + $0x480] ss:$8 sps:$4 sm:$0xff]  }
  0xe9   :  { %5661 = vmatprep.subr.bf16.mxu0 %v7383_v63  ;;  %v7469_v63 = vld [vmem:[%s10907_s1 + $0x1080] ss:$8 sps:$4 sm:$0xff]  }
  0xeb   :  { %5170 = vmatpush1.bf16.msra.mxu1 %v7378_v0  ;;  %v7474_v0 = vld [vmem:[%s10907_s1 + $0x494] ss:$8 sps:$4 sm:$0xff]  }
  0xec   :  { %5662 = vmatpush1.bf16.msra.mxu0 %v7381_v1  ;;  %5171 = vmatprep.subr.bf16.mxu1 %v7386_v2  ;;  %v7477_v1 = vld [vmem:[%s10907_s1 + $0x1094] ss:$8 sps:$4 sm:$0xff]   ;;  %v7472_v2 = vld [vmem:[%s10907_s1 + $0x490] ss:$8 sps:$4 sm:$0xff]  }
  0xed   :  { %5663 = vmatprep.subr.bf16.mxu0 %v7389_v3  ;;  %v7475_v3 = vld [vmem:[%s10907_s1 + $0x1090] ss:$8 sps:$4 sm:$0xff]  }
  0xef   :  { %5172 = vmatpush1.bf16.msra.mxu1 %v7384_v4  ;;  %v7480_v4 = vld [vmem:[%s10907_s1 + $0x4a4] ss:$8 sps:$4 sm:$0xff]  }
  0xf0   :  { %5664 = vmatpush1.bf16.msra.mxu0 %v7387_v5  ;;  %5173 = vmatprep.subr.bf16.mxu1 %v7392_v6  ;;  %v7483_v5 = vld [vmem:[%s10907_s1 + $0x10a4] ss:$8 sps:$4 sm:$0xff]   ;;  %v7478_v6 = vld [vmem:[%s10907_s1 + $0x4a0] ss:$8 sps:$4 sm:$0xff]  }
  0xf1   :  { %5665 = vmatprep.subr.bf16.mxu0 %v7395_v7  ;;  %v7481_v7 = vld [vmem:[%s10907_s1 + $0x10a0] ss:$8 sps:$4 sm:$0xff]  }
  0xf3   :  { %5174 = vmatpush1.bf16.msra.mxu1 %v7390_v8  ;;  %v7486_v8 = vld [vmem:[%s10907_s1 + $0x4b4] ss:$8 sps:$4 sm:$0xff]  }
  0xf4   :  { %5666 = vmatpush1.bf16.msra.mxu0 %v7393_v9  ;;  %5175 = vmatprep.subr.bf16.mxu1 %v7398_v10  ;;  %v7489_v9 = vld [vmem:[%s10907_s1 + $0x10b4] ss:$8 sps:$4 sm:$0xff]   ;;  %v7484_v10 = vld [vmem:[%s10907_s1 + $0x4b0] ss:$8 sps:$4 sm:$0xff]  }
  0xf5   :  { %5667 = vmatprep.subr.bf16.mxu0 %v7401_v11  ;;  %v7487_v11 = vld [vmem:[%s10907_s1 + $0x10b0] ss:$8 sps:$4 sm:$0xff]  }
  0xf7   :  { %5176 = vmatpush1.bf16.msra.mxu1 %v7396_v12  ;;  %v7492_v12 = vld [vmem:[%s10907_s1 + $0x4c4] ss:$8 sps:$4 sm:$0xff]  }
  0xf8   :  { %5668 = vmatpush1.bf16.msra.mxu0 %v7399_v13  ;;  %5177 = vmatprep.subr.bf16.mxu1 %v7404_v14  ;;  %v7495_v13 = vld [vmem:[%s10907_s1 + $0x10c4] ss:$8 sps:$4 sm:$0xff]   ;;  %v7490_v14 = vld [vmem:[%s10907_s1 + $0x4c0] ss:$8 sps:$4 sm:$0xff]  }
  0xf9   :  { %5669 = vmatprep.subr.bf16.mxu0 %v7407_v15  ;;  %v7493_v15 = vld [vmem:[%s10907_s1 + $0x10c0] ss:$8 sps:$4 sm:$0xff]  }
  0xfb   :  { %5178 = vmatpush1.bf16.msra.mxu1 %v7402_v16  ;;  %v7498_v16 = vld [vmem:[%s10907_s1 + $0x4d4] ss:$8 sps:$4 sm:$0xff]  }
  0xfc   :  { %5670 = vmatpush1.bf16.msra.mxu0 %v7405_v17  ;;  %5179 = vmatprep.subr.bf16.mxu1 %v7410_v19  ;;  %v7501_v17 = vld [vmem:[%s10907_s1 + $0x10d4] ss:$8 sps:$4 sm:$0xff]   ;;  %v7496_v19 = vld [vmem:[%s10907_s1 + $0x4d0] ss:$8 sps:$4 sm:$0xff]  }
  0xfd   :  { %5671 = vmatprep.subr.bf16.mxu0 %v7413_v21  ;;  %v7499_v21 = vld [vmem:[%s10907_s1 + $0x10d0] ss:$8 sps:$4 sm:$0xff]  }
  0xff   :  { %5180 = vmatpush1.bf16.msra.mxu1 %v7408_v22  ;;  %v7504_v22 = vld [vmem:[%s10907_s1 + $0x4e4] ss:$8 sps:$4 sm:$0xff]  }
 0x100   :  { %5672 = vmatpush1.bf16.msra.mxu0 %v7411_v23  ;;  %5190 = vmatprep.subr.bf16.mxu1 %v7418_v26  ;;  %v7507_v23 = vld [vmem:[%s10907_s1 + $0x10e4] ss:$8 sps:$4 sm:$0xff]   ;;  %v7502_v26 = vld [vmem:[%s10907_s1 + $0x4e0] ss:$8 sps:$4 sm:$0xff]  }
 0x101   :  { %5682 = vmatprep.subr.bf16.mxu0 %v7423_v18  ;;  %v7505_v18 = vld [vmem:[%s10907_s1 + $0x10e0] ss:$8 sps:$4 sm:$0xff]  }
 0x102   :  { %5182 = vmatmul.mubr.bf16.vlgmr.msra.gmra.mrb[0].mxu1 %v6076_v27  ;;  %v7510_v27 = vld [vmem:[%s10907_s1 + $0x4f4] ss:$8 sps:$4 sm:$0xff]  }
 0x103   :  { %5674 = vmatmul.mubr.bf16.vlgmr.msra.gmra.mrb[0].mxu0 %v6100_v28  ;;  %5191 = vmatpush1.bf16.msra.mxu1 %v7416_v30  ;;  %v7513_v28 = vld [vmem:[%s10907_s1 + $0x10f4] ss:$8 sps:$4 sm:$0xff]   ;;  %v7508_v30 = vld [vmem:[%s10907_s1 + $0x4f0] ss:$8 sps:$4 sm:$0xff]  }
 0x104   :  { %5683 = vmatpush1.bf16.msra.mxu0 %v7421_v31  ;;  %5192 = vmatprep.subr.bf16.mxu1 %v7426_v24  ;;  %v7511_v31 = vld [vmem:[%s10907_s1 + $0x10f0] ss:$8 sps:$4 sm:$0xff]   ;;  %v7518_v24 = vld [vmem:[%s10907_s1 + $0x504] ss:$8 sps:$4 sm:$0xff]  }
 0x105   :  { %5684 = vmatprep.subr.bf16.mxu0 %v7429_v25  ;;  %5222 = vmatprep.mubr.bf16.mxu1 %v6079_v32  ;;  %v7523_v25 = vld [vmem:[%s10907_s1 + $0x1104] ss:$8 sps:$4 sm:$0xff]  }
 0x106   :  { %5714 = vmatprep.mubr.bf16.mxu0 %v6103_v33  ;;  %v9331_v32 = vld [vmem:[%s10908_s0 + $0x28] sm:$0xff] }
 0x107   :  { %5193 = vmatpush1.bf16.msra.mxu1 %v7424_v34  ;;  %v9336_v33 = vld [vmem:[%s10908_s0 + $0x88] sm:$0xff]  ;;  %v6078_v34 = vcombine.low %v9121_v20, %v9121_v20  ;;  %v7529_v20 = vld [vmem:[%s10907_s1 + $0x1114] ss:$8 sps:$4 sm:$0xff]  }
 0x108   :  { %5685 = vmatpush1.bf16.msra.mxu0 %v7427_v35  ;;  %5194 = vmatprep.subr.bf16.mxu1 %v7432_v36  ;;  %v6102_v35 = vcombine.low %v9130_v29, %v9130_v29  ;;  %v7516_v36 = vld [vmem:[%s10907_s1 + $0x500] ss:$8 sps:$4 sm:$0xff]   ;;  %v6081_v29 = vcombine.high %v9331_v32, %v9331_v32 }
 0x109   :  { %5686 = vmatprep.subr.bf16.mxu0 %v7435_v37  ;;  %v7521_v37 = vld [vmem:[%s10907_s1 + $0x1100] ss:$8 sps:$4 sm:$0xff]  }
 0x10b   :  { %5195 = vmatpush1.bf16.msra.mxu1 %v7430_v38  ;;  %v7526_v38 = vld [vmem:[%s10907_s1 + $0x514] ss:$8 sps:$4 sm:$0xff]  }
 0x10c   :  { %5687 = vmatpush1.bf16.msra.mxu0 %v7433_v39  ;;  %5196 = vmatprep.subr.bf16.mxu1 %v7438_v40  ;;  %v6105_v39 = vcombine.high %v9336_v33, %v9336_v33  ;;  %v7524_v40 = vld [vmem:[%s10907_s1 + $0x510] ss:$8 sps:$4 sm:$0xff]  }
 0x10d   :  { %5688 = vmatprep.subr.bf16.mxu0 %v7441_v41  ;;  %v7527_v41 = vld [vmem:[%s10907_s1 + $0x1110] ss:$8 sps:$4 sm:$0xff]  }
 0x10f   :  { %5197 = vmatpush1.bf16.msra.mxu1 %v7436_v42  ;;  %v7532_v42 = vld [vmem:[%s10907_s1 + $0x524] ss:$8 sps:$4 sm:$0xff]  }
 0x110   :  { %5689 = vmatpush1.bf16.msra.mxu0 %v7439_v43  ;;  %5198 = vmatprep.subr.bf16.mxu1 %v7444_v44  ;;  %v7535_v43 = vld [vmem:[%s10907_s1 + $0x1124] ss:$8 sps:$4 sm:$0xff]   ;;  %v7530_v44 = vld [vmem:[%s10907_s1 + $0x520] ss:$8 sps:$4 sm:$0xff]  }
 0x111   :  { %5690 = vmatprep.subr.bf16.mxu0 %v7447_v45  ;;  %v7533_v45 = vld [vmem:[%s10907_s1 + $0x1120] ss:$8 sps:$4 sm:$0xff]  }
 0x113   :  { %5199 = vmatpush1.bf16.msra.mxu1 %v7442_v46  ;;  %v7538_v46 = vld [vmem:[%s10907_s1 + $0x534] ss:$8 sps:$4 sm:$0xff]  }
 0x114   :  { %5691 = vmatpush1.bf16.msra.mxu0 %v7445_v47  ;;  %5200 = vmatprep.subr.bf16.mxu1 %v7450_v48  ;;  %v7541_v47 = vld [vmem:[%s10907_s1 + $0x1134] ss:$8 sps:$4 sm:$0xff]   ;;  %v7536_v48 = vld [vmem:[%s10907_s1 + $0x530] ss:$8 sps:$4 sm:$0xff]  }
 0x115   :  { %5692 = vmatprep.subr.bf16.mxu0 %v7453_v49  ;;  %v7539_v49 = vld [vmem:[%s10907_s1 + $0x1130] ss:$8 sps:$4 sm:$0xff]  }
 0x117   :  { %5201 = vmatpush1.bf16.msra.mxu1 %v7448_v50  ;;  %v7544_v50 = vld [vmem:[%s10907_s1 + $0x544] ss:$8 sps:$4 sm:$0xff]  }
 0x118   :  { %5693 = vmatpush1.bf16.msra.mxu0 %v7451_v51  ;;  %5202 = vmatprep.subr.bf16.mxu1 %v7456_v52  ;;  %v7547_v51 = vld [vmem:[%s10907_s1 + $0x1144] ss:$8 sps:$4 sm:$0xff]   ;;  %v7542_v52 = vld [vmem:[%s10907_s1 + $0x540] ss:$8 sps:$4 sm:$0xff]  }
 0x119   :  { %5694 = vmatprep.subr.bf16.mxu0 %v7459_v53  ;;  %v7545_v53 = vld [vmem:[%s10907_s1 + $0x1140] ss:$8 sps:$4 sm:$0xff]  }
 0x11b   :  { %5203 = vmatpush1.bf16.msra.mxu1 %v7454_v54  ;;  %v7550_v54 = vld [vmem:[%s10907_s1 + $0x554] ss:$8 sps:$4 sm:$0xff]  }
 0x11c   :  { %5695 = vmatpush1.bf16.msra.mxu0 %v7457_v55  ;;  %5204 = vmatprep.subr.bf16.mxu1 %v7462_v56  ;;  %v7553_v55 = vld [vmem:[%s10907_s1 + $0x1154] ss:$8 sps:$4 sm:$0xff]   ;;  %v7548_v56 = vld [vmem:[%s10907_s1 + $0x550] ss:$8 sps:$4 sm:$0xff]  }
 0x11d   :  { %5696 = vmatprep.subr.bf16.mxu0 %v7465_v57  ;;  %v7551_v57 = vld [vmem:[%s10907_s1 + $0x1150] ss:$8 sps:$4 sm:$0xff]  }
 0x11f   :  { %5205 = vmatpush1.bf16.msra.mxu1 %v7460_v58  ;;  %v7556_v58 = vld [vmem:[%s10907_s1 + $0x564] ss:$8 sps:$4 sm:$0xff]  }
 0x120   :  { %5697 = vmatpush1.bf16.msra.mxu0 %v7463_v59  ;;  %5206 = vmatprep.subr.bf16.mxu1 %v7468_v60  ;;  %v7559_v59 = vld [vmem:[%s10907_s1 + $0x1164] ss:$8 sps:$4 sm:$0xff]   ;;  %v7554_v60 = vld [vmem:[%s10907_s1 + $0x560] ss:$8 sps:$4 sm:$0xff]  }
 0x121   :  { %5698 = vmatprep.subr.bf16.mxu0 %v7471_v61  ;;  %v7557_v61 = vld [vmem:[%s10907_s1 + $0x1160] ss:$8 sps:$4 sm:$0xff]  }
 0x123   :  { %5207 = vmatpush1.bf16.msra.mxu1 %v7466_v62  ;;  %v7562_v62 = vld [vmem:[%s10907_s1 + $0x574] ss:$8 sps:$4 sm:$0xff]  }
 0x124   :  { %5699 = vmatpush1.bf16.msra.mxu0 %v7469_v63  ;;  %5208 = vmatprep.subr.bf16.mxu1 %v7474_v0  ;;  %v7565_v63 = vld [vmem:[%s10907_s1 + $0x1174] ss:$8 sps:$4 sm:$0xff]   ;;  %v7560_v0 = vld [vmem:[%s10907_s1 + $0x570] ss:$8 sps:$4 sm:$0xff]  }
 0x125   :  { %5700 = vmatprep.subr.bf16.mxu0 %v7477_v1  ;;  %v7563_v1 = vld [vmem:[%s10907_s1 + $0x1170] ss:$8 sps:$4 sm:$0xff]  }
 0x127   :  { %5209 = vmatpush1.bf16.msra.mxu1 %v7472_v2  ;;  %v7568_v2 = vld [vmem:[%s10907_s1 + $0x584] ss:$8 sps:$4 sm:$0xff]  }
 0x128   :  { %5701 = vmatpush1.bf16.msra.mxu0 %v7475_v3  ;;  %5210 = vmatprep.subr.bf16.mxu1 %v7480_v4  ;;  %v7571_v3 = vld [vmem:[%s10907_s1 + $0x1184] ss:$8 sps:$4 sm:$0xff]   ;;  %v7566_v4 = vld [vmem:[%s10907_s1 + $0x580] ss:$8 sps:$4 sm:$0xff]  }
 0x129   :  { %5702 = vmatprep.subr.bf16.mxu0 %v7483_v5  ;;  %v7569_v5 = vld [vmem:[%s10907_s1 + $0x1180] ss:$8 sps:$4 sm:$0xff]  }
 0x12b   :  { %5211 = vmatpush1.bf16.msra.mxu1 %v7478_v6  ;;  %v7574_v6 = vld [vmem:[%s10907_s1 + $0x594] ss:$8 sps:$4 sm:$0xff]  }
 0x12c   :  { %5703 = vmatpush1.bf16.msra.mxu0 %v7481_v7  ;;  %5212 = vmatprep.subr.bf16.mxu1 %v7486_v8  ;;  %v7577_v7 = vld [vmem:[%s10907_s1 + $0x1194] ss:$8 sps:$4 sm:$0xff]   ;;  %v7572_v8 = vld [vmem:[%s10907_s1 + $0x590] ss:$8 sps:$4 sm:$0xff]  }
 0x12d   :  { %5704 = vmatprep.subr.bf16.mxu0 %v7489_v9  ;;  %v7575_v9 = vld [vmem:[%s10907_s1 + $0x1190] ss:$8 sps:$4 sm:$0xff]  }
 0x12f   :  { %5213 = vmatpush1.bf16.msra.mxu1 %v7484_v10  ;;  %v7580_v10 = vld [vmem:[%s10907_s1 + $0x5a4] ss:$8 sps:$4 sm:$0xff]  }
 0x130   :  { %5705 = vmatpush1.bf16.msra.mxu0 %v7487_v11  ;;  %5214 = vmatprep.subr.bf16.mxu1 %v7492_v12  ;;  %v7583_v11 = vld [vmem:[%s10907_s1 + $0x11a4] ss:$8 sps:$4 sm:$0xff]   ;;  %v7578_v12 = vld [vmem:[%s10907_s1 + $0x5a0] ss:$8 sps:$4 sm:$0xff]  }
 0x131   :  { %5706 = vmatprep.subr.bf16.mxu0 %v7495_v13  ;;  %v7581_v13 = vld [vmem:[%s10907_s1 + $0x11a0] ss:$8 sps:$4 sm:$0xff]  }
 0x133   :  { %5215 = vmatpush1.bf16.msra.mxu1 %v7490_v14  ;;  %v7586_v14 = vld [vmem:[%s10907_s1 + $0x5b4] ss:$8 sps:$4 sm:$0xff]  }
 0x134   :  { %5707 = vmatpush1.bf16.msra.mxu0 %v7493_v15  ;;  %5216 = vmatprep.subr.bf16.mxu1 %v7498_v16  ;;  %v7589_v15 = vld [vmem:[%s10907_s1 + $0x11b4] ss:$8 sps:$4 sm:$0xff]   ;;  %v7584_v16 = vld [vmem:[%s10907_s1 + $0x5b0] ss:$8 sps:$4 sm:$0xff]  }
 0x135   :  { %5708 = vmatprep.subr.bf16.mxu0 %v7501_v17  ;;  %v7587_v17 = vld [vmem:[%s10907_s1 + $0x11b0] ss:$8 sps:$4 sm:$0xff]  }
 0x137   :  { %5217 = vmatpush1.bf16.msra.mxu1 %v7496_v19  ;;  %v7592_v19 = vld [vmem:[%s10907_s1 + $0x5c4] ss:$8 sps:$4 sm:$0xff]  }
 0x138   :  { %5709 = vmatpush1.bf16.msra.mxu0 %v7499_v21  ;;  %5218 = vmatprep.subr.bf16.mxu1 %v7504_v22  ;;  %v7595_v21 = vld [vmem:[%s10907_s1 + $0x11c4] ss:$8 sps:$4 sm:$0xff]   ;;  %v7590_v22 = vld [vmem:[%s10907_s1 + $0x5c0] ss:$8 sps:$4 sm:$0xff]  }
 0x139   :  { %5710 = vmatprep.subr.bf16.mxu0 %v7507_v23  ;;  %v7593_v23 = vld [vmem:[%s10907_s1 + $0x11c0] ss:$8 sps:$4 sm:$0xff]  }
 0x13b   :  { %5219 = vmatpush1.bf16.msra.mxu1 %v7502_v26  ;;  %v7598_v26 = vld [vmem:[%s10907_s1 + $0x5d4] ss:$8 sps:$4 sm:$0xff]  }
 0x13c   :  { %5711 = vmatpush1.bf16.msra.mxu0 %v7505_v18  ;;  %5220 = vmatprep.subr.bf16.mxu1 %v7510_v27  ;;  %v7601_v18 = vld [vmem:[%s10907_s1 + $0x11d4] ss:$8 sps:$4 sm:$0xff]   ;;  %v7596_v27 = vld [vmem:[%s10907_s1 + $0x5d0] ss:$8 sps:$4 sm:$0xff]  }
 0x13d   :  { %5712 = vmatprep.subr.bf16.mxu0 %v7513_v28  ;;  %v7599_v28 = vld [vmem:[%s10907_s1 + $0x11d0] ss:$8 sps:$4 sm:$0xff]  }
 0x13f   :  { %5221 = vmatpush1.bf16.msra.mxu1 %v7508_v30  ;;  %v7604_v30 = vld [vmem:[%s10907_s1 + $0x5e4] ss:$8 sps:$4 sm:$0xff]  }
 0x140   :  { %5713 = vmatpush1.bf16.msra.mxu0 %v7511_v31  ;;  %5231 = vmatprep.subr.bf16.mxu1 %v7518_v24  ;;  %v7607_v31 = vld [vmem:[%s10907_s1 + $0x11e4] ss:$8 sps:$4 sm:$0xff]   ;;  %v7602_v24 = vld [vmem:[%s10907_s1 + $0x5e0] ss:$8 sps:$4 sm:$0xff]  }
 0x141   :  { %5723 = vmatprep.subr.bf16.mxu0 %v7523_v25  ;;  %v7605_v25 = vld [vmem:[%s10907_s1 + $0x11e0] ss:$8 sps:$4 sm:$0xff]  }
 0x142   :  { %5223 = vmatmul.mubr.bf16.vlgmr.msra.gmra.mrb[0].mxu1 %v6078_v34  ;;  %v7610_v34 = vld [vmem:[%s10907_s1 + $0x5f4] ss:$8 sps:$4 sm:$0xff]  }
 0x143   :  { %5715 = vmatmul.mubr.bf16.vlgmr.msra.gmra.mrb[0].mxu0 %v6102_v35  ;;  %5232 = vmatpush1.bf16.msra.mxu1 %v7516_v36  ;;  %v7613_v35 = vld [vmem:[%s10907_s1 + $0x11f4] ss:$8 sps:$4 sm:$0xff]   ;;  %v7608_v36 = vld [vmem:[%s10907_s1 + $0x5f0] ss:$8 sps:$4 sm:$0xff]  }
 0x144   :  { %5724 = vmatpush1.bf16.msra.mxu0 %v7521_v37  ;;  %5233 = vmatprep.subr.bf16.mxu1 %v7526_v38  ;;  %v7611_v37 = vld [vmem:[%s10907_s1 + $0x11f0] ss:$8 sps:$4 sm:$0xff]   ;;  %v7618_v38 = vld [vmem:[%s10907_s1 + $0x604] ss:$8 sps:$4 sm:$0xff]  }
 0x145   :  { %5725 = vmatprep.subr.bf16.mxu0 %v7529_v20  ;;  %5263 = vmatprep.mubr.bf16.mxu1 %v6081_v29  ;;  %v7623_v20 = vld [vmem:[%s10907_s1 + $0x1204] ss:$8 sps:$4 sm:$0xff]   ;;  %v9541_v29 = vld [vmem:[%s10908_s0 + $0x30] sm:$0xff] }
 0x146   :  { %5755 = vmatprep.mubr.bf16.mxu0 %v6105_v39  ;;  %v9546_v39 = vld [vmem:[%s10908_s0 + $0x90] sm:$0xff] }
 0x147   :  { %5234 = vmatpush1.bf16.msra.mxu1 %v7524_v40  ;;  %v6080_v40 = vcombine.low %v9331_v32, %v9331_v32  ;;  %v7629_v32 = vld [vmem:[%s10907_s1 + $0x1214] ss:$8 sps:$4 sm:$0xff]  }
 0x148   :  { %5726 = vmatpush1.bf16.msra.mxu0 %v7527_v41  ;;  %5235 = vmatprep.subr.bf16.mxu1 %v7532_v42  ;;  %v6104_v41 = vcombine.low %v9336_v33, %v9336_v33  ;;  %v7616_v42 = vld [vmem:[%s10907_s1 + $0x600] ss:$8 sps:$4 sm:$0xff]   ;;  %v6083_v33 = vcombine.high %v9541_v29, %v9541_v29 }
 0x149   :  { %5727 = vmatprep.subr.bf16.mxu0 %v7535_v43  ;;  %v7621_v43 = vld [vmem:[%s10907_s1 + $0x1200] ss:$8 sps:$4 sm:$0xff]  }
 0x14b   :  { %5236 = vmatpush1.bf16.msra.mxu1 %v7530_v44  ;;  %v7626_v44 = vld [vmem:[%s10907_s1 + $0x614] ss:$8 sps:$4 sm:$0xff]  }
 0x14c   :  { %5728 = vmatpush1.bf16.msra.mxu0 %v7533_v45  ;;  %5237 = vmatprep.subr.bf16.mxu1 %v7538_v46  ;;  %v6107_v45 = vcombine.high %v9546_v39, %v9546_v39  ;;  %v7624_v46 = vld [vmem:[%s10907_s1 + $0x610] ss:$8 sps:$4 sm:$0xff]  }
 0x14d   :  { %5729 = vmatprep.subr.bf16.mxu0 %v7541_v47  ;;  %v7627_v47 = vld [vmem:[%s10907_s1 + $0x1210] ss:$8 sps:$4 sm:$0xff]  }
 0x14f   :  { %5238 = vmatpush1.bf16.msra.mxu1 %v7536_v48  ;;  %v7632_v48 = vld [vmem:[%s10907_s1 + $0x624] ss:$8 sps:$4 sm:$0xff]  }
 0x150   :  { %5730 = vmatpush1.bf16.msra.mxu0 %v7539_v49  ;;  %5239 = vmatprep.subr.bf16.mxu1 %v7544_v50  ;;  %v7635_v49 = vld [vmem:[%s10907_s1 + $0x1224] ss:$8 sps:$4 sm:$0xff]   ;;  %v7630_v50 = vld [vmem:[%s10907_s1 + $0x620] ss:$8 sps:$4 sm:$0xff]  }
 0x151   :  { %5731 = vmatprep.subr.bf16.mxu0 %v7547_v51  ;;  %v7633_v51 = vld [vmem:[%s10907_s1 + $0x1220] ss:$8 sps:$4 sm:$0xff]  }
 0x153   :  { %5240 = vmatpush1.bf16.msra.mxu1 %v7542_v52  ;;  %v7638_v52 = vld [vmem:[%s10907_s1 + $0x634] ss:$8 sps:$4 sm:$0xff]  }
 0x154   :  { %5732 = vmatpush1.bf16.msra.mxu0 %v7545_v53  ;;  %5241 = vmatprep.subr.bf16.mxu1 %v7550_v54  ;;  %v7641_v53 = vld [vmem:[%s10907_s1 + $0x1234] ss:$8 sps:$4 sm:$0xff]   ;;  %v7636_v54 = vld [vmem:[%s10907_s1 + $0x630] ss:$8 sps:$4 sm:$0xff]  }
 0x155   :  { %5733 = vmatprep.subr.bf16.mxu0 %v7553_v55  ;;  %v7639_v55 = vld [vmem:[%s10907_s1 + $0x1230] ss:$8 sps:$4 sm:$0xff]  }
 0x157   :  { %5242 = vmatpush1.bf16.msra.mxu1 %v7548_v56  ;;  %v7644_v56 = vld [vmem:[%s10907_s1 + $0x644] ss:$8 sps:$4 sm:$0xff]  }
 0x158   :  { %5734 = vmatpush1.bf16.msra.mxu0 %v7551_v57  ;;  %5243 = vmatprep.subr.bf16.mxu1 %v7556_v58  ;;  %v7647_v57 = vld [vmem:[%s10907_s1 + $0x1244] ss:$8 sps:$4 sm:$0xff]   ;;  %v7642_v58 = vld [vmem:[%s10907_s1 + $0x640] ss:$8 sps:$4 sm:$0xff]  }
 0x159   :  { %5735 = vmatprep.subr.bf16.mxu0 %v7559_v59  ;;  %v7645_v59 = vld [vmem:[%s10907_s1 + $0x1240] ss:$8 sps:$4 sm:$0xff]  }
 0x15b   :  { %5244 = vmatpush1.bf16.msra.mxu1 %v7554_v60  ;;  %v7650_v60 = vld [vmem:[%s10907_s1 + $0x654] ss:$8 sps:$4 sm:$0xff]  }
 0x15c   :  { %5736 = vmatpush1.bf16.msra.mxu0 %v7557_v61  ;;  %5245 = vmatprep.subr.bf16.mxu1 %v7562_v62  ;;  %v7653_v61 = vld [vmem:[%s10907_s1 + $0x1254] ss:$8 sps:$4 sm:$0xff]   ;;  %v7648_v62 = vld [vmem:[%s10907_s1 + $0x650] ss:$8 sps:$4 sm:$0xff]  }
 0x15d   :  { %5737 = vmatprep.subr.bf16.mxu0 %v7565_v63  ;;  %v7651_v63 = vld [vmem:[%s10907_s1 + $0x1250] ss:$8 sps:$4 sm:$0xff]  }
 0x15f   :  { %5246 = vmatpush1.bf16.msra.mxu1 %v7560_v0  ;;  %v7656_v0 = vld [vmem:[%s10907_s1 + $0x664] ss:$8 sps:$4 sm:$0xff]  }
 0x160   :  { %5738 = vmatpush1.bf16.msra.mxu0 %v7563_v1  ;;  %5247 = vmatprep.subr.bf16.mxu1 %v7568_v2  ;;  %v7659_v1 = vld [vmem:[%s10907_s1 + $0x1264] ss:$8 sps:$4 sm:$0xff]   ;;  %v7654_v2 = vld [vmem:[%s10907_s1 + $0x660] ss:$8 sps:$4 sm:$0xff]  }
 0x161   :  { %5739 = vmatprep.subr.bf16.mxu0 %v7571_v3  ;;  %v7657_v3 = vld [vmem:[%s10907_s1 + $0x1260] ss:$8 sps:$4 sm:$0xff]  }
 0x163   :  { %5248 = vmatpush1.bf16.msra.mxu1 %v7566_v4  ;;  %v7662_v4 = vld [vmem:[%s10907_s1 + $0x674] ss:$8 sps:$4 sm:$0xff]  }
 0x164   :  { %5740 = vmatpush1.bf16.msra.mxu0 %v7569_v5  ;;  %5249 = vmatprep.subr.bf16.mxu1 %v7574_v6  ;;  %v7665_v5 = vld [vmem:[%s10907_s1 + $0x1274] ss:$8 sps:$4 sm:$0xff]   ;;  %v7660_v6 = vld [vmem:[%s10907_s1 + $0x670] ss:$8 sps:$4 sm:$0xff]  }
 0x165   :  { %5741 = vmatprep.subr.bf16.mxu0 %v7577_v7  ;;  %v7663_v7 = vld [vmem:[%s10907_s1 + $0x1270] ss:$8 sps:$4 sm:$0xff]  }
 0x167   :  { %5250 = vmatpush1.bf16.msra.mxu1 %v7572_v8  ;;  %v7668_v8 = vld [vmem:[%s10907_s1 + $0x684] ss:$8 sps:$4 sm:$0xff]  }
 0x168   :  { %5742 = vmatpush1.bf16.msra.mxu0 %v7575_v9  ;;  %5251 = vmatprep.subr.bf16.mxu1 %v7580_v10  ;;  %v7671_v9 = vld [vmem:[%s10907_s1 + $0x1284] ss:$8 sps:$4 sm:$0xff]   ;;  %v7666_v10 = vld [vmem:[%s10907_s1 + $0x680] ss:$8 sps:$4 sm:$0xff]  }
 0x169   :  { %5743 = vmatprep.subr.bf16.mxu0 %v7583_v11  ;;  %v7669_v11 = vld [vmem:[%s10907_s1 + $0x1280] ss:$8 sps:$4 sm:$0xff]  }
 0x16b   :  { %5252 = vmatpush1.bf16.msra.mxu1 %v7578_v12  ;;  %v7674_v12 = vld [vmem:[%s10907_s1 + $0x694] ss:$8 sps:$4 sm:$0xff]  }
 0x16c   :  { %5744 = vmatpush1.bf16.msra.mxu0 %v7581_v13  ;;  %5253 = vmatprep.subr.bf16.mxu1 %v7586_v14  ;;  %v7677_v13 = vld [vmem:[%s10907_s1 + $0x1294] ss:$8 sps:$4 sm:$0xff]   ;;  %v7672_v14 = vld [vmem:[%s10907_s1 + $0x690] ss:$8 sps:$4 sm:$0xff]  }
 0x16d   :  { %5745 = vmatprep.subr.bf16.mxu0 %v7589_v15  ;;  %v7675_v15 = vld [vmem:[%s10907_s1 + $0x1290] ss:$8 sps:$4 sm:$0xff]  }
 0x16f   :  { %5254 = vmatpush1.bf16.msra.mxu1 %v7584_v16  ;;  %v7680_v16 = vld [vmem:[%s10907_s1 + $0x6a4] ss:$8 sps:$4 sm:$0xff]  }
 0x170   :  { %5746 = vmatpush1.bf16.msra.mxu0 %v7587_v17  ;;  %5255 = vmatprep.subr.bf16.mxu1 %v7592_v19  ;;  %v7683_v17 = vld [vmem:[%s10907_s1 + $0x12a4] ss:$8 sps:$4 sm:$0xff]   ;;  %v7678_v19 = vld [vmem:[%s10907_s1 + $0x6a0] ss:$8 sps:$4 sm:$0xff]  }
 0x171   :  { %5747 = vmatprep.subr.bf16.mxu0 %v7595_v21  ;;  %v7681_v21 = vld [vmem:[%s10907_s1 + $0x12a0] ss:$8 sps:$4 sm:$0xff]  }
 0x173   :  { %5256 = vmatpush1.bf16.msra.mxu1 %v7590_v22  ;;  %v7686_v22 = vld [vmem:[%s10907_s1 + $0x6b4] ss:$8 sps:$4 sm:$0xff]  }
 0x174   :  { %5748 = vmatpush1.bf16.msra.mxu0 %v7593_v23  ;;  %5257 = vmatprep.subr.bf16.mxu1 %v7598_v26  ;;  %v7689_v23 = vld [vmem:[%s10907_s1 + $0x12b4] ss:$8 sps:$4 sm:$0xff]   ;;  %v7684_v26 = vld [vmem:[%s10907_s1 + $0x6b0] ss:$8 sps:$4 sm:$0xff]  }
 0x175   :  { %5749 = vmatprep.subr.bf16.mxu0 %v7601_v18  ;;  %v7687_v18 = vld [vmem:[%s10907_s1 + $0x12b0] ss:$8 sps:$4 sm:$0xff]  }
 0x177   :  { %5258 = vmatpush1.bf16.msra.mxu1 %v7596_v27  ;;  %v7692_v27 = vld [vmem:[%s10907_s1 + $0x6c4] ss:$8 sps:$4 sm:$0xff]  }
 0x178   :  { %5750 = vmatpush1.bf16.msra.mxu0 %v7599_v28  ;;  %5259 = vmatprep.subr.bf16.mxu1 %v7604_v30  ;;  %v7695_v28 = vld [vmem:[%s10907_s1 + $0x12c4] ss:$8 sps:$4 sm:$0xff]   ;;  %v7690_v30 = vld [vmem:[%s10907_s1 + $0x6c0] ss:$8 sps:$4 sm:$0xff]  }
 0x179   :  { %5751 = vmatprep.subr.bf16.mxu0 %v7607_v31  ;;  %v7693_v31 = vld [vmem:[%s10907_s1 + $0x12c0] ss:$8 sps:$4 sm:$0xff]  }
 0x17b   :  { %5260 = vmatpush1.bf16.msra.mxu1 %v7602_v24  ;;  %v7698_v24 = vld [vmem:[%s10907_s1 + $0x6d4] ss:$8 sps:$4 sm:$0xff]  }
 0x17c   :  { %5752 = vmatpush1.bf16.msra.mxu0 %v7605_v25  ;;  %5261 = vmatprep.subr.bf16.mxu1 %v7610_v34  ;;  %v7701_v25 = vld [vmem:[%s10907_s1 + $0x12d4] ss:$8 sps:$4 sm:$0xff]   ;;  %v7696_v34 = vld [vmem:[%s10907_s1 + $0x6d0] ss:$8 sps:$4 sm:$0xff]  }
 0x17d   :  { %5753 = vmatprep.subr.bf16.mxu0 %v7613_v35  ;;  %v7699_v35 = vld [vmem:[%s10907_s1 + $0x12d0] ss:$8 sps:$4 sm:$0xff]  }
 0x17f   :  { %5262 = vmatpush1.bf16.msra.mxu1 %v7608_v36  ;;  %v7704_v36 = vld [vmem:[%s10907_s1 + $0x6e4] ss:$8 sps:$4 sm:$0xff]  }
 0x180   :  { %5754 = vmatpush1.bf16.msra.mxu0 %v7611_v37  ;;  %5272 = vmatprep.subr.bf16.mxu1 %v7618_v38  ;;  %v7707_v37 = vld [vmem:[%s10907_s1 + $0x12e4] ss:$8 sps:$4 sm:$0xff]   ;;  %v7702_v38 = vld [vmem:[%s10907_s1 + $0x6e0] ss:$8 sps:$4 sm:$0xff]  }
 0x181   :  { %5764 = vmatprep.subr.bf16.mxu0 %v7623_v20  ;;  %v7705_v20 = vld [vmem:[%s10907_s1 + $0x12e0] ss:$8 sps:$4 sm:$0xff]  }
 0x182   :  { %5264 = vmatmul.mubr.bf16.vlgmr.msra.gmra.mrb[0].mxu1 %v6080_v40  ;;  %v7710_v40 = vld [vmem:[%s10907_s1 + $0x6f4] ss:$8 sps:$4 sm:$0xff]  }
 0x183   :  { %5756 = vmatmul.mubr.bf16.vlgmr.msra.gmra.mrb[0].mxu0 %v6104_v41  ;;  %5273 = vmatpush1.bf16.msra.mxu1 %v7616_v42  ;;  %v7713_v41 = vld [vmem:[%s10907_s1 + $0x12f4] ss:$8 sps:$4 sm:$0xff]   ;;  %v7708_v42 = vld [vmem:[%s10907_s1 + $0x6f0] ss:$8 sps:$4 sm:$0xff]  }
 0x184   :  { %5765 = vmatpush1.bf16.msra.mxu0 %v7621_v43  ;;  %5274 = vmatprep.subr.bf16.mxu1 %v7626_v44  ;;  %v7711_v43 = vld [vmem:[%s10907_s1 + $0x12f0] ss:$8 sps:$4 sm:$0xff]   ;;  %v7718_v44 = vld [vmem:[%s10907_s1 + $0x704] ss:$8 sps:$4 sm:$0xff]  }
 0x185   :  { %5766 = vmatprep.subr.bf16.mxu0 %v7629_v32  ;;  %5304 = vmatprep.mubr.bf16.mxu1 %v6083_v33  ;;  %v7723_v32 = vld [vmem:[%s10907_s1 + $0x1304] ss:$8 sps:$4 sm:$0xff]   ;;  %v9751_v33 = vld [vmem:[%s10908_s0 + $0x38] sm:$0xff] }
 0x186   :  { %5796 = vmatprep.mubr.bf16.mxu0 %v6107_v45  ;;  %v9756_v45 = vld [vmem:[%s10908_s0 + $0x98] sm:$0xff] }
 0x187   :  { %5275 = vmatpush1.bf16.msra.mxu1 %v7624_v46  ;;  %v6082_v46 = vcombine.low %v9541_v29, %v9541_v29  ;;  %v7729_v29 = vld [vmem:[%s10907_s1 + $0x1314] ss:$8 sps:$4 sm:$0xff]  }
 0x188   :  { %5767 = vmatpush1.bf16.msra.mxu0 %v7627_v47  ;;  %5276 = vmatprep.subr.bf16.mxu1 %v7632_v48  ;;  %v6106_v47 = vcombine.low %v9546_v39, %v9546_v39  ;;  %v7716_v48 = vld [vmem:[%s10907_s1 + $0x700] ss:$8 sps:$4 sm:$0xff]   ;;  %v6085_v39 = vcombine.high %v9751_v33, %v9751_v33 }
 0x189   :  { %5768 = vmatprep.subr.bf16.mxu0 %v7635_v49  ;;  %v7721_v49 = vld [vmem:[%s10907_s1 + $0x1300] ss:$8 sps:$4 sm:$0xff]  }
 0x18b   :  { %5277 = vmatpush1.bf16.msra.mxu1 %v7630_v50  ;;  %v7726_v50 = vld [vmem:[%s10907_s1 + $0x714] ss:$8 sps:$4 sm:$0xff]  }
 0x18c   :  { %5769 = vmatpush1.bf16.msra.mxu0 %v7633_v51  ;;  %5278 = vmatprep.subr.bf16.mxu1 %v7638_v52  ;;  %v6109_v51 = vcombine.high %v9756_v45, %v9756_v45  ;;  %v7724_v52 = vld [vmem:[%s10907_s1 + $0x710] ss:$8 sps:$4 sm:$0xff]  }
 0x18d   :  { %5770 = vmatprep.subr.bf16.mxu0 %v7641_v53  ;;  %v7727_v53 = vld [vmem:[%s10907_s1 + $0x1310] ss:$8 sps:$4 sm:$0xff]  }
 0x18f   :  { %5279 = vmatpush1.bf16.msra.mxu1 %v7636_v54  ;;  %v7732_v54 = vld [vmem:[%s10907_s1 + $0x724] ss:$8 sps:$4 sm:$0xff]  }
 0x190   :  { %5771 = vmatpush1.bf16.msra.mxu0 %v7639_v55  ;;  %5280 = vmatprep.subr.bf16.mxu1 %v7644_v56  ;;  %v7735_v55 = vld [vmem:[%s10907_s1 + $0x1324] ss:$8 sps:$4 sm:$0xff]   ;;  %v7730_v56 = vld [vmem:[%s10907_s1 + $0x720] ss:$8 sps:$4 sm:$0xff]  }
 0x191   :  { %5772 = vmatprep.subr.bf16.mxu0 %v7647_v57  ;;  %v7733_v57 = vld [vmem:[%s10907_s1 + $0x1320] ss:$8 sps:$4 sm:$0xff]  }
 0x193   :  { %5281 = vmatpush1.bf16.msra.mxu1 %v7642_v58  ;;  %v7738_v58 = vld [vmem:[%s10907_s1 + $0x734] ss:$8 sps:$4 sm:$0xff]  }
 0x194   :  { %5773 = vmatpush1.bf16.msra.mxu0 %v7645_v59  ;;  %5282 = vmatprep.subr.bf16.mxu1 %v7650_v60  ;;  %v7741_v59 = vld [vmem:[%s10907_s1 + $0x1334] ss:$8 sps:$4 sm:$0xff]   ;;  %v7736_v60 = vld [vmem:[%s10907_s1 + $0x730] ss:$8 sps:$4 sm:$0xff]  }
 0x195   :  { %5774 = vmatprep.subr.bf16.mxu0 %v7653_v61  ;;  %v7739_v61 = vld [vmem:[%s10907_s1 + $0x1330] ss:$8 sps:$4 sm:$0xff]  }
 0x197   :  { %5283 = vmatpush1.bf16.msra.mxu1 %v7648_v62  ;;  %v7744_v62 = vld [vmem:[%s10907_s1 + $0x744] ss:$8 sps:$4 sm:$0xff]  }
 0x198   :  { %5775 = vmatpush1.bf16.msra.mxu0 %v7651_v63  ;;  %5284 = vmatprep.subr.bf16.mxu1 %v7656_v0  ;;  %v7747_v63 = vld [vmem:[%s10907_s1 + $0x1344] ss:$8 sps:$4 sm:$0xff]   ;;  %v7742_v0 = vld [vmem:[%s10907_s1 + $0x740] ss:$8 sps:$4 sm:$0xff]  }
 0x199   :  { %5776 = vmatprep.subr.bf16.mxu0 %v7659_v1  ;;  %v7745_v1 = vld [vmem:[%s10907_s1 + $0x1340] ss:$8 sps:$4 sm:$0xff]  }
 0x19b   :  { %5285 = vmatpush1.bf16.msra.mxu1 %v7654_v2  ;;  %v7750_v2 = vld [vmem:[%s10907_s1 + $0x754] ss:$8 sps:$4 sm:$0xff]  }
 0x19c   :  { %5777 = vmatpush1.bf16.msra.mxu0 %v7657_v3  ;;  %5286 = vmatprep.subr.bf16.mxu1 %v7662_v4  ;;  %v7753_v3 = vld [vmem:[%s10907_s1 + $0x1354] ss:$8 sps:$4 sm:$0xff]   ;;  %v7748_v4 = vld [vmem:[%s10907_s1 + $0x750] ss:$8 sps:$4 sm:$0xff]  }
 0x19d   :  { %5778 = vmatprep.subr.bf16.mxu0 %v7665_v5  ;;  %v7751_v5 = vld [vmem:[%s10907_s1 + $0x1350] ss:$8 sps:$4 sm:$0xff]  }
 0x19f   :  { %5287 = vmatpush1.bf16.msra.mxu1 %v7660_v6  ;;  %v7756_v6 = vld [vmem:[%s10907_s1 + $0x764] ss:$8 sps:$4 sm:$0xff]  }
 0x1a0   :  { %5779 = vmatpush1.bf16.msra.mxu0 %v7663_v7  ;;  %5288 = vmatprep.subr.bf16.mxu1 %v7668_v8  ;;  %v7759_v7 = vld [vmem:[%s10907_s1 + $0x1364] ss:$8 sps:$4 sm:$0xff]   ;;  %v7754_v8 = vld [vmem:[%s10907_s1 + $0x760] ss:$8 sps:$4 sm:$0xff]  }
 0x1a1   :  { %5780 = vmatprep.subr.bf16.mxu0 %v7671_v9  ;;  %v7757_v9 = vld [vmem:[%s10907_s1 + $0x1360] ss:$8 sps:$4 sm:$0xff]  }
 0x1a3   :  { %5289 = vmatpush1.bf16.msra.mxu1 %v7666_v10  ;;  %v7762_v10 = vld [vmem:[%s10907_s1 + $0x774] ss:$8 sps:$4 sm:$0xff]  }
 0x1a4   :  { %5781 = vmatpush1.bf16.msra.mxu0 %v7669_v11  ;;  %5290 = vmatprep.subr.bf16.mxu1 %v7674_v12  ;;  %v7765_v11 = vld [vmem:[%s10907_s1 + $0x1374] ss:$8 sps:$4 sm:$0xff]   ;;  %v7760_v12 = vld [vmem:[%s10907_s1 + $0x770] ss:$8 sps:$4 sm:$0xff]  }
 0x1a5   :  { %5782 = vmatprep.subr.bf16.mxu0 %v7677_v13  ;;  %v7763_v13 = vld [vmem:[%s10907_s1 + $0x1370] ss:$8 sps:$4 sm:$0xff]  }
 0x1a7   :  { %5291 = vmatpush1.bf16.msra.mxu1 %v7672_v14  ;;  %v7768_v14 = vld [vmem:[%s10907_s1 + $0x784] ss:$8 sps:$4 sm:$0xff]  }
 0x1a8   :  { %5783 = vmatpush1.bf16.msra.mxu0 %v7675_v15  ;;  %5292 = vmatprep.subr.bf16.mxu1 %v7680_v16  ;;  %v7771_v15 = vld [vmem:[%s10907_s1 + $0x1384] ss:$8 sps:$4 sm:$0xff]   ;;  %v7766_v16 = vld [vmem:[%s10907_s1 + $0x780] ss:$8 sps:$4 sm:$0xff]  }
 0x1a9   :  { %5784 = vmatprep.subr.bf16.mxu0 %v7683_v17  ;;  %v7769_v17 = vld [vmem:[%s10907_s1 + $0x1380] ss:$8 sps:$4 sm:$0xff]  }
 0x1ab   :  { %5293 = vmatpush1.bf16.msra.mxu1 %v7678_v19  ;;  %v7774_v19 = vld [vmem:[%s10907_s1 + $0x794] ss:$8 sps:$4 sm:$0xff]  }
 0x1ac   :  { %5785 = vmatpush1.bf16.msra.mxu0 %v7681_v21  ;;  %5294 = vmatprep.subr.bf16.mxu1 %v7686_v22  ;;  %v7777_v21 = vld [vmem:[%s10907_s1 + $0x1394] ss:$8 sps:$4 sm:$0xff]   ;;  %v7772_v22 = vld [vmem:[%s10907_s1 + $0x790] ss:$8 sps:$4 sm:$0xff]  }
 0x1ad   :  { %5786 = vmatprep.subr.bf16.mxu0 %v7689_v23  ;;  %v7775_v23 = vld [vmem:[%s10907_s1 + $0x1390] ss:$8 sps:$4 sm:$0xff]  }
 0x1af   :  { %5295 = vmatpush1.bf16.msra.mxu1 %v7684_v26  ;;  %v7780_v26 = vld [vmem:[%s10907_s1 + $0x7a4] ss:$8 sps:$4 sm:$0xff]  }
 0x1b0   :  { %5787 = vmatpush1.bf16.msra.mxu0 %v7687_v18  ;;  %5296 = vmatprep.subr.bf16.mxu1 %v7692_v27  ;;  %v7783_v18 = vld [vmem:[%s10907_s1 + $0x13a4] ss:$8 sps:$4 sm:$0xff]   ;;  %v7778_v27 = vld [vmem:[%s10907_s1 + $0x7a0] ss:$8 sps:$4 sm:$0xff]  }
 0x1b1   :  { %5788 = vmatprep.subr.bf16.mxu0 %v7695_v28  ;;  %v7781_v28 = vld [vmem:[%s10907_s1 + $0x13a0] ss:$8 sps:$4 sm:$0xff]  }
 0x1b3   :  { %5297 = vmatpush1.bf16.msra.mxu1 %v7690_v30  ;;  %v7786_v30 = vld [vmem:[%s10907_s1 + $0x7b4] ss:$8 sps:$4 sm:$0xff]  }
 0x1b4   :  { %5789 = vmatpush1.bf16.msra.mxu0 %v7693_v31  ;;  %5298 = vmatprep.subr.bf16.mxu1 %v7698_v24  ;;  %v7789_v31 = vld [vmem:[%s10907_s1 + $0x13b4] ss:$8 sps:$4 sm:$0xff]   ;;  %v7784_v24 = vld [vmem:[%s10907_s1 + $0x7b0] ss:$8 sps:$4 sm:$0xff]  }
 0x1b5   :  { %5790 = vmatprep.subr.bf16.mxu0 %v7701_v25  ;;  %v7787_v25 = vld [vmem:[%s10907_s1 + $0x13b0] ss:$8 sps:$4 sm:$0xff]  }
 0x1b7   :  { %5299 = vmatpush1.bf16.msra.mxu1 %v7696_v34  ;;  %v7792_v34 = vld [vmem:[%s10907_s1 + $0x7c4] ss:$8 sps:$4 sm:$0xff]  }
 0x1b8   :  { %5791 = vmatpush1.bf16.msra.mxu0 %v7699_v35  ;;  %5300 = vmatprep.subr.bf16.mxu1 %v7704_v36  ;;  %v7795_v35 = vld [vmem:[%s10907_s1 + $0x13c4] ss:$8 sps:$4 sm:$0xff]   ;;  %v7790_v36 = vld [vmem:[%s10907_s1 + $0x7c0] ss:$8 sps:$4 sm:$0xff]  }
 0x1b9   :  { %5792 = vmatprep.subr.bf16.mxu0 %v7707_v37  ;;  %v7793_v37 = vld [vmem:[%s10907_s1 + $0x13c0] ss:$8 sps:$4 sm:$0xff]  }
 0x1bb   :  { %5301 = vmatpush1.bf16.msra.mxu1 %v7702_v38  ;;  %v7798_v38 = vld [vmem:[%s10907_s1 + $0x7d4] ss:$8 sps:$4 sm:$0xff]  }
 0x1bc   :  { %5793 = vmatpush1.bf16.msra.mxu0 %v7705_v20  ;;  %5302 = vmatprep.subr.bf16.mxu1 %v7710_v40  ;;  %v7801_v20 = vld [vmem:[%s10907_s1 + $0x13d4] ss:$8 sps:$4 sm:$0xff]   ;;  %v7796_v40 = vld [vmem:[%s10907_s1 + $0x7d0] ss:$8 sps:$4 sm:$0xff]  }
 0x1bd   :  { %5794 = vmatprep.subr.bf16.mxu0 %v7713_v41  ;;  %v7799_v41 = vld [vmem:[%s10907_s1 + $0x13d0] ss:$8 sps:$4 sm:$0xff]  }
 0x1bf   :  { %5303 = vmatpush1.bf16.msra.mxu1 %v7708_v42  ;;  %v7804_v42 = vld [vmem:[%s10907_s1 + $0x7e4] ss:$8 sps:$4 sm:$0xff]  }
 0x1c0   :  { %5795 = vmatpush1.bf16.msra.mxu0 %v7711_v43  ;;  %5313 = vmatprep.subr.bf16.mxu1 %v7718_v44  ;;  %v7807_v43 = vld [vmem:[%s10907_s1 + $0x13e4] ss:$8 sps:$4 sm:$0xff]   ;;  %v7802_v44 = vld [vmem:[%s10907_s1 + $0x7e0] ss:$8 sps:$4 sm:$0xff]  }
 0x1c1   :  { %5805 = vmatprep.subr.bf16.mxu0 %v7723_v32  ;;  %v7805_v32 = vld [vmem:[%s10907_s1 + $0x13e0] ss:$8 sps:$4 sm:$0xff]  }
 0x1c2   :  { %5305 = vmatmul.mubr.bf16.vlgmr.msra.gmra.mrb[0].mxu1 %v6082_v46  ;;  %v7810_v46 = vld [vmem:[%s10907_s1 + $0x7f4] ss:$8 sps:$4 sm:$0xff]  }
 0x1c3   :  { %5797 = vmatmul.mubr.bf16.vlgmr.msra.gmra.mrb[0].mxu0 %v6106_v47  ;;  %5314 = vmatpush1.bf16.msra.mxu1 %v7716_v48  ;;  %v7813_v47 = vld [vmem:[%s10907_s1 + $0x13f4] ss:$8 sps:$4 sm:$0xff]   ;;  %v7808_v48 = vld [vmem:[%s10907_s1 + $0x7f0] ss:$8 sps:$4 sm:$0xff]  }
 0x1c4   :  { %5806 = vmatpush1.bf16.msra.mxu0 %v7721_v49  ;;  %5315 = vmatprep.subr.bf16.mxu1 %v7726_v50  ;;  %v7811_v49 = vld [vmem:[%s10907_s1 + $0x13f0] ss:$8 sps:$4 sm:$0xff]   ;;  %v7818_v50 = vld [vmem:[%s10907_s1 + $0x804] ss:$8 sps:$4 sm:$0xff]  }
 0x1c5   :  { %5807 = vmatprep.subr.bf16.mxu0 %v7729_v29  ;;  %5345 = vmatprep.mubr.bf16.mxu1 %v6085_v39  ;;  %v7823_v29 = vld [vmem:[%s10907_s1 + $0x1404] ss:$8 sps:$4 sm:$0xff]   ;;  %v6084_v39 = vcombine.low %v9751_v33, %v9751_v33  ;;  %v7821_v33 = vld [vmem:[%s10907_s1 + $0x1400] ss:$8 sps:$4 sm:$0xff]  }
 0x1c6   :  { %5837 = vmatprep.mubr.bf16.mxu0 %v6109_v51  ;;  %v6108_v51 = vcombine.low %v9756_v45, %v9756_v45  ;;  %v7826_v45 = vld [vmem:[%s10907_s1 + $0x814] ss:$8 sps:$4 sm:$0xff]  }
 0x1c7   :  { %5316 = vmatpush1.bf16.msra.mxu1 %v7724_v52  ;;  %v9965_v52 = vld [vmem:[%s10908_s0 + $0x40] sm:$0xff] }
 0x1c8   :  { %5808 = vmatpush1.bf16.msra.mxu0 %v7727_v53  ;;  %5317 = vmatprep.subr.bf16.mxu1 %v7732_v54  ;;  %v9970_v53 = vld [vmem:[%s10908_s0 + $0xa0] sm:$0xff] }
 0x1c9   :  { %5809 = vmatprep.subr.bf16.mxu0 %v7735_v55  ;;  %v7816_v54 = vld [vmem:[%s10907_s1 + $0x800] ss:$8 sps:$4 sm:$0xff]   ;;  %v7829_v55 = vld [vmem:[%s10907_s1 + $0x1414] ss:$8 sps:$4 sm:$0xff]  }
 0x1cb   :  { %5318 = vmatpush1.bf16.msra.mxu1 %v7730_v56  ;;  %v6087_v56 = vcombine.high %v9965_v52, %v9965_v52 }
 0x1cc   :  { %5810 = vmatpush1.bf16.msra.mxu0 %v7733_v57  ;;  %5319 = vmatprep.subr.bf16.mxu1 %v7738_v58  ;;  %v6111_v57 = vcombine.high %v9970_v53, %v9970_v53  ;;  %v7824_v58 = vld [vmem:[%s10907_s1 + $0x810] ss:$8 sps:$4 sm:$0xff]  }
 0x1cd   :  { %5811 = vmatprep.subr.bf16.mxu0 %v7741_v59  ;;  %v7827_v59 = vld [vmem:[%s10907_s1 + $0x1410] ss:$8 sps:$4 sm:$0xff]  }
 0x1cf   :  { %5320 = vmatpush1.bf16.msra.mxu1 %v7736_v60  ;;  %v7832_v60 = vld [vmem:[%s10907_s1 + $0x824] ss:$8 sps:$4 sm:$0xff]  }
 0x1d0   :  { %5812 = vmatpush1.bf16.msra.mxu0 %v7739_v61  ;;  %5321 = vmatprep.subr.bf16.mxu1 %v7744_v62  ;;  %v7835_v61 = vld [vmem:[%s10907_s1 + $0x1424] ss:$8 sps:$4 sm:$0xff]   ;;  %v7830_v62 = vld [vmem:[%s10907_s1 + $0x820] ss:$8 sps:$4 sm:$0xff]  }
 0x1d1   :  { %5813 = vmatprep.subr.bf16.mxu0 %v7747_v63  ;;  %v7833_v63 = vld [vmem:[%s10907_s1 + $0x1420] ss:$8 sps:$4 sm:$0xff]  }
 0x1d3   :  { %5322 = vmatpush1.bf16.msra.mxu1 %v7742_v0  ;;  %v7838_v0 = vld [vmem:[%s10907_s1 + $0x834] ss:$8 sps:$4 sm:$0xff]  }
 0x1d4   :  { %5814 = vmatpush1.bf16.msra.mxu0 %v7745_v1  ;;  %5323 = vmatprep.subr.bf16.mxu1 %v7750_v2  ;;  %v7841_v1 = vld [vmem:[%s10907_s1 + $0x1434] ss:$8 sps:$4 sm:$0xff]   ;;  %v7836_v2 = vld [vmem:[%s10907_s1 + $0x830] ss:$8 sps:$4 sm:$0xff]  }
 0x1d5   :  { %5815 = vmatprep.subr.bf16.mxu0 %v7753_v3  ;;  %v7839_v3 = vld [vmem:[%s10907_s1 + $0x1430] ss:$8 sps:$4 sm:$0xff]  }
 0x1d7   :  { %5324 = vmatpush1.bf16.msra.mxu1 %v7748_v4  ;;  %v7844_v4 = vld [vmem:[%s10907_s1 + $0x844] ss:$8 sps:$4 sm:$0xff]  }
 0x1d8   :  { %5816 = vmatpush1.bf16.msra.mxu0 %v7751_v5  ;;  %5325 = vmatprep.subr.bf16.mxu1 %v7756_v6  ;;  %v7847_v5 = vld [vmem:[%s10907_s1 + $0x1444] ss:$8 sps:$4 sm:$0xff]   ;;  %v7842_v6 = vld [vmem:[%s10907_s1 + $0x840] ss:$8 sps:$4 sm:$0xff]  }
 0x1d9   :  { %5817 = vmatprep.subr.bf16.mxu0 %v7759_v7  ;;  %v7845_v7 = vld [vmem:[%s10907_s1 + $0x1440] ss:$8 sps:$4 sm:$0xff]  }
 0x1db   :  { %5326 = vmatpush1.bf16.msra.mxu1 %v7754_v8  ;;  %v7850_v8 = vld [vmem:[%s10907_s1 + $0x854] ss:$8 sps:$4 sm:$0xff]  }
 0x1dc   :  { %5818 = vmatpush1.bf16.msra.mxu0 %v7757_v9  ;;  %5327 = vmatprep.subr.bf16.mxu1 %v7762_v10  ;;  %v7853_v9 = vld [vmem:[%s10907_s1 + $0x1454] ss:$8 sps:$4 sm:$0xff]   ;;  %v7848_v10 = vld [vmem:[%s10907_s1 + $0x850] ss:$8 sps:$4 sm:$0xff]  }
 0x1dd   :  { %5819 = vmatprep.subr.bf16.mxu0 %v7765_v11  ;;  %v7851_v11 = vld [vmem:[%s10907_s1 + $0x1450] ss:$8 sps:$4 sm:$0xff]  }
 0x1df   :  { %5328 = vmatpush1.bf16.msra.mxu1 %v7760_v12  ;;  %v7856_v12 = vld [vmem:[%s10907_s1 + $0x864] ss:$8 sps:$4 sm:$0xff]  }
 0x1e0   :  { %5820 = vmatpush1.bf16.msra.mxu0 %v7763_v13  ;;  %5329 = vmatprep.subr.bf16.mxu1 %v7768_v14  ;;  %v7859_v13 = vld [vmem:[%s10907_s1 + $0x1464] ss:$8 sps:$4 sm:$0xff]   ;;  %v7854_v14 = vld [vmem:[%s10907_s1 + $0x860] ss:$8 sps:$4 sm:$0xff]  }
 0x1e1   :  { %5821 = vmatprep.subr.bf16.mxu0 %v7771_v15  ;;  %v7857_v15 = vld [vmem:[%s10907_s1 + $0x1460] ss:$8 sps:$4 sm:$0xff]  }
 0x1e3   :  { %5330 = vmatpush1.bf16.msra.mxu1 %v7766_v16  ;;  %v7862_v16 = vld [vmem:[%s10907_s1 + $0x874] ss:$8 sps:$4 sm:$0xff]  }
 0x1e4   :  { %5822 = vmatpush1.bf16.msra.mxu0 %v7769_v17  ;;  %5331 = vmatprep.subr.bf16.mxu1 %v7774_v19  ;;  %v7865_v17 = vld [vmem:[%s10907_s1 + $0x1474] ss:$8 sps:$4 sm:$0xff]   ;;  %v7860_v19 = vld [vmem:[%s10907_s1 + $0x870] ss:$8 sps:$4 sm:$0xff]  }
 0x1e5   :  { %5823 = vmatprep.subr.bf16.mxu0 %v7777_v21  ;;  %v7863_v21 = vld [vmem:[%s10907_s1 + $0x1470] ss:$8 sps:$4 sm:$0xff]  }
 0x1e7   :  { %5332 = vmatpush1.bf16.msra.mxu1 %v7772_v22  ;;  %v7868_v22 = vld [vmem:[%s10907_s1 + $0x884] ss:$8 sps:$4 sm:$0xff]  }
 0x1e8   :  { %5824 = vmatpush1.bf16.msra.mxu0 %v7775_v23  ;;  %5333 = vmatprep.subr.bf16.mxu1 %v7780_v26  ;;  %v7871_v23 = vld [vmem:[%s10907_s1 + $0x1484] ss:$8 sps:$4 sm:$0xff]   ;;  %v7866_v26 = vld [vmem:[%s10907_s1 + $0x880] ss:$8 sps:$4 sm:$0xff]  }
 0x1e9   :  { %5825 = vmatprep.subr.bf16.mxu0 %v7783_v18  ;;  %v7869_v18 = vld [vmem:[%s10907_s1 + $0x1480] ss:$8 sps:$4 sm:$0xff]  }
 0x1eb   :  { %5334 = vmatpush1.bf16.msra.mxu1 %v7778_v27  ;;  %v7874_v27 = vld [vmem:[%s10907_s1 + $0x894] ss:$8 sps:$4 sm:$0xff]  }
 0x1ec   :  { %5826 = vmatpush1.bf16.msra.mxu0 %v7781_v28  ;;  %5335 = vmatprep.subr.bf16.mxu1 %v7786_v30  ;;  %v7877_v28 = vld [vmem:[%s10907_s1 + $0x1494] ss:$8 sps:$4 sm:$0xff]   ;;  %v7872_v30 = vld [vmem:[%s10907_s1 + $0x890] ss:$8 sps:$4 sm:$0xff]  }
 0x1ed   :  { %5827 = vmatprep.subr.bf16.mxu0 %v7789_v31  ;;  %v7875_v31 = vld [vmem:[%s10907_s1 + $0x1490] ss:$8 sps:$4 sm:$0xff]  }
 0x1ef   :  { %5336 = vmatpush1.bf16.msra.mxu1 %v7784_v24  ;;  %v7880_v24 = vld [vmem:[%s10907_s1 + $0x8a4] ss:$8 sps:$4 sm:$0xff]  }
 0x1f0   :  { %5828 = vmatpush1.bf16.msra.mxu0 %v7787_v25  ;;  %5337 = vmatprep.subr.bf16.mxu1 %v7792_v34  ;;  %v7883_v25 = vld [vmem:[%s10907_s1 + $0x14a4] ss:$8 sps:$4 sm:$0xff]   ;;  %v7878_v34 = vld [vmem:[%s10907_s1 + $0x8a0] ss:$8 sps:$4 sm:$0xff]  }
 0x1f1   :  { %5829 = vmatprep.subr.bf16.mxu0 %v7795_v35  ;;  %v7881_v35 = vld [vmem:[%s10907_s1 + $0x14a0] ss:$8 sps:$4 sm:$0xff]  }
 0x1f3   :  { %5338 = vmatpush1.bf16.msra.mxu1 %v7790_v36  ;;  %v7886_v36 = vld [vmem:[%s10907_s1 + $0x8b4] ss:$8 sps:$4 sm:$0xff]  }
 0x1f4   :  { %5830 = vmatpush1.bf16.msra.mxu0 %v7793_v37  ;;  %5339 = vmatprep.subr.bf16.mxu1 %v7798_v38  ;;  %v7889_v37 = vld [vmem:[%s10907_s1 + $0x14b4] ss:$8 sps:$4 sm:$0xff]   ;;  %v7884_v38 = vld [vmem:[%s10907_s1 + $0x8b0] ss:$8 sps:$4 sm:$0xff]  }
 0x1f5   :  { %5831 = vmatprep.subr.bf16.mxu0 %v7801_v20  ;;  %v7887_v20 = vld [vmem:[%s10907_s1 + $0x14b0] ss:$8 sps:$4 sm:$0xff]  }
 0x1f7   :  { %5340 = vmatpush1.bf16.msra.mxu1 %v7796_v40  ;;  %v7892_v40 = vld [vmem:[%s10907_s1 + $0x8c4] ss:$8 sps:$4 sm:$0xff]  }
 0x1f8   :  { %5832 = vmatpush1.bf16.msra.mxu0 %v7799_v41  ;;  %5341 = vmatprep.subr.bf16.mxu1 %v7804_v42  ;;  %v7895_v41 = vld [vmem:[%s10907_s1 + $0x14c4] ss:$8 sps:$4 sm:$0xff]   ;;  %v7890_v42 = vld [vmem:[%s10907_s1 + $0x8c0] ss:$8 sps:$4 sm:$0xff]  }
 0x1f9   :  { %5833 = vmatprep.subr.bf16.mxu0 %v7807_v43  ;;  %v7893_v43 = vld [vmem:[%s10907_s1 + $0x14c0] ss:$8 sps:$4 sm:$0xff]  }
 0x1fb   :  { %5342 = vmatpush1.bf16.msra.mxu1 %v7802_v44  ;;  %v7898_v44 = vld [vmem:[%s10907_s1 + $0x8d4] ss:$8 sps:$4 sm:$0xff]  }
 0x1fc   :  { %5834 = vmatpush1.bf16.msra.mxu0 %v7805_v32  ;;  %5343 = vmatprep.subr.bf16.mxu1 %v7810_v46  ;;  %v7901_v32 = vld [vmem:[%s10907_s1 + $0x14d4] ss:$8 sps:$4 sm:$0xff]   ;;  %v7896_v46 = vld [vmem:[%s10907_s1 + $0x8d0] ss:$8 sps:$4 sm:$0xff]  }
 0x1fd   :  { %5835 = vmatprep.subr.bf16.mxu0 %v7813_v47  ;;  %v7899_v47 = vld [vmem:[%s10907_s1 + $0x14d0] ss:$8 sps:$4 sm:$0xff]  }
 0x1ff   :  { %5344 = vmatpush1.bf16.msra.mxu1 %v7808_v48  ;;  %v7904_v48 = vld [vmem:[%s10907_s1 + $0x8e4] ss:$8 sps:$4 sm:$0xff]  }
 0x200   :  { %5836 = vmatpush1.bf16.msra.mxu0 %v7811_v49  ;;  %5354 = vmatprep.subr.bf16.mxu1 %v7818_v50  ;;  %v7907_v49 = vld [vmem:[%s10907_s1 + $0x14e4] ss:$8 sps:$4 sm:$0xff]   ;;  %v7902_v50 = vld [vmem:[%s10907_s1 + $0x8e0] ss:$8 sps:$4 sm:$0xff]  }
 0x201   :  { %5846 = vmatprep.subr.bf16.mxu0 %v7823_v29  ;;  %v7905_v29 = vld [vmem:[%s10907_s1 + $0x14e0] ss:$8 sps:$4 sm:$0xff]  }
 0x202   :  { %5346 = vmatmul.mubr.bf16.vlgmr.msra.gmra.mrb[0].mxu1 %v6084_v39  ;;  %v7910_v39 = vld [vmem:[%s10907_s1 + $0x8f4] ss:$8 sps:$4 sm:$0xff]  }
 0x203   :  { %5838 = vmatmul.mubr.bf16.vlgmr.msra.gmra.mrb[0].mxu0 %v6108_v51  ;;  %5355 = vmatpush1.bf16.msra.mxu1 %v7816_v54  ;;  %v7913_v51 = vld [vmem:[%s10907_s1 + $0x14f4] ss:$8 sps:$4 sm:$0xff]   ;;  %v7908_v54 = vld [vmem:[%s10907_s1 + $0x8f0] ss:$8 sps:$4 sm:$0xff]  }
 0x204   :  { %5847 = vmatpush1.bf16.msra.mxu0 %v7821_v33  ;;  %5356 = vmatprep.subr.bf16.mxu1 %v7826_v45  ;;  %v7911_v33 = vld [vmem:[%s10907_s1 + $0x14f0] ss:$8 sps:$4 sm:$0xff]   ;;  %v7918_v45 = vld [vmem:[%s10907_s1 + $0x904] ss:$8 sps:$4 sm:$0xff]  }
 0x205   :  { %5848 = vmatprep.subr.bf16.mxu0 %v7829_v55  ;;  %5386 = vmatprep.mubr.bf16.mxu1 %v6087_v56  ;;  %v7923_v55 = vld [vmem:[%s10907_s1 + $0x1504] ss:$8 sps:$4 sm:$0xff]   ;;  %v6086_v56 = vcombine.low %v9965_v52, %v9965_v52  ;;  %v7921_v52 = vld [vmem:[%s10907_s1 + $0x1500] ss:$8 sps:$4 sm:$0xff]  }
 0x206   :  { %5878 = vmatprep.mubr.bf16.mxu0 %v6111_v57  ;;  %v6110_v57 = vcombine.low %v9970_v53, %v9970_v53  ;;  %v7926_v53 = vld [vmem:[%s10907_s1 + $0x914] ss:$8 sps:$4 sm:$0xff]  }
 0x207   :  { %5357 = vmatpush1.bf16.msra.mxu1 %v7824_v58  ;;  %v10175_v58 = vld [vmem:[%s10908_s0 + $0x48] sm:$0xff] }
 0x208   :  { %5849 = vmatpush1.bf16.msra.mxu0 %v7827_v59  ;;  %5358 = vmatprep.subr.bf16.mxu1 %v7832_v60  ;;  %v10180_v59 = vld [vmem:[%s10908_s0 + $0xa8] sm:$0xff] }
 0x209   :  { %5850 = vmatprep.subr.bf16.mxu0 %v7835_v61  ;;  %v7916_v60 = vld [vmem:[%s10907_s1 + $0x900] ss:$8 sps:$4 sm:$0xff]   ;;  %v7929_v61 = vld [vmem:[%s10907_s1 + $0x1514] ss:$8 sps:$4 sm:$0xff]  }
 0x20b   :  { %5359 = vmatpush1.bf16.msra.mxu1 %v7830_v62  ;;  %v6089_v62 = vcombine.high %v10175_v58, %v10175_v58 }
 0x20c   :  { %5851 = vmatpush1.bf16.msra.mxu0 %v7833_v63  ;;  %5360 = vmatprep.subr.bf16.mxu1 %v7838_v0  ;;  %v6113_v63 = vcombine.high %v10180_v59, %v10180_v59  ;;  %v7924_v0 = vld [vmem:[%s10907_s1 + $0x910] ss:$8 sps:$4 sm:$0xff]  }
 0x20d   :  { %5852 = vmatprep.subr.bf16.mxu0 %v7841_v1  ;;  %v7927_v1 = vld [vmem:[%s10907_s1 + $0x1510] ss:$8 sps:$4 sm:$0xff]  }
 0x20f   :  { %5361 = vmatpush1.bf16.msra.mxu1 %v7836_v2  ;;  %v7932_v2 = vld [vmem:[%s10907_s1 + $0x924] ss:$8 sps:$4 sm:$0xff]  }
 0x210   :  { %5853 = vmatpush1.bf16.msra.mxu0 %v7839_v3  ;;  %5362 = vmatprep.subr.bf16.mxu1 %v7844_v4  ;;  %v7935_v3 = vld [vmem:[%s10907_s1 + $0x1524] ss:$8 sps:$4 sm:$0xff]   ;;  %v7930_v4 = vld [vmem:[%s10907_s1 + $0x920] ss:$8 sps:$4 sm:$0xff]  }
 0x211   :  { %5854 = vmatprep.subr.bf16.mxu0 %v7847_v5  ;;  %v7933_v5 = vld [vmem:[%s10907_s1 + $0x1520] ss:$8 sps:$4 sm:$0xff]  }
 0x213   :  { %5363 = vmatpush1.bf16.msra.mxu1 %v7842_v6  ;;  %v7938_v6 = vld [vmem:[%s10907_s1 + $0x934] ss:$8 sps:$4 sm:$0xff]  }
 0x214   :  { %5855 = vmatpush1.bf16.msra.mxu0 %v7845_v7  ;;  %5364 = vmatprep.subr.bf16.mxu1 %v7850_v8  ;;  %v7941_v7 = vld [vmem:[%s10907_s1 + $0x1534] ss:$8 sps:$4 sm:$0xff]   ;;  %v7936_v8 = vld [vmem:[%s10907_s1 + $0x930] ss:$8 sps:$4 sm:$0xff]  }
 0x215   :  { %5856 = vmatprep.subr.bf16.mxu0 %v7853_v9  ;;  %v7939_v9 = vld [vmem:[%s10907_s1 + $0x1530] ss:$8 sps:$4 sm:$0xff]  }
 0x217   :  { %5365 = vmatpush1.bf16.msra.mxu1 %v7848_v10  ;;  %v7944_v10 = vld [vmem:[%s10907_s1 + $0x944] ss:$8 sps:$4 sm:$0xff]  }
 0x218   :  { %5857 = vmatpush1.bf16.msra.mxu0 %v7851_v11  ;;  %5366 = vmatprep.subr.bf16.mxu1 %v7856_v12  ;;  %v7947_v11 = vld [vmem:[%s10907_s1 + $0x1544] ss:$8 sps:$4 sm:$0xff]   ;;  %v7942_v12 = vld [vmem:[%s10907_s1 + $0x940] ss:$8 sps:$4 sm:$0xff]  }
 0x219   :  { %5858 = vmatprep.subr.bf16.mxu0 %v7859_v13  ;;  %v7945_v13 = vld [vmem:[%s10907_s1 + $0x1540] ss:$8 sps:$4 sm:$0xff]  }
 0x21b   :  { %5367 = vmatpush1.bf16.msra.mxu1 %v7854_v14  ;;  %v7950_v14 = vld [vmem:[%s10907_s1 + $0x954] ss:$8 sps:$4 sm:$0xff]  }
 0x21c   :  { %5859 = vmatpush1.bf16.msra.mxu0 %v7857_v15  ;;  %5368 = vmatprep.subr.bf16.mxu1 %v7862_v16  ;;  %v7953_v15 = vld [vmem:[%s10907_s1 + $0x1554] ss:$8 sps:$4 sm:$0xff]   ;;  %v7948_v16 = vld [vmem:[%s10907_s1 + $0x950] ss:$8 sps:$4 sm:$0xff]  }
 0x21d   :  { %5860 = vmatprep.subr.bf16.mxu0 %v7865_v17  ;;  %v7951_v17 = vld [vmem:[%s10907_s1 + $0x1550] ss:$8 sps:$4 sm:$0xff]  }
 0x21f   :  { %5369 = vmatpush1.bf16.msra.mxu1 %v7860_v19  ;;  %v7956_v19 = vld [vmem:[%s10907_s1 + $0x964] ss:$8 sps:$4 sm:$0xff]  }
 0x220   :  { %5861 = vmatpush1.bf16.msra.mxu0 %v7863_v21  ;;  %5370 = vmatprep.subr.bf16.mxu1 %v7868_v22  ;;  %v7959_v21 = vld [vmem:[%s10907_s1 + $0x1564] ss:$8 sps:$4 sm:$0xff]   ;;  %v7954_v22 = vld [vmem:[%s10907_s1 + $0x960] ss:$8 sps:$4 sm:$0xff]  }
 0x221   :  { %5862 = vmatprep.subr.bf16.mxu0 %v7871_v23  ;;  %v7957_v23 = vld [vmem:[%s10907_s1 + $0x1560] ss:$8 sps:$4 sm:$0xff]  }
 0x223   :  { %5371 = vmatpush1.bf16.msra.mxu1 %v7866_v26  ;;  %v7962_v26 = vld [vmem:[%s10907_s1 + $0x974] ss:$8 sps:$4 sm:$0xff]  }
 0x224   :  { %5863 = vmatpush1.bf16.msra.mxu0 %v7869_v18  ;;  %5372 = vmatprep.subr.bf16.mxu1 %v7874_v27  ;;  %v7965_v18 = vld [vmem:[%s10907_s1 + $0x1574] ss:$8 sps:$4 sm:$0xff]   ;;  %v7960_v27 = vld [vmem:[%s10907_s1 + $0x970] ss:$8 sps:$4 sm:$0xff]  }
 0x225   :  { %5864 = vmatprep.subr.bf16.mxu0 %v7877_v28  ;;  %v7963_v28 = vld [vmem:[%s10907_s1 + $0x1570] ss:$8 sps:$4 sm:$0xff]  }
 0x227   :  { %5373 = vmatpush1.bf16.msra.mxu1 %v7872_v30  ;;  %v7968_v30 = vld [vmem:[%s10907_s1 + $0x984] ss:$8 sps:$4 sm:$0xff]  }
 0x228   :  { %5865 = vmatpush1.bf16.msra.mxu0 %v7875_v31  ;;  %5374 = vmatprep.subr.bf16.mxu1 %v7880_v24  ;;  %v7971_v31 = vld [vmem:[%s10907_s1 + $0x1584] ss:$8 sps:$4 sm:$0xff]   ;;  %v7966_v24 = vld [vmem:[%s10907_s1 + $0x980] ss:$8 sps:$4 sm:$0xff]  }
 0x229   :  { %5866 = vmatprep.subr.bf16.mxu0 %v7883_v25  ;;  %v7969_v25 = vld [vmem:[%s10907_s1 + $0x1580] ss:$8 sps:$4 sm:$0xff]  }
 0x22b   :  { %5375 = vmatpush1.bf16.msra.mxu1 %v7878_v34  ;;  %v7974_v34 = vld [vmem:[%s10907_s1 + $0x994] ss:$8 sps:$4 sm:$0xff]  }
 0x22c   :  { %5867 = vmatpush1.bf16.msra.mxu0 %v7881_v35  ;;  %5376 = vmatprep.subr.bf16.mxu1 %v7886_v36  ;;  %v7977_v35 = vld [vmem:[%s10907_s1 + $0x1594] ss:$8 sps:$4 sm:$0xff]   ;;  %v7972_v36 = vld [vmem:[%s10907_s1 + $0x990] ss:$8 sps:$4 sm:$0xff]  }
 0x22d   :  { %5868 = vmatprep.subr.bf16.mxu0 %v7889_v37  ;;  %v7975_v37 = vld [vmem:[%s10907_s1 + $0x1590] ss:$8 sps:$4 sm:$0xff]  }
 0x22f   :  { %5377 = vmatpush1.bf16.msra.mxu1 %v7884_v38  ;;  %v7980_v38 = vld [vmem:[%s10907_s1 + $0x9a4] ss:$8 sps:$4 sm:$0xff]  }
 0x230   :  { %5869 = vmatpush1.bf16.msra.mxu0 %v7887_v20  ;;  %5378 = vmatprep.subr.bf16.mxu1 %v7892_v40  ;;  %v7983_v20 = vld [vmem:[%s10907_s1 + $0x15a4] ss:$8 sps:$4 sm:$0xff]   ;;  %v7978_v40 = vld [vmem:[%s10907_s1 + $0x9a0] ss:$8 sps:$4 sm:$0xff]  }
 0x231   :  { %5870 = vmatprep.subr.bf16.mxu0 %v7895_v41  ;;  %v7981_v41 = vld [vmem:[%s10907_s1 + $0x15a0] ss:$8 sps:$4 sm:$0xff]  }
 0x233   :  { %5379 = vmatpush1.bf16.msra.mxu1 %v7890_v42  ;;  %v7986_v42 = vld [vmem:[%s10907_s1 + $0x9b4] ss:$8 sps:$4 sm:$0xff]  }
 0x234   :  { %5871 = vmatpush1.bf16.msra.mxu0 %v7893_v43  ;;  %5380 = vmatprep.subr.bf16.mxu1 %v7898_v44  ;;  %v7989_v43 = vld [vmem:[%s10907_s1 + $0x15b4] ss:$8 sps:$4 sm:$0xff]   ;;  %v7984_v44 = vld [vmem:[%s10907_s1 + $0x9b0] ss:$8 sps:$4 sm:$0xff]  }
 0x235   :  { %5872 = vmatprep.subr.bf16.mxu0 %v7901_v32  ;;  %v7987_v32 = vld [vmem:[%s10907_s1 + $0x15b0] ss:$8 sps:$4 sm:$0xff]  }
 0x237   :  { %5381 = vmatpush1.bf16.msra.mxu1 %v7896_v46  ;;  %v7992_v46 = vld [vmem:[%s10907_s1 + $0x9c4] ss:$8 sps:$4 sm:$0xff]  }
 0x238   :  { %5873 = vmatpush1.bf16.msra.mxu0 %v7899_v47  ;;  %5382 = vmatprep.subr.bf16.mxu1 %v7904_v48  ;;  %v7995_v47 = vld [vmem:[%s10907_s1 + $0x15c4] ss:$8 sps:$4 sm:$0xff]   ;;  %v7990_v48 = vld [vmem:[%s10907_s1 + $0x9c0] ss:$8 sps:$4 sm:$0xff]  }
 0x239   :  { %5874 = vmatprep.subr.bf16.mxu0 %v7907_v49  ;;  %v7993_v49 = vld [vmem:[%s10907_s1 + $0x15c0] ss:$8 sps:$4 sm:$0xff]  }
 0x23b   :  { %5383 = vmatpush1.bf16.msra.mxu1 %v7902_v50  ;;  %v7998_v50 = vld [vmem:[%s10907_s1 + $0x9d4] ss:$8 sps:$4 sm:$0xff]  }
 0x23c   :  { %5875 = vmatpush1.bf16.msra.mxu0 %v7905_v29  ;;  %5384 = vmatprep.subr.bf16.mxu1 %v7910_v39  ;;  %v8001_v29 = vld [vmem:[%s10907_s1 + $0x15d4] ss:$8 sps:$4 sm:$0xff]   ;;  %v7996_v39 = vld [vmem:[%s10907_s1 + $0x9d0] ss:$8 sps:$4 sm:$0xff]  }
 0x23d   :  { %5876 = vmatprep.subr.bf16.mxu0 %v7913_v51  ;;  %v7999_v51 = vld [vmem:[%s10907_s1 + $0x15d0] ss:$8 sps:$4 sm:$0xff]  }
 0x23f   :  { %5385 = vmatpush1.bf16.msra.mxu1 %v7908_v54  ;;  %v8004_v54 = vld [vmem:[%s10907_s1 + $0x9e4] ss:$8 sps:$4 sm:$0xff]  }
 0x240   :  { %5877 = vmatpush1.bf16.msra.mxu0 %v7911_v33  ;;  %5395 = vmatprep.subr.bf16.mxu1 %v7918_v45  ;;  %v8007_v33 = vld [vmem:[%s10907_s1 + $0x15e4] ss:$8 sps:$4 sm:$0xff]   ;;  %v8002_v45 = vld [vmem:[%s10907_s1 + $0x9e0] ss:$8 sps:$4 sm:$0xff]  }
 0x241   :  { %5887 = vmatprep.subr.bf16.mxu0 %v7923_v55  ;;  %v8005_v55 = vld [vmem:[%s10907_s1 + $0x15e0] ss:$8 sps:$4 sm:$0xff]  }
 0x242   :  { %5387 = vmatmul.mubr.bf16.vlgmr.msra.gmra.mrb[0].mxu1 %v6086_v56  ;;  %v8010_v56 = vld [vmem:[%s10907_s1 + $0x9f4] ss:$8 sps:$4 sm:$0xff]  }
 0x243   :  { %5879 = vmatmul.mubr.bf16.vlgmr.msra.gmra.mrb[0].mxu0 %v6110_v57  ;;  %5396 = vmatpush1.bf16.msra.mxu1 %v7916_v60  ;;  %v8013_v57 = vld [vmem:[%s10907_s1 + $0x15f4] ss:$8 sps:$4 sm:$0xff]   ;;  %v8008_v60 = vld [vmem:[%s10907_s1 + $0x9f0] ss:$8 sps:$4 sm:$0xff]  }
 0x244   :  { %5888 = vmatpush1.bf16.msra.mxu0 %v7921_v52  ;;  %5397 = vmatprep.subr.bf16.mxu1 %v7926_v53  ;;  %v8011_v52 = vld [vmem:[%s10907_s1 + $0x15f0] ss:$8 sps:$4 sm:$0xff]   ;;  %v8018_v53 = vld [vmem:[%s10907_s1 + $0xa04] ss:$8 sps:$4 sm:$0xff]  }
 0x245   :  { %5889 = vmatprep.subr.bf16.mxu0 %v7929_v61  ;;  %5427 = vmatprep.mubr.bf16.mxu1 %v6089_v62  ;;  %v8023_v61 = vld [vmem:[%s10907_s1 + $0x1604] ss:$8 sps:$4 sm:$0xff]   ;;  %v6088_v62 = vcombine.low %v10175_v58, %v10175_v58  ;;  %v8021_v58 = vld [vmem:[%s10907_s1 + $0x1600] ss:$8 sps:$4 sm:$0xff]  }
 0x246   :  { %5919 = vmatprep.mubr.bf16.mxu0 %v6113_v63  ;;  %v6112_v63 = vcombine.low %v10180_v59, %v10180_v59  ;;  %v8026_v59 = vld [vmem:[%s10907_s1 + $0xa14] ss:$8 sps:$4 sm:$0xff]  }
 0x247   :  { %5398 = vmatpush1.bf16.msra.mxu1 %v7924_v0  ;;  %v10385_v0 = vld [vmem:[%s10908_s0 + $0x50] sm:$0xff] }
 0x248   :  { %5890 = vmatpush1.bf16.msra.mxu0 %v7927_v1  ;;  %5399 = vmatprep.subr.bf16.mxu1 %v7932_v2  ;;  %v10390_v1 = vld [vmem:[%s10908_s0 + $0xb0] sm:$0xff]  ;;  %v8016_v2 = vld [vmem:[%s10907_s1 + $0xa00] ss:$8 sps:$4 sm:$0xff]  }
 0x249   :  { %5891 = vmatprep.subr.bf16.mxu0 %v7935_v3  ;;  %v8029_v3 = vld [vmem:[%s10907_s1 + $0x1614] ss:$8 sps:$4 sm:$0xff]  }
 0x24b   :  { %5400 = vmatpush1.bf16.msra.mxu1 %v7930_v4  ;;  %v6091_v4 = vcombine.high %v10385_v0, %v10385_v0 }
 0x24c   :  { %5892 = vmatpush1.bf16.msra.mxu0 %v7933_v5  ;;  %5401 = vmatprep.subr.bf16.mxu1 %v7938_v6  ;;  %v6115_v5 = vcombine.high %v10390_v1, %v10390_v1  ;;  %v8024_v6 = vld [vmem:[%s10907_s1 + $0xa10] ss:$8 sps:$4 sm:$0xff]  }
 0x24d   :  { %5893 = vmatprep.subr.bf16.mxu0 %v7941_v7  ;;  %v8027_v7 = vld [vmem:[%s10907_s1 + $0x1610] ss:$8 sps:$4 sm:$0xff]  }
 0x24f   :  { %5402 = vmatpush1.bf16.msra.mxu1 %v7936_v8  ;;  %v8032_v8 = vld [vmem:[%s10907_s1 + $0xa24] ss:$8 sps:$4 sm:$0xff]  }
 0x250   :  { %5894 = vmatpush1.bf16.msra.mxu0 %v7939_v9  ;;  %5403 = vmatprep.subr.bf16.mxu1 %v7944_v10  ;;  %v8035_v9 = vld [vmem:[%s10907_s1 + $0x1624] ss:$8 sps:$4 sm:$0xff]   ;;  %v8030_v10 = vld [vmem:[%s10907_s1 + $0xa20] ss:$8 sps:$4 sm:$0xff]  }
 0x251   :  { %5895 = vmatprep.subr.bf16.mxu0 %v7947_v11  ;;  %v8033_v11 = vld [vmem:[%s10907_s1 + $0x1620] ss:$8 sps:$4 sm:$0xff]  }
 0x253   :  { %5404 = vmatpush1.bf16.msra.mxu1 %v7942_v12  ;;  %v8038_v12 = vld [vmem:[%s10907_s1 + $0xa34] ss:$8 sps:$4 sm:$0xff]  }
 0x254   :  { %5896 = vmatpush1.bf16.msra.mxu0 %v7945_v13  ;;  %5405 = vmatprep.subr.bf16.mxu1 %v7950_v14  ;;  %v8041_v13 = vld [vmem:[%s10907_s1 + $0x1634] ss:$8 sps:$4 sm:$0xff]   ;;  %v8036_v14 = vld [vmem:[%s10907_s1 + $0xa30] ss:$8 sps:$4 sm:$0xff]  }
 0x255   :  { %5897 = vmatprep.subr.bf16.mxu0 %v7953_v15  ;;  %v8039_v15 = vld [vmem:[%s10907_s1 + $0x1630] ss:$8 sps:$4 sm:$0xff]  }
 0x257   :  { %5406 = vmatpush1.bf16.msra.mxu1 %v7948_v16  ;;  %v8044_v16 = vld [vmem:[%s10907_s1 + $0xa44] ss:$8 sps:$4 sm:$0xff]  }
 0x258   :  { %5898 = vmatpush1.bf16.msra.mxu0 %v7951_v17  ;;  %5407 = vmatprep.subr.bf16.mxu1 %v7956_v19  ;;  %v8047_v17 = vld [vmem:[%s10907_s1 + $0x1644] ss:$8 sps:$4 sm:$0xff]   ;;  %v8042_v19 = vld [vmem:[%s10907_s1 + $0xa40] ss:$8 sps:$4 sm:$0xff]  }
 0x259   :  { %5899 = vmatprep.subr.bf16.mxu0 %v7959_v21  ;;  %v8045_v21 = vld [vmem:[%s10907_s1 + $0x1640] ss:$8 sps:$4 sm:$0xff]  }
 0x25b   :  { %5408 = vmatpush1.bf16.msra.mxu1 %v7954_v22  ;;  %v8050_v22 = vld [vmem:[%s10907_s1 + $0xa54] ss:$8 sps:$4 sm:$0xff]  }
 0x25c   :  { %5900 = vmatpush1.bf16.msra.mxu0 %v7957_v23  ;;  %5409 = vmatprep.subr.bf16.mxu1 %v7962_v26  ;;  %v8053_v23 = vld [vmem:[%s10907_s1 + $0x1654] ss:$8 sps:$4 sm:$0xff]   ;;  %v8048_v26 = vld [vmem:[%s10907_s1 + $0xa50] ss:$8 sps:$4 sm:$0xff]  }
 0x25d   :  { %5901 = vmatprep.subr.bf16.mxu0 %v7965_v18  ;;  %v8051_v18 = vld [vmem:[%s10907_s1 + $0x1650] ss:$8 sps:$4 sm:$0xff]  }
 0x25f   :  { %5410 = vmatpush1.bf16.msra.mxu1 %v7960_v27  ;;  %v8056_v27 = vld [vmem:[%s10907_s1 + $0xa64] ss:$8 sps:$4 sm:$0xff]  }
 0x260   :  { %5902 = vmatpush1.bf16.msra.mxu0 %v7963_v28  ;;  %5411 = vmatprep.subr.bf16.mxu1 %v7968_v30  ;;  %v8059_v28 = vld [vmem:[%s10907_s1 + $0x1664] ss:$8 sps:$4 sm:$0xff]   ;;  %v8054_v30 = vld [vmem:[%s10907_s1 + $0xa60] ss:$8 sps:$4 sm:$0xff]  }
 0x261   :  { %5903 = vmatprep.subr.bf16.mxu0 %v7971_v31  ;;  %v8057_v31 = vld [vmem:[%s10907_s1 + $0x1660] ss:$8 sps:$4 sm:$0xff]  }
 0x263   :  { %5412 = vmatpush1.bf16.msra.mxu1 %v7966_v24  ;;  %v8062_v24 = vld [vmem:[%s10907_s1 + $0xa74] ss:$8 sps:$4 sm:$0xff]  }
 0x264   :  { %5904 = vmatpush1.bf16.msra.mxu0 %v7969_v25  ;;  %5413 = vmatprep.subr.bf16.mxu1 %v7974_v34  ;;  %v8065_v25 = vld [vmem:[%s10907_s1 + $0x1674] ss:$8 sps:$4 sm:$0xff]   ;;  %v8060_v34 = vld [vmem:[%s10907_s1 + $0xa70] ss:$8 sps:$4 sm:$0xff]  }
 0x265   :  { %5905 = vmatprep.subr.bf16.mxu0 %v7977_v35  ;;  %v8063_v35 = vld [vmem:[%s10907_s1 + $0x1670] ss:$8 sps:$4 sm:$0xff]  }
 0x267   :  { %5414 = vmatpush1.bf16.msra.mxu1 %v7972_v36  ;;  %v8068_v36 = vld [vmem:[%s10907_s1 + $0xa84] ss:$8 sps:$4 sm:$0xff]  }
 0x268   :  { %5906 = vmatpush1.bf16.msra.mxu0 %v7975_v37  ;;  %5415 = vmatprep.subr.bf16.mxu1 %v7980_v38  ;;  %v8071_v37 = vld [vmem:[%s10907_s1 + $0x1684] ss:$8 sps:$4 sm:$0xff]   ;;  %v8066_v38 = vld [vmem:[%s10907_s1 + $0xa80] ss:$8 sps:$4 sm:$0xff]  }
 0x269   :  { %5907 = vmatprep.subr.bf16.mxu0 %v7983_v20  ;;  %v8069_v20 = vld [vmem:[%s10907_s1 + $0x1680] ss:$8 sps:$4 sm:$0xff]  }
 0x26b   :  { %5416 = vmatpush1.bf16.msra.mxu1 %v7978_v40  ;;  %v8074_v40 = vld [vmem:[%s10907_s1 + $0xa94] ss:$8 sps:$4 sm:$0xff]  }
 0x26c   :  { %5908 = vmatpush1.bf16.msra.mxu0 %v7981_v41  ;;  %5417 = vmatprep.subr.bf16.mxu1 %v7986_v42  ;;  %v8077_v41 = vld [vmem:[%s10907_s1 + $0x1694] ss:$8 sps:$4 sm:$0xff]   ;;  %v8072_v42 = vld [vmem:[%s10907_s1 + $0xa90] ss:$8 sps:$4 sm:$0xff]  }
 0x26d   :  { %5909 = vmatprep.subr.bf16.mxu0 %v7989_v43  ;;  %v8075_v43 = vld [vmem:[%s10907_s1 + $0x1690] ss:$8 sps:$4 sm:$0xff]  }
 0x26f   :  { %5418 = vmatpush1.bf16.msra.mxu1 %v7984_v44  ;;  %v8080_v44 = vld [vmem:[%s10907_s1 + $0xaa4] ss:$8 sps:$4 sm:$0xff]  }
 0x270   :  { %5910 = vmatpush1.bf16.msra.mxu0 %v7987_v32  ;;  %5419 = vmatprep.subr.bf16.mxu1 %v7992_v46  ;;  %v8083_v32 = vld [vmem:[%s10907_s1 + $0x16a4] ss:$8 sps:$4 sm:$0xff]   ;;  %v8078_v46 = vld [vmem:[%s10907_s1 + $0xaa0] ss:$8 sps:$4 sm:$0xff]  }
 0x271   :  { %5911 = vmatprep.subr.bf16.mxu0 %v7995_v47  ;;  %v8081_v47 = vld [vmem:[%s10907_s1 + $0x16a0] ss:$8 sps:$4 sm:$0xff]  }
 0x273   :  { %5420 = vmatpush1.bf16.msra.mxu1 %v7990_v48  ;;  %v8086_v48 = vld [vmem:[%s10907_s1 + $0xab4] ss:$8 sps:$4 sm:$0xff]  }
 0x274   :  { %5912 = vmatpush1.bf16.msra.mxu0 %v7993_v49  ;;  %5421 = vmatprep.subr.bf16.mxu1 %v7998_v50  ;;  %v8089_v49 = vld [vmem:[%s10907_s1 + $0x16b4] ss:$8 sps:$4 sm:$0xff]   ;;  %v8084_v50 = vld [vmem:[%s10907_s1 + $0xab0] ss:$8 sps:$4 sm:$0xff]  }
 0x275   :  { %5913 = vmatprep.subr.bf16.mxu0 %v8001_v29  ;;  %v8087_v29 = vld [vmem:[%s10907_s1 + $0x16b0] ss:$8 sps:$4 sm:$0xff]  }
 0x277   :  { %5422 = vmatpush1.bf16.msra.mxu1 %v7996_v39  ;;  %v8092_v39 = vld [vmem:[%s10907_s1 + $0xac4] ss:$8 sps:$4 sm:$0xff]  }
 0x278   :  { %5914 = vmatpush1.bf16.msra.mxu0 %v7999_v51  ;;  %5423 = vmatprep.subr.bf16.mxu1 %v8004_v54  ;;  %v8095_v51 = vld [vmem:[%s10907_s1 + $0x16c4] ss:$8 sps:$4 sm:$0xff]   ;;  %v8090_v54 = vld [vmem:[%s10907_s1 + $0xac0] ss:$8 sps:$4 sm:$0xff]  }
 0x279   :  { %5915 = vmatprep.subr.bf16.mxu0 %v8007_v33  ;;  %v8093_v33 = vld [vmem:[%s10907_s1 + $0x16c0] ss:$8 sps:$4 sm:$0xff]  }
 0x27b   :  { %5424 = vmatpush1.bf16.msra.mxu1 %v8002_v45  ;;  %v8098_v45 = vld [vmem:[%s10907_s1 + $0xad4] ss:$8 sps:$4 sm:$0xff]  }
 0x27c   :  { %5916 = vmatpush1.bf16.msra.mxu0 %v8005_v55  ;;  %5425 = vmatprep.subr.bf16.mxu1 %v8010_v56  ;;  %v8101_v55 = vld [vmem:[%s10907_s1 + $0x16d4] ss:$8 sps:$4 sm:$0xff]   ;;  %v8096_v56 = vld [vmem:[%s10907_s1 + $0xad0] ss:$8 sps:$4 sm:$0xff]  }
 0x27d   :  { %5917 = vmatprep.subr.bf16.mxu0 %v8013_v57  ;;  %v8099_v57 = vld [vmem:[%s10907_s1 + $0x16d0] ss:$8 sps:$4 sm:$0xff]  }
 0x27f   :  { %5426 = vmatpush1.bf16.msra.mxu1 %v8008_v60  ;;  %v8104_v60 = vld [vmem:[%s10907_s1 + $0xae4] ss:$8 sps:$4 sm:$0xff]  }
 0x280   :  { %5918 = vmatpush1.bf16.msra.mxu0 %v8011_v52  ;;  %5436 = vmatprep.subr.bf16.mxu1 %v8018_v53  ;;  %v8107_v52 = vld [vmem:[%s10907_s1 + $0x16e4] ss:$8 sps:$4 sm:$0xff]   ;;  %v8102_v53 = vld [vmem:[%s10907_s1 + $0xae0] ss:$8 sps:$4 sm:$0xff]  }
 0x281   :  { %5928 = vmatprep.subr.bf16.mxu0 %v8023_v61  ;;  %v8105_v61 = vld [vmem:[%s10907_s1 + $0x16e0] ss:$8 sps:$4 sm:$0xff]  }
 0x282   :  { %5428 = vmatmul.mubr.bf16.vlgmr.msra.gmra.mrb[0].mxu1 %v6088_v62  ;;  %v8110_v62 = vld [vmem:[%s10907_s1 + $0xaf4] ss:$8 sps:$4 sm:$0xff]  }
 0x283   :  { %5920 = vmatmul.mubr.bf16.vlgmr.msra.gmra.mrb[0].mxu0 %v6112_v63  ;;  %5437 = vmatpush1.bf16.msra.mxu1 %v8016_v2  ;;  %v8113_v63 = vld [vmem:[%s10907_s1 + $0x16f4] ss:$8 sps:$4 sm:$0xff]   ;;  %v8108_v2 = vld [vmem:[%s10907_s1 + $0xaf0] ss:$8 sps:$4 sm:$0xff]  }
 0x284   :  { %5929 = vmatpush1.bf16.msra.mxu0 %v8021_v58  ;;  %5438 = vmatprep.subr.bf16.mxu1 %v8026_v59  ;;  %v8111_v58 = vld [vmem:[%s10907_s1 + $0x16f0] ss:$8 sps:$4 sm:$0xff]   ;;  %v8118_v59 = vld [vmem:[%s10907_s1 + $0xb04] ss:$8 sps:$4 sm:$0xff]  }
 0x285   :  { %5930 = vmatprep.subr.bf16.mxu0 %v8029_v3  ;;  %5468 = vmatprep.mubr.bf16.mxu1 %v6091_v4  ;;  %v8123_v3 = vld [vmem:[%s10907_s1 + $0x1704] ss:$8 sps:$4 sm:$0xff]   ;;  %v6090_v4 = vcombine.low %v10385_v0, %v10385_v0  ;;  %v8121_v0 = vld [vmem:[%s10907_s1 + $0x1700] ss:$8 sps:$4 sm:$0xff]  }
 0x286   :  { %5960 = vmatprep.mubr.bf16.mxu0 %v6115_v5  ;;  %v6114_v5 = vcombine.low %v10390_v1, %v10390_v1  ;;  %v8126_v1 = vld [vmem:[%s10907_s1 + $0xb14] ss:$8 sps:$4 sm:$0xff]  }
 0x287   :  { %5439 = vmatpush1.bf16.msra.mxu1 %v8024_v6  ;;  %v10595_v6 = vld [vmem:[%s10908_s0 + $0x58] sm:$0xff] }
 0x288   :  { %5931 = vmatpush1.bf16.msra.mxu0 %v8027_v7  ;;  %5440 = vmatprep.subr.bf16.mxu1 %v8032_v8  ;;  %v10600_v7 = vld [vmem:[%s10908_s0 + $0xb8] sm:$0xff]  ;;  %v8116_v8 = vld [vmem:[%s10907_s1 + $0xb00] ss:$8 sps:$4 sm:$0xff]  }
 0x289   :  { %5932 = vmatprep.subr.bf16.mxu0 %v8035_v9  ;;  %v8129_v9 = vld [vmem:[%s10907_s1 + $0x1714] ss:$8 sps:$4 sm:$0xff]  }
 0x28b   :  { %5441 = vmatpush1.bf16.msra.mxu1 %v8030_v10  ;;  %v6093_v10 = vcombine.high %v10595_v6, %v10595_v6 }
 0x28c   :  { %5933 = vmatpush1.bf16.msra.mxu0 %v8033_v11  ;;  %5442 = vmatprep.subr.bf16.mxu1 %v8038_v12  ;;  %v6117_v11 = vcombine.high %v10600_v7, %v10600_v7  ;;  %v8124_v12 = vld [vmem:[%s10907_s1 + $0xb10] ss:$8 sps:$4 sm:$0xff]  }
 0x28d   :  { %5934 = vmatprep.subr.bf16.mxu0 %v8041_v13  ;;  %v8127_v13 = vld [vmem:[%s10907_s1 + $0x1710] ss:$8 sps:$4 sm:$0xff]  }
 0x28f   :  { %5443 = vmatpush1.bf16.msra.mxu1 %v8036_v14  ;;  %v8132_v14 = vld [vmem:[%s10907_s1 + $0xb24] ss:$8 sps:$4 sm:$0xff]  }
 0x290   :  { %5935 = vmatpush1.bf16.msra.mxu0 %v8039_v15  ;;  %5444 = vmatprep.subr.bf16.mxu1 %v8044_v16  ;;  %v8135_v15 = vld [vmem:[%s10907_s1 + $0x1724] ss:$8 sps:$4 sm:$0xff]   ;;  %v8130_v16 = vld [vmem:[%s10907_s1 + $0xb20] ss:$8 sps:$4 sm:$0xff]  }
 0x291   :  { %5936 = vmatprep.subr.bf16.mxu0 %v8047_v17  ;;  %v8133_v17 = vld [vmem:[%s10907_s1 + $0x1720] ss:$8 sps:$4 sm:$0xff]  }
 0x293   :  { %5445 = vmatpush1.bf16.msra.mxu1 %v8042_v19  ;;  %v8138_v19 = vld [vmem:[%s10907_s1 + $0xb34] ss:$8 sps:$4 sm:$0xff]  }
 0x294   :  { %5937 = vmatpush1.bf16.msra.mxu0 %v8045_v21  ;;  %5446 = vmatprep.subr.bf16.mxu1 %v8050_v22  ;;  %v8141_v21 = vld [vmem:[%s10907_s1 + $0x1734] ss:$8 sps:$4 sm:$0xff]   ;;  %v8136_v22 = vld [vmem:[%s10907_s1 + $0xb30] ss:$8 sps:$4 sm:$0xff]  }
 0x295   :  { %5938 = vmatprep.subr.bf16.mxu0 %v8053_v23  ;;  %v8139_v23 = vld [vmem:[%s10907_s1 + $0x1730] ss:$8 sps:$4 sm:$0xff]  }
 0x297   :  { %5447 = vmatpush1.bf16.msra.mxu1 %v8048_v26  ;;  %v8144_v26 = vld [vmem:[%s10907_s1 + $0xb44] ss:$8 sps:$4 sm:$0xff]  }
 0x298   :  { %5939 = vmatpush1.bf16.msra.mxu0 %v8051_v18  ;;  %5448 = vmatprep.subr.bf16.mxu1 %v8056_v27  ;;  %v8147_v18 = vld [vmem:[%s10907_s1 + $0x1744] ss:$8 sps:$4 sm:$0xff]   ;;  %v8142_v27 = vld [vmem:[%s10907_s1 + $0xb40] ss:$8 sps:$4 sm:$0xff]  }
 0x299   :  { %5940 = vmatprep.subr.bf16.mxu0 %v8059_v28  ;;  %v8145_v28 = vld [vmem:[%s10907_s1 + $0x1740] ss:$8 sps:$4 sm:$0xff]  }
 0x29b   :  { %5449 = vmatpush1.bf16.msra.mxu1 %v8054_v30  ;;  %v8150_v30 = vld [vmem:[%s10907_s1 + $0xb54] ss:$8 sps:$4 sm:$0xff]  }
 0x29c   :  { %5941 = vmatpush1.bf16.msra.mxu0 %v8057_v31  ;;  %5450 = vmatprep.subr.bf16.mxu1 %v8062_v24  ;;  %v8153_v31 = vld [vmem:[%s10907_s1 + $0x1754] ss:$8 sps:$4 sm:$0xff]   ;;  %v8148_v24 = vld [vmem:[%s10907_s1 + $0xb50] ss:$8 sps:$4 sm:$0xff]  }
 0x29d   :  { %5942 = vmatprep.subr.bf16.mxu0 %v8065_v25  ;;  %v8151_v25 = vld [vmem:[%s10907_s1 + $0x1750] ss:$8 sps:$4 sm:$0xff]  }
 0x29f   :  { %5451 = vmatpush1.bf16.msra.mxu1 %v8060_v34  ;;  %v8156_v34 = vld [vmem:[%s10907_s1 + $0xb64] ss:$8 sps:$4 sm:$0xff]  }
 0x2a0   :  { %5943 = vmatpush1.bf16.msra.mxu0 %v8063_v35  ;;  %5452 = vmatprep.subr.bf16.mxu1 %v8068_v36  ;;  %v8159_v35 = vld [vmem:[%s10907_s1 + $0x1764] ss:$8 sps:$4 sm:$0xff]   ;;  %v8154_v36 = vld [vmem:[%s10907_s1 + $0xb60] ss:$8 sps:$4 sm:$0xff]  }
 0x2a1   :  { %5944 = vmatprep.subr.bf16.mxu0 %v8071_v37  ;;  %v8157_v37 = vld [vmem:[%s10907_s1 + $0x1760] ss:$8 sps:$4 sm:$0xff]  }
 0x2a3   :  { %5453 = vmatpush1.bf16.msra.mxu1 %v8066_v38  ;;  %v8162_v38 = vld [vmem:[%s10907_s1 + $0xb74] ss:$8 sps:$4 sm:$0xff]  }
 0x2a4   :  { %5945 = vmatpush1.bf16.msra.mxu0 %v8069_v20  ;;  %5454 = vmatprep.subr.bf16.mxu1 %v8074_v40  ;;  %v8165_v20 = vld [vmem:[%s10907_s1 + $0x1774] ss:$8 sps:$4 sm:$0xff]   ;;  %v8160_v40 = vld [vmem:[%s10907_s1 + $0xb70] ss:$8 sps:$4 sm:$0xff]  }
 0x2a5   :  { %5946 = vmatprep.subr.bf16.mxu0 %v8077_v41  ;;  %v8163_v41 = vld [vmem:[%s10907_s1 + $0x1770] ss:$8 sps:$4 sm:$0xff]  }
 0x2a7   :  { %5455 = vmatpush1.bf16.msra.mxu1 %v8072_v42  ;;  %v8168_v42 = vld [vmem:[%s10907_s1 + $0xb84] ss:$8 sps:$4 sm:$0xff]  }
 0x2a8   :  { %5947 = vmatpush1.bf16.msra.mxu0 %v8075_v43  ;;  %5456 = vmatprep.subr.bf16.mxu1 %v8080_v44  ;;  %v8171_v43 = vld [vmem:[%s10907_s1 + $0x1784] ss:$8 sps:$4 sm:$0xff]   ;;  %v8166_v44 = vld [vmem:[%s10907_s1 + $0xb80] ss:$8 sps:$4 sm:$0xff]  }
 0x2a9   :  { %5948 = vmatprep.subr.bf16.mxu0 %v8083_v32  ;;  %v8169_v32 = vld [vmem:[%s10907_s1 + $0x1780] ss:$8 sps:$4 sm:$0xff]  }
 0x2ab   :  { %5457 = vmatpush1.bf16.msra.mxu1 %v8078_v46  ;;  %v8174_v46 = vld [vmem:[%s10907_s1 + $0xb94] ss:$8 sps:$4 sm:$0xff]  }
 0x2ac   :  { %5949 = vmatpush1.bf16.msra.mxu0 %v8081_v47  ;;  %5458 = vmatprep.subr.bf16.mxu1 %v8086_v48  ;;  %v8177_v47 = vld [vmem:[%s10907_s1 + $0x1794] ss:$8 sps:$4 sm:$0xff]   ;;  %v8172_v48 = vld [vmem:[%s10907_s1 + $0xb90] ss:$8 sps:$4 sm:$0xff]  }
 0x2ad   :  { %5950 = vmatprep.subr.bf16.mxu0 %v8089_v49  ;;  %v8175_v49 = vld [vmem:[%s10907_s1 + $0x1790] ss:$8 sps:$4 sm:$0xff]  }
 0x2af   :  { %5459 = vmatpush1.bf16.msra.mxu1 %v8084_v50  ;;  %v8180_v50 = vld [vmem:[%s10907_s1 + $0xba4] ss:$8 sps:$4 sm:$0xff]  }
 0x2b0   :  { %5951 = vmatpush1.bf16.msra.mxu0 %v8087_v29  ;;  %5460 = vmatprep.subr.bf16.mxu1 %v8092_v39  ;;  %v8183_v29 = vld [vmem:[%s10907_s1 + $0x17a4] ss:$8 sps:$4 sm:$0xff]   ;;  %v8178_v39 = vld [vmem:[%s10907_s1 + $0xba0] ss:$8 sps:$4 sm:$0xff]  }
 0x2b1   :  { %5952 = vmatprep.subr.bf16.mxu0 %v8095_v51  ;;  %v8181_v51 = vld [vmem:[%s10907_s1 + $0x17a0] ss:$8 sps:$4 sm:$0xff]  }
 0x2b3   :  { %5461 = vmatpush1.bf16.msra.mxu1 %v8090_v54  ;;  %v8186_v54 = vld [vmem:[%s10907_s1 + $0xbb4] ss:$8 sps:$4 sm:$0xff]  }
 0x2b4   :  { %5953 = vmatpush1.bf16.msra.mxu0 %v8093_v33  ;;  %5462 = vmatprep.subr.bf16.mxu1 %v8098_v45  ;;  %v8189_v33 = vld [vmem:[%s10907_s1 + $0x17b4] ss:$8 sps:$4 sm:$0xff]   ;;  %v8184_v45 = vld [vmem:[%s10907_s1 + $0xbb0] ss:$8 sps:$4 sm:$0xff]  }
 0x2b5   :  { %5954 = vmatprep.subr.bf16.mxu0 %v8101_v55  ;;  %v8187_v55 = vld [vmem:[%s10907_s1 + $0x17b0] ss:$8 sps:$4 sm:$0xff]  }
 0x2b7   :  { %5463 = vmatpush1.bf16.msra.mxu1 %v8096_v56  ;;  %v8192_v56 = vld [vmem:[%s10907_s1 + $0xbc4] ss:$8 sps:$4 sm:$0xff]  }
 0x2b8   :  { %5955 = vmatpush1.bf16.msra.mxu0 %v8099_v57  ;;  %5464 = vmatprep.subr.bf16.mxu1 %v8104_v60  ;;  %v8195_v57 = vld [vmem:[%s10907_s1 + $0x17c4] ss:$8 sps:$4 sm:$0xff]   ;;  %v8190_v60 = vld [vmem:[%s10907_s1 + $0xbc0] ss:$8 sps:$4 sm:$0xff]  }
 0x2b9   :  { %5956 = vmatprep.subr.bf16.mxu0 %v8107_v52  ;;  %v8193_v52 = vld [vmem:[%s10907_s1 + $0x17c0] ss:$8 sps:$4 sm:$0xff]  }
 0x2bb   :  { %5465 = vmatpush1.bf16.msra.mxu1 %v8102_v53  ;;  %v8198_v53 = vld [vmem:[%s10907_s1 + $0xbd4] ss:$8 sps:$4 sm:$0xff]  }
 0x2bc   :  { %5957 = vmatpush1.bf16.msra.mxu0 %v8105_v61  ;;  %5466 = vmatprep.subr.bf16.mxu1 %v8110_v62  ;;  %v8201_v61 = vld [vmem:[%s10907_s1 + $0x17d4] ss:$8 sps:$4 sm:$0xff]   ;;  %v8196_v62 = vld [vmem:[%s10907_s1 + $0xbd0] ss:$8 sps:$4 sm:$0xff]  }
 0x2bd   :  { %5958 = vmatprep.subr.bf16.mxu0 %v8113_v63  ;;  %v8199_v63 = vld [vmem:[%s10907_s1 + $0x17d0] ss:$8 sps:$4 sm:$0xff]  }
 0x2bf   :  { %5467 = vmatpush1.bf16.msra.mxu1 %v8108_v2  ;;  %v8204_v2 = vld [vmem:[%s10907_s1 + $0xbe4] ss:$8 sps:$4 sm:$0xff]  }
 0x2c0   :  { %5959 = vmatpush1.bf16.msra.mxu0 %v8111_v58  ;;  %5477 = vmatprep.subr.bf16.mxu1 %v8118_v59  ;;  %v8207_v58 = vld [vmem:[%s10907_s1 + $0x17e4] ss:$8 sps:$4 sm:$0xff]   ;;  %v8202_v59 = vld [vmem:[%s10907_s1 + $0xbe0] ss:$8 sps:$4 sm:$0xff]  }
 0x2c1   :  { %5969 = vmatprep.subr.bf16.mxu0 %v8123_v3  ;;  %v8205_v3 = vld [vmem:[%s10907_s1 + $0x17e0] ss:$8 sps:$4 sm:$0xff]  }
 0x2c2   :  { %5469 = vmatmul.mubr.bf16.vlgmr.msra.gmra.mrb[0].mxu1 %v6090_v4  ;;  %v8210_v4 = vld [vmem:[%s10907_s1 + $0xbf4] ss:$8 sps:$4 sm:$0xff]  }
 0x2c3   :  { %5961 = vmatmul.mubr.bf16.vlgmr.msra.gmra.mrb[0].mxu0 %v6114_v5  ;;  %5478 = vmatpush1.bf16.msra.mxu1 %v8116_v8  ;;  %v8213_v5 = vld [vmem:[%s10907_s1 + $0x17f4] ss:$8 sps:$4 sm:$0xff]   ;;  %v8208_v8 = vld [vmem:[%s10907_s1 + $0xbf0] ss:$8 sps:$4 sm:$0xff]  }
 0x2c4   :  { %5970 = vmatpush1.bf16.msra.mxu0 %v8121_v0  ;;  %5479 = vmatprep.subr.bf16.mxu1 %v8126_v1  ;;  %v8211_v0 = vld [vmem:[%s10907_s1 + $0x17f0] ss:$8 sps:$4 sm:$0xff]   ;;  %v8220_v1 = vld [vmem:[%s10907_s1 + $0x1804] ss:$8 sps:$4 sm:$0xff]  }
 0x2c5   :  { %5971 = vmatprep.subr.bf16.mxu0 %v8129_v9  ;;  %5509 = vmatprep.mubr.bf16.mxu1 %v6093_v10  ;;  %v10798_v9 = vld [vmem:[%s10908_s0 + $0xc0] sm:$0xff]  ;;  %v6092_v10 = vcombine.low %v10595_v6, %v10595_v6  ;;  %v8221_v6 = vld [vmem:[%s10907_s1 + $0x1810] ss:$8 sps:$4 sm:$0xff]  }
 0x2c6   :  { %6001 = vmatprep.mubr.bf16.mxu0 %v6117_v11  ;;  %v6116_v11 = vcombine.low %v10600_v7, %v10600_v7  ;;  %v8226_v7 = vld [vmem:[%s10907_s1 + $0x1824] ss:$8 sps:$4 sm:$0xff]  }
 0x2c7   :  { %5480 = vmatpush1.bf16.msra.mxu1 %v8124_v12  ;;  %v8218_v12 = vld [vmem:[%s10907_s1 + $0x1800] ss:$8 sps:$4 sm:$0xff]  }
 0x2c8   :  { %5972 = vmatpush1.bf16.msra.mxu0 %v8127_v13  ;;  %5481 = vmatprep.subr.bf16.mxu1 %v8132_v14  ;;  %v6119_v13 = vcombine.high %v10798_v9, %v10798_v9  ;;  %v8223_v14 = vld [vmem:[%s10907_s1 + $0x1814] ss:$8 sps:$4 sm:$0xff]  }
 0x2c9   :  { %5973 = vmatprep.subr.bf16.mxu0 %v8135_v15  ;;  %v8224_v15 = vld [vmem:[%s10907_s1 + $0x1820] ss:$8 sps:$4 sm:$0xff]  }
 0x2cb   :  { %5482 = vmatpush1.bf16.msra.mxu1 %v8130_v16  ;;  %v8229_v16 = vld [vmem:[%s10907_s1 + $0x1834] ss:$8 sps:$4 sm:$0xff]  }
 0x2cc   :  { %5974 = vmatpush1.bf16.msra.mxu0 %v8133_v17  ;;  %5483 = vmatprep.subr.bf16.mxu1 %v8138_v19  ;;  %v8227_v17 = vld [vmem:[%s10907_s1 + $0x1830] ss:$8 sps:$4 sm:$0xff]   ;;  %v8232_v19 = vld [vmem:[%s10907_s1 + $0x1844] ss:$8 sps:$4 sm:$0xff]  }
 0x2cd   :  { %5975 = vmatprep.subr.bf16.mxu0 %v8141_v21  ;;  %v8230_v21 = vld [vmem:[%s10907_s1 + $0x1840] ss:$8 sps:$4 sm:$0xff]  }
 0x2cf   :  { %5484 = vmatpush1.bf16.msra.mxu1 %v8136_v22  ;;  %v8235_v22 = vld [vmem:[%s10907_s1 + $0x1854] ss:$8 sps:$4 sm:$0xff]  }
 0x2d0   :  { %5976 = vmatpush1.bf16.msra.mxu0 %v8139_v23  ;;  %5485 = vmatprep.subr.bf16.mxu1 %v8144_v26  ;;  %v8233_v23 = vld [vmem:[%s10907_s1 + $0x1850] ss:$8 sps:$4 sm:$0xff]   ;;  %v8238_v26 = vld [vmem:[%s10907_s1 + $0x1864] ss:$8 sps:$4 sm:$0xff]  }
 0x2d1   :  { %5977 = vmatprep.subr.bf16.mxu0 %v8147_v18  ;;  %v8236_v18 = vld [vmem:[%s10907_s1 + $0x1860] ss:$8 sps:$4 sm:$0xff]  }
 0x2d3   :  { %5486 = vmatpush1.bf16.msra.mxu1 %v8142_v27  ;;  %v8241_v27 = vld [vmem:[%s10907_s1 + $0x1874] ss:$8 sps:$4 sm:$0xff]  }
 0x2d4   :  { %5978 = vmatpush1.bf16.msra.mxu0 %v8145_v28  ;;  %5487 = vmatprep.subr.bf16.mxu1 %v8150_v30  ;;  %v8239_v28 = vld [vmem:[%s10907_s1 + $0x1870] ss:$8 sps:$4 sm:$0xff]   ;;  %v8244_v30 = vld [vmem:[%s10907_s1 + $0x1884] ss:$8 sps:$4 sm:$0xff]  }
 0x2d5   :  { %5979 = vmatprep.subr.bf16.mxu0 %v8153_v31  ;;  %v8242_v31 = vld [vmem:[%s10907_s1 + $0x1880] ss:$8 sps:$4 sm:$0xff]  }
 0x2d7   :  { %5488 = vmatpush1.bf16.msra.mxu1 %v8148_v24  ;;  %v8247_v24 = vld [vmem:[%s10907_s1 + $0x1894] ss:$8 sps:$4 sm:$0xff]  }
 0x2d8   :  { %5980 = vmatpush1.bf16.msra.mxu0 %v8151_v25  ;;  %5489 = vmatprep.subr.bf16.mxu1 %v8156_v34  ;;  %v8245_v25 = vld [vmem:[%s10907_s1 + $0x1890] ss:$8 sps:$4 sm:$0xff]   ;;  %v8250_v34 = vld [vmem:[%s10907_s1 + $0x18a4] ss:$8 sps:$4 sm:$0xff]  }
 0x2d9   :  { %5981 = vmatprep.subr.bf16.mxu0 %v8159_v35  ;;  %v8248_v35 = vld [vmem:[%s10907_s1 + $0x18a0] ss:$8 sps:$4 sm:$0xff]  }
 0x2db   :  { %5490 = vmatpush1.bf16.msra.mxu1 %v8154_v36  ;;  %v8253_v36 = vld [vmem:[%s10907_s1 + $0x18b4] ss:$8 sps:$4 sm:$0xff]  }
 0x2dc   :  { %5982 = vmatpush1.bf16.msra.mxu0 %v8157_v37  ;;  %5491 = vmatprep.subr.bf16.mxu1 %v8162_v38  ;;  %v8251_v37 = vld [vmem:[%s10907_s1 + $0x18b0] ss:$8 sps:$4 sm:$0xff]   ;;  %v8256_v38 = vld [vmem:[%s10907_s1 + $0x18c4] ss:$8 sps:$4 sm:$0xff]  }
 0x2dd   :  { %5983 = vmatprep.subr.bf16.mxu0 %v8165_v20  ;;  %v8254_v20 = vld [vmem:[%s10907_s1 + $0x18c0] ss:$8 sps:$4 sm:$0xff]  }
 0x2df   :  { %5492 = vmatpush1.bf16.msra.mxu1 %v8160_v40  ;;  %v8259_v40 = vld [vmem:[%s10907_s1 + $0x18d4] ss:$8 sps:$4 sm:$0xff]  }
 0x2e0   :  { %5984 = vmatpush1.bf16.msra.mxu0 %v8163_v41  ;;  %5493 = vmatprep.subr.bf16.mxu1 %v8168_v42  ;;  %v8257_v41 = vld [vmem:[%s10907_s1 + $0x18d0] ss:$8 sps:$4 sm:$0xff]   ;;  %v8262_v42 = vld [vmem:[%s10907_s1 + $0x18e4] ss:$8 sps:$4 sm:$0xff]  }
 0x2e1   :  { %5985 = vmatprep.subr.bf16.mxu0 %v8171_v43  ;;  %v8260_v43 = vld [vmem:[%s10907_s1 + $0x18e0] ss:$8 sps:$4 sm:$0xff]  }
 0x2e3   :  { %5494 = vmatpush1.bf16.msra.mxu1 %v8166_v44  ;;  %v8265_v44 = vld [vmem:[%s10907_s1 + $0x18f4] ss:$8 sps:$4 sm:$0xff]  }
 0x2e4   :  { %5986 = vmatpush1.bf16.msra.mxu0 %v8169_v32  ;;  %5495 = vmatprep.subr.bf16.mxu1 %v8174_v46  ;;  %v8263_v32 = vld [vmem:[%s10907_s1 + $0x18f0] ss:$8 sps:$4 sm:$0xff]   ;;  %v6118_v46 = vcombine.low %v10798_v9, %v10798_v9 }
 0x2e5   :  { %5987 = vmatprep.subr.bf16.mxu0 %v8177_v47 }
 0x2e7   :  { %5496 = vmatpush1.bf16.msra.mxu1 %v8172_v48 }
 0x2e8   :  { %5988 = vmatpush1.bf16.msra.mxu0 %v8175_v49  ;;  %5497 = vmatprep.subr.bf16.mxu1 %v8180_v50 }
 0x2e9   :  { %5989 = vmatprep.subr.bf16.mxu0 %v8183_v29  ;;  %v841_v29 = vlaneseq }
 0x2eb   :  { %5498 = vmatpush1.bf16.msra.mxu1 %v8178_v39  ;;  %v842_v39 = vshrl.u32 %v841_v29, 7 }
 0x2ec   :  { %5990 = vmatpush1.bf16.msra.mxu0 %v8181_v51  ;;  %5499 = vmatprep.subr.bf16.mxu1 %v8186_v54  ;;  %v839_v54 = vld [vmem:[%s10909_s2] sm:$0x3] }
 0x2ed   :  { %5991 = vmatprep.subr.bf16.mxu0 %v8189_v33  ;;  %v843_v51 = vsub.s32 0, %v842_v39  ;;  %v847_v33 = vsub.s32 1, %v842_v39 }
 0x2ef   :  { %5500 = vmatpush1.bf16.msra.mxu1 %v8184_v45  ;;  %v844_v45 = vrot.slane %v839_v54, %v843_v51 }
 0x2f0   :  { %5992 = vmatpush1.bf16.msra.mxu0 %v8187_v55  ;;  %5501 = vmatprep.subr.bf16.mxu1 %v8192_v56  ;;  %v848_v55 = vrot.slane %v839_v54, %v847_v33 }
 0x2f1   :  { %5993 = vmatprep.subr.bf16.mxu0 %v8195_v57 }
 0x2f3   :  { %5502 = vmatpush1.bf16.msra.mxu1 %v8190_v60 }
 0x2f4   :  { %5994 = vmatpush1.bf16.msra.mxu0 %v8193_v52  ;;  %5503 = vmatprep.subr.bf16.mxu1 %v8198_v53 }
 0x2f5   :  { %5995 = vmatprep.subr.bf16.mxu0 %v8201_v61 }
 0x2f7   :  { %5504 = vmatpush1.bf16.msra.mxu1 %v8196_v62 }
 0x2f8   :  { %5996 = vmatpush1.bf16.msra.mxu0 %v8199_v63  ;;  %5505 = vmatprep.subr.bf16.mxu1 %v8204_v2 }
 0x2f9   :  { %5997 = vmatprep.subr.bf16.mxu0 %v8207_v58 }
 0x2fb   :  { %5506 = vmatpush1.bf16.msra.mxu1 %v8202_v59 }
 0x2fc   :  { %5998 = vmatpush1.bf16.msra.mxu0 %v8205_v3  ;;  %5507 = vmatprep.subr.bf16.mxu1 %v8210_v4 }
 0x2fd   :  { %5999 = vmatprep.subr.bf16.mxu0 %v8213_v5 }
 0x2ff   :  { %5508 = vmatpush1.bf16.msra.mxu1 %v8208_v8 }
 0x300   :  { %6000 = vmatpush1.bf16.msra.mxu0 %v8211_v0 }
 0x301   :  { %6010 = vmatprep.subr.bf16.mxu0 %v8220_v1 }
 0x302   :  { %5510 = vmatmul.mubr.bf16.vlgmr.msra.gmra.mrb[0].mxu1 %v6092_v10 }
 0x303   :  { %6002 = vmatmul.mubr.bf16.vlgmr.msra.gmra.mrb[0].mxu0 %v6116_v11 }
 0x304   :  { %6011 = vmatpush1.bf16.msra.mxu0 %v8218_v12  ;;  %6042 = vmatprep.mubr.bf16.mxu0 %v6119_v13 }
 0x305   :  { %6012 = vmatprep.subr.bf16.mxu0 %v8223_v14 }
 0x308   :  { %6013 = vmatpush1.bf16.msra.mxu0 %v8221_v6 }
 0x309   :  { %6014 = vmatprep.subr.bf16.mxu0 %v8226_v7 }
 0x30c   :  { %6015 = vmatpush1.bf16.msra.mxu0 %v8224_v15 }
 0x30d   :  { %6016 = vmatprep.subr.bf16.mxu0 %v8229_v16 }
 0x310   :  { %6017 = vmatpush1.bf16.msra.mxu0 %v8227_v17 }
 0x311   :  { %6018 = vmatprep.subr.bf16.mxu0 %v8232_v19 }
 0x314   :  { %6019 = vmatpush1.bf16.msra.mxu0 %v8230_v21 }
 0x315   :  { %6020 = vmatprep.subr.bf16.mxu0 %v8235_v22 }
 0x318   :  { %6021 = vmatpush1.bf16.msra.mxu0 %v8233_v23 }
 0x319   :  { %6022 = vmatprep.subr.bf16.mxu0 %v8238_v26 }
 0x31c   :  { %6023 = vmatpush1.bf16.msra.mxu0 %v8236_v18 }
 0x31d   :  { %6024 = vmatprep.subr.bf16.mxu0 %v8241_v27 }
 0x320   :  { %6025 = vmatpush1.bf16.msra.mxu0 %v8239_v28 }
 0x321   :  { %6026 = vmatprep.subr.bf16.mxu0 %v8244_v30 }
 0x324   :  { %6027 = vmatpush1.bf16.msra.mxu0 %v8242_v31 }
 0x325   :  { %6028 = vmatprep.subr.bf16.mxu0 %v8247_v24 }
 0x328   :  { %6029 = vmatpush1.bf16.msra.mxu0 %v8245_v25 }
 0x329   :  { %6030 = vmatprep.subr.bf16.mxu0 %v8250_v34 }
 0x32c   :  { %6031 = vmatpush1.bf16.msra.mxu0 %v8248_v35 }
 0x32d   :  { %6032 = vmatprep.subr.bf16.mxu0 %v8253_v36 }
 0x330   :  { %6033 = vmatpush1.bf16.msra.mxu0 %v8251_v37 }
 0x331   :  { %6034 = vmatprep.subr.bf16.mxu0 %v8256_v38 }
 0x334   :  { %6035 = vmatpush1.bf16.msra.mxu0 %v8254_v20 }
 0x335   :  { %6036 = vmatprep.subr.bf16.mxu0 %v8259_v40 }
 0x338   :  { %6037 = vmatpush1.bf16.msra.mxu0 %v8257_v41 }
 0x339   :  { %6038 = vmatprep.subr.bf16.mxu0 %v8262_v42 }
 0x33c   :  { %6039 = vmatpush1.bf16.msra.mxu0 %v8260_v43 }
 0x33d   :  { %6040 = vmatprep.subr.bf16.mxu0 %v8265_v44 }
 0x340   :  { %6041 = vmatpush1.bf16.msra.mxu0 %v8263_v32 }
 0x343   :  { %6043 = vmatmul.mubr.bf16.vlgmr.msra.gmra.mrb[0].mxu0 %v6118_v46 }
 0x3d5   :  { %v5511_v47 = vpop.f32.mrb[0].mxu1 }
 0x3d6   :  { %v5513_v48 = vpop.f32.mrb[1].mxu1  ;;  %v6922_v56 = vadd.f32 %v5511_v47, %v844_v45 }
 0x3d7   :  { %v5515_v49 = vpop.f32.mrb[2].mxu1  ;;  %v6924_v57 = vadd.f32 %v5513_v48, %v848_v55 }
 0x3d8   :  { %v5516_v50 = vpop.f32.mrb[3].mxu1 }
 0x416   :  { %v6044_v60 = vpop.f32.mrb[0].mxu0 }
 0x417   :  { %v6923_v52 = vadd.f32 %v6922_v56, %v6044_v60  ;;  %v6046_v53 = vpop.f32.mrb[1].mxu0 }
 0x418   :  { %v6925_v61 = vadd.f32 %v6924_v57, %v6046_v53  ;;  %v6048_v62 = vpop.f32.mrb[2].mxu0 }
 0x419   :  { %vm6051_vm0 = vcmp.ge.f32.partialorder %v6923_v52, 0.0  ;;  %v6053_v63 = vmul.f32 0.2, %v6923_v52  ;;  %v6049_v2 = vpop.f32.mrb[3].mxu0 }
 0x41a   :  { %vm6052_vm1 = vcmp.ge.f32.partialorder %v6925_v61, 0.0  ;;  %v6054_v58 = vmul.f32 0.2, %v6925_v61 }
 0x41b   :  { %v6055_v59 = vsel %vm6051_vm0, %v6923_v52, %v6053_v63 }
 0x41c   :  { %v6056_v3 = vsel %vm6052_vm1, %v6925_v61, %v6054_v58 }
 0x41d   :  { %v6921_v4 = vpack.c.bf16 %v6056_v3, %v6055_v59 }
 0x41f   :  { %6065 = vst [vmem:[%s10910_s3] sm:$0xff] %v6921_v4 }

</bundles_post_ra>
